<compile_context>
chip_gen: v5e
topology: v5e:2x2
jax: 0.10.0
libtpu: 0.0.40
codegen_flags: <defaults>
</compile_context>

<pallas_src>
import functools
import math

import jax
import jax.numpy as jnp
from jax import lax
from jax.experimental import pallas as pl
from jax.experimental.pallas import tpu as pltpu


def _const_spec(shape):
    nd = len(shape)
    return pl.BlockSpec(tuple(shape), lambda b, _nd=nd: (0,) * _nd)


# ---------------------------------------------------------------------------
# in_proj kernel:  (B, L, Kp) @ (Kp, C) + (1, C)     (Kp = in_dim + 2 padded to 8)
# ---------------------------------------------------------------------------
def _in_proj_kernel(x_ref, w_ref, b_ref, o_ref):
    x = x_ref[0].astype(jnp.float32)                                    # (L, Kp)
    y = jnp.dot(x, w_ref[...], preferred_element_type=jnp.float32) + b_ref[...]
    o_ref[0] = y.astype(o_ref.dtype)


def in_proj_pallas(x, w, b):
    B, L, Kp = x.shape
    C = w.shape[1]
    return pl.pallas_call(
        _in_proj_kernel,
        out_shape=jax.ShapeDtypeStruct((B, L, C), x.dtype),
        grid_spec=pltpu.PrefetchScalarGridSpec(
            num_scalar_prefetch=0,
            grid=(B,),
            in_specs=[
                pl.BlockSpec((1, L, Kp), lambda bb: (bb, 0, 0)),
                _const_spec((Kp, C)),
                _const_spec((1, C)),
            ],
            out_specs=pl.BlockSpec((1, L, C), lambda bb: (bb, 0, 0)),
        ),
        compiler_params=pltpu.CompilerParams(dimension_semantics=("parallel",)),
    )(x, w, b)


# ---------------------------------------------------------------------------
# Fused transformer Block kernel: LN1 -> MHA(+RoPE) -> +res -> LN2 -> MLP -> +res
# ---------------------------------------------------------------------------
def _make_block_kernel(num_heads, scale, eps):
    inv_sqrt2 = 1.0 / math.sqrt(2.0)

    def kernel(x_ref, g1_ref, be1_ref,
               wq_ref, bq_ref, wk_ref, bk_ref, wv_ref, bv_ref,
               cos_ref, sin_ref, rot_ref,
               wo_ref, bo_ref,
               g2_ref, be2_ref,
               w1_ref, b1_ref, w2_ref, b2_ref,
               o_ref):
        x = x_ref[0].astype(jnp.float32)                                # (L, C)
        L, C = x.shape

        # ---- LayerNorm 1 (eps matches torch default 1e-5) ----
        mu = jnp.mean(x, axis=-1, keepdims=True)
        xc = x - mu
        var = jnp.mean(xc * xc, axis=-1, keepdims=True)
        xn = xc * lax.rsqrt(var + eps) * g1_ref[...] + be1_ref[...]

        cos = cos_ref[...]                                              # (L, d)
        sin = sin_ref[...]
        rot = rot_ref[...]                                              # (d, d)

        # ---- Window attention with RoPE; proj folded into the per-head sum ----
        attn = jnp.zeros((L, C), jnp.float32)
        for h in range(num_heads):                                      # small static unroll
            q = jnp.dot(xn, wq_ref[h], preferred_element_type=jnp.float32) + bq_ref[h]
            k = jnp.dot(xn, wk_ref[h], preferred_element_type=jnp.float32) + bk_ref[h]
            v = jnp.dot(xn, wv_ref[h], preferred_element_type=jnp.float32) + bv_ref[h]
            # RoPE: x*cos + rotate_half(x)*sin, rotate_half(x) == x @ rot (constant perm).
            q = q * cos + jnp.dot(q, rot, preferred_element_type=jnp.float32) * sin
            k = k * cos + jnp.dot(k, rot, preferred_element_type=jnp.float32) * sin
            s = scale * lax.dot_general(q, k, (((1,), (1,)), ((), ())),
                                        preferred_element_type=jnp.float32)   # (L, L)
            s = s - jnp.max(s, axis=-1, keepdims=True)
            e = jnp.exp(s)
            p = e / jnp.sum(e, axis=-1, keepdims=True)
            o = jnp.dot(p, v, preferred_element_type=jnp.float32)             # (L, d)
            attn = attn + jnp.dot(o, wo_ref[h], preferred_element_type=jnp.float32)
        x1 = x + attn + bo_ref[...]

        # ---- LayerNorm 2 ----
        mu2 = jnp.mean(x1, axis=-1, keepdims=True)
        xc2 = x1 - mu2
        var2 = jnp.mean(xc2 * xc2, axis=-1, keepdims=True)
        xn2 = xc2 * lax.rsqrt(var2 + eps) * g2_ref[...] + be2_ref[...]

        # ---- MLP: fc1 -> exact (erf) GELU -> fc2 ----
        h1 = jnp.dot(xn2, w1_ref[...], preferred_element_type=jnp.float32) + b1_ref[...]
        h1 = 0.5 * h1 * (1.0 + lax.erf(h1 * inv_sqrt2))
        y = jnp.dot(h1, w2_ref[...], preferred_element_type=jnp.float32) + b2_ref[...]

        o_ref[0] = (x1 + y).astype(o_ref.dtype)

    return kernel


def block_pallas(x, lp, cos, sin, rot, *, num_heads, scale, eps=1e-5):
    B, L, C = x.shape
    d = cos.shape[-1]
    hidden = lp["w1"].shape[-1]

    weights = (lp["g1"], lp["be1"],
               lp["wq"], lp["bq"], lp["wk"], lp["bk"], lp["wv"], lp["bv"],
               cos, sin, rot,
               lp["wo"], lp["bo"],
               lp["g2"], lp["be2"],
               lp["w1"], lp["b1"], lp["w2"], lp["b2"])
    in_specs = [pl.BlockSpec((1, L, C), lambda bb: (bb, 0, 0))]
    in_specs += [_const_spec(w.shape) for w in weights]

    flops = B * (2 * L * C * 3 * C                # qkv
                 + 2 * num_heads * 2 * L * d * d  # rope rotations
                 + 2 * 2 * L * L * C              # scores + attn@v (all heads)
                 + 2 * L * C * C                  # output projection
                 + 2 * 2 * L * C * hidden)        # mlp
    weight_bytes = sum(int(w.size) * 4 for w in weights)
    cost = pl.CostEstimate(
        flops=int(flops),
        transcendentals=int(B * (num_heads * L * L + L * hidden)),
        bytes_accessed=int(2 * B * L * C * 4 + weight_bytes),
    )

    kernel = _make_block_kernel(num_heads, scale, eps)
    return pl.pallas_call(
        kernel,
        out_shape=jax.ShapeDtypeStruct((B, L, C), x.dtype),
        grid_spec=pltpu.PrefetchScalarGridSpec(
            num_scalar_prefetch=0,
            grid=(B,),
            in_specs=in_specs,
            out_specs=pl.BlockSpec((1, L, C), lambda bb: (bb, 0, 0)),
        ),
        compiler_params=pltpu.CompilerParams(dimension_semantics=("parallel",)),
        cost_estimate=cost,
    )(x, *weights)


# ---------------------------------------------------------------------------
# One-time parameter / constant preparation (hoisted out of the call path).
# ---------------------------------------------------------------------------
def init_gkformer_params(key, *, depth, embed_dim, num_heads, mlp_ratio,
                         in_dim=3, size=8, rope_ratio=0.5, rope_theta=10000.0):
    f32 = jnp.float32
    head_dim = embed_dim // num_heads
    hidden = int(embed_dim * mlp_ratio)
    L = size * size
    assert head_dim * num_heads == embed_dim and head_dim % 4 == 0

    # Normalized board coordinates (concatenated to the input features).
    lin = jnp.linspace(0.0, 1.0, 2 * size + 1)[1::2].astype(f32)
    yy, xx = jnp.meshgrid(lin, lin, indexing="ij")
    coords = jnp.stack([yy.reshape(-1), xx.reshape(-1)], axis=-1)            # (L, 2)

    # RoPE tables (RotaryEmbedding buffers).
    rdim = head_dim // 2
    expo = jnp.arange(0, rdim, 2)[: rdim // 2].astype(f32) / rdim
    base = jnp.power(jnp.float32(rope_theta), -expo)
    base = jnp.repeat(base, 2) * rope_ratio                                  # (rdim,)
    gy, gx = jnp.meshgrid(jnp.arange(size, dtype=f32),
                          jnp.arange(size, dtype=f32), indexing="ij")
    gcoords = jnp.stack([gy.reshape(-1), gx.reshape(-1)], axis=-1)           # (L, 2)
    freqs = (gcoords[:, :, None] * base[None, None, :]).reshape(L, head_dim)
    cos = jnp.cos(freqs)
    sin = jnp.sin(freqs)

    # rotate_half as a constant signed permutation: rot_half(x) == x @ rot.
    rot = jnp.zeros((head_dim, head_dim), f32)
    ev = jnp.arange(0, head_dim, 2)
    rot = rot.at[ev + 1, ev].set(1.0)      # out[2i]   =  x[2i+1]
    rot = rot.at[ev, ev + 1].set(-1.0)     # out[2i+1] = -x[2i]

    def nrm(k, shape, s):
        return s * jax.random.normal(k, shape, f32)

    # in_proj, contraction padded 5 -> 8 so the MXU K dim is sublane-aligned (exact).
    kp = 8
    key, k1, k2 = jax.random.split(key, 3)
    win = jnp.zeros((kp, embed_dim), f32).at[: in_dim + 2].set(
        nrm(k1, (in_dim + 2, embed_dim), 0.3))
    bin_ = nrm(k2, (1, embed_dim), 0.1)

    blocks = []
    for _ in range(depth):
        keys = jax.random.split(key, 17)
        key, ks = keys[0], keys[1:]
        blocks.append(dict(
            g1=1.0 + nrm(ks[0], (1, embed_dim), 0.05),
            be1=nrm(ks[1], (1, embed_dim), 0.05),
            wq=nrm(ks[2], (num_heads, embed_dim, head_dim), 0.2),
            bq=nrm(ks[3], (num_heads, 1, head_dim), 0.05),
            wk=nrm(ks[4], (num_heads, embed_dim, head_dim), 0.2),
            bk=nrm(ks[5], (num_heads, 1, head_dim), 0.05),
            wv=nrm(ks[6], (num_heads, embed_dim, head_dim), 0.2),
            bv=nrm(ks[7], (num_heads, 1, head_dim), 0.05),
            wo=nrm(ks[8], (num_heads, head_dim, embed_dim), 0.2),
            bo=nrm(ks[9], (1, embed_dim), 0.05),
            g2=1.0 + nrm(ks[10], (1, embed_dim), 0.05),
            be2=nrm(ks[11], (1, embed_dim), 0.05),
            w1=nrm(ks[12], (embed_dim, hidden), 0.2),
            b1=nrm(ks[13], (1, hidden), 0.05),
            w2=nrm(ks[14], (hidden, embed_dim), 0.2),
            b2=nrm(ks[15], (1, embed_dim), 0.05),
        ))

    return dict(coords=coords, win=win, bin=bin_, cos=cos, sin=sin, rot=rot,
                blocks=blocks)


# ---------------------------------------------------------------------------
# Full GKFormerV0 forward built from the Pallas kernels.
# ---------------------------------------------------------------------------
def gkformer_pallas(x, params):
    B, Cin, H, W = x.shape
    L = H * W
    num_heads = params["blocks"][0]["wq"].shape[0]
    head_dim = params["cos"].shape[-1]
    scale = float(head_dim) ** -0.5

    # b c h w -> b (h w) c, concat normalized coords (pure layout ops, done in XLA).
    xt = jnp.transpose(x, (0, 2, 3, 1)).reshape(B, L, Cin)
    coords = jnp.broadcast_to(params["coords"][None], (B, L, 2))
    xin = jnp.concatenate([xt, coords], axis=-1).astype(jnp.float32)
    kp = params["win"].shape[0]
    xin = jnp.pad(xin, ((0, 0), (0, 0), (0, kp - xin.shape[-1])))

    h = in_proj_pallas(xin, params["win"], params["bin"])
    for lp in params["blocks"]:
        h = block_pallas(h, lp, params["cos"], params["sin"], params["rot"],
                         num_heads=num_heads, scale=scale)
    C = h.shape[-1]
    return h.reshape(B, H, W, C).transpose(0, 3, 1, 2)   # b (h w) c -> b c h w


# ---------------------------------------------------------------------------
# Pure-jnp reference (mirrors the PyTorch module) for a correctness check.
# ---------------------------------------------------------------------------
def _layernorm_ref(x, g, b, eps=1e-5):
    mu = jnp.mean(x, axis=-1, keepdims=True)
    var = jnp.mean((x - mu) ** 2, axis=-1, keepdims=True)
    return (x - mu) / jnp.sqrt(var + eps) * g + b


def _rope_ref(t, cos, sin):
    te = t[..., 0::2]
    to = t[..., 1::2]
    rt = jnp.stack([to, -te], axis=-1).reshape(t.shape)
    return t * cos + rt * sin


def gkformer_reference(x, params):
    B, Cin, H, W = x.shape
    L = H * W
    num_heads = params["blocks"][0]["wq"].shape[0]
    head_dim = params["cos"].shape[-1]
    scale = float(head_dim) ** -0.5
    cos, sin = params["cos"], params["sin"]

    xt = jnp.transpose(x, (0, 2, 3, 1)).reshape(B, L, Cin)
    coords = jnp.broadcast_to(params["coords"][None], (B, L, 2))
    xin = jnp.concatenate([xt, coords], axis=-1).astype(jnp.float32)
    kp = params["win"].shape[0]
    xin = jnp.pad(xin, ((0, 0), (0, 0), (0, kp - xin.shape[-1])))
    h = xin @ params["win"] + params["bin"]

    for lp in params["blocks"]:
        xn = _layernorm_ref(h, lp["g1"], lp["be1"])
        attn = jnp.zeros_like(h)
        for hd in range(num_heads):
            q = _rope_ref(xn @ lp["wq"][hd] + lp["bq"][hd], cos, sin)
            k = _rope_ref(xn @ lp["wk"][hd] + lp["bk"][hd], cos, sin)
            v = xn @ lp["wv"][hd] + lp["bv"][hd]
            s = scale * jnp.einsum("bld,bmd->blm", q, k)
            p = jax.nn.softmax(s, axis=-1)
            attn = attn + jnp.einsum("blm,bmd->bld", p, v) @ lp["wo"][hd]
        h = h + attn + lp["bo"]
        xn2 = _layernorm_ref(h, lp["g2"], lp["be2"])
        m = jax.nn.gelu(xn2 @ lp["w1"] + lp["b1"], approximate=False)
        h = h + (m @ lp["w2"] + lp["b2"])
    C = h.shape[-1]
    return h.reshape(B, H, W, C).transpose(0, 3, 1, 2)


if __name__ == "__main__":
    key = jax.random.PRNGKey(0)
    k_p, k_x = jax.random.split(key)

    # Small GKFormerV0 config: board 8x8 -> L = 64 tokens, embed_dim=32, 4 heads,
    # mlp_ratio=2 (hidden=64), depth=2, input planes=3.
    depth, embed_dim, num_heads, mlp_ratio = 2, 32, 4, 2.0
    in_dim, size, batch = 3, 8, 2

    params = init_gkformer_params(k_p, depth=depth, embed_dim=embed_dim,
                                  num_heads=num_heads, mlp_ratio=mlp_ratio,
                                  in_dim=in_dim, size=size)
    x = jax.random.normal(k_x, (batch, in_dim, size, size), jnp.float32)

    fwd = jax.jit(gkformer_pallas)
    y = jax.block_until_ready(fwd(x, params))
    y_ref = gkformer_reference(x, params)

    assert y.shape == (batch, embed_dim, size, size), y.shape
    assert bool(jnp.all(jnp.isfinite(y)))
    assert jnp.allclose(y, y_ref, atol=1e-2, rtol=1e-2), \
        float(jnp.max(jnp.abs(y - y_ref)))

    print("KERNEL_OK")
</pallas_src>

<mosaic_0001>
module attributes {stable_mosaic.version = 11 : i64} {
  func.func @_in_proj_kernel(%arg0: i32, %arg1: memref<1x64x8xf32, #tpu.memory_space<vmem>>, %arg2: memref<8x32xf32, #tpu.memory_space<vmem>>, %arg3: memref<1x32xf32, #tpu.memory_space<vmem>>, %arg4: memref<1x64x32xf32, #tpu.memory_space<vmem>>) attributes {dimension_semantics = [#tpu.dimension_semantics<parallel>], iteration_bounds = array<i64: 2>, scalar_prefetch = 0 : i64, scratch_operands = 0 : i64, tpu.core_type = #tpu.core_type<tc>, window_params = [{transform_indices = @transform_0, window_bounds = array<i64: 1, 64, 8>}, {pipeline_mode = #tpu.pipeline_mode<synchronous>, transform_indices = @transform_1, window_bounds = array<i64: 8, 32>}, {pipeline_mode = #tpu.pipeline_mode<synchronous>, transform_indices = @transform_2, window_bounds = array<i64: 1, 32>}, {transform_indices = @transform_3, window_bounds = array<i64: 1, 64, 32>}]} {
    %c0 = arith.constant 0 : index
    %c0_0 = arith.constant 0 : index
    %c0_1 = arith.constant 0 : index
    %0 = vector.load %arg1[%c0, %c0_0, %c0_1] : memref<1x64x8xf32, #tpu.memory_space<vmem>>, vector<1x64x8xf32>
    %1 = vector.shape_cast %0 : vector<1x64x8xf32> to vector<64x8xf32>
    %c0_2 = arith.constant 0 : index
    %c0_3 = arith.constant 0 : index
    %2 = vector.load %arg2[%c0_2, %c0_3] : memref<8x32xf32, #tpu.memory_space<vmem>>, vector<8x32xf32>
    %cst = arith.constant dense<0.000000e+00> : vector<64x32xf32>
    %3 = tpu.matmul %1, %2, %cst {dimension_numbers = #tpu.dot_dimension_numbers<[1], [0], [0], [1], [0, 0, 1, 1], [], []>} : vector<64x8xf32>, vector<8x32xf32>, vector<64x32xf32> -> vector<64x32xf32>
    %c0_4 = arith.constant 0 : index
    %c0_5 = arith.constant 0 : index
    %4 = vector.load %arg3[%c0_4, %c0_5] : memref<1x32xf32, #tpu.memory_space<vmem>>, vector<1x32xf32>
    %5 = vector.broadcast %4 : vector<1x32xf32> to vector<64x32xf32>
    %6 = arith.addf %3, %5 : vector<64x32xf32>
    %c0_6 = arith.constant 0 : index
    %c0_7 = arith.constant 0 : index
    %c0_8 = arith.constant 0 : index
    %7 = vector.load %arg4[%c0_6, %c0_7, %c0_8] : memref<1x64x32xf32, #tpu.memory_space<vmem>>, vector<1x64x32xf32>
    %8 = vector.shape_cast %7 : vector<1x64x32xf32> to vector<64x32xf32>
    %9 = vector.shape_cast %6 : vector<64x32xf32> to vector<1x64x32xf32>
    tpu.vector_store %arg4[%c0_6, %c0_7, %c0_8], %9 {strides = array<i32>} : memref<1x64x32xf32, #tpu.memory_space<vmem>>, vector<1x64x32xf32>,
    return
  }
  func.func @transform_0(%arg0: i32) -> (i32, i32, i32) {
    %c0_i32 = arith.constant 0 : i32
    %c0_i32_0 = arith.constant 0 : i32
    %c0_i32_1 = arith.constant 0 : i32
    return %arg0, %c0_i32, %c0_i32_0 : i32, i32, i32
  }
  func.func @transform_1(%arg0: i32) -> (i32, i32) {
    %c0_i32 = arith.constant 0 : i32
    %c0_i32_0 = arith.constant 0 : i32
    %c0_i32_1 = arith.constant 0 : i32
    return %c0_i32, %c0_i32_0 : i32, i32
  }
  func.func @transform_2(%arg0: i32) -> (i32, i32) {
    %c0_i32 = arith.constant 0 : i32
    %c0_i32_0 = arith.constant 0 : i32
    %c0_i32_1 = arith.constant 0 : i32
    return %c0_i32, %c0_i32_0 : i32, i32
  }
  func.func @transform_3(%arg0: i32) -> (i32, i32, i32) {
    %c0_i32 = arith.constant 0 : i32
    %c0_i32_0 = arith.constant 0 : i32
    %c0_i32_1 = arith.constant 0 : i32
    return %arg0, %c0_i32, %c0_i32_0 : i32, i32, i32
  }
}

module attributes {stable_mosaic.version = 11 : i64} {
  func.func @kernel(%arg0: i32, %arg1: memref<1x64x32xf32, #tpu.memory_space<vmem>>, %arg2: memref<1x32xf32, #tpu.memory_space<vmem>>, %arg3: memref<1x32xf32, #tpu.memory_space<vmem>>, %arg4: memref<4x32x8xf32, #tpu.memory_space<vmem>>, %arg5: memref<4x1x8xf32, #tpu.memory_space<vmem>>, %arg6: memref<4x32x8xf32, #tpu.memory_space<vmem>>, %arg7: memref<4x1x8xf32, #tpu.memory_space<vmem>>, %arg8: memref<4x32x8xf32, #tpu.memory_space<vmem>>, %arg9: memref<4x1x8xf32, #tpu.memory_space<vmem>>, %arg10: memref<64x8xf32, #tpu.memory_space<vmem>>, %arg11: memref<64x8xf32, #tpu.memory_space<vmem>>, %arg12: memref<8x8xf32, #tpu.memory_space<vmem>>, %arg13: memref<4x8x32xf32, #tpu.memory_space<vmem>>, %arg14: memref<1x32xf32, #tpu.memory_space<vmem>>, %arg15: memref<1x32xf32, #tpu.memory_space<vmem>>, %arg16: memref<1x32xf32, #tpu.memory_space<vmem>>, %arg17: memref<32x64xf32, #tpu.memory_space<vmem>>, %arg18: memref<1x64xf32, #tpu.memory_space<vmem>>, %arg19: memref<64x32xf32, #tpu.memory_space<vmem>>, %arg20: memref<1x32xf32, #tpu.memory_space<vmem>>, %arg21: memref<1x64x32xf32, #tpu.memory_space<vmem>>) attributes {dimension_semantics = [#tpu.dimension_semantics<parallel>], iteration_bounds = array<i64: 2>, scalar_prefetch = 0 : i64, scratch_operands = 0 : i64, tpu.core_type = #tpu.core_type<tc>, window_params = [{transform_indices = @transform_0, window_bounds = array<i64: 1, 64, 32>}, {pipeline_mode = #tpu.pipeline_mode<synchronous>, transform_indices = @transform_1, window_bounds = array<i64: 1, 32>}, {pipeline_mode = #tpu.pipeline_mode<synchronous>, transform_indices = @transform_2, window_bounds = array<i64: 1, 32>}, {pipeline_mode = #tpu.pipeline_mode<synchronous>, transform_indices = @transform_3, window_bounds = array<i64: 4, 32, 8>}, {pipeline_mode = #tpu.pipeline_mode<synchronous>, transform_indices = @transform_4, window_bounds = array<i64: 4, 1, 8>}, {pipeline_mode = #tpu.pipeline_mode<synchronous>, transform_indices = @transform_5, window_bounds = array<i64: 4, 32, 8>}, {pipeline_mode = #tpu.pipeline_mode<synchronous>, transform_indices = @transform_6, window_bounds = array<i64: 4, 1, 8>}, {pipeline_mode = #tpu.pipeline_mode<synchronous>, transform_indices = @transform_7, window_bounds = array<i64: 4, 32, 8>}, {pipeline_mode = #tpu.pipeline_mode<synchronous>, transform_indices = @transform_8, window_bounds = array<i64: 4, 1, 8>}, {pipeline_mode = #tpu.pipeline_mode<synchronous>, transform_indices = @transform_9, window_bounds = array<i64: 64, 8>}, {pipeline_mode = #tpu.pipeline_mode<synchronous>, transform_indices = @transform_10, window_bounds = array<i64: 64, 8>}, {pipeline_mode = #tpu.pipeline_mode<synchronous>, transform_indices = @transform_11, window_bounds = array<i64: 8, 8>}, {pipeline_mode = #tpu.pipeline_mode<synchronous>, transform_indices = @transform_12, window_bounds = array<i64: 4, 8, 32>}, {pipeline_mode = #tpu.pipeline_mode<synchronous>, transform_indices = @transform_13, window_bounds = array<i64: 1, 32>}, {pipeline_mode = #tpu.pipeline_mode<synchronous>, transform_indices = @transform_14, window_bounds = array<i64: 1, 32>}, {pipeline_mode = #tpu.pipeline_mode<synchronous>, transform_indices = @transform_15, window_bounds = array<i64: 1, 32>}, {pipeline_mode = #tpu.pipeline_mode<synchronous>, transform_indices = @transform_16, window_bounds = array<i64: 32, 64>}, {pipeline_mode = #tpu.pipeline_mode<synchronous>, transform_indices = @transform_17, window_bounds = array<i64: 1, 64>}, {pipeline_mode = #tpu.pipeline_mode<synchronous>, transform_indices = @transform_18, window_bounds = array<i64: 64, 32>}, {pipeline_mode = #tpu.pipeline_mode<synchronous>, transform_indices = @transform_19, window_bounds = array<i64: 1, 32>}, {transform_indices = @transform_20, window_bounds = array<i64: 1, 64, 32>}]} {
    %c0 = arith.constant 0 : index
    %c0_0 = arith.constant 0 : index
    %c0_1 = arith.constant 0 : index
    %0 = vector.load %arg1[%c0, %c0_0, %c0_1] : memref<1x64x32xf32, #tpu.memory_space<vmem>>, vector<1x64x32xf32>
    %1 = vector.shape_cast %0 : vector<1x64x32xf32> to vector<64x32xf32>
    %cst = arith.constant dense<0.000000e+00> : vector<64xf32>
    %2 = vector.multi_reduction <add>, %1, %cst [1] : vector<64x32xf32> to vector<64xf32>
    %3 = vector.shape_cast %2 : vector<64xf32> to vector<64x1xf32>
    %cst_2 = arith.constant 3.200000e+01 : f32
    %4 = vector.broadcast %cst_2 : f32 to vector<64x1xf32>
    %5 = arith.divf %3, %4 : vector<64x1xf32>
    %6 = vector.broadcast %5 : vector<64x1xf32> to vector<64x32xf32>
    %7 = arith.subf %1, %6 : vector<64x32xf32>
    %8 = arith.mulf %7, %7 : vector<64x32xf32>
    %cst_3 = arith.constant dense<0.000000e+00> : vector<64xf32>
    %9 = vector.multi_reduction <add>, %8, %cst_3 [1] : vector<64x32xf32> to vector<64xf32>
    %10 = vector.shape_cast %9 : vector<64xf32> to vector<64x1xf32>
    %cst_4 = arith.constant 3.200000e+01 : f32
    %11 = vector.broadcast %cst_4 : f32 to vector<64x1xf32>
    %12 = arith.divf %10, %11 : vector<64x1xf32>
    %cst_5 = arith.constant 9.99999974E-6 : f32
    %13 = vector.broadcast %cst_5 : f32 to vector<64x1xf32>
    %14 = arith.addf %12, %13 : vector<64x1xf32>
    %15 = math.rsqrt %14 : vector<64x1xf32>
    %16 = vector.broadcast %15 : vector<64x1xf32> to vector<64x32xf32>
    %17 = arith.mulf %7, %16 : vector<64x32xf32>
    %c0_6 = arith.constant 0 : index
    %c0_7 = arith.constant 0 : index
    %18 = vector.load %arg2[%c0_6, %c0_7] : memref<1x32xf32, #tpu.memory_space<vmem>>, vector<1x32xf32>
    %19 = vector.broadcast %18 : vector<1x32xf32> to vector<64x32xf32>
    %20 = arith.mulf %17, %19 : vector<64x32xf32>
    %c0_8 = arith.constant 0 : index
    %c0_9 = arith.constant 0 : index
    %21 = vector.load %arg3[%c0_8, %c0_9] : memref<1x32xf32, #tpu.memory_space<vmem>>, vector<1x32xf32>
    %22 = vector.broadcast %21 : vector<1x32xf32> to vector<64x32xf32>
    %23 = arith.addf %20, %22 : vector<64x32xf32>
    %c0_10 = arith.constant 0 : index
    %c0_11 = arith.constant 0 : index
    %24 = vector.load %arg10[%c0_10, %c0_11] : memref<64x8xf32, #tpu.memory_space<vmem>>, vector<64x8xf32>
    %c0_12 = arith.constant 0 : index
    %c0_13 = arith.constant 0 : index
    %25 = vector.load %arg11[%c0_12, %c0_13] : memref<64x8xf32, #tpu.memory_space<vmem>>, vector<64x8xf32>
    %c0_14 = arith.constant 0 : index
    %c0_15 = arith.constant 0 : index
    %26 = vector.load %arg12[%c0_14, %c0_15] : memref<8x8xf32, #tpu.memory_space<vmem>>, vector<8x8xf32>
    %cst_16 = arith.constant 0.000000e+00 : f32
    %27 = vector.broadcast %cst_16 : f32 to vector<64x32xf32>
    %c0_17 = arith.constant 0 : index
    %c0_18 = arith.constant 0 : index
    %c0_19 = arith.constant 0 : index
    %28 = vector.load %arg4[%c0_17, %c0_18, %c0_19] : memref<4x32x8xf32, #tpu.memory_space<vmem>>, vector<1x32x8xf32>
    %29 = vector.shape_cast %28 : vector<1x32x8xf32> to vector<32x8xf32>
    %cst_20 = arith.constant dense<0.000000e+00> : vector<64x8xf32>
    %30 = tpu.matmul %23, %29, %cst_20 {dimension_numbers = #tpu.dot_dimension_numbers<[1], [0], [0], [1], [0, 0, 1, 1], [], []>} : vector<64x32xf32>, vector<32x8xf32>, vector<64x8xf32> -> vector<64x8xf32>
    %c0_21 = arith.constant 0 : index
    %c0_22 = arith.constant 0 : index
    %c0_23 = arith.constant 0 : index
    %31 = vector.load %arg5[%c0_21, %c0_22, %c0_23] : memref<4x1x8xf32, #tpu.memory_space<vmem>>, vector<1x1x8xf32>
    %32 = vector.shape_cast %31 : vector<1x1x8xf32> to vector<1x8xf32>
    %33 = vector.broadcast %32 : vector<1x8xf32> to vector<64x8xf32>
    %34 = arith.addf %30, %33 : vector<64x8xf32>
    %c0_24 = arith.constant 0 : index
    %c0_25 = arith.constant 0 : index
    %c0_26 = arith.constant 0 : index
    %35 = vector.load %arg6[%c0_24, %c0_25, %c0_26] : memref<4x32x8xf32, #tpu.memory_space<vmem>>, vector<1x32x8xf32>
    %36 = vector.shape_cast %35 : vector<1x32x8xf32> to vector<32x8xf32>
    %cst_27 = arith.constant dense<0.000000e+00> : vector<64x8xf32>
    %37 = tpu.matmul %23, %36, %cst_27 {dimension_numbers = #tpu.dot_dimension_numbers<[1], [0], [0], [1], [0, 0, 1, 1], [], []>} : vector<64x32xf32>, vector<32x8xf32>, vector<64x8xf32> -> vector<64x8xf32>
    %c0_28 = arith.constant 0 : index
    %c0_29 = arith.constant 0 : index
    %c0_30 = arith.constant 0 : index
    %38 = vector.load %arg7[%c0_28, %c0_29, %c0_30] : memref<4x1x8xf32, #tpu.memory_space<vmem>>, vector<1x1x8xf32>
    %39 = vector.shape_cast %38 : vector<1x1x8xf32> to vector<1x8xf32>
    %40 = vector.broadcast %39 : vector<1x8xf32> to vector<64x8xf32>
    %41 = arith.addf %37, %40 : vector<64x8xf32>
    %c0_31 = arith.constant 0 : index
    %c0_32 = arith.constant 0 : index
    %c0_33 = arith.constant 0 : index
    %42 = vector.load %arg8[%c0_31, %c0_32, %c0_33] : memref<4x32x8xf32, #tpu.memory_space<vmem>>, vector<1x32x8xf32>
    %43 = vector.shape_cast %42 : vector<1x32x8xf32> to vector<32x8xf32>
    %cst_34 = arith.constant dense<0.000000e+00> : vector<64x8xf32>
    %44 = tpu.matmul %23, %43, %cst_34 {dimension_numbers = #tpu.dot_dimension_numbers<[1], [0], [0], [1], [0, 0, 1, 1], [], []>} : vector<64x32xf32>, vector<32x8xf32>, vector<64x8xf32> -> vector<64x8xf32>
    %c0_35 = arith.constant 0 : index
    %c0_36 = arith.constant 0 : index
    %c0_37 = arith.constant 0 : index
    %45 = vector.load %arg9[%c0_35, %c0_36, %c0_37] : memref<4x1x8xf32, #tpu.memory_space<vmem>>, vector<1x1x8xf32>
    %46 = vector.shape_cast %45 : vector<1x1x8xf32> to vector<1x8xf32>
    %47 = vector.broadcast %46 : vector<1x8xf32> to vector<64x8xf32>
    %48 = arith.addf %44, %47 : vector<64x8xf32>
    %49 = arith.mulf %34, %24 : vector<64x8xf32>
    %cst_38 = arith.constant dense<0.000000e+00> : vector<64x8xf32>
    %50 = tpu.matmul %34, %26, %cst_38 {dimension_numbers = #tpu.dot_dimension_numbers<[1], [0], [0], [1], [0, 0, 1, 1], [], []>} : vector<64x8xf32>, vector<8x8xf32>, vector<64x8xf32> -> vector<64x8xf32>
    %51 = arith.mulf %50, %25 : vector<64x8xf32>
    %52 = arith.addf %49, %51 : vector<64x8xf32>
    %53 = arith.mulf %41, %24 : vector<64x8xf32>
    %cst_39 = arith.constant dense<0.000000e+00> : vector<64x8xf32>
    %54 = tpu.matmul %41, %26, %cst_39 {dimension_numbers = #tpu.dot_dimension_numbers<[1], [0], [0], [1], [0, 0, 1, 1], [], []>} : vector<64x8xf32>, vector<8x8xf32>, vector<64x8xf32> -> vector<64x8xf32>
    %55 = arith.mulf %54, %25 : vector<64x8xf32>
    %56 = arith.addf %53, %55 : vector<64x8xf32>
    %cst_40 = arith.constant dense<0.000000e+00> : vector<64x64xf32>
    %57 = tpu.matmul %52, %56, %cst_40 {dimension_numbers = #tpu.dot_dimension_numbers<[1], [1], [0], [0], [0, 0, 1, 0], [], []>} : vector<64x8xf32>, vector<64x8xf32>, vector<64x64xf32> -> vector<64x64xf32>
    %cst_41 = arith.constant 0.353553385 : f32
    %58 = vector.broadcast %cst_41 : f32 to vector<64x64xf32>
    %59 = arith.mulf %58, %57 : vector<64x64xf32>
    %cst_42 = arith.constant dense<0xFF800000> : vector<64xf32>
    %60 = vector.multi_reduction <maximumf>, %59, %cst_42 [1] : vector<64x64xf32> to vector<64xf32>
    %61 = vector.shape_cast %60 : vector<64xf32> to vector<64x1xf32>
    %62 = vector.broadcast %61 : vector<64x1xf32> to vector<64x64xf32>
    %63 = arith.subf %59, %62 : vector<64x64xf32>
    %64 = math.exp %63 : vector<64x64xf32>
    %cst_43 = arith.constant dense<0.000000e+00> : vector<64xf32>
    %65 = vector.multi_reduction <add>, %64, %cst_43 [1] : vector<64x64xf32> to vector<64xf32>
    %66 = vector.shape_cast %65 : vector<64xf32> to vector<64x1xf32>
    %67 = vector.broadcast %66 : vector<64x1xf32> to vector<64x64xf32>
    %68 = arith.divf %64, %67 : vector<64x64xf32>
    %cst_44 = arith.constant dense<0.000000e+00> : vector<64x8xf32>
    %69 = tpu.matmul %68, %48, %cst_44 {dimension_numbers = #tpu.dot_dimension_numbers<[1], [0], [0], [1], [0, 0, 1, 1], [], []>} : vector<64x64xf32>, vector<64x8xf32>, vector<64x8xf32> -> vector<64x8xf32>
    %c0_45 = arith.constant 0 : index
    %c0_46 = arith.constant 0 : index
    %c0_47 = arith.constant 0 : index
    %70 = vector.load %arg13[%c0_45, %c0_46, %c0_47] : memref<4x8x32xf32, #tpu.memory_space<vmem>>, vector<1x8x32xf32>
    %71 = vector.shape_cast %70 : vector<1x8x32xf32> to vector<8x32xf32>
    %cst_48 = arith.constant dense<0.000000e+00> : vector<64x32xf32>
    %72 = tpu.matmul %69, %71, %cst_48 {dimension_numbers = #tpu.dot_dimension_numbers<[1], [0], [0], [1], [0, 0, 1, 1], [], []>} : vector<64x8xf32>, vector<8x32xf32>, vector<64x32xf32> -> vector<64x32xf32>
    %73 = arith.addf %27, %72 : vector<64x32xf32>
    %c1 = arith.constant 1 : index
    %c0_49 = arith.constant 0 : index
    %c0_50 = arith.constant 0 : index
    %74 = vector.load %arg4[%c1, %c0_49, %c0_50] : memref<4x32x8xf32, #tpu.memory_space<vmem>>, vector<1x32x8xf32>
    %75 = vector.shape_cast %74 : vector<1x32x8xf32> to vector<32x8xf32>
    %cst_51 = arith.constant dense<0.000000e+00> : vector<64x8xf32>
    %76 = tpu.matmul %23, %75, %cst_51 {dimension_numbers = #tpu.dot_dimension_numbers<[1], [0], [0], [1], [0, 0, 1, 1], [], []>} : vector<64x32xf32>, vector<32x8xf32>, vector<64x8xf32> -> vector<64x8xf32>
    %c1_52 = arith.constant 1 : index
    %c0_53 = arith.constant 0 : index
    %c0_54 = arith.constant 0 : index
    %77 = vector.load %arg5[%c1_52, %c0_53, %c0_54] : memref<4x1x8xf32, #tpu.memory_space<vmem>>, vector<1x1x8xf32>
    %78 = vector.shape_cast %77 : vector<1x1x8xf32> to vector<1x8xf32>
    %79 = vector.broadcast %78 : vector<1x8xf32> to vector<64x8xf32>
    %80 = arith.addf %76, %79 : vector<64x8xf32>
    %c1_55 = arith.constant 1 : index
    %c0_56 = arith.constant 0 : index
    %c0_57 = arith.constant 0 : index
    %81 = vector.load %arg6[%c1_55, %c0_56, %c0_57] : memref<4x32x8xf32, #tpu.memory_space<vmem>>, vector<1x32x8xf32>
    %82 = vector.shape_cast %81 : vector<1x32x8xf32> to vector<32x8xf32>
    %cst_58 = arith.constant dense<0.000000e+00> : vector<64x8xf32>
    %83 = tpu.matmul %23, %82, %cst_58 {dimension_numbers = #tpu.dot_dimension_numbers<[1], [0], [0], [1], [0, 0, 1, 1], [], []>} : vector<64x32xf32>, vector<32x8xf32>, vector<64x8xf32> -> vector<64x8xf32>
    %c1_59 = arith.constant 1 : index
    %c0_60 = arith.constant 0 : index
    %c0_61 = arith.constant 0 : index
    %84 = vector.load %arg7[%c1_59, %c0_60, %c0_61] : memref<4x1x8xf32, #tpu.memory_space<vmem>>, vector<1x1x8xf32>
    %85 = vector.shape_cast %84 : vector<1x1x8xf32> to vector<1x8xf32>
    %86 = vector.broadcast %85 : vector<1x8xf32> to vector<64x8xf32>
    %87 = arith.addf %83, %86 : vector<64x8xf32>
    %c1_62 = arith.constant 1 : index
    %c0_63 = arith.constant 0 : index
    %c0_64 = arith.constant 0 : index
    %88 = vector.load %arg8[%c1_62, %c0_63, %c0_64] : memref<4x32x8xf32, #tpu.memory_space<vmem>>, vector<1x32x8xf32>
    %89 = vector.shape_cast %88 : vector<1x32x8xf32> to vector<32x8xf32>
    %cst_65 = arith.constant dense<0.000000e+00> : vector<64x8xf32>
    %90 = tpu.matmul %23, %89, %cst_65 {dimension_numbers = #tpu.dot_dimension_numbers<[1], [0], [0], [1], [0, 0, 1, 1], [], []>} : vector<64x32xf32>, vector<32x8xf32>, vector<64x8xf32> -> vector<64x8xf32>
    %c1_66 = arith.constant 1 : index
    %c0_67 = arith.constant 0 : index
    %c0_68 = arith.constant 0 : index
    %91 = vector.load %arg9[%c1_66, %c0_67, %c0_68] : memref<4x1x8xf32, #tpu.memory_space<vmem>>, vector<1x1x8xf32>
    %92 = vector.shape_cast %91 : vector<1x1x8xf32> to vector<1x8xf32>
    %93 = vector.broadcast %92 : vector<1x8xf32> to vector<64x8xf32>
    %94 = arith.addf %90, %93 : vector<64x8xf32>
    %95 = arith.mulf %80, %24 : vector<64x8xf32>
    %cst_69 = arith.constant dense<0.000000e+00> : vector<64x8xf32>
    %96 = tpu.matmul %80, %26, %cst_69 {dimension_numbers = #tpu.dot_dimension_numbers<[1], [0], [0], [1], [0, 0, 1, 1], [], []>} : vector<64x8xf32>, vector<8x8xf32>, vector<64x8xf32> -> vector<64x8xf32>
    %97 = arith.mulf %96, %25 : vector<64x8xf32>
    %98 = arith.addf %95, %97 : vector<64x8xf32>
    %99 = arith.mulf %87, %24 : vector<64x8xf32>
    %cst_70 = arith.constant dense<0.000000e+00> : vector<64x8xf32>
    %100 = tpu.matmul %87, %26, %cst_70 {dimension_numbers = #tpu.dot_dimension_numbers<[1], [0], [0], [1], [0, 0, 1, 1], [], []>} : vector<64x8xf32>, vector<8x8xf32>, vector<64x8xf32> -> vector<64x8xf32>
    %101 = arith.mulf %100, %25 : vector<64x8xf32>
    %102 = arith.addf %99, %101 : vector<64x8xf32>
    %cst_71 = arith.constant dense<0.000000e+00> : vector<64x64xf32>
    %103 = tpu.matmul %98, %102, %cst_71 {dimension_numbers = #tpu.dot_dimension_numbers<[1], [1], [0], [0], [0, 0, 1, 0], [], []>} : vector<64x8xf32>, vector<64x8xf32>, vector<64x64xf32> -> vector<64x64xf32>
    %cst_72 = arith.constant 0.353553385 : f32
    %104 = vector.broadcast %cst_72 : f32 to vector<64x64xf32>
    %105 = arith.mulf %104, %103 : vector<64x64xf32>
    %cst_73 = arith.constant dense<0xFF800000> : vector<64xf32>
    %106 = vector.multi_reduction <maximumf>, %105, %cst_73 [1] : vector<64x64xf32> to vector<64xf32>
    %107 = vector.shape_cast %106 : vector<64xf32> to vector<64x1xf32>
    %108 = vector.broadcast %107 : vector<64x1xf32> to vector<64x64xf32>
    %109 = arith.subf %105, %108 : vector<64x64xf32>
    %110 = math.exp %109 : vector<64x64xf32>
    %cst_74 = arith.constant dense<0.000000e+00> : vector<64xf32>
    %111 = vector.multi_reduction <add>, %110, %cst_74 [1] : vector<64x64xf32> to vector<64xf32>
    %112 = vector.shape_cast %111 : vector<64xf32> to vector<64x1xf32>
    %113 = vector.broadcast %112 : vector<64x1xf32> to vector<64x64xf32>
    %114 = arith.divf %110, %113 : vector<64x64xf32>
    %cst_75 = arith.constant dense<0.000000e+00> : vector<64x8xf32>
    %115 = tpu.matmul %114, %94, %cst_75 {dimension_numbers = #tpu.dot_dimension_numbers<[1], [0], [0], [1], [0, 0, 1, 1], [], []>} : vector<64x64xf32>, vector<64x8xf32>, vector<64x8xf32> -> vector<64x8xf32>
    %c1_76 = arith.constant 1 : index
    %c0_77 = arith.constant 0 : index
    %c0_78 = arith.constant 0 : index
    %116 = vector.load %arg13[%c1_76, %c0_77, %c0_78] : memref<4x8x32xf32, #tpu.memory_space<vmem>>, vector<1x8x32xf32>
    %117 = vector.shape_cast %116 : vector<1x8x32xf32> to vector<8x32xf32>
    %cst_79 = arith.constant dense<0.000000e+00> : vector<64x32xf32>
    %118 = tpu.matmul %115, %117, %cst_79 {dimension_numbers = #tpu.dot_dimension_numbers<[1], [0], [0], [1], [0, 0, 1, 1], [], []>} : vector<64x8xf32>, vector<8x32xf32>, vector<64x32xf32> -> vector<64x32xf32>
    %119 = arith.addf %73, %118 : vector<64x32xf32>
    %c2 = arith.constant 2 : index
    %c0_80 = arith.constant 0 : index
    %c0_81 = arith.constant 0 : index
    %120 = vector.load %arg4[%c2, %c0_80, %c0_81] : memref<4x32x8xf32, #tpu.memory_space<vmem>>, vector<1x32x8xf32>
    %121 = vector.shape_cast %120 : vector<1x32x8xf32> to vector<32x8xf32>
    %cst_82 = arith.constant dense<0.000000e+00> : vector<64x8xf32>
    %122 = tpu.matmul %23, %121, %cst_82 {dimension_numbers = #tpu.dot_dimension_numbers<[1], [0], [0], [1], [0, 0, 1, 1], [], []>} : vector<64x32xf32>, vector<32x8xf32>, vector<64x8xf32> -> vector<64x8xf32>
    %c2_83 = arith.constant 2 : index
    %c0_84 = arith.constant 0 : index
    %c0_85 = arith.constant 0 : index
    %123 = vector.load %arg5[%c2_83, %c0_84, %c0_85] : memref<4x1x8xf32, #tpu.memory_space<vmem>>, vector<1x1x8xf32>
    %124 = vector.shape_cast %123 : vector<1x1x8xf32> to vector<1x8xf32>
    %125 = vector.broadcast %124 : vector<1x8xf32> to vector<64x8xf32>
    %126 = arith.addf %122, %125 : vector<64x8xf32>
    %c2_86 = arith.constant 2 : index
    %c0_87 = arith.constant 0 : index
    %c0_88 = arith.constant 0 : index
    %127 = vector.load %arg6[%c2_86, %c0_87, %c0_88] : memref<4x32x8xf32, #tpu.memory_space<vmem>>, vector<1x32x8xf32>
    %128 = vector.shape_cast %127 : vector<1x32x8xf32> to vector<32x8xf32>
    %cst_89 = arith.constant dense<0.000000e+00> : vector<64x8xf32>
    %129 = tpu.matmul %23, %128, %cst_89 {dimension_numbers = #tpu.dot_dimension_numbers<[1], [0], [0], [1], [0, 0, 1, 1], [], []>} : vector<64x32xf32>, vector<32x8xf32>, vector<64x8xf32> -> vector<64x8xf32>
    %c2_90 = arith.constant 2 : index
    %c0_91 = arith.constant 0 : index
    %c0_92 = arith.constant 0 : index
    %130 = vector.load %arg7[%c2_90, %c0_91, %c0_92] : memref<4x1x8xf32, #tpu.memory_space<vmem>>, vector<1x1x8xf32>
    %131 = vector.shape_cast %130 : vector<1x1x8xf32> to vector<1x8xf32>
    %132 = vector.broadcast %131 : vector<1x8xf32> to vector<64x8xf32>
    %133 = arith.addf %129, %132 : vector<64x8xf32>
    %c2_93 = arith.constant 2 : index
    %c0_94 = arith.constant 0 : index
    %c0_95 = arith.constant 0 : index
    %134 = vector.load %arg8[%c2_93, %c0_94, %c0_95] : memref<4x32x8xf32, #tpu.memory_space<vmem>>, vector<1x32x8xf32>
    %135 = vector.shape_cast %134 : vector<1x32x8xf32> to vector<32x8xf32>
    %cst_96 = arith.constant dense<0.000000e+00> : vector<64x8xf32>
    %136 = tpu.matmul %23, %135, %cst_96 {dimension_numbers = #tpu.dot_dimension_numbers<[1], [0], [0], [1], [0, 0, 1, 1], [], []>} : vector<64x32xf32>, vector<32x8xf32>, vector<64x8xf32> -> vector<64x8xf32>
    %c2_97 = arith.constant 2 : index
    %c0_98 = arith.constant 0 : index
    %c0_99 = arith.constant 0 : index
    %137 = vector.load %arg9[%c2_97, %c0_98, %c0_99] : memref<4x1x8xf32, #tpu.memory_space<vmem>>, vector<1x1x8xf32>
    %138 = vector.shape_cast %137 : vector<1x1x8xf32> to vector<1x8xf32>
    %139 = vector.broadcast %138 : vector<1x8xf32> to vector<64x8xf32>
    %140 = arith.addf %136, %139 : vector<64x8xf32>
    %141 = arith.mulf %126, %24 : vector<64x8xf32>
    %cst_100 = arith.constant dense<0.000000e+00> : vector<64x8xf32>
    %142 = tpu.matmul %126, %26, %cst_100 {dimension_numbers = #tpu.dot_dimension_numbers<[1], [0], [0], [1], [0, 0, 1, 1], [], []>} : vector<64x8xf32>, vector<8x8xf32>, vector<64x8xf32> -> vector<64x8xf32>
    %143 = arith.mulf %142, %25 : vector<64x8xf32>
    %144 = arith.addf %141, %143 : vector<64x8xf32>
    %145 = arith.mulf %133, %24 : vector<64x8xf32>
    %cst_101 = arith.constant dense<0.000000e+00> : vector<64x8xf32>
    %146 = tpu.matmul %133, %26, %cst_101 {dimension_numbers = #tpu.dot_dimension_numbers<[1], [0], [0], [1], [0, 0, 1, 1], [], []>} : vector<64x8xf32>, vector<8x8xf32>, vector<64x8xf32> -> vector<64x8xf32>
    %147 = arith.mulf %146, %25 : vector<64x8xf32>
    %148 = arith.addf %145, %147 : vector<64x8xf32>
    %cst_102 = arith.constant dense<0.000000e+00> : vector<64x64xf32>
    %149 = tpu.matmul %144, %148, %cst_102 {dimension_numbers = #tpu.dot_dimension_numbers<[1], [1], [0], [0], [0, 0, 1, 0], [], []>} : vector<64x8xf32>, vector<64x8xf32>, vector<64x64xf32> -> vector<64x64xf32>
    %cst_103 = arith.constant 0.353553385 : f32
    %150 = vector.broadcast %cst_103 : f32 to vector<64x64xf32>
    %151 = arith.mulf %150, %149 : vector<64x64xf32>
    %cst_104 = arith.constant dense<0xFF800000> : vector<64xf32>
    %152 = vector.multi_reduction <maximumf>, %151, %cst_104 [1] : vector<64x64xf32> to vector<64xf32>
    %153 = vector.shape_cast %152 : vector<64xf32> to vector<64x1xf32>
    %154 = vector.broadcast %153 : vector<64x1xf32> to vector<64x64xf32>
    %155 = arith.subf %151, %154 : vector<64x64xf32>
    %156 = math.exp %155 : vector<64x64xf32>
    %cst_105 = arith.constant dense<0.000000e+00> : vector<64xf32>
    %157 = vector.multi_reduction <add>, %156, %cst_105 [1] : vector<64x64xf32> to vector<64xf32>
    %158 = vector.shape_cast %157 : vector<64xf32> to vector<64x1xf32>
    %159 = vector.broadcast %158 : vector<64x1xf32> to vector<64x64xf32>
    %160 = arith.divf %156, %159 : vector<64x64xf32>
    %cst_106 = arith.constant dense<0.000000e+00> : vector<64x8xf32>
    %161 = tpu.matmul %160, %140, %cst_106 {dimension_numbers = #tpu.dot_dimension_numbers<[1], [0], [0], [1], [0, 0, 1, 1], [], []>} : vector<64x64xf32>, vector<64x8xf32>, vector<64x8xf32> -> vector<64x8xf32>
    %c2_107 = arith.constant 2 : index
    %c0_108 = arith.constant 0 : index
    %c0_109 = arith.constant 0 : index
    %162 = vector.load %arg13[%c2_107, %c0_108, %c0_109] : memref<4x8x32xf32, #tpu.memory_space<vmem>>, vector<1x8x32xf32>
    %163 = vector.shape_cast %162 : vector<1x8x32xf32> to vector<8x32xf32>
    %cst_110 = arith.constant dense<0.000000e+00> : vector<64x32xf32>
    %164 = tpu.matmul %161, %163, %cst_110 {dimension_numbers = #tpu.dot_dimension_numbers<[1], [0], [0], [1], [0, 0, 1, 1], [], []>} : vector<64x8xf32>, vector<8x32xf32>, vector<64x32xf32> -> vector<64x32xf32>
    %165 = arith.addf %119, %164 : vector<64x32xf32>
    %c3 = arith.constant 3 : index
    %c0_111 = arith.constant 0 : index
    %c0_112 = arith.constant 0 : index
    %166 = vector.load %arg4[%c3, %c0_111, %c0_112] : memref<4x32x8xf32, #tpu.memory_space<vmem>>, vector<1x32x8xf32>
    %167 = vector.shape_cast %166 : vector<1x32x8xf32> to vector<32x8xf32>
    %cst_113 = arith.constant dense<0.000000e+00> : vector<64x8xf32>
    %168 = tpu.matmul %23, %167, %cst_113 {dimension_numbers = #tpu.dot_dimension_numbers<[1], [0], [0], [1], [0, 0, 1, 1], [], []>} : vector<64x32xf32>, vector<32x8xf32>, vector<64x8xf32> -> vector<64x8xf32>
    %c3_114 = arith.constant 3 : index
    %c0_115 = arith.constant 0 : index
    %c0_116 = arith.constant 0 : index
    %169 = vector.load %arg5[%c3_114, %c0_115, %c0_116] : memref<4x1x8xf32, #tpu.memory_space<vmem>>, vector<1x1x8xf32>
    %170 = vector.shape_cast %169 : vector<1x1x8xf32> to vector<1x8xf32>
    %171 = vector.broadcast %170 : vector<1x8xf32> to vector<64x8xf32>
    %172 = arith.addf %168, %171 : vector<64x8xf32>
    %c3_117 = arith.constant 3 : index
    %c0_118 = arith.constant 0 : index
    %c0_119 = arith.constant 0 : index
    %173 = vector.load %arg6[%c3_117, %c0_118, %c0_119] : memref<4x32x8xf32, #tpu.memory_space<vmem>>, vector<1x32x8xf32>
    %174 = vector.shape_cast %173 : vector<1x32x8xf32> to vector<32x8xf32>
    %cst_120 = arith.constant dense<0.000000e+00> : vector<64x8xf32>
    %175 = tpu.matmul %23, %174, %cst_120 {dimension_numbers = #tpu.dot_dimension_numbers<[1], [0], [0], [1], [0, 0, 1, 1], [], []>} : vector<64x32xf32>, vector<32x8xf32>, vector<64x8xf32> -> vector<64x8xf32>
    %c3_121 = arith.constant 3 : index
    %c0_122 = arith.constant 0 : index
    %c0_123 = arith.constant 0 : index
    %176 = vector.load %arg7[%c3_121, %c0_122, %c0_123] : memref<4x1x8xf32, #tpu.memory_space<vmem>>, vector<1x1x8xf32>
    %177 = vector.shape_cast %176 : vector<1x1x8xf32> to vector<1x8xf32>
    %178 = vector.broadcast %177 : vector<1x8xf32> to vector<64x8xf32>
    %179 = arith.addf %175, %178 : vector<64x8xf32>
    %c3_124 = arith.constant 3 : index
    %c0_125 = arith.constant 0 : index
    %c0_126 = arith.constant 0 : index
    %180 = vector.load %arg8[%c3_124, %c0_125, %c0_126] : memref<4x32x8xf32, #tpu.memory_space<vmem>>, vector<1x32x8xf32>
    %181 = vector.shape_cast %180 : vector<1x32x8xf32> to vector<32x8xf32>
    %cst_127 = arith.constant dense<0.000000e+00> : vector<64x8xf32>
    %182 = tpu.matmul %23, %181, %cst_127 {dimension_numbers = #tpu.dot_dimension_numbers<[1], [0], [0], [1], [0, 0, 1, 1], [], []>} : vector<64x32xf32>, vector<32x8xf32>, vector<64x8xf32> -> vector<64x8xf32>
    %c3_128 = arith.constant 3 : index
    %c0_129 = arith.constant 0 : index
    %c0_130 = arith.constant 0 : index
    %183 = vector.load %arg9[%c3_128, %c0_129, %c0_130] : memref<4x1x8xf32, #tpu.memory_space<vmem>>, vector<1x1x8xf32>
    %184 = vector.shape_cast %183 : vector<1x1x8xf32> to vector<1x8xf32>
    %185 = vector.broadcast %184 : vector<1x8xf32> to vector<64x8xf32>
    %186 = arith.addf %182, %185 : vector<64x8xf32>
    %187 = arith.mulf %172, %24 : vector<64x8xf32>
    %cst_131 = arith.constant dense<0.000000e+00> : vector<64x8xf32>
    %188 = tpu.matmul %172, %26, %cst_131 {dimension_numbers = #tpu.dot_dimension_numbers<[1], [0], [0], [1], [0, 0, 1, 1], [], []>} : vector<64x8xf32>, vector<8x8xf32>, vector<64x8xf32> -> vector<64x8xf32>
    %189 = arith.mulf %188, %25 : vector<64x8xf32>
    %190 = arith.addf %187, %189 : vector<64x8xf32>
    %191 = arith.mulf %179, %24 : vector<64x8xf32>
    %cst_132 = arith.constant dense<0.000000e+00> : vector<64x8xf32>
    %192 = tpu.matmul %179, %26, %cst_132 {dimension_numbers = #tpu.dot_dimension_numbers<[1], [0], [0], [1], [0, 0, 1, 1], [], []>} : vector<64x8xf32>, vector<8x8xf32>, vector<64x8xf32> -> vector<64x8xf32>
    %193 = arith.mulf %192, %25 : vector<64x8xf32>
    %194 = arith.addf %191, %193 : vector<64x8xf32>
    %cst_133 = arith.constant dense<0.000000e+00> : vector<64x64xf32>
    %195 = tpu.matmul %190, %194, %cst_133 {dimension_numbers = #tpu.dot_dimension_numbers<[1], [1], [0], [0], [0, 0, 1, 0], [], []>} : vector<64x8xf32>, vector<64x8xf32>, vector<64x64xf32> -> vector<64x64xf32>
    %cst_134 = arith.constant 0.353553385 : f32
    %196 = vector.broadcast %cst_134 : f32 to vector<64x64xf32>
    %197 = arith.mulf %196, %195 : vector<64x64xf32>
    %cst_135 = arith.constant dense<0xFF800000> : vector<64xf32>
    %198 = vector.multi_reduction <maximumf>, %197, %cst_135 [1] : vector<64x64xf32> to vector<64xf32>
    %199 = vector.shape_cast %198 : vector<64xf32> to vector<64x1xf32>
    %200 = vector.broadcast %199 : vector<64x1xf32> to vector<64x64xf32>
    %201 = arith.subf %197, %200 : vector<64x64xf32>
    %202 = math.exp %201 : vector<64x64xf32>
    %cst_136 = arith.constant dense<0.000000e+00> : vector<64xf32>
    %203 = vector.multi_reduction <add>, %202, %cst_136 [1] : vector<64x64xf32> to vector<64xf32>
    %204 = vector.shape_cast %203 : vector<64xf32> to vector<64x1xf32>
    %205 = vector.broadcast %204 : vector<64x1xf32> to vector<64x64xf32>
    %206 = arith.divf %202, %205 : vector<64x64xf32>
    %cst_137 = arith.constant dense<0.000000e+00> : vector<64x8xf32>
    %207 = tpu.matmul %206, %186, %cst_137 {dimension_numbers = #tpu.dot_dimension_numbers<[1], [0], [0], [1], [0, 0, 1, 1], [], []>} : vector<64x64xf32>, vector<64x8xf32>, vector<64x8xf32> -> vector<64x8xf32>
    %c3_138 = arith.constant 3 : index
    %c0_139 = arith.constant 0 : index
    %c0_140 = arith.constant 0 : index
    %208 = vector.load %arg13[%c3_138, %c0_139, %c0_140] : memref<4x8x32xf32, #tpu.memory_space<vmem>>, vector<1x8x32xf32>
    %209 = vector.shape_cast %208 : vector<1x8x32xf32> to vector<8x32xf32>
    %cst_141 = arith.constant dense<0.000000e+00> : vector<64x32xf32>
    %210 = tpu.matmul %207, %209, %cst_141 {dimension_numbers = #tpu.dot_dimension_numbers<[1], [0], [0], [1], [0, 0, 1, 1], [], []>} : vector<64x8xf32>, vector<8x32xf32>, vector<64x32xf32> -> vector<64x32xf32>
    %211 = arith.addf %165, %210 : vector<64x32xf32>
    %212 = arith.addf %1, %211 : vector<64x32xf32>
    %c0_142 = arith.constant 0 : index
    %c0_143 = arith.constant 0 : index
    %213 = vector.load %arg14[%c0_142, %c0_143] : memref<1x32xf32, #tpu.memory_space<vmem>>, vector<1x32xf32>
    %214 = vector.broadcast %213 : vector<1x32xf32> to vector<64x32xf32>
    %215 = arith.addf %212, %214 : vector<64x32xf32>
    %cst_144 = arith.constant dense<0.000000e+00> : vector<64xf32>
    %216 = vector.multi_reduction <add>, %215, %cst_144 [1] : vector<64x32xf32> to vector<64xf32>
    %217 = vector.shape_cast %216 : vector<64xf32> to vector<64x1xf32>
    %cst_145 = arith.constant 3.200000e+01 : f32
    %218 = vector.broadcast %cst_145 : f32 to vector<64x1xf32>
    %219 = arith.divf %217, %218 : vector<64x1xf32>
    %220 = vector.broadcast %219 : vector<64x1xf32> to vector<64x32xf32>
    %221 = arith.subf %215, %220 : vector<64x32xf32>
    %222 = arith.mulf %221, %221 : vector<64x32xf32>
    %cst_146 = arith.constant dense<0.000000e+00> : vector<64xf32>
    %223 = vector.multi_reduction <add>, %222, %cst_146 [1] : vector<64x32xf32> to vector<64xf32>
    %224 = vector.shape_cast %223 : vector<64xf32> to vector<64x1xf32>
    %cst_147 = arith.constant 3.200000e+01 : f32
    %225 = vector.broadcast %cst_147 : f32 to vector<64x1xf32>
    %226 = arith.divf %224, %225 : vector<64x1xf32>
    %cst_148 = arith.constant 9.99999974E-6 : f32
    %227 = vector.broadcast %cst_148 : f32 to vector<64x1xf32>
    %228 = arith.addf %226, %227 : vector<64x1xf32>
    %229 = math.rsqrt %228 : vector<64x1xf32>
    %230 = vector.broadcast %229 : vector<64x1xf32> to vector<64x32xf32>
    %231 = arith.mulf %221, %230 : vector<64x32xf32>
    %c0_149 = arith.constant 0 : index
    %c0_150 = arith.constant 0 : index
    %232 = vector.load %arg15[%c0_149, %c0_150] : memref<1x32xf32, #tpu.memory_space<vmem>>, vector<1x32xf32>
    %233 = vector.broadcast %232 : vector<1x32xf32> to vector<64x32xf32>
    %234 = arith.mulf %231, %233 : vector<64x32xf32>
    %c0_151 = arith.constant 0 : index
    %c0_152 = arith.constant 0 : index
    %235 = vector.load %arg16[%c0_151, %c0_152] : memref<1x32xf32, #tpu.memory_space<vmem>>, vector<1x32xf32>
    %236 = vector.broadcast %235 : vector<1x32xf32> to vector<64x32xf32>
    %237 = arith.addf %234, %236 : vector<64x32xf32>
    %c0_153 = arith.constant 0 : index
    %c0_154 = arith.constant 0 : index
    %238 = vector.load %arg17[%c0_153, %c0_154] : memref<32x64xf32, #tpu.memory_space<vmem>>, vector<32x64xf32>
    %cst_155 = arith.constant dense<0.000000e+00> : vector<64x64xf32>
    %239 = tpu.matmul %237, %238, %cst_155 {dimension_numbers = #tpu.dot_dimension_numbers<[1], [0], [0], [1], [0, 0, 1, 1], [], []>} : vector<64x32xf32>, vector<32x64xf32>, vector<64x64xf32> -> vector<64x64xf32>
    %c0_156 = arith.constant 0 : index
    %c0_157 = arith.constant 0 : index
    %240 = vector.load %arg18[%c0_156, %c0_157] : memref<1x64xf32, #tpu.memory_space<vmem>>, vector<1x64xf32>
    %241 = vector.broadcast %240 : vector<1x64xf32> to vector<64x64xf32>
    %242 = arith.addf %239, %241 : vector<64x64xf32>
    %cst_158 = arith.constant 5.000000e-01 : f32
    %243 = vector.broadcast %cst_158 : f32 to vector<64x64xf32>
    %244 = arith.mulf %243, %242 : vector<64x64xf32>
    %cst_159 = arith.constant 0.707106769 : f32
    %245 = vector.broadcast %cst_159 : f32 to vector<64x64xf32>
    %246 = arith.mulf %242, %245 : vector<64x64xf32>
    %247 = math.erf %246 : vector<64x64xf32>
    %cst_160 = arith.constant 1.000000e+00 : f32
    %248 = vector.broadcast %cst_160 : f32 to vector<64x64xf32>
    %249 = arith.addf %248, %247 : vector<64x64xf32>
    %250 = arith.mulf %244, %249 : vector<64x64xf32>
    %c0_161 = arith.constant 0 : index
    %c0_162 = arith.constant 0 : index
    %251 = vector.load %arg19[%c0_161, %c0_162] : memref<64x32xf32, #tpu.memory_space<vmem>>, vector<64x32xf32>
    %cst_163 = arith.constant dense<0.000000e+00> : vector<64x32xf32>
    %252 = tpu.matmul %250, %251, %cst_163 {dimension_numbers = #tpu.dot_dimension_numbers<[1], [0], [0], [1], [0, 0, 1, 1], [], []>} : vector<64x64xf32>, vector<64x32xf32>, vector<64x32xf32> -> vector<64x32xf32>
    %c0_164 = arith.constant 0 : index
    %c0_165 = arith.constant 0 : index
    %253 = vector.load %arg20[%c0_164, %c0_165] : memref<1x32xf32, #tpu.memory_space<vmem>>, vector<1x32xf32>
    %254 = vector.broadcast %253 : vector<1x32xf32> to vector<64x32xf32>
    %255 = arith.addf %252, %254 : vector<64x32xf32>
    %256 = arith.addf %215, %255 : vector<64x32xf32>
    %c0_166 = arith.constant 0 : index
    %c0_167 = arith.constant 0 : index
    %c0_168 = arith.constant 0 : index
    %257 = vector.load %arg21[%c0_166, %c0_167, %c0_168] : memref<1x64x32xf32, #tpu.memory_space<vmem>>, vector<1x64x32xf32>
    %258 = vector.shape_cast %257 : vector<1x64x32xf32> to vector<64x32xf32>
    %259 = vector.shape_cast %256 : vector<64x32xf32> to vector<1x64x32xf32>
    tpu.vector_store %arg21[%c0_166, %c0_167, %c0_168], %259 {strides = array<i32>} : memref<1x64x32xf32, #tpu.memory_space<vmem>>, vector<1x64x32xf32>,
    return
  }
  func.func @transform_0(%arg0: i32) -> (i32, i32, i32) {
    %c0_i32 = arith.constant 0 : i32
    %c0_i32_0 = arith.constant 0 : i32
    %c0_i32_1 = arith.constant 0 : i32
    return %arg0, %c0_i32, %c0_i32_0 : i32, i32, i32
  }
  func.func @transform_1(%arg0: i32) -> (i32, i32) {
    %c0_i32 = arith.constant 0 : i32
    %c0_i32_0 = arith.constant 0 : i32
    %c0_i32_1 = arith.constant 0 : i32
    return %c0_i32, %c0_i32_0 : i32, i32
  }
  func.func @transform_2(%arg0: i32) -> (i32, i32) {
    %c0_i32 = arith.constant 0 : i32
    %c0_i32_0 = arith.constant 0 : i32
    %c0_i32_1 = arith.constant 0 : i32
    return %c0_i32, %c0_i32_0 : i32, i32
  }
  func.func @transform_3(%arg0: i32) -> (i32, i32, i32) {
    %c0_i32 = arith.constant 0 : i32
    %c0_i32_0 = arith.constant 0 : i32
    %c0_i32_1 = arith.constant 0 : i32
    %c0_i32_2 = arith.constant 0 : i32
    return %c0_i32, %c0_i32_0, %c0_i32_1 : i32, i32, i32
  }
  func.func @transform_4(%arg0: i32) -> (i32, i32, i32) {
    %c0_i32 = arith.constant 0 : i32
    %c0_i32_0 = arith.constant 0 : i32
    %c0_i32_1 = arith.constant 0 : i32
    %c0_i32_2 = arith.constant 0 : i32
    return %c0_i32, %c0_i32_0, %c0_i32_1 : i32, i32, i32
  }
  func.func @transform_5(%arg0: i32) -> (i32, i32, i32) {
    %c0_i32 = arith.constant 0 : i32
    %c0_i32_0 = arith.constant 0 : i32
    %c0_i32_1 = arith.constant 0 : i32
    %c0_i32_2 = arith.constant 0 : i32
    return %c0_i32, %c0_i32_0, %c0_i32_1 : i32, i32, i32
  }
  func.func @transform_6(%arg0: i32) -> (i32, i32, i32) {
    %c0_i32 = arith.constant 0 : i32
    %c0_i32_0 = arith.constant 0 : i32
    %c0_i32_1 = arith.constant 0 : i32
    %c0_i32_2 = arith.constant 0 : i32
    return %c0_i32, %c0_i32_0, %c0_i32_1 : i32, i32, i32
  }
  func.func @transform_7(%arg0: i32) -> (i32, i32, i32) {
    %c0_i32 = arith.constant 0 : i32
    %c0_i32_0 = arith.constant 0 : i32
    %c0_i32_1 = arith.constant 0 : i32
    %c0_i32_2 = arith.constant 0 : i32
    return %c0_i32, %c0_i32_0, %c0_i32_1 : i32, i32, i32
  }
  func.func @transform_8(%arg0: i32) -> (i32, i32, i32) {
    %c0_i32 = arith.constant 0 : i32
    %c0_i32_0 = arith.constant 0 : i32
    %c0_i32_1 = arith.constant 0 : i32
    %c0_i32_2 = arith.constant 0 : i32
    return %c0_i32, %c0_i32_0, %c0_i32_1 : i32, i32, i32
  }
  func.func @transform_9(%arg0: i32) -> (i32, i32) {
    %c0_i32 = arith.constant 0 : i32
    %c0_i32_0 = arith.constant 0 : i32
    %c0_i32_1 = arith.constant 0 : i32
    return %c0_i32, %c0_i32_0 : i32, i32
  }
  func.func @transform_10(%arg0: i32) -> (i32, i32) {
    %c0_i32 = arith.constant 0 : i32
    %c0_i32_0 = arith.constant 0 : i32
    %c0_i32_1 = arith.constant 0 : i32
    return %c0_i32, %c0_i32_0 : i32, i32
  }
  func.func @transform_11(%arg0: i32) -> (i32, i32) {
    %c0_i32 = arith.constant 0 : i32
    %c0_i32_0 = arith.constant 0 : i32
    %c0_i32_1 = arith.constant 0 : i32
    return %c0_i32, %c0_i32_0 : i32, i32
  }
  func.func @transform_12(%arg0: i32) -> (i32, i32, i32) {
    %c0_i32 = arith.constant 0 : i32
    %c0_i32_0 = arith.constant 0 : i32
    %c0_i32_1 = arith.constant 0 : i32
    %c0_i32_2 = arith.constant 0 : i32
    return %c0_i32, %c0_i32_0, %c0_i32_1 : i32, i32, i32
  }
  func.func @transform_13(%arg0: i32) -> (i32, i32) {
    %c0_i32 = arith.constant 0 : i32
    %c0_i32_0 = arith.constant 0 : i32
    %c0_i32_1 = arith.constant 0 : i32
    return %c0_i32, %c0_i32_0 : i32, i32
  }
  func.func @transform_14(%arg0: i32) -> (i32, i32) {
    %c0_i32 = arith.constant 0 : i32
    %c0_i32_0 = arith.constant 0 : i32
    %c0_i32_1 = arith.constant 0 : i32
    return %c0_i32, %c0_i32_0 : i32, i32
  }
  func.func @transform_15(%arg0: i32) -> (i32, i32) {
    %c0_i32 = arith.constant 0 : i32
    %c0_i32_0 = arith.constant 0 : i32
    %c0_i32_1 = arith.constant 0 : i32
    return %c0_i32, %c0_i32_0 : i32, i32
  }
  func.func @transform_16(%arg0: i32) -> (i32, i32) {
    %c0_i32 = arith.constant 0 : i32
    %c0_i32_0 = arith.constant 0 : i32
    %c0_i32_1 = arith.constant 0 : i32
    return %c0_i32, %c0_i32_0 : i32, i32
  }
  func.func @transform_17(%arg0: i32) -> (i32, i32) {
    %c0_i32 = arith.constant 0 : i32
    %c0_i32_0 = arith.constant 0 : i32
    %c0_i32_1 = arith.constant 0 : i32
    return %c0_i32, %c0_i32_0 : i32, i32
  }
  func.func @transform_18(%arg0: i32) -> (i32, i32) {
    %c0_i32 = arith.constant 0 : i32
    %c0_i32_0 = arith.constant 0 : i32
    %c0_i32_1 = arith.constant 0 : i32
    return %c0_i32, %c0_i32_0 : i32, i32
  }
  func.func @transform_19(%arg0: i32) -> (i32, i32) {
    %c0_i32 = arith.constant 0 : i32
    %c0_i32_0 = arith.constant 0 : i32
    %c0_i32_1 = arith.constant 0 : i32
    return %c0_i32, %c0_i32_0 : i32, i32
  }
  func.func @transform_20(%arg0: i32) -> (i32, i32, i32) {
    %c0_i32 = arith.constant 0 : i32
    %c0_i32_0 = arith.constant 0 : i32
    %c0_i32_1 = arith.constant 0 : i32
    return %arg0, %c0_i32, %c0_i32_0 : i32, i32, i32
  }
}

module attributes {stable_mosaic.version = 11 : i64} {
  func.func @kernel(%arg0: i32, %arg1: memref<1x64x32xf32, #tpu.memory_space<vmem>>, %arg2: memref<1x32xf32, #tpu.memory_space<vmem>>, %arg3: memref<1x32xf32, #tpu.memory_space<vmem>>, %arg4: memref<4x32x8xf32, #tpu.memory_space<vmem>>, %arg5: memref<4x1x8xf32, #tpu.memory_space<vmem>>, %arg6: memref<4x32x8xf32, #tpu.memory_space<vmem>>, %arg7: memref<4x1x8xf32, #tpu.memory_space<vmem>>, %arg8: memref<4x32x8xf32, #tpu.memory_space<vmem>>, %arg9: memref<4x1x8xf32, #tpu.memory_space<vmem>>, %arg10: memref<64x8xf32, #tpu.memory_space<vmem>>, %arg11: memref<64x8xf32, #tpu.memory_space<vmem>>, %arg12: memref<8x8xf32, #tpu.memory_space<vmem>>, %arg13: memref<4x8x32xf32, #tpu.memory_space<vmem>>, %arg14: memref<1x32xf32, #tpu.memory_space<vmem>>, %arg15: memref<1x32xf32, #tpu.memory_space<vmem>>, %arg16: memref<1x32xf32, #tpu.memory_space<vmem>>, %arg17: memref<32x64xf32, #tpu.memory_space<vmem>>, %arg18: memref<1x64xf32, #tpu.memory_space<vmem>>, %arg19: memref<64x32xf32, #tpu.memory_space<vmem>>, %arg20: memref<1x32xf32, #tpu.memory_space<vmem>>, %arg21: memref<1x64x32xf32, #tpu.memory_space<vmem>>) attributes {dimension_semantics = [#tpu.dimension_semantics<parallel>], iteration_bounds = array<i64: 2>, scalar_prefetch = 0 : i64, scratch_operands = 0 : i64, tpu.core_type = #tpu.core_type<tc>, window_params = [{transform_indices = @transform_0, window_bounds = array<i64: 1, 64, 32>}, {pipeline_mode = #tpu.pipeline_mode<synchronous>, transform_indices = @transform_1, window_bounds = array<i64: 1, 32>}, {pipeline_mode = #tpu.pipeline_mode<synchronous>, transform_indices = @transform_2, window_bounds = array<i64: 1, 32>}, {pipeline_mode = #tpu.pipeline_mode<synchronous>, transform_indices = @transform_3, window_bounds = array<i64: 4, 32, 8>}, {pipeline_mode = #tpu.pipeline_mode<synchronous>, transform_indices = @transform_4, window_bounds = array<i64: 4, 1, 8>}, {pipeline_mode = #tpu.pipeline_mode<synchronous>, transform_indices = @transform_5, window_bounds = array<i64: 4, 32, 8>}, {pipeline_mode = #tpu.pipeline_mode<synchronous>, transform_indices = @transform_6, window_bounds = array<i64: 4, 1, 8>}, {pipeline_mode = #tpu.pipeline_mode<synchronous>, transform_indices = @transform_7, window_bounds = array<i64: 4, 32, 8>}, {pipeline_mode = #tpu.pipeline_mode<synchronous>, transform_indices = @transform_8, window_bounds = array<i64: 4, 1, 8>}, {pipeline_mode = #tpu.pipeline_mode<synchronous>, transform_indices = @transform_9, window_bounds = array<i64: 64, 8>}, {pipeline_mode = #tpu.pipeline_mode<synchronous>, transform_indices = @transform_10, window_bounds = array<i64: 64, 8>}, {pipeline_mode = #tpu.pipeline_mode<synchronous>, transform_indices = @transform_11, window_bounds = array<i64: 8, 8>}, {pipeline_mode = #tpu.pipeline_mode<synchronous>, transform_indices = @transform_12, window_bounds = array<i64: 4, 8, 32>}, {pipeline_mode = #tpu.pipeline_mode<synchronous>, transform_indices = @transform_13, window_bounds = array<i64: 1, 32>}, {pipeline_mode = #tpu.pipeline_mode<synchronous>, transform_indices = @transform_14, window_bounds = array<i64: 1, 32>}, {pipeline_mode = #tpu.pipeline_mode<synchronous>, transform_indices = @transform_15, window_bounds = array<i64: 1, 32>}, {pipeline_mode = #tpu.pipeline_mode<synchronous>, transform_indices = @transform_16, window_bounds = array<i64: 32, 64>}, {pipeline_mode = #tpu.pipeline_mode<synchronous>, transform_indices = @transform_17, window_bounds = array<i64: 1, 64>}, {pipeline_mode = #tpu.pipeline_mode<synchronous>, transform_indices = @transform_18, window_bounds = array<i64: 64, 32>}, {pipeline_mode = #tpu.pipeline_mode<synchronous>, transform_indices = @transform_19, window_bounds = array<i64: 1, 32>}, {transform_indices = @transform_20, window_bounds = array<i64: 1, 64, 32>}]} {
    %c0 = arith.constant 0 : index
    %c0_0 = arith.constant 0 : index
    %c0_1 = arith.constant 0 : index
    %0 = vector.load %arg1[%c0, %c0_0, %c0_1] : memref<1x64x32xf32, #tpu.memory_space<vmem>>, vector<1x64x32xf32>
    %1 = vector.shape_cast %0 : vector<1x64x32xf32> to vector<64x32xf32>
    %cst = arith.constant dense<0.000000e+00> : vector<64xf32>
    %2 = vector.multi_reduction <add>, %1, %cst [1] : vector<64x32xf32> to vector<64xf32>
    %3 = vector.shape_cast %2 : vector<64xf32> to vector<64x1xf32>
    %cst_2 = arith.constant 3.200000e+01 : f32
    %4 = vector.broadcast %cst_2 : f32 to vector<64x1xf32>
    %5 = arith.divf %3, %4 : vector<64x1xf32>
    %6 = vector.broadcast %5 : vector<64x1xf32> to vector<64x32xf32>
    %7 = arith.subf %1, %6 : vector<64x32xf32>
    %8 = arith.mulf %7, %7 : vector<64x32xf32>
    %cst_3 = arith.constant dense<0.000000e+00> : vector<64xf32>
    %9 = vector.multi_reduction <add>, %8, %cst_3 [1] : vector<64x32xf32> to vector<64xf32>
    %10 = vector.shape_cast %9 : vector<64xf32> to vector<64x1xf32>
    %cst_4 = arith.constant 3.200000e+01 : f32
    %11 = vector.broadcast %cst_4 : f32 to vector<64x1xf32>
    %12 = arith.divf %10, %11 : vector<64x1xf32>
    %cst_5 = arith.constant 9.99999974E-6 : f32
    %13 = vector.broadcast %cst_5 : f32 to vector<64x1xf32>
    %14 = arith.addf %12, %13 : vector<64x1xf32>
    %15 = math.rsqrt %14 : vector<64x1xf32>
    %16 = vector.broadcast %15 : vector<64x1xf32> to vector<64x32xf32>
    %17 = arith.mulf %7, %16 : vector<64x32xf32>
    %c0_6 = arith.constant 0 : index
    %c0_7 = arith.constant 0 : index
    %18 = vector.load %arg2[%c0_6, %c0_7] : memref<1x32xf32, #tpu.memory_space<vmem>>, vector<1x32xf32>
    %19 = vector.broadcast %18 : vector<1x32xf32> to vector<64x32xf32>
    %20 = arith.mulf %17, %19 : vector<64x32xf32>
    %c0_8 = arith.constant 0 : index
    %c0_9 = arith.constant 0 : index
    %21 = vector.load %arg3[%c0_8, %c0_9] : memref<1x32xf32, #tpu.memory_space<vmem>>, vector<1x32xf32>
    %22 = vector.broadcast %21 : vector<1x32xf32> to vector<64x32xf32>
    %23 = arith.addf %20, %22 : vector<64x32xf32>
    %c0_10 = arith.constant 0 : index
    %c0_11 = arith.constant 0 : index
    %24 = vector.load %arg10[%c0_10, %c0_11] : memref<64x8xf32, #tpu.memory_space<vmem>>, vector<64x8xf32>
    %c0_12 = arith.constant 0 : index
    %c0_13 = arith.constant 0 : index
    %25 = vector.load %arg11[%c0_12, %c0_13] : memref<64x8xf32, #tpu.memory_space<vmem>>, vector<64x8xf32>
    %c0_14 = arith.constant 0 : index
    %c0_15 = arith.constant 0 : index
    %26 = vector.load %arg12[%c0_14, %c0_15] : memref<8x8xf32, #tpu.memory_space<vmem>>, vector<8x8xf32>
    %cst_16 = arith.constant 0.000000e+00 : f32
    %27 = vector.broadcast %cst_16 : f32 to vector<64x32xf32>
    %c0_17 = arith.constant 0 : index
    %c0_18 = arith.constant 0 : index
    %c0_19 = arith.constant 0 : index
    %28 = vector.load %arg4[%c0_17, %c0_18, %c0_19] : memref<4x32x8xf32, #tpu.memory_space<vmem>>, vector<1x32x8xf32>
    %29 = vector.shape_cast %28 : vector<1x32x8xf32> to vector<32x8xf32>
    %cst_20 = arith.constant dense<0.000000e+00> : vector<64x8xf32>
    %30 = tpu.matmul %23, %29, %cst_20 {dimension_numbers = #tpu.dot_dimension_numbers<[1], [0], [0], [1], [0, 0, 1, 1], [], []>} : vector<64x32xf32>, vector<32x8xf32>, vector<64x8xf32> -> vector<64x8xf32>
    %c0_21 = arith.constant 0 : index
    %c0_22 = arith.constant 0 : index
    %c0_23 = arith.constant 0 : index
    %31 = vector.load %arg5[%c0_21, %c0_22, %c0_23] : memref<4x1x8xf32, #tpu.memory_space<vmem>>, vector<1x1x8xf32>
    %32 = vector.shape_cast %31 : vector<1x1x8xf32> to vector<1x8xf32>
    %33 = vector.broadcast %32 : vector<1x8xf32> to vector<64x8xf32>
    %34 = arith.addf %30, %33 : vector<64x8xf32>
    %c0_24 = arith.constant 0 : index
    %c0_25 = arith.constant 0 : index
    %c0_26 = arith.constant 0 : index
    %35 = vector.load %arg6[%c0_24, %c0_25, %c0_26] : memref<4x32x8xf32, #tpu.memory_space<vmem>>, vector<1x32x8xf32>
    %36 = vector.shape_cast %35 : vector<1x32x8xf32> to vector<32x8xf32>
    %cst_27 = arith.constant dense<0.000000e+00> : vector<64x8xf32>
    %37 = tpu.matmul %23, %36, %cst_27 {dimension_numbers = #tpu.dot_dimension_numbers<[1], [0], [0], [1], [0, 0, 1, 1], [], []>} : vector<64x32xf32>, vector<32x8xf32>, vector<64x8xf32> -> vector<64x8xf32>
    %c0_28 = arith.constant 0 : index
    %c0_29 = arith.constant 0 : index
    %c0_30 = arith.constant 0 : index
    %38 = vector.load %arg7[%c0_28, %c0_29, %c0_30] : memref<4x1x8xf32, #tpu.memory_space<vmem>>, vector<1x1x8xf32>
    %39 = vector.shape_cast %38 : vector<1x1x8xf32> to vector<1x8xf32>
    %40 = vector.broadcast %39 : vector<1x8xf32> to vector<64x8xf32>
    %41 = arith.addf %37, %40 : vector<64x8xf32>
    %c0_31 = arith.constant 0 : index
    %c0_32 = arith.constant 0 : index
    %c0_33 = arith.constant 0 : index
    %42 = vector.load %arg8[%c0_31, %c0_32, %c0_33] : memref<4x32x8xf32, #tpu.memory_space<vmem>>, vector<1x32x8xf32>
    %43 = vector.shape_cast %42 : vector<1x32x8xf32> to vector<32x8xf32>
    %cst_34 = arith.constant dense<0.000000e+00> : vector<64x8xf32>
    %44 = tpu.matmul %23, %43, %cst_34 {dimension_numbers = #tpu.dot_dimension_numbers<[1], [0], [0], [1], [0, 0, 1, 1], [], []>} : vector<64x32xf32>, vector<32x8xf32>, vector<64x8xf32> -> vector<64x8xf32>
    %c0_35 = arith.constant 0 : index
    %c0_36 = arith.constant 0 : index
    %c0_37 = arith.constant 0 : index
    %45 = vector.load %arg9[%c0_35, %c0_36, %c0_37] : memref<4x1x8xf32, #tpu.memory_space<vmem>>, vector<1x1x8xf32>
    %46 = vector.shape_cast %45 : vector<1x1x8xf32> to vector<1x8xf32>
    %47 = vector.broadcast %46 : vector<1x8xf32> to vector<64x8xf32>
    %48 = arith.addf %44, %47 : vector<64x8xf32>
    %49 = arith.mulf %34, %24 : vector<64x8xf32>
    %cst_38 = arith.constant dense<0.000000e+00> : vector<64x8xf32>
    %50 = tpu.matmul %34, %26, %cst_38 {dimension_numbers = #tpu.dot_dimension_numbers<[1], [0], [0], [1], [0, 0, 1, 1], [], []>} : vector<64x8xf32>, vector<8x8xf32>, vector<64x8xf32> -> vector<64x8xf32>
    %51 = arith.mulf %50, %25 : vector<64x8xf32>
    %52 = arith.addf %49, %51 : vector<64x8xf32>
    %53 = arith.mulf %41, %24 : vector<64x8xf32>
    %cst_39 = arith.constant dense<0.000000e+00> : vector<64x8xf32>
    %54 = tpu.matmul %41, %26, %cst_39 {dimension_numbers = #tpu.dot_dimension_numbers<[1], [0], [0], [1], [0, 0, 1, 1], [], []>} : vector<64x8xf32>, vector<8x8xf32>, vector<64x8xf32> -> vector<64x8xf32>
    %55 = arith.mulf %54, %25 : vector<64x8xf32>
    %56 = arith.addf %53, %55 : vector<64x8xf32>
    %cst_40 = arith.constant dense<0.000000e+00> : vector<64x64xf32>
    %57 = tpu.matmul %52, %56, %cst_40 {dimension_numbers = #tpu.dot_dimension_numbers<[1], [1], [0], [0], [0, 0, 1, 0], [], []>} : vector<64x8xf32>, vector<64x8xf32>, vector<64x64xf32> -> vector<64x64xf32>
    %cst_41 = arith.constant 0.353553385 : f32
    %58 = vector.broadcast %cst_41 : f32 to vector<64x64xf32>
    %59 = arith.mulf %58, %57 : vector<64x64xf32>
    %cst_42 = arith.constant dense<0xFF800000> : vector<64xf32>
    %60 = vector.multi_reduction <maximumf>, %59, %cst_42 [1] : vector<64x64xf32> to vector<64xf32>
    %61 = vector.shape_cast %60 : vector<64xf32> to vector<64x1xf32>
    %62 = vector.broadcast %61 : vector<64x1xf32> to vector<64x64xf32>
    %63 = arith.subf %59, %62 : vector<64x64xf32>
    %64 = math.exp %63 : vector<64x64xf32>
    %cst_43 = arith.constant dense<0.000000e+00> : vector<64xf32>
    %65 = vector.multi_reduction <add>, %64, %cst_43 [1] : vector<64x64xf32> to vector<64xf32>
    %66 = vector.shape_cast %65 : vector<64xf32> to vector<64x1xf32>
    %67 = vector.broadcast %66 : vector<64x1xf32> to vector<64x64xf32>
    %68 = arith.divf %64, %67 : vector<64x64xf32>
    %cst_44 = arith.constant dense<0.000000e+00> : vector<64x8xf32>
    %69 = tpu.matmul %68, %48, %cst_44 {dimension_numbers = #tpu.dot_dimension_numbers<[1], [0], [0], [1], [0, 0, 1, 1], [], []>} : vector<64x64xf32>, vector<64x8xf32>, vector<64x8xf32> -> vector<64x8xf32>
    %c0_45 = arith.constant 0 : index
    %c0_46 = arith.constant 0 : index
    %c0_47 = arith.constant 0 : index
    %70 = vector.load %arg13[%c0_45, %c0_46, %c0_47] : memref<4x8x32xf32, #tpu.memory_space<vmem>>, vector<1x8x32xf32>
    %71 = vector.shape_cast %70 : vector<1x8x32xf32> to vector<8x32xf32>
    %cst_48 = arith.constant dense<0.000000e+00> : vector<64x32xf32>
    %72 = tpu.matmul %69, %71, %cst_48 {dimension_numbers = #tpu.dot_dimension_numbers<[1], [0], [0], [1], [0, 0, 1, 1], [], []>} : vector<64x8xf32>, vector<8x32xf32>, vector<64x32xf32> -> vector<64x32xf32>
    %73 = arith.addf %27, %72 : vector<64x32xf32>
    %c1 = arith.constant 1 : index
    %c0_49 = arith.constant 0 : index
    %c0_50 = arith.constant 0 : index
    %74 = vector.load %arg4[%c1, %c0_49, %c0_50] : memref<4x32x8xf32, #tpu.memory_space<vmem>>, vector<1x32x8xf32>
    %75 = vector.shape_cast %74 : vector<1x32x8xf32> to vector<32x8xf32>
    %cst_51 = arith.constant dense<0.000000e+00> : vector<64x8xf32>
    %76 = tpu.matmul %23, %75, %cst_51 {dimension_numbers = #tpu.dot_dimension_numbers<[1], [0], [0], [1], [0, 0, 1, 1], [], []>} : vector<64x32xf32>, vector<32x8xf32>, vector<64x8xf32> -> vector<64x8xf32>
    %c1_52 = arith.constant 1 : index
    %c0_53 = arith.constant 0 : index
    %c0_54 = arith.constant 0 : index
    %77 = vector.load %arg5[%c1_52, %c0_53, %c0_54] : memref<4x1x8xf32, #tpu.memory_space<vmem>>, vector<1x1x8xf32>
    %78 = vector.shape_cast %77 : vector<1x1x8xf32> to vector<1x8xf32>
    %79 = vector.broadcast %78 : vector<1x8xf32> to vector<64x8xf32>
    %80 = arith.addf %76, %79 : vector<64x8xf32>
    %c1_55 = arith.constant 1 : index
    %c0_56 = arith.constant 0 : index
    %c0_57 = arith.constant 0 : index
    %81 = vector.load %arg6[%c1_55, %c0_56, %c0_57] : memref<4x32x8xf32, #tpu.memory_space<vmem>>, vector<1x32x8xf32>
    %82 = vector.shape_cast %81 : vector<1x32x8xf32> to vector<32x8xf32>
    %cst_58 = arith.constant dense<0.000000e+00> : vector<64x8xf32>
    %83 = tpu.matmul %23, %82, %cst_58 {dimension_numbers = #tpu.dot_dimension_numbers<[1], [0], [0], [1], [0, 0, 1, 1], [], []>} : vector<64x32xf32>, vector<32x8xf32>, vector<64x8xf32> -> vector<64x8xf32>
    %c1_59 = arith.constant 1 : index
    %c0_60 = arith.constant 0 : index
    %c0_61 = arith.constant 0 : index
    %84 = vector.load %arg7[%c1_59, %c0_60, %c0_61] : memref<4x1x8xf32, #tpu.memory_space<vmem>>, vector<1x1x8xf32>
    %85 = vector.shape_cast %84 : vector<1x1x8xf32> to vector<1x8xf32>
    %86 = vector.broadcast %85 : vector<1x8xf32> to vector<64x8xf32>
    %87 = arith.addf %83, %86 : vector<64x8xf32>
    %c1_62 = arith.constant 1 : index
    %c0_63 = arith.constant 0 : index
    %c0_64 = arith.constant 0 : index
    %88 = vector.load %arg8[%c1_62, %c0_63, %c0_64] : memref<4x32x8xf32, #tpu.memory_space<vmem>>, vector<1x32x8xf32>
    %89 = vector.shape_cast %88 : vector<1x32x8xf32> to vector<32x8xf32>
    %cst_65 = arith.constant dense<0.000000e+00> : vector<64x8xf32>
    %90 = tpu.matmul %23, %89, %cst_65 {dimension_numbers = #tpu.dot_dimension_numbers<[1], [0], [0], [1], [0, 0, 1, 1], [], []>} : vector<64x32xf32>, vector<32x8xf32>, vector<64x8xf32> -> vector<64x8xf32>
    %c1_66 = arith.constant 1 : index
    %c0_67 = arith.constant 0 : index
    %c0_68 = arith.constant 0 : index
    %91 = vector.load %arg9[%c1_66, %c0_67, %c0_68] : memref<4x1x8xf32, #tpu.memory_space<vmem>>, vector<1x1x8xf32>
    %92 = vector.shape_cast %91 : vector<1x1x8xf32> to vector<1x8xf32>
    %93 = vector.broadcast %92 : vector<1x8xf32> to vector<64x8xf32>
    %94 = arith.addf %90, %93 : vector<64x8xf32>
    %95 = arith.mulf %80, %24 : vector<64x8xf32>
    %cst_69 = arith.constant dense<0.000000e+00> : vector<64x8xf32>
    %96 = tpu.matmul %80, %26, %cst_69 {dimension_numbers = #tpu.dot_dimension_numbers<[1], [0], [0], [1], [0, 0, 1, 1], [], []>} : vector<64x8xf32>, vector<8x8xf32>, vector<64x8xf32> -> vector<64x8xf32>
    %97 = arith.mulf %96, %25 : vector<64x8xf32>
    %98 = arith.addf %95, %97 : vector<64x8xf32>
    %99 = arith.mulf %87, %24 : vector<64x8xf32>
    %cst_70 = arith.constant dense<0.000000e+00> : vector<64x8xf32>
    %100 = tpu.matmul %87, %26, %cst_70 {dimension_numbers = #tpu.dot_dimension_numbers<[1], [0], [0], [1], [0, 0, 1, 1], [], []>} : vector<64x8xf32>, vector<8x8xf32>, vector<64x8xf32> -> vector<64x8xf32>
    %101 = arith.mulf %100, %25 : vector<64x8xf32>
    %102 = arith.addf %99, %101 : vector<64x8xf32>
    %cst_71 = arith.constant dense<0.000000e+00> : vector<64x64xf32>
    %103 = tpu.matmul %98, %102, %cst_71 {dimension_numbers = #tpu.dot_dimension_numbers<[1], [1], [0], [0], [0, 0, 1, 0], [], []>} : vector<64x8xf32>, vector<64x8xf32>, vector<64x64xf32> -> vector<64x64xf32>
    %cst_72 = arith.constant 0.353553385 : f32
    %104 = vector.broadcast %cst_72 : f32 to vector<64x64xf32>
    %105 = arith.mulf %104, %103 : vector<64x64xf32>
    %cst_73 = arith.constant dense<0xFF800000> : vector<64xf32>
    %106 = vector.multi_reduction <maximumf>, %105, %cst_73 [1] : vector<64x64xf32> to vector<64xf32>
    %107 = vector.shape_cast %106 : vector<64xf32> to vector<64x1xf32>
    %108 = vector.broadcast %107 : vector<64x1xf32> to vector<64x64xf32>
    %109 = arith.subf %105, %108 : vector<64x64xf32>
    %110 = math.exp %109 : vector<64x64xf32>
    %cst_74 = arith.constant dense<0.000000e+00> : vector<64xf32>
    %111 = vector.multi_reduction <add>, %110, %cst_74 [1] : vector<64x64xf32> to vector<64xf32>
    %112 = vector.shape_cast %111 : vector<64xf32> to vector<64x1xf32>
    %113 = vector.broadcast %112 : vector<64x1xf32> to vector<64x64xf32>
    %114 = arith.divf %110, %113 : vector<64x64xf32>
    %cst_75 = arith.constant dense<0.000000e+00> : vector<64x8xf32>
    %115 = tpu.matmul %114, %94, %cst_75 {dimension_numbers = #tpu.dot_dimension_numbers<[1], [0], [0], [1], [0, 0, 1, 1], [], []>} : vector<64x64xf32>, vector<64x8xf32>, vector<64x8xf32> -> vector<64x8xf32>
    %c1_76 = arith.constant 1 : index
    %c0_77 = arith.constant 0 : index
    %c0_78 = arith.constant 0 : index
    %116 = vector.load %arg13[%c1_76, %c0_77, %c0_78] : memref<4x8x32xf32, #tpu.memory_space<vmem>>, vector<1x8x32xf32>
    %117 = vector.shape_cast %116 : vector<1x8x32xf32> to vector<8x32xf32>
    %cst_79 = arith.constant dense<0.000000e+00> : vector<64x32xf32>
    %118 = tpu.matmul %115, %117, %cst_79 {dimension_numbers = #tpu.dot_dimension_numbers<[1], [0], [0], [1], [0, 0, 1, 1], [], []>} : vector<64x8xf32>, vector<8x32xf32>, vector<64x32xf32> -> vector<64x32xf32>
    %119 = arith.addf %73, %118 : vector<64x32xf32>
    %c2 = arith.constant 2 : index
    %c0_80 = arith.constant 0 : index
    %c0_81 = arith.constant 0 : index
    %120 = vector.load %arg4[%c2, %c0_80, %c0_81] : memref<4x32x8xf32, #tpu.memory_space<vmem>>, vector<1x32x8xf32>
    %121 = vector.shape_cast %120 : vector<1x32x8xf32> to vector<32x8xf32>
    %cst_82 = arith.constant dense<0.000000e+00> : vector<64x8xf32>
    %122 = tpu.matmul %23, %121, %cst_82 {dimension_numbers = #tpu.dot_dimension_numbers<[1], [0], [0], [1], [0, 0, 1, 1], [], []>} : vector<64x32xf32>, vector<32x8xf32>, vector<64x8xf32> -> vector<64x8xf32>
    %c2_83 = arith.constant 2 : index
    %c0_84 = arith.constant 0 : index
    %c0_85 = arith.constant 0 : index
    %123 = vector.load %arg5[%c2_83, %c0_84, %c0_85] : memref<4x1x8xf32, #tpu.memory_space<vmem>>, vector<1x1x8xf32>
    %124 = vector.shape_cast %123 : vector<1x1x8xf32> to vector<1x8xf32>
    %125 = vector.broadcast %124 : vector<1x8xf32> to vector<64x8xf32>
    %126 = arith.addf %122, %125 : vector<64x8xf32>
    %c2_86 = arith.constant 2 : index
    %c0_87 = arith.constant 0 : index
    %c0_88 = arith.constant 0 : index
    %127 = vector.load %arg6[%c2_86, %c0_87, %c0_88] : memref<4x32x8xf32, #tpu.memory_space<vmem>>, vector<1x32x8xf32>
    %128 = vector.shape_cast %127 : vector<1x32x8xf32> to vector<32x8xf32>
    %cst_89 = arith.constant dense<0.000000e+00> : vector<64x8xf32>
    %129 = tpu.matmul %23, %128, %cst_89 {dimension_numbers = #tpu.dot_dimension_numbers<[1], [0], [0], [1], [0, 0, 1, 1], [], []>} : vector<64x32xf32>, vector<32x8xf32>, vector<64x8xf32> -> vector<64x8xf32>
    %c2_90 = arith.constant 2 : index
    %c0_91 = arith.constant 0 : index
    %c0_92 = arith.constant 0 : index
    %130 = vector.load %arg7[%c2_90, %c0_91, %c0_92] : memref<4x1x8xf32, #tpu.memory_space<vmem>>, vector<1x1x8xf32>
    %131 = vector.shape_cast %130 : vector<1x1x8xf32> to vector<1x8xf32>
    %132 = vector.broadcast %131 : vector<1x8xf32> to vector<64x8xf32>
    %133 = arith.addf %129, %132 : vector<64x8xf32>
    %c2_93 = arith.constant 2 : index
    %c0_94 = arith.constant 0 : index
    %c0_95 = arith.constant 0 : index
    %134 = vector.load %arg8[%c2_93, %c0_94, %c0_95] : memref<4x32x8xf32, #tpu.memory_space<vmem>>, vector<1x32x8xf32>
    %135 = vector.shape_cast %134 : vector<1x32x8xf32> to vector<32x8xf32>
    %cst_96 = arith.constant dense<0.000000e+00> : vector<64x8xf32>
    %136 = tpu.matmul %23, %135, %cst_96 {dimension_numbers = #tpu.dot_dimension_numbers<[1], [0], [0], [1], [0, 0, 1, 1], [], []>} : vector<64x32xf32>, vector<32x8xf32>, vector<64x8xf32> -> vector<64x8xf32>
    %c2_97 = arith.constant 2 : index
    %c0_98 = arith.constant 0 : index
    %c0_99 = arith.constant 0 : index
    %137 = vector.load %arg9[%c2_97, %c0_98, %c0_99] : memref<4x1x8xf32, #tpu.memory_space<vmem>>, vector<1x1x8xf32>
    %138 = vector.shape_cast %137 : vector<1x1x8xf32> to vector<1x8xf32>
    %139 = vector.broadcast %138 : vector<1x8xf32> to vector<64x8xf32>
    %140 = arith.addf %136, %139 : vector<64x8xf32>
    %141 = arith.mulf %126, %24 : vector<64x8xf32>
    %cst_100 = arith.constant dense<0.000000e+00> : vector<64x8xf32>
    %142 = tpu.matmul %126, %26, %cst_100 {dimension_numbers = #tpu.dot_dimension_numbers<[1], [0], [0], [1], [0, 0, 1, 1], [], []>} : vector<64x8xf32>, vector<8x8xf32>, vector<64x8xf32> -> vector<64x8xf32>
    %143 = arith.mulf %142, %25 : vector<64x8xf32>
    %144 = arith.addf %141, %143 : vector<64x8xf32>
    %145 = arith.mulf %133, %24 : vector<64x8xf32>
    %cst_101 = arith.constant dense<0.000000e+00> : vector<64x8xf32>
    %146 = tpu.matmul %133, %26, %cst_101 {dimension_numbers = #tpu.dot_dimension_numbers<[1], [0], [0], [1], [0, 0, 1, 1], [], []>} : vector<64x8xf32>, vector<8x8xf32>, vector<64x8xf32> -> vector<64x8xf32>
    %147 = arith.mulf %146, %25 : vector<64x8xf32>
    %148 = arith.addf %145, %147 : vector<64x8xf32>
    %cst_102 = arith.constant dense<0.000000e+00> : vector<64x64xf32>
    %149 = tpu.matmul %144, %148, %cst_102 {dimension_numbers = #tpu.dot_dimension_numbers<[1], [1], [0], [0], [0, 0, 1, 0], [], []>} : vector<64x8xf32>, vector<64x8xf32>, vector<64x64xf32> -> vector<64x64xf32>
    %cst_103 = arith.constant 0.353553385 : f32
    %150 = vector.broadcast %cst_103 : f32 to vector<64x64xf32>
    %151 = arith.mulf %150, %149 : vector<64x64xf32>
    %cst_104 = arith.constant dense<0xFF800000> : vector<64xf32>
    %152 = vector.multi_reduction <maximumf>, %151, %cst_104 [1] : vector<64x64xf32> to vector<64xf32>
    %153 = vector.shape_cast %152 : vector<64xf32> to vector<64x1xf32>
    %154 = vector.broadcast %153 : vector<64x1xf32> to vector<64x64xf32>
    %155 = arith.subf %151, %154 : vector<64x64xf32>
    %156 = math.exp %155 : vector<64x64xf32>
    %cst_105 = arith.constant dense<0.000000e+00> : vector<64xf32>
    %157 = vector.multi_reduction <add>, %156, %cst_105 [1] : vector<64x64xf32> to vector<64xf32>
    %158 = vector.shape_cast %157 : vector<64xf32> to vector<64x1xf32>
    %159 = vector.broadcast %158 : vector<64x1xf32> to vector<64x64xf32>
    %160 = arith.divf %156, %159 : vector<64x64xf32>
    %cst_106 = arith.constant dense<0.000000e+00> : vector<64x8xf32>
    %161 = tpu.matmul %160, %140, %cst_106 {dimension_numbers = #tpu.dot_dimension_numbers<[1], [0], [0], [1], [0, 0, 1, 1], [], []>} : vector<64x64xf32>, vector<64x8xf32>, vector<64x8xf32> -> vector<64x8xf32>
    %c2_107 = arith.constant 2 : index
    %c0_108 = arith.constant 0 : index
    %c0_109 = arith.constant 0 : index
    %162 = vector.load %arg13[%c2_107, %c0_108, %c0_109] : memref<4x8x32xf32, #tpu.memory_space<vmem>>, vector<1x8x32xf32>
    %163 = vector.shape_cast %162 : vector<1x8x32xf32> to vector<8x32xf32>
    %cst_110 = arith.constant dense<0.000000e+00> : vector<64x32xf32>
    %164 = tpu.matmul %161, %163, %cst_110 {dimension_numbers = #tpu.dot_dimension_numbers<[1], [0], [0], [1], [0, 0, 1, 1], [], []>} : vector<64x8xf32>, vector<8x32xf32>, vector<64x32xf32> -> vector<64x32xf32>
    %165 = arith.addf %119, %164 : vector<64x32xf32>
    %c3 = arith.constant 3 : index
    %c0_111 = arith.constant 0 : index
    %c0_112 = arith.constant 0 : index
    %166 = vector.load %arg4[%c3, %c0_111, %c0_112] : memref<4x32x8xf32, #tpu.memory_space<vmem>>, vector<1x32x8xf32>
    %167 = vector.shape_cast %166 : vector<1x32x8xf32> to vector<32x8xf32>
    %cst_113 = arith.constant dense<0.000000e+00> : vector<64x8xf32>
    %168 = tpu.matmul %23, %167, %cst_113 {dimension_numbers = #tpu.dot_dimension_numbers<[1], [0], [0], [1], [0, 0, 1, 1], [], []>} : vector<64x32xf32>, vector<32x8xf32>, vector<64x8xf32> -> vector<64x8xf32>
    %c3_114 = arith.constant 3 : index
    %c0_115 = arith.constant 0 : index
    %c0_116 = arith.constant 0 : index
    %169 = vector.load %arg5[%c3_114, %c0_115, %c0_116] : memref<4x1x8xf32, #tpu.memory_space<vmem>>, vector<1x1x8xf32>
    %170 = vector.shape_cast %169 : vector<1x1x8xf32> to vector<1x8xf32>
    %171 = vector.broadcast %170 : vector<1x8xf32> to vector<64x8xf32>
    %172 = arith.addf %168, %171 : vector<64x8xf32>
    %c3_117 = arith.constant 3 : index
    %c0_118 = arith.constant 0 : index
    %c0_119 = arith.constant 0 : index
    %173 = vector.load %arg6[%c3_117, %c0_118, %c0_119] : memref<4x32x8xf32, #tpu.memory_space<vmem>>, vector<1x32x8xf32>
    %174 = vector.shape_cast %173 : vector<1x32x8xf32> to vector<32x8xf32>
    %cst_120 = arith.constant dense<0.000000e+00> : vector<64x8xf32>
    %175 = tpu.matmul %23, %174, %cst_120 {dimension_numbers = #tpu.dot_dimension_numbers<[1], [0], [0], [1], [0, 0, 1, 1], [], []>} : vector<64x32xf32>, vector<32x8xf32>, vector<64x8xf32> -> vector<64x8xf32>
    %c3_121 = arith.constant 3 : index
    %c0_122 = arith.constant 0 : index
    %c0_123 = arith.constant 0 : index
    %176 = vector.load %arg7[%c3_121, %c0_122, %c0_123] : memref<4x1x8xf32, #tpu.memory_space<vmem>>, vector<1x1x8xf32>
    %177 = vector.shape_cast %176 : vector<1x1x8xf32> to vector<1x8xf32>
    %178 = vector.broadcast %177 : vector<1x8xf32> to vector<64x8xf32>
    %179 = arith.addf %175, %178 : vector<64x8xf32>
    %c3_124 = arith.constant 3 : index
    %c0_125 = arith.constant 0 : index
    %c0_126 = arith.constant 0 : index
    %180 = vector.load %arg8[%c3_124, %c0_125, %c0_126] : memref<4x32x8xf32, #tpu.memory_space<vmem>>, vector<1x32x8xf32>
    %181 = vector.shape_cast %180 : vector<1x32x8xf32> to vector<32x8xf32>
    %cst_127 = arith.constant dense<0.000000e+00> : vector<64x8xf32>
    %182 = tpu.matmul %23, %181, %cst_127 {dimension_numbers = #tpu.dot_dimension_numbers<[1], [0], [0], [1], [0, 0, 1, 1], [], []>} : vector<64x32xf32>, vector<32x8xf32>, vector<64x8xf32> -> vector<64x8xf32>
    %c3_128 = arith.constant 3 : index
    %c0_129 = arith.constant 0 : index
    %c0_130 = arith.constant 0 : index
    %183 = vector.load %arg9[%c3_128, %c0_129, %c0_130] : memref<4x1x8xf32, #tpu.memory_space<vmem>>, vector<1x1x8xf32>
    %184 = vector.shape_cast %183 : vector<1x1x8xf32> to vector<1x8xf32>
    %185 = vector.broadcast %184 : vector<1x8xf32> to vector<64x8xf32>
    %186 = arith.addf %182, %185 : vector<64x8xf32>
    %187 = arith.mulf %172, %24 : vector<64x8xf32>
    %cst_131 = arith.constant dense<0.000000e+00> : vector<64x8xf32>
    %188 = tpu.matmul %172, %26, %cst_131 {dimension_numbers = #tpu.dot_dimension_numbers<[1], [0], [0], [1], [0, 0, 1, 1], [], []>} : vector<64x8xf32>, vector<8x8xf32>, vector<64x8xf32> -> vector<64x8xf32>
    %189 = arith.mulf %188, %25 : vector<64x8xf32>
    %190 = arith.addf %187, %189 : vector<64x8xf32>
    %191 = arith.mulf %179, %24 : vector<64x8xf32>
    %cst_132 = arith.constant dense<0.000000e+00> : vector<64x8xf32>
    %192 = tpu.matmul %179, %26, %cst_132 {dimension_numbers = #tpu.dot_dimension_numbers<[1], [0], [0], [1], [0, 0, 1, 1], [], []>} : vector<64x8xf32>, vector<8x8xf32>, vector<64x8xf32> -> vector<64x8xf32>
    %193 = arith.mulf %192, %25 : vector<64x8xf32>
    %194 = arith.addf %191, %193 : vector<64x8xf32>
    %cst_133 = arith.constant dense<0.000000e+00> : vector<64x64xf32>
    %195 = tpu.matmul %190, %194, %cst_133 {dimension_numbers = #tpu.dot_dimension_numbers<[1], [1], [0], [0], [0, 0, 1, 0], [], []>} : vector<64x8xf32>, vector<64x8xf32>, vector<64x64xf32> -> vector<64x64xf32>
    %cst_134 = arith.constant 0.353553385 : f32
    %196 = vector.broadcast %cst_134 : f32 to vector<64x64xf32>
    %197 = arith.mulf %196, %195 : vector<64x64xf32>
    %cst_135 = arith.constant dense<0xFF800000> : vector<64xf32>
    %198 = vector.multi_reduction <maximumf>, %197, %cst_135 [1] : vector<64x64xf32> to vector<64xf32>
    %199 = vector.shape_cast %198 : vector<64xf32> to vector<64x1xf32>
    %200 = vector.broadcast %199 : vector<64x1xf32> to vector<64x64xf32>
    %201 = arith.subf %197, %200 : vector<64x64xf32>
    %202 = math.exp %201 : vector<64x64xf32>
    %cst_136 = arith.constant dense<0.000000e+00> : vector<64xf32>
    %203 = vector.multi_reduction <add>, %202, %cst_136 [1] : vector<64x64xf32> to vector<64xf32>
    %204 = vector.shape_cast %203 : vector<64xf32> to vector<64x1xf32>
    %205 = vector.broadcast %204 : vector<64x1xf32> to vector<64x64xf32>
    %206 = arith.divf %202, %205 : vector<64x64xf32>
    %cst_137 = arith.constant dense<0.000000e+00> : vector<64x8xf32>
    %207 = tpu.matmul %206, %186, %cst_137 {dimension_numbers = #tpu.dot_dimension_numbers<[1], [0], [0], [1], [0, 0, 1, 1], [], []>} : vector<64x64xf32>, vector<64x8xf32>, vector<64x8xf32> -> vector<64x8xf32>
    %c3_138 = arith.constant 3 : index
    %c0_139 = arith.constant 0 : index
    %c0_140 = arith.constant 0 : index
    %208 = vector.load %arg13[%c3_138, %c0_139, %c0_140] : memref<4x8x32xf32, #tpu.memory_space<vmem>>, vector<1x8x32xf32>
    %209 = vector.shape_cast %208 : vector<1x8x32xf32> to vector<8x32xf32>
    %cst_141 = arith.constant dense<0.000000e+00> : vector<64x32xf32>
    %210 = tpu.matmul %207, %209, %cst_141 {dimension_numbers = #tpu.dot_dimension_numbers<[1], [0], [0], [1], [0, 0, 1, 1], [], []>} : vector<64x8xf32>, vector<8x32xf32>, vector<64x32xf32> -> vector<64x32xf32>
    %211 = arith.addf %165, %210 : vector<64x32xf32>
    %212 = arith.addf %1, %211 : vector<64x32xf32>
    %c0_142 = arith.constant 0 : index
    %c0_143 = arith.constant 0 : index
    %213 = vector.load %arg14[%c0_142, %c0_143] : memref<1x32xf32, #tpu.memory_space<vmem>>, vector<1x32xf32>
    %214 = vector.broadcast %213 : vector<1x32xf32> to vector<64x32xf32>
    %215 = arith.addf %212, %214 : vector<64x32xf32>
    %cst_144 = arith.constant dense<0.000000e+00> : vector<64xf32>
    %216 = vector.multi_reduction <add>, %215, %cst_144 [1] : vector<64x32xf32> to vector<64xf32>
    %217 = vector.shape_cast %216 : vector<64xf32> to vector<64x1xf32>
    %cst_145 = arith.constant 3.200000e+01 : f32
    %218 = vector.broadcast %cst_145 : f32 to vector<64x1xf32>
    %219 = arith.divf %217, %218 : vector<64x1xf32>
    %220 = vector.broadcast %219 : vector<64x1xf32> to vector<64x32xf32>
    %221 = arith.subf %215, %220 : vector<64x32xf32>
    %222 = arith.mulf %221, %221 : vector<64x32xf32>
    %cst_146 = arith.constant dense<0.000000e+00> : vector<64xf32>
    %223 = vector.multi_reduction <add>, %222, %cst_146 [1] : vector<64x32xf32> to vector<64xf32>
    %224 = vector.shape_cast %223 : vector<64xf32> to vector<64x1xf32>
    %cst_147 = arith.constant 3.200000e+01 : f32
    %225 = vector.broadcast %cst_147 : f32 to vector<64x1xf32>
    %226 = arith.divf %224, %225 : vector<64x1xf32>
    %cst_148 = arith.constant 9.99999974E-6 : f32
    %227 = vector.broadcast %cst_148 : f32 to vector<64x1xf32>
    %228 = arith.addf %226, %227 : vector<64x1xf32>
    %229 = math.rsqrt %228 : vector<64x1xf32>
    %230 = vector.broadcast %229 : vector<64x1xf32> to vector<64x32xf32>
    %231 = arith.mulf %221, %230 : vector<64x32xf32>
    %c0_149 = arith.constant 0 : index
    %c0_150 = arith.constant 0 : index
    %232 = vector.load %arg15[%c0_149, %c0_150] : memref<1x32xf32, #tpu.memory_space<vmem>>, vector<1x32xf32>
    %233 = vector.broadcast %232 : vector<1x32xf32> to vector<64x32xf32>
    %234 = arith.mulf %231, %233 : vector<64x32xf32>
    %c0_151 = arith.constant 0 : index
    %c0_152 = arith.constant 0 : index
    %235 = vector.load %arg16[%c0_151, %c0_152] : memref<1x32xf32, #tpu.memory_space<vmem>>, vector<1x32xf32>
    %236 = vector.broadcast %235 : vector<1x32xf32> to vector<64x32xf32>
    %237 = arith.addf %234, %236 : vector<64x32xf32>
    %c0_153 = arith.constant 0 : index
    %c0_154 = arith.constant 0 : index
    %238 = vector.load %arg17[%c0_153, %c0_154] : memref<32x64xf32, #tpu.memory_space<vmem>>, vector<32x64xf32>
    %cst_155 = arith.constant dense<0.000000e+00> : vector<64x64xf32>
    %239 = tpu.matmul %237, %238, %cst_155 {dimension_numbers = #tpu.dot_dimension_numbers<[1], [0], [0], [1], [0, 0, 1, 1], [], []>} : vector<64x32xf32>, vector<32x64xf32>, vector<64x64xf32> -> vector<64x64xf32>
    %c0_156 = arith.constant 0 : index
    %c0_157 = arith.constant 0 : index
    %240 = vector.load %arg18[%c0_156, %c0_157] : memref<1x64xf32, #tpu.memory_space<vmem>>, vector<1x64xf32>
    %241 = vector.broadcast %240 : vector<1x64xf32> to vector<64x64xf32>
    %242 = arith.addf %239, %241 : vector<64x64xf32>
    %cst_158 = arith.constant 5.000000e-01 : f32
    %243 = vector.broadcast %cst_158 : f32 to vector<64x64xf32>
    %244 = arith.mulf %243, %242 : vector<64x64xf32>
    %cst_159 = arith.constant 0.707106769 : f32
    %245 = vector.broadcast %cst_159 : f32 to vector<64x64xf32>
    %246 = arith.mulf %242, %245 : vector<64x64xf32>
    %247 = math.erf %246 : vector<64x64xf32>
    %cst_160 = arith.constant 1.000000e+00 : f32
    %248 = vector.broadcast %cst_160 : f32 to vector<64x64xf32>
    %249 = arith.addf %248, %247 : vector<64x64xf32>
    %250 = arith.mulf %244, %249 : vector<64x64xf32>
    %c0_161 = arith.constant 0 : index
    %c0_162 = arith.constant 0 : index
    %251 = vector.load %arg19[%c0_161, %c0_162] : memref<64x32xf32, #tpu.memory_space<vmem>>, vector<64x32xf32>
    %cst_163 = arith.constant dense<0.000000e+00> : vector<64x32xf32>
    %252 = tpu.matmul %250, %251, %cst_163 {dimension_numbers = #tpu.dot_dimension_numbers<[1], [0], [0], [1], [0, 0, 1, 1], [], []>} : vector<64x64xf32>, vector<64x32xf32>, vector<64x32xf32> -> vector<64x32xf32>
    %c0_164 = arith.constant 0 : index
    %c0_165 = arith.constant 0 : index
    %253 = vector.load %arg20[%c0_164, %c0_165] : memref<1x32xf32, #tpu.memory_space<vmem>>, vector<1x32xf32>
    %254 = vector.broadcast %253 : vector<1x32xf32> to vector<64x32xf32>
    %255 = arith.addf %252, %254 : vector<64x32xf32>
    %256 = arith.addf %215, %255 : vector<64x32xf32>
    %c0_166 = arith.constant 0 : index
    %c0_167 = arith.constant 0 : index
    %c0_168 = arith.constant 0 : index
    %257 = vector.load %arg21[%c0_166, %c0_167, %c0_168] : memref<1x64x32xf32, #tpu.memory_space<vmem>>, vector<1x64x32xf32>
    %258 = vector.shape_cast %257 : vector<1x64x32xf32> to vector<64x32xf32>
    %259 = vector.shape_cast %256 : vector<64x32xf32> to vector<1x64x32xf32>
    tpu.vector_store %arg21[%c0_166, %c0_167, %c0_168], %259 {strides = array<i32>} : memref<1x64x32xf32, #tpu.memory_space<vmem>>, vector<1x64x32xf32>,
    return
  }
  func.func @transform_0(%arg0: i32) -> (i32, i32, i32) {
    %c0_i32 = arith.constant 0 : i32
    %c0_i32_0 = arith.constant 0 : i32
    %c0_i32_1 = arith.constant 0 : i32
    return %arg0, %c0_i32, %c0_i32_0 : i32, i32, i32
  }
  func.func @transform_1(%arg0: i32) -> (i32, i32) {
    %c0_i32 = arith.constant 0 : i32
    %c0_i32_0 = arith.constant 0 : i32
    %c0_i32_1 = arith.constant 0 : i32
    return %c0_i32, %c0_i32_0 : i32, i32
  }
  func.func @transform_2(%arg0: i32) -> (i32, i32) {
    %c0_i32 = arith.constant 0 : i32
    %c0_i32_0 = arith.constant 0 : i32
    %c0_i32_1 = arith.constant 0 : i32
    return %c0_i32, %c0_i32_0 : i32, i32
  }
  func.func @transform_3(%arg0: i32) -> (i32, i32, i32) {
    %c0_i32 = arith.constant 0 : i32
    %c0_i32_0 = arith.constant 0 : i32
    %c0_i32_1 = arith.constant 0 : i32
    %c0_i32_2 = arith.constant 0 : i32
    return %c0_i32, %c0_i32_0, %c0_i32_1 : i32, i32, i32
  }
  func.func @transform_4(%arg0: i32) -> (i32, i32, i32) {
    %c0_i32 = arith.constant 0 : i32
    %c0_i32_0 = arith.constant 0 : i32
    %c0_i32_1 = arith.constant 0 : i32
    %c0_i32_2 = arith.constant 0 : i32
    return %c0_i32, %c0_i32_0, %c0_i32_1 : i32, i32, i32
  }
  func.func @transform_5(%arg0: i32) -> (i32, i32, i32) {
    %c0_i32 = arith.constant 0 : i32
    %c0_i32_0 = arith.constant 0 : i32
    %c0_i32_1 = arith.constant 0 : i32
    %c0_i32_2 = arith.constant 0 : i32
    return %c0_i32, %c0_i32_0, %c0_i32_1 : i32, i32, i32
  }
  func.func @transform_6(%arg0: i32) -> (i32, i32, i32) {
    %c0_i32 = arith.constant 0 : i32
    %c0_i32_0 = arith.constant 0 : i32
    %c0_i32_1 = arith.constant 0 : i32
    %c0_i32_2 = arith.constant 0 : i32
    return %c0_i32, %c0_i32_0, %c0_i32_1 : i32, i32, i32
  }
  func.func @transform_7(%arg0: i32) -> (i32, i32, i32) {
    %c0_i32 = arith.constant 0 : i32
    %c0_i32_0 = arith.constant 0 : i32
    %c0_i32_1 = arith.constant 0 : i32
    %c0_i32_2 = arith.constant 0 : i32
    return %c0_i32, %c0_i32_0, %c0_i32_1 : i32, i32, i32
  }
  func.func @transform_8(%arg0: i32) -> (i32, i32, i32) {
    %c0_i32 = arith.constant 0 : i32
    %c0_i32_0 = arith.constant 0 : i32
    %c0_i32_1 = arith.constant 0 : i32
    %c0_i32_2 = arith.constant 0 : i32
    return %c0_i32, %c0_i32_0, %c0_i32_1 : i32, i32, i32
  }
  func.func @transform_9(%arg0: i32) -> (i32, i32) {
    %c0_i32 = arith.constant 0 : i32
    %c0_i32_0 = arith.constant 0 : i32
    %c0_i32_1 = arith.constant 0 : i32
    return %c0_i32, %c0_i32_0 : i32, i32
  }
  func.func @transform_10(%arg0: i32) -> (i32, i32) {
    %c0_i32 = arith.constant 0 : i32
    %c0_i32_0 = arith.constant 0 : i32
    %c0_i32_1 = arith.constant 0 : i32
    return %c0_i32, %c0_i32_0 : i32, i32
  }
  func.func @transform_11(%arg0: i32) -> (i32, i32) {
    %c0_i32 = arith.constant 0 : i32
    %c0_i32_0 = arith.constant 0 : i32
    %c0_i32_1 = arith.constant 0 : i32
    return %c0_i32, %c0_i32_0 : i32, i32
  }
  func.func @transform_12(%arg0: i32) -> (i32, i32, i32) {
    %c0_i32 = arith.constant 0 : i32
    %c0_i32_0 = arith.constant 0 : i32
    %c0_i32_1 = arith.constant 0 : i32
    %c0_i32_2 = arith.constant 0 : i32
    return %c0_i32, %c0_i32_0, %c0_i32_1 : i32, i32, i32
  }
  func.func @transform_13(%arg0: i32) -> (i32, i32) {
    %c0_i32 = arith.constant 0 : i32
    %c0_i32_0 = arith.constant 0 : i32
    %c0_i32_1 = arith.constant 0 : i32
    return %c0_i32, %c0_i32_0 : i32, i32
  }
  func.func @transform_14(%arg0: i32) -> (i32, i32) {
    %c0_i32 = arith.constant 0 : i32
    %c0_i32_0 = arith.constant 0 : i32
    %c0_i32_1 = arith.constant 0 : i32
    return %c0_i32, %c0_i32_0 : i32, i32
  }
  func.func @transform_15(%arg0: i32) -> (i32, i32) {
    %c0_i32 = arith.constant 0 : i32
    %c0_i32_0 = arith.constant 0 : i32
    %c0_i32_1 = arith.constant 0 : i32
    return %c0_i32, %c0_i32_0 : i32, i32
  }
  func.func @transform_16(%arg0: i32) -> (i32, i32) {
    %c0_i32 = arith.constant 0 : i32
    %c0_i32_0 = arith.constant 0 : i32
    %c0_i32_1 = arith.constant 0 : i32
    return %c0_i32, %c0_i32_0 : i32, i32
  }
  func.func @transform_17(%arg0: i32) -> (i32, i32) {
    %c0_i32 = arith.constant 0 : i32
    %c0_i32_0 = arith.constant 0 : i32
    %c0_i32_1 = arith.constant 0 : i32
    return %c0_i32, %c0_i32_0 : i32, i32
  }
  func.func @transform_18(%arg0: i32) -> (i32, i32) {
    %c0_i32 = arith.constant 0 : i32
    %c0_i32_0 = arith.constant 0 : i32
    %c0_i32_1 = arith.constant 0 : i32
    return %c0_i32, %c0_i32_0 : i32, i32
  }
  func.func @transform_19(%arg0: i32) -> (i32, i32) {
    %c0_i32 = arith.constant 0 : i32
    %c0_i32_0 = arith.constant 0 : i32
    %c0_i32_1 = arith.constant 0 : i32
    return %c0_i32, %c0_i32_0 : i32, i32
  }
  func.func @transform_20(%arg0: i32) -> (i32, i32, i32) {
    %c0_i32 = arith.constant 0 : i32
    %c0_i32_0 = arith.constant 0 : i32
    %c0_i32_1 = arith.constant 0 : i32
    return %arg0, %c0_i32, %c0_i32_0 : i32, i32, i32
  }
}

</mosaic_0001>

<bundles_post_ra>
// kernel: gkformer_pallas.3
= control target key start
LH: loop header
LB: loop body
LE: loop exit
PB: predicated region body
PF: predicated region fallthrough
CT: control target
= control target key end

     0   :  { %s375_s12 = smov 0   ;;  %s414_s0 = inlined_call_operand.vmem [shape: f32[2,64,8], index: 0, kind: input, shape index: {}]   ;;  %s415_s1 = inlined_call_operand.vmem [shape: f32[8,32], index: 1, kind: input, shape index: {}]   ;;  %s416_s2 = inlined_call_operand.vmem [shape: f32[1,32], index: 2, kind: input, shape index: {}]   ;;  %s417_s3 = inlined_call_operand.vmem [shape: f32[2,64,32], index: 3, kind: output, shape index: {}]  }
   0x1 LB: > { %s314_s13 = sadd.s32 4294967295, %s353_s12   ;;  %p318_p0 = scmp.ge.s32.totalorder %s353_s12, 1  ;;  %s353_s12 = sphi %s375_s12, %s13_s12  }
   0x2   : > { %p137_p1 = scmp.lt.s32.totalorder %s353_s12, 3 }
   0x4   : > { %p138_p2 = pnand %p318_p0, %p137_p1 }
   0x5   : > { %p161_p3 = scmp.lt.s32.totalorder (!%p138_p2), %s314_s13, 1 }
   0x6   : > { %141 = sbr.rel (%p138_p2) target bundleno = 159 (0x9f), region = 32 }
   0xb   : > { %v179_v0 = vld [vmem:[%s415_s1] sm:$0xff]  ;;  %s419_s13 = smov (!%p161_p3, %s314_s13), 1  ;;  %vm184_vm0 = vcmask 64512   ;;  %vm250_vm1 = vcmask 261120  }
   0xc   : > { %336 = vmatpush.msra.mxu2 %v179_v0  ;;  %337 = vmatpush.msra.mxu3 %v179_v0  ;;  %s333_s16 = sshll.u32 %s419_s13, 6  ;;  %v346_v9 = vld [vmem:[%s416_s2] ss:$0 sm:$0xff] }
   0xd   : > { %224 = vmatpush.msra.mxu0 %v179_v0  ;;  %335 = vmatpush.msra.mxu1 %v179_v0  ;;  %s165_s19 = scalar_lea.vmem %s414_s0, %s333_s16  ;;  %s170_s24 = scalar_lea.vmem %s417_s3, %s333_s16 }
   0xe   : > { %v175_v1 = vld [vmem:[%s165_s19 + $0x20] sm:$0xff]  ;;  %v177_v2 = vld [vmem:[%s165_s19 + $0x30] sm:$0xff]  ;;  %v176_v5 = vld [vmem:[%s165_s19 + $0x28] sm:$0xff] }
   0xf   : > { %v171_v3 = vld [vmem:[%s165_s19] sm:$0xff]  ;;  %327 = vmatmul.msk.f32.vlgmr.msra.gmra.mxu2 %vm184_vm0, %v175_v1  ;;  %329 = vmatmul.msk.f32.vlgmr.msra.gmra.mxu3 %vm184_vm0, %v177_v2  ;;  %v173_v4 = vld [vmem:[%s165_s19 + $0x10] sm:$0xff]  ;;  %v178_v6 = vld [vmem:[%s165_s19 + $0x38] sm:$0xff] }
  0x10   : > { %323 = vmatmul.msk.f32.vlgmr.msra.gmra.mxu0 %vm184_vm0, %v171_v3  ;;  %325 = vmatmul.msk.f32.vlgmr.msra.gmra.mxu1 %vm184_vm0, %v173_v4  ;;  %v172_v7 = vld [vmem:[%s165_s19 + $0x8] sm:$0xff]  ;;  %v174_v8 = vld [vmem:[%s165_s19 + $0x18] sm:$0xff] }
  0x17   : > { %328 = vmatmul.msk.f32.gmra.mxu2 %vm184_vm0, %v176_v5  ;;  %330 = vmatmul.msk.f32.gmra.mxu3 %vm184_vm0, %v178_v6 }
  0x18   : > { %324 = vmatmul.msk.f32.gmra.mxu0 %vm184_vm0, %v172_v7  ;;  %326 = vmatmul.msk.f32.gmra.mxu1 %vm184_vm0, %v174_v8 }
  0x8d   : > { %v226_v10 = vpop.f32.mrf.mxu0  ;;  %v232_v11 = vpop.f32.mrf.mxu1 }
  0x8e   : > { %v227_v12 = vadd.f32 %v346_v9, %v226_v10  ;;  %v233_v13 = vadd.f32 %v346_v9, %v232_v11 }
  0x90   : > { %251 = vst.msk [vmem:[%s170_s24] sm:$0xff] %vm250_vm1, %v227_v12 }
  0x91   : > { %253 = vst.msk [vmem:[%s170_s24 + $0x10] sm:$0xff] %vm250_vm1, %v233_v13 }
  0x92   : > { %v238_v14 = vpop.f32.mrf.mxu2  ;;  %v244_v15 = vpop.f32.mrf.mxu3 }
  0x93   : > { %v239_v16 = vadd.f32 %v346_v9, %v238_v14  ;;  %v245_v17 = vadd.f32 %v346_v9, %v244_v15 }
  0x95   : > { %255 = vst.msk [vmem:[%s170_s24 + $0x20] sm:$0xff] %vm250_vm1, %v239_v16  ;;  %v229_v18 = vpop.f32.mrf.mxu0  ;;  %v235_v19 = vpop.f32.mrf.mxu1 }
  0x96   : > { %257 = vst.msk [vmem:[%s170_s24 + $0x30] sm:$0xff] %vm250_vm1, %v245_v17  ;;  %v230_v20 = vadd.f32 %v346_v9, %v229_v18  ;;  %v236_v21 = vadd.f32 %v346_v9, %v235_v19 }
  0x98   : > { %252 = vst.msk [vmem:[%s170_s24 + $0x8] sm:$0xff] %vm250_vm1, %v230_v20 }
  0x99   : > { %254 = vst.msk [vmem:[%s170_s24 + $0x18] sm:$0xff] %vm250_vm1, %v236_v21 }
  0x9a   : > { %v241_v22 = vpop.f32.mrf.mxu2  ;;  %v247_v23 = vpop.f32.mrf.mxu3 }
  0x9b   : > { %v242_v24 = vadd.f32 %v346_v9, %v241_v22  ;;  %v248_v25 = vadd.f32 %v346_v9, %v247_v23 }
  0x9d   : > { %256 = vst.msk [vmem:[%s170_s24 + $0x28] sm:$0xff] %vm250_vm1, %v242_v24 }
  0x9e   : > { %258 = vst.msk [vmem:[%s170_s24 + $0x38] sm:$0xff] %vm250_vm1, %v248_v25 }
  0x9f PF: > { %s13_s12 = sadd.s32 1, %s353_s12  }
  0xa0   : > { %p10_p4 = scmp.ge.s32.totalorder %s13_s12, 4  }
  0xa2   :  { %12 = sbr.rel (!%p10_p4) target bundleno = 1 (0x1), region = 62 }

// kernel: gkformer_pallas.4
= control target key start
LH: loop header
LB: loop body
LE: loop exit
PB: predicated region body
PF: predicated region fallthrough
CT: control target
= control target key end

     0   :  { %s7537_s0 = inlined_call_operand.vmem [shape: f32[2,64,32], index: 0, kind: input, shape index: {}]   ;;  %s7538_s1 = inlined_call_operand.vmem [shape: f32[1,32], index: 1, kind: input, shape index: {}]   ;;  %s7539_s2 = inlined_call_operand.vmem [shape: f32[1,32], index: 2, kind: input, shape index: {}]   ;;  %s7540_s3 = inlined_call_operand.vmem [shape: f32[4,32,8], index: 3, kind: input, shape index: {}]   ;;  %s7541_s4 = inlined_call_operand.vmem [shape: f32[4,1,8], index: 4, kind: input, shape index: {}]   ;;  %s7542_s5 = inlined_call_operand.vmem [shape: f32[4,32,8], index: 5, kind: input, shape index: {}]   ;;  %s7543_s6 = inlined_call_operand.vmem [shape: f32[4,1,8], index: 6, kind: input, shape index: {}]   ;;  %s7544_s7 = inlined_call_operand.vmem [shape: f32[4,32,8], index: 7, kind: input, shape index: {}]   ;;  %s7545_s8 = inlined_call_operand.vmem [shape: f32[4,1,8], index: 8, kind: input, shape index: {}]   ;;  %s7546_s9 = inlined_call_operand.vmem [shape: f32[64,8], index: 9, kind: input, shape index: {}]   ;;  %s7547_s10 = inlined_call_operand.vmem [shape: f32[64,8], index: 10, kind: input, shape index: {}]   ;;  %s7548_s11 = inlined_call_operand.vmem [shape: f32[8,8], index: 11, kind: input, shape index: {}]   ;;  %s7549_s12 = inlined_call_operand.vmem [shape: f32[4,8,32], index: 12, kind: input, shape index: {}]   ;;  %s7550_s13 = inlined_call_operand.vmem [shape: f32[1,32], index: 13, kind: input, shape index: {}]   ;;  %s7551_s14 = inlined_call_operand.vmem [shape: f32[1,32], index: 14, kind: input, shape index: {}]   ;;  %s7552_s15 = inlined_call_operand.vmem [shape: f32[1,32], index: 15, kind: input, shape index: {}]   ;;  %s7553_s16 = inlined_call_operand.vmem [shape: f32[32,64], index: 16, kind: input, shape index: {}]   ;;  %s7554_s17 = inlined_call_operand.vmem [shape: f32[1,64], index: 17, kind: input, shape index: {}]   ;;  %s7555_s18 = inlined_call_operand.vmem [shape: f32[64,32], index: 18, kind: input, shape index: {}]   ;;  %s7556_s19 = inlined_call_operand.vmem [shape: f32[1,32], index: 19, kind: input, shape index: {}]   ;;  %s7557_s20 = inlined_call_operand.vmem [shape: f32[2,64,32], index: 20, kind: output, shape index: {}]  }
   0x1   :  { %7566 = sst [smem:[#allocation23_spill]] %s7537_s0 }
   0x2   :  { %7567 = sst [smem:[#allocation24_spill]] %s7538_s1  ;;  %s5429_s1 = smov 0  }
   0x3   :  { %7568 = sst [smem:[#allocation25_spill]] %s7539_s2 }
   0x4   :  { %7569 = sst [smem:[#allocation26_spill]] %s7540_s3 }
   0x5   :  { %7570 = sst [smem:[#allocation27_spill]] %s7541_s4 }
   0x6 LB: > { %s4699_s22 = sadd.s32 4294967295, %s5321_s1   ;;  %p4703_p0 = scmp.ge.s32.totalorder %s5321_s1, 1  ;;  %s5321_s1 = sphi %s5429_s1, %s30_s1  }
   0x7   : > { %p562_p1 = scmp.lt.s32.totalorder %s5321_s1, 3 }
   0x9   : > { %p563_p2 = pnand %p4703_p0, %p562_p1 }
   0xb   : > { %566 = sbr.rel (%p563_p2) target bundleno = 4271 (0x10af), region = 100 }
  0x10   : > { %p620_p3 = scmp.lt.s32.totalorder %s4699_s22, 1  ;;  %vm638_vm0 = vcmask 261120   ;;  %s7571_s25 = sld [smem:[#allocation23_spill]]  ;;  %v5323_v14 = vmov 32.0   ;;  %v988_v59 = vld [vmem:[%s7544_s7 + $0x18] sm:$0xff]  ;;  %v987_v61 = vld [vmem:[%s7544_s7 + $0x10] sm:$0xff] }
  0x11   : > { %5108 = vrcp.f32 %v5323_v14  ;;  %s7573_s28 = sld [smem:[#allocation26_spill]]  ;;  %1005 = vmatpush.msra.mxu2 %v988_v59  ;;  %v986_v63 = vld [vmem:[%s7544_s7 + $0x8] sm:$0xff] }
  0x12   : > { %s7625_s22 = smov (!%p620_p3, %s4699_s22), 1  ;;  %s7574_s2 = sld [smem:[#allocation24_spill]] }
  0x13   : > { %s5070_s23 = sshll.u32 %s7625_s22, 6  ;;  %1006 = vmatpush.msra.mxu2 %v987_v61  ;;  %s7575_s27 = sld [smem:[#allocation25_spill]] }
  0x14   : > { %s7578_s4 = sld [smem:[#allocation27_spill]]  ;;  %s7507_s0 = scalar_lea.vmem %s7557_s20, %s5070_s23 }
  0x15   : > { %1007 = vmatpush.msra.mxu2 %v986_v63 }
  0x16   : > { %s5445_s3 = scalar_lea.vmem %s7571_s25, %s5070_s23 }
  0x17   : > { %v634_v0 = vld [vmem:[%s5445_s3 + $0x20] sm:$0xff]  ;;  %v632_v1 = vld [vmem:[%s5445_s3 + $0x10] sm:$0xff]  ;;  %v635_v6 = vld [vmem:[%s5445_s3 + $0x28] sm:$0xff]  ;;  %v5109_v15 = vpop.eup %5108 }
  0x18   : > { %v630_v2 = vld [vmem:[%s5445_s3] sm:$0xff]  ;;  %v651_v3 = vsel %vm638_vm0, %v634_v0, 0.0  ;;  %v645_v4 = vsel %vm638_vm0, %v632_v1, 0.0  ;;  %v633_v7 = vld [vmem:[%s5445_s3 + $0x18] sm:$0xff]  ;;  %v631_v8 = vld [vmem:[%s5445_s3 + $0x8] sm:$0xff]  ;;  %v654_v9 = vsel %vm638_vm0, %v635_v6, 0.0  ;;  %vm668_vm1 = vweird.f32 %v5109_v15 }
  0x19   : > { %v639_v5 = vsel %vm638_vm0, %v630_v2, 0.0  ;;  %652 = vadd.xlane.f32.xlu2 %v651_v3  ;;  %646 = vadd.xlane.f32.xlu1 %v645_v4  ;;  %v648_v10 = vsel %vm638_vm0, %v633_v7, 0.0  ;;  %v642_v11 = vsel %vm638_vm0, %v631_v8, 0.0  ;;  %v636_v12 = vld [vmem:[%s5445_s3 + $0x30] sm:$0xff]  ;;  %v664_v16 = vmul.f32 32.0, %v5109_v15  ;;  %v637_v40 = vld [vmem:[%s5445_s3 + $0x38] sm:$0xff] }
  0x1a   : > { %640 = vadd.xlane.f32.xlu0 %v639_v5  ;;  %v657_v13 = vsel %vm638_vm0, %v636_v12, 0.0  ;;  %v660_v45 = vsel %vm638_vm0, %v637_v40, 0.0  ;;  %v866_v58 = vld [vmem:[%s7573_s28 + $0x18] sm:$0xff]  ;;  %v865_v60 = vld [vmem:[%s7573_s28 + $0x10] sm:$0xff]  ;;  %v864_v62 = vld [vmem:[%s7573_s28 + $0x8] sm:$0xff] }
  0x1b   : > { %v665_v17 = vsub.f32 1.0, %v664_v16  ;;  %907 = vmatpush.msra.mxu0 %v866_v58  ;;  %5072 = vmatpush.msra.mxu1 %v866_v58 }
  0x1d   : > { %v666_v18 = vmul.f32 %v5109_v15, %v665_v17  ;;  %908 = vmatpush.msra.mxu0 %v865_v60  ;;  %5073 = vmatpush.msra.mxu1 %v865_v60 }
  0x1f   : > { %v667_v19 = vadd.f32 %v5109_v15, %v666_v18  ;;  %909 = vmatpush.msra.mxu0 %v864_v62  ;;  %5074 = vmatpush.msra.mxu1 %v864_v62 }
  0x21   : > { %655 = vadd.xlane.f32.xlu2 %v654_v9  ;;  %649 = vadd.xlane.f32.xlu1 %v648_v10  ;;  %v5461_v20 = vsel %vm668_vm1, %v5109_v15, %v667_v19 }
  0x22   : > { %643 = vadd.xlane.f32.xlu0 %v642_v11  ;;  %7572 = vst [vmem:[#allocation2_spill] sm:$0xff] %v5461_v20 }
  0x29   : > { %658 = vadd.xlane.f32.xlu1 %v657_v13 }
  0x8c   : > { %v653_v21 = vpop.xlane.xlu2 %652  ;;  %v647_v22 = vpop.xlane.xlu1 %646 }
  0x8d   : > { %v672_v23 = vmul.f32 %v5461_v20, %v647_v22  ;;  %v641_v24 = vpop.xlane.xlu0 %640  ;;  %v674_v36 = vmul.f32 %v5461_v20, %v653_v21 }
  0x8e   : > { %v670_v25 = vmul.f32 %v5461_v20, %v641_v24 }
  0x8f   : > { %v5465_v26 = vsub.f32 %v632_v1, %v672_v23  ;;  %v5486_v43 = vsub.f32 %v634_v0, %v674_v36  ;;  %v863_v0 = vld [vmem:[%s7573_s28] sm:$0xff] }
  0x90   : > { %v5467_v27 = vsub.f32 %v630_v2, %v670_v25  ;;  %v985_v1 = vld [vmem:[%s7544_s7] sm:$0xff]  ;;  %910 = vmatpush.msra.mxu0 %v863_v0  ;;  %5075 = vmatpush.msra.mxu1 %v863_v0 }
  0x91   : > { %v688_v28 = vmul.f32 %v5465_v26, %v5465_v26  ;;  %v690_v51 = vmul.f32 %v5486_v43, %v5486_v43  ;;  %1008 = vmatpush.msra.mxu2 %v985_v1 }
  0x92   : > { %v686_v29 = vmul.f32 %v5467_v27, %v5467_v27 }
  0x93   : > { %v700_v30 = vsel %vm638_vm0, %v688_v28, 0.0  ;;  %v706_v54 = vsel %vm638_vm0, %v690_v51, 0.0 }
  0x94   : > { %v656_v31 = vpop.xlane.xlu2 %655  ;;  %701 = vadd.xlane.f32.xlu1 %v700_v30  ;;  %v694_v32 = vsel %vm638_vm0, %v686_v29, 0.0  ;;  %v650_v33 = vpop.xlane.xlu1 %649 }
  0x95   : > { %v675_v34 = vmul.f32 %v5461_v20, %v656_v31  ;;  %695 = vadd.xlane.f32.xlu0 %v694_v32  ;;  %v644_v35 = vpop.xlane.xlu0 %643  ;;  %v673_v38 = vmul.f32 %v5461_v20, %v650_v33 }
  0x96   : > { %v671_v37 = vmul.f32 %v5461_v20, %v644_v35 }
  0x97   : > { %v5479_v39 = vsub.f32 %v635_v6, %v675_v34  ;;  %v5488_v44 = vsub.f32 %v633_v7, %v673_v38 }
  0x98   : > { %v5482_v41 = vsub.f32 %v631_v8, %v671_v37 }
  0x99   : > { %v691_v42 = vmul.f32 %v5479_v39, %v5479_v39  ;;  %v689_v52 = vmul.f32 %v5488_v44, %v5488_v44 }
  0x9a   : > { %v687_v46 = vmul.f32 %v5482_v41, %v5482_v41 }
  0x9b   : > { %v709_v47 = vsel %vm638_vm0, %v691_v42, 0.0  ;;  %v703_v55 = vsel %vm638_vm0, %v689_v52, 0.0 }
  0x9c   : > { %710 = vadd.xlane.f32.xlu1 %v709_v47  ;;  %v697_v48 = vsel %vm638_vm0, %v687_v46, 0.0  ;;  %v659_v49 = vpop.xlane.xlu1 %658 }
  0x9d   : > { %661 = vadd.xlane.f32.xlu0 %v660_v45  ;;  %698 = vadd.xlane.f32.xlu2 %v697_v48  ;;  %v676_v50 = vmul.f32 %v5461_v20, %v659_v49  ;;  %v5561_v45 = vld [vmem:[%s7574_s2] ss:$0 sm:$0xff] }
  0x9e   : > { %v5569_v49 = vld [vmem:[%s7575_s27] ss:$0 sm:$0xff] }
  0x9f   : > { %v5500_v53 = vsub.f32 %v636_v12, %v676_v50 }
  0xa1   : > { %v692_v56 = vmul.f32 %v5500_v53, %v5500_v53 }
  0xa3   : > { %v712_v57 = vsel %vm638_vm0, %v692_v56, 0.0 }
  0xa5   : > { %707 = vadd.xlane.f32.xlu0 %v706_v54  ;;  %704 = vadd.xlane.f32.xlu2 %v703_v55 }
  0xad   : > { %713 = vadd.xlane.f32.xlu2 %v712_v57 }
 0x107   : > { %v702_v2 = vpop.xlane.xlu1 %701 }
 0x108   : > { %v720_v3 = vmul.f32 %v702_v2, %v5461_v20  ;;  %v696_v4 = vpop.xlane.xlu0 %695 }
 0x109   : > { %v718_v5 = vmul.f32 %v696_v4, %v5461_v20 }
 0x10a   : > { %v5533_v6 = vadd.f32 1e-05, %v720_v3 }
 0x10b   : > { %v726_v7 = vadd.f32 1e-05, %v718_v5 }
 0x10c   : > { %5110 = vrsqrt.f32 %v5533_v6  ;;  %vm760_vm7 = vweird.f32 %v5533_v6 }
 0x10d   : > { %5112 = vrsqrt.f32 %v726_v7  ;;  %vm740_vm3 = vweird.f32 %v726_v7 }
 0x10f   : > { %v711_v8 = vpop.xlane.xlu1 %710 }
 0x110   : > { %v723_v9 = vmul.f32 %v711_v8, %v5461_v20  ;;  %v699_v10 = vpop.xlane.xlu2 %698  ;;  %v662_v11 = vpop.xlane.xlu0 %661 }
 0x111   : > { %v719_v12 = vmul.f32 %v699_v10, %v5461_v20  ;;  %v677_v13 = vmul.f32 %v5461_v20, %v662_v11 }
 0x112   : > { %v5539_v14 = vpop.eup %5110  ;;  %v5541_v15 = vadd.f32 1e-05, %v723_v9 }
 0x113   : > { %v5113_v16 = vpop.eup %5112  ;;  %v727_v17 = vadd.f32 1e-05, %v719_v12  ;;  %v5543_v18 = vsub.f32 %v637_v40, %v677_v13  ;;  %v755_v19 = vmul.f32 %v5539_v14, %v5533_v6  ;;  %vm761_vm8 = vweird.f32 %v5539_v14 }
 0x114   : > { %v735_v21 = vmul.f32 %v5113_v16, %v726_v7  ;;  %5114 = vrsqrt.f32 %v5541_v15  ;;  %vm741_vm2 = vweird.f32 %v5113_v16  ;;  %vm5582_vm10 = vmor %vm760_vm7, %vm761_vm8  ;;  %vm790_vm13 = vweird.f32 %v5541_v15 }
 0x115   : > { %5116 = vrsqrt.f32 %v727_v17  ;;  %v693_v22 = vmul.f32 %v5543_v18, %v5543_v18  ;;  %v756_v25 = vmul.f32 %v5539_v14, %v755_v19  ;;  %vm742_vm4 = vmor %vm740_vm3, %vm741_vm2  ;;  %vm750_vm5 = vweird.f32 %v727_v17 }
 0x116   : > { %v736_v23 = vmul.f32 %v5113_v16, %v735_v21 }
 0x117   : > { %v715_v24 = vsel %vm638_vm0, %v693_v22, 0.0  ;;  %v757_v37 = vmul.f32 0.5, %v756_v25 }
 0x118   : > { %v737_v28 = vmul.f32 0.5, %v736_v23  ;;  %v705_v29 = vpop.xlane.xlu2 %704  ;;  %716 = vadd.xlane.f32.xlu0 %v715_v24  ;;  %v708_v30 = vpop.xlane.xlu0 %707 }
 0x119   : > { %v721_v31 = vmul.f32 %v705_v29, %v5461_v20  ;;  %v722_v32 = vmul.f32 %v708_v30, %v5461_v20  ;;  %v758_v51 = vsub.f32 1.5, %v757_v37 }
 0x11a   : > { %v5554_v33 = vpop.eup %5114  ;;  %v738_v34 = vsub.f32 1.5, %v737_v28 }
 0x11b   : > { %v5117_v35 = vpop.eup %5116  ;;  %v5556_v36 = vadd.f32 1e-05, %v721_v31  ;;  %v730_v42 = vadd.f32 1e-05, %v722_v32  ;;  %v785_v46 = vmul.f32 %v5554_v33, %v5541_v15  ;;  %v759_v62 = vmul.f32 %v5539_v14, %v758_v51 }
 0x11c   : > { %v739_v38 = vmul.f32 %v5113_v16, %v738_v34  ;;  %v745_v40 = vmul.f32 %v5117_v35, %v727_v17  ;;  %vm751_vm6 = vweird.f32 %v5117_v35  ;;  %vm791_vm1 = vweird.f32 %v5554_v33 }
 0x11d   : > { %5118 = vrsqrt.f32 %v5556_v36  ;;  %v786_v56 = vmul.f32 %v5554_v33, %v785_v46  ;;  %vm752_vm9 = vmor %vm750_vm5, %vm751_vm6  ;;  %v763_v8 = vsel %vm5582_vm10, %v5539_v14, %v759_v62  ;;  %vm780_vm11 = vweird.f32 %v730_v42 }
 0x11e   : > { %v743_v47 = vsel %vm742_vm4, %v5113_v16, %v739_v38  ;;  %v746_v48 = vmul.f32 %v5117_v35, %v745_v40  ;;  %5120 = vrsqrt.f32 %v730_v42  ;;  %vm770_vm14 = vweird.f32 %v5556_v36  ;;  %vm792_vm4 = vmor %vm790_vm13, %vm791_vm1 }
 0x11f   : > { %v814_v50 = vmul.f32 %v743_v47, %v5467_v27  ;;  %v787_v2 = vmul.f32 0.5, %v786_v56  ;;  %v937_v56 = vld [vmem:[%s7542_s5 + $0x8] sm:$0xff] }
 0x120   : > { %v747_v52 = vmul.f32 0.5, %v746_v48  ;;  %v714_v54 = vpop.xlane.xlu2 %713  ;;  %v939_v48 = vld [vmem:[%s7542_s5 + $0x18] sm:$0xff] }
 0x121   : > { %v826_v55 = vmul.f32 %v5561_v45, %v814_v50  ;;  %v724_v57 = vmul.f32 %v714_v54, %v5461_v20  ;;  %v788_v10 = vsub.f32 1.5, %v787_v2  ;;  %v4775_v50 = vld [vmem:[%s7573_s28 + $0x38] sm:$0xff]  ;;  %956 = vmatpush.msrb.mxu1 %v939_v48  ;;  %v4774_v54 = vld [vmem:[%s7573_s28 + $0x30] sm:$0xff] }
 0x122   : > { %v748_v58 = vsub.f32 1.5, %v747_v52  ;;  %1591 = vmatpush.msrb.mxu2 %v4775_v50  ;;  %v938_v52 = vld [vmem:[%s7542_s5 + $0x10] sm:$0xff] }
 0x123   : > { %v5119_v59 = vpop.eup %5118  ;;  %v5578_v60 = vadd.f32 %v5569_v49, %v826_v55  ;;  %v732_v27 = vadd.f32 1e-05, %v724_v57  ;;  %v789_v22 = vmul.f32 %v5554_v33, %v788_v10  ;;  %957 = vmatpush.msrb.mxu1 %v938_v52  ;;  %v4773_v57 = vld [vmem:[%s7573_s28 + $0x28] sm:$0xff] }
 0x124   : > { %v5121_v61 = vpop.eup %5120  ;;  %v749_v63 = vmul.f32 %v5117_v35, %v748_v58  ;;  %v765_v0 = vmul.f32 %v5119_v59, %v5556_v36  ;;  %vm771_vm15 = vweird.f32 %v5119_v59  ;;  %1592 = vmatpush.msrb.mxu2 %v4774_v54  ;;  %v936_v58 = vld [vmem:[%s7542_s5] sm:$0xff] }
 0x125   : > { %v775_v3 = vmul.f32 %v5121_v61, %v730_v42  ;;  %5122 = vrsqrt.f32 %v732_v27  ;;  %4708 = vmatmul.msk.f32.vlgmr.msra.gmra.mxu0 %vm638_vm0, %v5578_v60  ;;  %4724 = vmatmul.msk.f32.vlgmr.msra.gmra.mxu2 %vm638_vm0, %v5578_v60  ;;  %vm781_vm12 = vweird.f32 %v5121_v61  ;;  %vm772_vm3 = vmor %vm770_vm14, %vm771_vm15  ;;  %v793_v31 = vsel %vm792_vm4, %v5554_v33, %v789_v22 }
 0x126   : > { %v753_v4 = vsel %vm752_vm9, %v5117_v35, %v749_v63  ;;  %v766_v5 = vmul.f32 %v5119_v59, %v765_v0  ;;  %vm782_vm2 = vmor %vm780_vm11, %vm781_vm12  ;;  %vm800_vm5 = vweird.f32 %v732_v27  ;;  %v819_v15 = vmul.f32 %v793_v31, %v5479_v39  ;;  %958 = vmatpush.msrb.mxu1 %v937_v56  ;;  %1593 = vmatpush.msrb.mxu2 %v4773_v57 }
 0x127   : > { %v815_v6 = vmul.f32 %v753_v4, %v5482_v41  ;;  %v776_v7 = vmul.f32 %v5121_v61, %v775_v3  ;;  %v816_v41 = vmul.f32 %v763_v8, %v5465_v26  ;;  %v5690_v3 = vld [vmem:[%s7578_s4] ss:$0 sm:$0xff]  ;;  %vm1042_vm11 = vcmask 64512  }
 0x128   : > { %v767_v9 = vmul.f32 0.5, %v766_v5  ;;  %959 = vmatpush.msrb.mxu1 %v936_v58  ;;  %vm1310_vm12 = vcmask 523264  }
 0x129   : > { %v827_v11 = vmul.f32 %v5561_v45, %v815_v6  ;;  %v777_v12 = vmul.f32 0.5, %v776_v7  ;;  %v828_v24 = vmul.f32 %v5561_v45, %v816_v41 }
 0x12a   : > { %v768_v13 = vsub.f32 1.5, %v767_v9 }
 0x12b   : > { %v5123_v16 = vpop.eup %5122  ;;  %v5600_v14 = vadd.f32 %v5569_v49, %v827_v11  ;;  %v778_v17 = vsub.f32 1.5, %v777_v12  ;;  %v5615_v35 = vadd.f32 %v5569_v49, %v828_v24 }
 0x12c   : > { %v769_v19 = vmul.f32 %v5119_v59, %v768_v13  ;;  %v795_v21 = vmul.f32 %v5123_v16, %v732_v27  ;;  %vm801_vm6 = vweird.f32 %v5123_v16  ;;  %v4772_v27 = vld [vmem:[%s7573_s28 + $0x20] sm:$0xff] }
 0x12d   : > { %v779_v23 = vmul.f32 %v5121_v61, %v778_v17  ;;  %4709 = vmatmul.msk.f32.gmra.mxu0 %vm638_vm0, %v5600_v14  ;;  %4725 = vmatmul.msk.f32.gmra.mxu2 %vm638_vm0, %v5600_v14  ;;  %vm802_vm7 = vmor %vm800_vm5, %vm801_vm6  ;;  %v4788_v17 = vld [vmem:[%s7542_s5 + $0x38] sm:$0xff] }
 0x12e   : > { %v796_v26 = vmul.f32 %v5123_v16, %v795_v21  ;;  %v773_v28 = vsel %vm772_vm3, %v5119_v59, %v769_v19  ;;  %1594 = vmatpush.msrb.mxu2 %v4772_v27  ;;  %v4787_v19 = vld [vmem:[%s7542_s5 + $0x30] sm:$0xff]  ;;  %v4786_v21 = vld [vmem:[%s7542_s5 + $0x28] sm:$0xff] }
 0x12f   : > { %v783_v25 = vsel %vm782_vm2, %v5121_v61, %v779_v23  ;;  %v817_v36 = vmul.f32 %v773_v28, %v5488_v44  ;;  %v831_v44 = vmul.f32 %v5561_v45, %v819_v15  ;;  %v4785_v23 = vld [vmem:[%s7542_s5 + $0x20] sm:$0xff] }
 0x130   : > { %v818_v29 = vmul.f32 %v783_v25, %v5486_v43  ;;  %v797_v30 = vmul.f32 0.5, %v796_v26  ;;  %1642 = vmatpush.msra.mxu2 %v4788_v17 }
 0x131   : > { %v829_v43 = vmul.f32 %v5561_v45, %v817_v36  ;;  %v5634_v40 = vadd.f32 %v5569_v49, %v831_v44 }
 0x132   : > { %v830_v32 = vmul.f32 %v5561_v45, %v818_v29  ;;  %v798_v34 = vsub.f32 1.5, %v797_v30  ;;  %1643 = vmatpush.msra.mxu2 %v4787_v19 }
 0x133   : > { %v5631_v39 = vadd.f32 %v5569_v49, %v829_v43  ;;  %v5093_v43 = vld [vmem:[%s7543_s6] ss:$0 sm:$0xff] }
 0x134   : > { %v5620_v37 = vadd.f32 %v5569_v49, %v830_v32  ;;  %v799_v38 = vmul.f32 %v5123_v16, %v798_v34  ;;  %1644 = vmatpush.msra.mxu2 %v4786_v21 }
 0x135   : > { %4710 = vmatmul.msk.f32.gmra.mxu0 %vm638_vm0, %v5615_v35  ;;  %4726 = vmatmul.msk.f32.gmra.mxu2 %vm638_vm0, %v5615_v35 }
 0x136   : > { %4712 = vmatmul.msk.f32.vlgmr.msra.gmra.mxu1 %vm638_vm0, %v5620_v37  ;;  %v803_v33 = vsel %vm802_vm7, %v5123_v16, %v799_v38  ;;  %1645 = vmatpush.msra.mxu2 %v4785_v23  ;;  %v5092_v38 = vld [vmem:[%s7545_s8] ss:$0 sm:$0xff] }
 0x137   : > { %v820_v42 = vmul.f32 %v803_v33, %v5500_v53  ;;  %v5658_v53 = vld [vmem:[%s7548_s11] sm:$0xff] }
 0x138   : > { %1082 = vmatpush.msra.mxu3 %v5658_v53 }
 0x139   : > { %v832_v46 = vmul.f32 %v5561_v45, %v820_v42 }
 0x13a   : > { %1171 = vmatpush.msrb.mxu3 %v5658_v53 }
 0x13b   : > { %v5645_v47 = vadd.f32 %v5569_v49, %v832_v46 }
 0x13d   : > { %4711 = vmatmul.msk.f32.gmra.mxu0 %vm638_vm0, %v5631_v39  ;;  %4727 = vmatmul.msk.f32.gmra.mxu2 %vm638_vm0, %v5631_v39 }
 0x13e   : > { %4713 = vmatmul.msk.f32.gmra.mxu1 %vm638_vm0, %v5634_v40 }
 0x145   : > { %4728 = vmatmul.msk.f32.gmra.mxu2 %vm638_vm0, %v5620_v37 }
 0x146   : > { %4714 = vmatmul.msk.f32.gmra.mxu1 %vm638_vm0, %v5645_v47 }
 0x14d   : > { %4729 = vmatmul.msk.f32.gmra.mxu2 %vm638_vm0, %v5634_v40 }
 0x155   : > { %4730 = vmatmul.msk.f32.gmra.mxu2 %vm638_vm0, %v5645_v47 }
 0x18b   : > { %v717_v51 = vpop.xlane.xlu0 %716 }
 0x18c   : > { %v725_v55 = vmul.f32 %v717_v51, %v5461_v20 }
 0x18e   : > { %v733_v59 = vadd.f32 1e-05, %v725_v55 }
 0x190   : > { %5124 = vrsqrt.f32 %v733_v59  ;;  %vm810_vm9 = vweird.f32 %v733_v59 }
 0x196   : > { %v5125_v61 = vpop.eup %5124 }
 0x197   : > { %v805_v62 = vmul.f32 %v5125_v61, %v733_v59  ;;  %vm811_vm8 = vweird.f32 %v5125_v61 }
 0x198   : > { %vm812_vm10 = vmor %vm810_vm9, %vm811_vm8 }
 0x199   : > { %v806_v63 = vmul.f32 %v5125_v61, %v805_v62 }
 0x19b   : > { %v807_v0 = vmul.f32 0.5, %v806_v63 }
 0x19d   : > { %v808_v1 = vsub.f32 1.5, %v807_v0 }
 0x19f   : > { %v809_v2 = vmul.f32 %v5125_v61, %v808_v1 }
 0x1a1   : > { %v813_v4 = vsel %vm812_vm10, %v5125_v61, %v809_v2 }
 0x1a2   : > { %v821_v5 = vmul.f32 %v813_v4, %v5543_v18  ;;  %v912_v6 = vpop.f32.mrf.mxu0 }
 0x1a3   : > { %v5694_v7 = vadd.f32 %v5690_v3, %v912_v6 }
 0x1a4   : > { %v833_v8 = vmul.f32 %v5561_v45, %v821_v5 }
 0x1a5   : > { %4732 = vmatmul.msk.f32.vlgmr.msra.gmra.mxu3 %vm1042_vm11, %v5694_v7 }
 0x1a6   : > { %v5700_v9 = vadd.f32 %v5569_v49, %v833_v8  ;;  %5076 = vmatpush.msra.mxu3 %v4788_v17 }
 0x1a8   : > { %4715 = vmatmul.msk.f32.gmra.mxu1 %vm638_vm0, %v5700_v9  ;;  %4731 = vmatmul.msk.f32.gmra.mxu2 %vm638_vm0, %v5700_v9  ;;  %v1010_v25 = vpop.f32.mrf.mxu2 }
 0x1a9   : > { %5077 = vmatpush.msra.mxu3 %v4787_v19  ;;  %v1011_v59 = vadd.f32 %v5092_v38, %v1010_v25 }
 0x1aa   : > { %v915_v18 = vpop.f32.mrf.mxu0 }
 0x1ab   : > { %v5707_v10 = vadd.f32 %v5690_v3, %v915_v18  ;;  %5078 = vmatpush.msra.mxu3 %v4786_v21  ;;  %v5847_v21 = vld [vmem:[%s7543_s6 + $0x1] ss:$0 sm:$0xff] }
 0x1ad   : > { %4733 = vmatmul.msk.f32.gmra.mxu3 %vm1042_vm11, %v5707_v10 }
 0x1ae   : > { %5079 = vmatpush.msra.mxu3 %v4785_v23 }
 0x1b0   : > { %4716 = vmatmul.msk.f32.vlgmr.msrb.gmra.mxu1 %vm638_vm0, %v5578_v60  ;;  %4777 = vmatmul.msk.f32.vlgmr.msrb.gmra.mxu2 %vm638_vm0, %v5578_v60  ;;  %v1013_v28 = vpop.f32.mrf.mxu2 }
 0x1b1   : > { %1858 = vmatpush.msrb.mxu2 %v5658_v53  ;;  %v1014_v58 = vadd.f32 %v5092_v38, %v1013_v28 }
 0x1b2   : > { %v918_v45 = vpop.f32.mrf.mxu0 }
 0x1b3   : > { %v5716_v49 = vadd.f32 %v5690_v3, %v918_v45  ;;  %v924_v13 = vpop.f32.mrf.mxu1 }
 0x1b4   : > { %v5734_v16 = vadd.f32 %v5690_v3, %v924_v13 }
 0x1b5   : > { %4734 = vmatmul.msk.f32.gmra.mxu3 %vm1042_vm11, %v5716_v49 }
 0x1b8   : > { %4717 = vmatmul.msk.f32.gmra.mxu1 %vm638_vm0, %v5600_v14  ;;  %4778 = vmatmul.msk.f32.gmra.mxu2 %vm638_vm0, %v5600_v14  ;;  %v1016_v29 = vpop.f32.mrf.mxu2 }
 0x1b9   : > { %v1017_v56 = vadd.f32 %v5092_v38, %v1016_v29 }
 0x1ba   : > { %v921_v11 = vpop.f32.mrf.mxu0 }
 0x1bb   : > { %v5725_v12 = vadd.f32 %v5690_v3, %v921_v11  ;;  %v927_v41 = vpop.f32.mrf.mxu1 }
 0x1bc   : > { %v5752_v22 = vadd.f32 %v5690_v3, %v927_v41 }
 0x1bd   : > { %4735 = vmatmul.msk.f32.gmra.mxu3 %vm1042_vm11, %v5725_v12 }
 0x1c0   : > { %4718 = vmatmul.msk.f32.gmra.mxu1 %vm638_vm0, %v5615_v35  ;;  %4779 = vmatmul.msk.f32.gmra.mxu2 %vm638_vm0, %v5615_v35  ;;  %v1019_v30 = vpop.f32.mrf.mxu2 }
 0x1c1   : > { %v1020_v54 = vadd.f32 %v5092_v38, %v1019_v30 }
 0x1c3   : > { %v930_v26 = vpop.f32.mrf.mxu1 }
 0x1c4   : > { %v5765_v24 = vadd.f32 %v5690_v3, %v930_v26 }
 0x1c5   : > { %4736 = vmatmul.msk.f32.gmra.mxu3 %vm1042_vm11, %v5734_v16 }
 0x1c8   : > { %4719 = vmatmul.msk.f32.gmra.mxu1 %vm638_vm0, %v5631_v39  ;;  %4780 = vmatmul.msk.f32.gmra.mxu2 %vm638_vm0, %v5631_v39  ;;  %v1022_v31 = vpop.f32.mrf.mxu2 }
 0x1c9   : > { %v1023_v51 = vadd.f32 %v5092_v38, %v1022_v31 }
 0x1cd   : > { %4737 = vmatmul.msk.f32.gmra.mxu3 %vm1042_vm11, %v5752_v22 }
 0x1d0   : > { %4720 = vmatmul.msk.f32.gmra.mxu1 %vm638_vm0, %v5620_v37  ;;  %4781 = vmatmul.msk.f32.gmra.mxu2 %vm638_vm0, %v5620_v37  ;;  %v1025_v32 = vpop.f32.mrf.mxu2 }
 0x1d1   : > { %v1026_v50 = vadd.f32 %v5092_v38, %v1025_v32 }
 0x1d5   : > { %4738 = vmatmul.msk.f32.gmra.mxu3 %vm1042_vm11, %v5765_v24 }
 0x1d8   : > { %4721 = vmatmul.msk.f32.gmra.mxu1 %vm638_vm0, %v5634_v40  ;;  %4782 = vmatmul.msk.f32.gmra.mxu2 %vm638_vm0, %v5634_v40  ;;  %v1028_v34 = vpop.f32.mrf.mxu2 }
 0x1d9   : > { %v1029_v46 = vadd.f32 %v5092_v38, %v1028_v34 }
 0x1e0   : > { %4722 = vmatmul.msk.f32.gmra.mxu1 %vm638_vm0, %v5645_v47  ;;  %4783 = vmatmul.msk.f32.gmra.mxu2 %vm638_vm0, %v5645_v47 }
 0x1e8   : > { %4723 = vmatmul.msk.f32.gmra.mxu1 %vm638_vm0, %v5700_v9  ;;  %4784 = vmatmul.msk.f32.gmra.mxu2 %vm638_vm0, %v5700_v9 }
 0x1f0   : > { %4790 = vmatmul.msk.f32.vlgmr.msra.gmra.mxu2 %vm638_vm0, %v5578_v60 }
 0x1f8   : > { %4791 = vmatmul.msk.f32.gmra.mxu2 %vm638_vm0, %v5600_v14 }
 0x200   : > { %4792 = vmatmul.msk.f32.gmra.mxu2 %vm638_vm0, %v5615_v35 }
 0x208   : > { %4793 = vmatmul.msk.f32.gmra.mxu2 %vm638_vm0, %v5631_v39 }
 0x225   : > { %v933_v36 = vpop.f32.mrf.mxu1 }
 0x226   : > { %v5790_v15 = vadd.f32 %v5690_v3, %v933_v36 }
 0x228   : > { %4739 = vmatmul.msk.f32.gmra.mxu3 %vm1042_vm11, %v5790_v15  ;;  %v5837_v17 = vpop.f32.mrf.mxu3 }
 0x22b   : > { %v1031_v44 = vpop.f32.mrf.mxu2 }
 0x22c   : > { %v1032_v33 = vadd.f32 %v5092_v38, %v1031_v44 }
 0x22d   : > { %v961_v42 = vpop.f32.mrf.mxu1 }
 0x22e   : > { %v5800_v48 = vadd.f32 %v5093_v43, %v961_v42  ;;  %1535 = vmatpush.msra.mxu1 %v1032_v33 }
 0x230   : > { %4740 = vmatmul.msk.f32.vlgmr.msrb.gmra.mxu3 %vm1042_vm11, %v5800_v48  ;;  %1536 = vmatpush.msra.mxu1 %v1029_v46  ;;  %v5849_v23 = vpop.f32.mrf.mxu3 }
 0x232   : > { %1537 = vmatpush.msra.mxu1 %v1026_v50 }
 0x233   : > { %v5804_v52 = vpop.f32.mrf.mxu2 }
 0x234   : > { %1538 = vmatpush.msra.mxu1 %v1023_v51 }
 0x235   : > { %v964_v55 = vpop.f32.mrf.mxu1 }
 0x236   : > { %v5806_v57 = vadd.f32 %v5093_v43, %v964_v55  ;;  %1539 = vmatpush.msra.mxu1 %v1020_v54 }
 0x238   : > { %4741 = vmatmul.msk.f32.gmra.mxu3 %vm1042_vm11, %v5806_v57  ;;  %1540 = vmatpush.msra.mxu1 %v1017_v56  ;;  %v5858_v28 = vpop.f32.mrf.mxu3 }
 0x23a   : > { %1541 = vmatpush.msra.mxu1 %v1014_v58 }
 0x23b   : > { %v5810_v27 = vpop.f32.mrf.mxu2 }
 0x23c   : > { %1542 = vmatpush.msra.mxu1 %v1011_v59  ;;  %v5892_v59 = vld [vmem:[%s7546_s9 + $0x38] sm:$0xff] }
 0x23d   : > { %v967_v61 = vpop.f32.mrf.mxu1 }
 0x23e   : > { %1769 = vmatpush.msrb.mxu1 %v5658_v53  ;;  %v5813_v62 = vadd.f32 %v5093_v43, %v967_v61  ;;  %v5897_v61 = vld [vmem:[%s7547_s10 + $0x38] sm:$0xff] }
 0x240   : > { %4742 = vmatmul.msk.f32.gmra.mxu3 %vm1042_vm11, %v5813_v62  ;;  %v5870_v34 = vpop.f32.mrf.mxu3 }
 0x243   : > { %v5817_v63 = vpop.f32.mrf.mxu2 }
 0x245   : > { %v970_v0 = vpop.f32.mrf.mxu1 }
 0x246   : > { %v5819_v1 = vadd.f32 %v5093_v43, %v970_v0 }
 0x248   : > { %4743 = vmatmul.msk.f32.gmra.mxu3 %vm1042_vm11, %v5819_v1 }
 0x24b   : > { %v5823_v2 = vpop.f32.mrf.mxu2 }
 0x24d   : > { %v973_v3 = vpop.f32.mrf.mxu1 }
 0x24e   : > { %v5825_v4 = vadd.f32 %v5093_v43, %v973_v3 }
 0x250   : > { %4744 = vmatmul.msk.f32.gmra.mxu3 %vm1042_vm11, %v5825_v4 }
 0x253   : > { %v5829_v53 = vpop.f32.mrf.mxu2 }
 0x255   : > { %v976_v5 = vpop.f32.mrf.mxu1 }
 0x256   : > { %v977_v6 = vadd.f32 %v5093_v43, %v976_v5 }
 0x258   : > { %4745 = vmatmul.msk.f32.gmra.mxu3 %vm1042_vm11, %v977_v6 }
 0x25b   : > { %v5832_v8 = vpop.f32.mrf.mxu2 }
 0x25d   : > { %v979_v18 = vpop.f32.mrf.mxu1 }
 0x25e   : > { %v980_v45 = vadd.f32 %v5093_v43, %v979_v18  ;;  %v5904_v18 = vld [vmem:[%s7547_s10 + $0x30] sm:$0xff] }
 0x260   : > { %4746 = vmatmul.msk.f32.gmra.mxu3 %vm1042_vm11, %v980_v45 }
 0x263   : > { %v5835_v11 = vpop.f32.mrf.mxu2 }
 0x264   : > { %7579 = vst [vmem:[#allocation3_spill] sm:$0xff] %v5835_v11 }
 0x265   : > { %v982_v13 = vpop.f32.mrf.mxu1 }
 0x266   : > { %v983_v41 = vadd.f32 %v5093_v43, %v982_v13  ;;  %v5881_v43 = vpop.f32.mrf.mxu3 }
 0x268   : > { %4747 = vmatmul.msk.f32.gmra.mxu3 %vm1042_vm11, %v983_v41  ;;  %v1131_v3 = vmul.f32 %v983_v41, %v5892_v59  ;;  %v5917_v41 = vld [vmem:[%s7547_s10 + $0x28] sm:$0xff] }
 0x26b   : > { %v5840_v19 = vpop.f32.mrf.mxu2 }
 0x26c   : > { %7580 = vst [vmem:[#allocation4_spill] sm:$0xff] %v5840_v19 }
 0x26e   : > { %v5883_v44 = vpop.f32.mrf.mxu3 }
 0x270   : > { %4794 = vmatmul.msk.f32.vlgmr.msra.gmra.mxu3 %vm638_vm0, %v5620_v37 }
 0x273   : > { %v1647_v26 = vpop.f32.mrf.mxu2 }
 0x274   : > { %v5852_v25 = vadd.f32 %v5847_v21, %v1647_v26 }
 0x276   : > { %4819 = vmatmul.msk.f32.vlgmr.msrb.gmra.mxu2 %vm1042_vm11, %v5852_v25  ;;  %v5885_v33 = vpop.f32.mrf.mxu3 }
 0x278   : > { %4795 = vmatmul.msk.f32.gmra.mxu3 %vm638_vm0, %v5634_v40 }
 0x27b   : > { %v1650_v29 = vpop.f32.mrf.mxu2 }
 0x27c   : > { %v5861_v30 = vadd.f32 %v5847_v21, %v1650_v29  ;;  %v5910_v29 = vld [vmem:[%s7546_s9 + $0x30] sm:$0xff] }
 0x27e   : > { %4820 = vmatmul.msk.f32.gmra.mxu2 %vm1042_vm11, %v5861_v30 }
 0x280   : > { %4796 = vmatmul.msk.f32.gmra.mxu3 %vm638_vm0, %v5645_v47 }
 0x283   : > { %v1653_v31 = vpop.f32.mrf.mxu2 }
 0x284   : > { %v5868_v32 = vadd.f32 %v5847_v21, %v1653_v31  ;;  %v1130_v31 = vmul.f32 %v980_v45, %v5910_v29 }
 0x286   : > { %4821 = vmatmul.msk.f32.gmra.mxu2 %vm1042_vm11, %v5868_v32 }
 0x288   : > { %4797 = vmatmul.msk.f32.gmra.mxu3 %vm638_vm0, %v5700_v9 }
 0x28b   : > { %v1656_v36 = vpop.f32.mrf.mxu2 }
 0x28c   : > { %v5877_v38 = vadd.f32 %v5847_v21, %v1656_v36 }
 0x28e   : > { %4822 = vmatmul.msk.f32.gmra.mxu2 %vm1042_vm11, %v5877_v38 }
 0x2ab   : > { %v5887_v42 = vpop.f32.mrf.mxu3 }
 0x2b3   : > { %v1173_v46 = vpop.f32.mrf.mxu3 }
 0x2bb   : > { %v1176_v50 = vpop.f32.mrf.mxu3 }
 0x2c3   : > { %v1179_v51 = vpop.f32.mrf.mxu3 }
 0x2cb   : > { %v1182_v54 = vpop.f32.mrf.mxu3 }
 0x2d3   : > { %v1185_v55 = vpop.f32.mrf.mxu3 }
 0x2db   : > { %v1188_v56 = vpop.f32.mrf.mxu3 }
 0x2dc   : > { %v1202_v36 = vmul.f32 %v1188_v56, %v5917_v41 }
 0x2e3   : > { %v1191_v58 = vpop.f32.mrf.mxu3 }
 0x2e4   : > { %v1203_v13 = vmul.f32 %v1191_v58, %v5904_v18  ;;  %v5923_v58 = vld [vmem:[%s7546_s9 + $0x28] sm:$0xff] }
 0x2eb   : > { %v1194_v0 = vpop.f32.mrf.mxu3 }
 0x2ec   : > { %v1204_v5 = vmul.f32 %v1194_v0, %v5897_v61  ;;  %v1211_v0 = vadd.f32 %v1203_v13, %v1130_v31 }
 0x2ee   : > { %v1212_v26 = vadd.f32 %v1204_v5, %v1131_v3  ;;  %v1129_v5 = vmul.f32 %v977_v6, %v5923_v58  ;;  %v5941_v6 = vld [vmem:[%s7546_s9 + $0x20] sm:$0xff] }
 0x2ef   : > { %v1128_v31 = vmul.f32 %v5825_v4, %v5941_v6 }
 0x2f0   : > { %4748 = vmatpush.xpose.msk.msrb.mxu0 %vm1042_vm11, %v1212_v26  ;;  %v5933_v26 = vld [vmem:[%s7547_s10 + $0x20] sm:$0xff]  ;;  %v1210_v13 = vadd.f32 %v1202_v36, %v1129_v5 }
 0x2f1   : > { %v1201_v56 = vmul.f32 %v1185_v55, %v5933_v26 }
 0x2f3   : > { %v1659_v3 = vpop.f32.mrf.mxu3  ;;  %v1209_v36 = vadd.f32 %v1201_v56, %v1128_v31 }
 0x2f4   : > { %v5927_v45 = vadd.f32 %v5847_v21, %v1659_v3  ;;  %4749 = vmatpush.xpose.msk.msrb.mxu0 %vm1042_vm11, %v1211_v0  ;;  %v5949_v0 = vld [vmem:[%s7547_s10 + $0x18] sm:$0xff] }
 0x2f5   : > { %v1200_v55 = vmul.f32 %v1182_v54, %v5949_v0  ;;  %v5955_v3 = vld [vmem:[%s7546_s9 + $0x18] sm:$0xff] }
 0x2f6   : > { %4823 = vmatmul.msk.f32.gmra.mxu2 %vm1042_vm11, %v5927_v45  ;;  %v1127_v20 = vmul.f32 %v5819_v1, %v5955_v3  ;;  %v5974_v1 = vld [vmem:[%s7546_s9 + $0x10] sm:$0xff] }
 0x2f7   : > { %v1126_v31 = vmul.f32 %v5813_v62, %v5974_v1 }
 0x2f8   : > { %4750 = vmatpush.xpose.msk.msrb.mxu0 %vm1042_vm11, %v1210_v13  ;;  %v5966_v13 = vld [vmem:[%s7547_s10 + $0x10] sm:$0xff]  ;;  %v1208_v56 = vadd.f32 %v1200_v55, %v1127_v20  ;;  %v5988_v55 = vld [vmem:[%s7546_s9 + $0x8] sm:$0xff] }
 0x2f9   : > { %v1199_v54 = vmul.f32 %v1179_v51, %v5966_v13  ;;  %v1125_v19 = vmul.f32 %v5806_v57, %v5988_v55  ;;  %v6007_v57 = vld [vmem:[%s7546_s9] sm:$0xff] }
 0x2fb   : > { %v1662_v5 = vpop.f32.mrf.mxu3  ;;  %v1207_v51 = vadd.f32 %v1199_v54, %v1126_v31  ;;  %v1124_v31 = vmul.f32 %v5800_v48, %v6007_v57 }
 0x2fc   : > { %v5960_v4 = vadd.f32 %v5847_v21, %v1662_v5  ;;  %4751 = vmatpush.xpose.msk.msrb.mxu0 %vm1042_vm11, %v1209_v36  ;;  %v5982_v36 = vld [vmem:[%s7547_s10 + $0x8] sm:$0xff] }
 0x2fd   : > { %v1198_v20 = vmul.f32 %v1176_v50, %v5982_v36  ;;  %v1109_v48 = vmul.f32 %v5849_v23, %v5982_v36  ;;  %v1037_v23 = vmul.f32 %v5725_v12, %v5955_v3  ;;  %v1038_v12 = vmul.f32 %v5734_v16, %v5941_v6 }
 0x2fe   : > { %4824 = vmatmul.msk.f32.gmra.mxu2 %vm1042_vm11, %v5960_v4  ;;  %v1114_v16 = vmul.f32 %v5885_v33, %v5904_v18 }
 0x2ff   : > { %v1206_v54 = vadd.f32 %v1198_v20, %v1125_v19  ;;  %v1034_v19 = vmul.f32 %v5694_v7, %v6007_v57  ;;  %v1110_v7 = vmul.f32 %v5858_v28, %v5966_v13  ;;  %v1112_v28 = vmul.f32 %v5881_v43, %v5933_v26 }
 0x300   : > { %4752 = vmatpush.xpose.msk.msrb.mxu0 %vm1042_vm11, %v1208_v56  ;;  %v5999_v56 = vld [vmem:[%s7547_s10] sm:$0xff]  ;;  %v1113_v43 = vmul.f32 %v5883_v44, %v5917_v41  ;;  %v1041_v44 = vmul.f32 %v5790_v15, %v5892_v59 }
 0x301   : > { %v1197_v50 = vmul.f32 %v1173_v46, %v5999_v56 }
 0x303   : > { %v1665_v5 = vpop.f32.mrf.mxu3 }
 0x304   : > { %v5993_v62 = vadd.f32 %v5847_v21, %v1665_v5  ;;  %4753 = vmatpush.xpose.msk.msrb.mxu0 %vm1042_vm11, %v1207_v51  ;;  %v1108_v51 = vmul.f32 %v5837_v17, %v5999_v56  ;;  %v1205_v5 = vadd.f32 %v1197_v50, %v1124_v31  ;;  %v1035_v17 = vmul.f32 %v5707_v10, %v5988_v55  ;;  %v4801_v10 = vld [vmem:[%s7544_s7 + $0x38] sm:$0xff] }
 0x306   : > { %4825 = vmatmul.msk.f32.gmra.mxu2 %vm1042_vm11, %v5993_v62  ;;  %v1116_v11 = vadd.f32 %v1108_v51, %v1034_v19  ;;  %v1117_v50 = vadd.f32 %v1109_v48, %v1035_v17  ;;  %v4798_v51 = vld [vmem:[%s7544_s7 + $0x20] sm:$0xff]  ;;  %v1039_v19 = vmul.f32 %v5752_v22, %v5923_v58  ;;  %v1040_v48 = vmul.f32 %v5765_v24, %v5910_v29  ;;  %v1860_v22 = vpop.f32.mrf.mxu2 }
 0x308   : > { %4754 = vmatpush.xpose.msk.msrb.mxu0 %vm1042_vm11, %v1206_v54  ;;  %v1122_v17 = vadd.f32 %v1114_v16, %v1040_v48 }
 0x30b   : > { %v1668_v46 = vpop.f32.mrf.mxu3 }
 0x30c   : > { %v1669_v20 = vadd.f32 %v5847_v21, %v1668_v46  ;;  %4755 = vmatpush.xpose.msk.msrb.mxu0 %vm1042_vm11, %v1205_v5  ;;  %v1036_v21 = vmul.f32 %v5716_v49, %v5974_v1  ;;  %v4800_v49 = vld [vmem:[%s7544_s7 + $0x30] sm:$0xff]  ;;  %v1120_v5 = vadd.f32 %v1112_v28, %v1038_v12  ;;  %v1121_v46 = vadd.f32 %v1113_v43, %v1039_v19 }
 0x30d   : > { %v1817_v43 = vmul.f32 %v5993_v62, %v5910_v29  ;;  %v1815_v62 = vmul.f32 %v5927_v45, %v5941_v6  ;;  %v1813_v45 = vmul.f32 %v5868_v32, %v5974_v1  ;;  %v1811_v32 = vmul.f32 %v5852_v25, %v6007_v57 }
 0x30e   : > { %4826 = vmatmul.msk.f32.gmra.mxu2 %vm1042_vm11, %v1669_v20  ;;  %v1118_v54 = vadd.f32 %v1110_v7, %v1036_v21  ;;  %v1863_v24 = vpop.f32.mrf.mxu2 }
 0x30f   : > { %4756 = vmatmul.msk.f32.vlgmr.msrb.gmra.mxu0 %vm1042_vm11, %v1116_v11  ;;  %v1111_v11 = vmul.f32 %v5870_v34, %v5949_v0  ;;  %v4799_v34 = vld [vmem:[%s7544_s7 + $0x28] sm:$0xff] }
 0x310   : > { %1693 = vmatpush.msra.mxu0 %v4801_v10 }
 0x311   : > { %v1119_v31 = vadd.f32 %v1111_v11, %v1037_v23 }
 0x312   : > { %1694 = vmatpush.msra.mxu0 %v4800_v49  ;;  %v1818_v49 = vmul.f32 %v1669_v20, %v5892_v59  ;;  %v1816_v20 = vmul.f32 %v5960_v4, %v5923_v58  ;;  %v1814_v4 = vmul.f32 %v5877_v38, %v5955_v3  ;;  %v1812_v38 = vmul.f32 %v5861_v30, %v5988_v55 }
 0x314   : > { %1695 = vmatpush.msra.mxu0 %v4799_v34 }
 0x316   : > { %1696 = vmatpush.msra.mxu0 %v4798_v51  ;;  %v1866_v33 = vpop.f32.mrf.mxu2 }
 0x317   : > { %4757 = vmatmul.msk.f32.gmra.mxu0 %vm1042_vm11, %v1117_v50  ;;  %v1115_v50 = vmul.f32 %v5887_v42, %v5897_v61 }
 0x319   : > { %v1123_v7 = vadd.f32 %v1115_v50, %v1041_v44 }
 0x31e   : > { %v1869_v15 = vpop.f32.mrf.mxu2 }
 0x31f   : > { %4758 = vmatmul.msk.f32.gmra.mxu0 %vm1042_vm11, %v1118_v54 }
 0x327   : > { %4759 = vmatmul.msk.f32.gmra.mxu0 %vm1042_vm11, %v1119_v31 }
 0x32f   : > { %4760 = vmatmul.msk.f32.gmra.mxu0 %vm1042_vm11, %v1120_v5 }
 0x337   : > { %4761 = vmatmul.msk.f32.gmra.mxu0 %vm1042_vm11, %v1121_v46 }
 0x33f   : > { %4762 = vmatmul.msk.f32.gmra.mxu0 %vm1042_vm11, %v1122_v17 }
 0x347   : > { %4763 = vmatmul.msk.f32.gmra.mxu0 %vm1042_vm11, %v1123_v7 }
 0x34f   : > { %4803 = vmatmul.msk.f32.vlgmr.msra.gmra.mxu0 %vm638_vm0, %v5578_v60 }
 0x357   : > { %4804 = vmatmul.msk.f32.gmra.mxu0 %vm638_vm0, %v5600_v14 }
 0x35f   : > { %4805 = vmatmul.msk.f32.gmra.mxu0 %vm638_vm0, %v5615_v35 }
 0x367   : > { %4806 = vmatmul.msk.f32.gmra.mxu0 %vm638_vm0, %v5631_v39 }
 0x36f   : > { %4807 = vmatmul.msk.f32.gmra.mxu0 %vm638_vm0, %v5620_v37 }
 0x377   : > { %4808 = vmatmul.msk.f32.gmra.mxu0 %vm638_vm0, %v5634_v40 }
 0x379   : > { %v1872_v42 = vpop.f32.mrf.mxu2 }
 0x37a   : > { %v1888_v48 = vmul.f32 %v1872_v42, %v5933_v26  ;;  %v1886_v42 = vmul.f32 %v1866_v33, %v5966_v13  ;;  %v1884_v33 = vmul.f32 %v1860_v22, %v5999_v56 }
 0x37f   : > { %4809 = vmatmul.msk.f32.gmra.mxu0 %vm638_vm0, %v5645_v47 }
 0x381   : > { %v1875_v21 = vpop.f32.mrf.mxu2 }
 0x382   : > { %v1889_v46 = vmul.f32 %v1875_v21, %v5917_v41  ;;  %v1887_v21 = vmul.f32 %v1869_v15, %v5949_v0 }
 0x384   : > { %v1897_v17 = vadd.f32 %v1889_v46, %v1816_v20 }
 0x387   : > { %4810 = vmatmul.msk.f32.gmra.mxu0 %vm638_vm0, %v5700_v9 }
 0x389   : > { %v1878_v54 = vpop.f32.mrf.mxu2 }
 0x38a   : > { %v1890_v34 = vmul.f32 %v1878_v54, %v5904_v18  ;;  %v1896_v54 = vadd.f32 %v1888_v48, %v1815_v62 }
 0x38c   : > { %v1278_v11 = vpop.f32.mrf.mxu0  ;;  %v1898_v16 = vadd.f32 %v1890_v34, %v1817_v43  ;;  %v1892_v43 = vadd.f32 %v1884_v33, %v1811_v32 }
 0x38d   : > { %v6083_v23 = vmul.f32 0.35355338, %v1278_v11  ;;  %v1895_v11 = vadd.f32 %v1887_v21, %v1814_v4 }
 0x38f   : > { %v1311_v31 = vsel %vm1310_vm12, %v6083_v23, -inf }
 0x390   : > { %1312 = vmax.xlane.f32.xlu1 %v1311_v31 }
 0x391   : > { %v1881_v10 = vpop.f32.mrf.mxu2 }
 0x392   : > { %v1891_v28 = vmul.f32 %v1881_v10, %v5897_v61 }
 0x394   : > { %v1899_v12 = vadd.f32 %v1891_v28, %v1818_v49  ;;  %v1281_v51 = vpop.f32.mrf.mxu0  ;;  %v1885_v49 = vmul.f32 %v1863_v24, %v5982_v36  ;;  %v1894_v28 = vadd.f32 %v1886_v42, %v1813_v45 }
 0x395   : > { %v6090_v5 = vmul.f32 0.35355338, %v1281_v51 }
 0x396   : > { %4827 = vmatpush.xpose.msk.msrb.mxu3 %vm1042_vm11, %v1899_v12  ;;  %v1893_v34 = vadd.f32 %v1885_v49, %v1812_v38 }
 0x397   : > { %v1314_v19 = vsel %vm1310_vm12, %v6090_v5, -inf }
 0x398   : > { %1315 = vmax.xlane.f32.xlu2 %v1314_v19 }
 0x39a   : > { %4828 = vmatpush.xpose.msk.msrb.mxu3 %vm1042_vm11, %v1898_v16 }
 0x39c   : > { %v1284_v50 = vpop.f32.mrf.mxu0 }
 0x39d   : > { %v6102_v44 = vmul.f32 0.35355338, %v1284_v50 }
 0x39e   : > { %4829 = vmatpush.xpose.msk.msrb.mxu3 %vm1042_vm11, %v1897_v17 }
 0x39f   : > { %v1317_v7 = vsel %vm1310_vm12, %v6102_v44, -inf }
 0x3a0   : > { %1318 = vmax.xlane.f32.xlu0 %v1317_v7 }
 0x3a2   : > { %4830 = vmatpush.xpose.msk.msrb.mxu3 %vm1042_vm11, %v1896_v54 }
 0x3a4   : > { %v1287_v31 = vpop.f32.mrf.mxu0 }
 0x3a5   : > { %v6114_v10 = vmul.f32 0.35355338, %v1287_v31 }
 0x3a6   : > { %4831 = vmatpush.xpose.msk.msrb.mxu3 %vm1042_vm11, %v1895_v11  ;;  %v5096_v11 = vld [vmem:[%s7545_s8 + $0x1] ss:$0 sm:$0xff] }
 0x3a7   : > { %v1320_v15 = vsel %vm1310_vm12, %v6114_v10, -inf }
 0x3a8   : > { %1321 = vmax.xlane.f32.xlu1 %v1320_v15 }
 0x3aa   : > { %4832 = vmatpush.xpose.msk.msrb.mxu3 %vm1042_vm11, %v1894_v28 }
 0x3ac   : > { %v1290_v12 = vpop.f32.mrf.mxu0 }
 0x3ad   : > { %v6126_v51 = vmul.f32 0.35355338, %v1290_v12 }
 0x3ae   : > { %4833 = vmatpush.xpose.msk.msrb.mxu3 %vm1042_vm11, %v1893_v34 }
 0x3af   : > { %v1323_v24 = vsel %vm1310_vm12, %v6126_v51, -inf }
 0x3b0   : > { %1324 = vmax.xlane.f32.xlu2 %v1323_v24 }
 0x3b2   : > { %4834 = vmatpush.xpose.msk.msrb.mxu3 %vm1042_vm11, %v1892_v43 }
 0x3b4   : > { %v1293_v30 = vpop.f32.mrf.mxu0 }
 0x3b5   : > { %v6134_v19 = vmul.f32 0.35355338, %v1293_v30 }
 0x3b7   : > { %v1326_v22 = vsel %vm1310_vm12, %v6134_v19, -inf }
 0x3b8   : > { %1327 = vmax.xlane.f32.xlu0 %v1326_v22 }
 0x3bc   : > { %v1296_v46 = vpop.f32.mrf.mxu0 }
 0x3bd   : > { %v6138_v16 = vmul.f32 0.35355338, %v1296_v46 }
 0x3bf   : > { %v1329_v25 = vsel %vm1310_vm12, %v6138_v16, -inf }
 0x3c0   : > { %1330 = vmax.xlane.f32.xlu1 %v1329_v25 }
 0x3c4   : > { %v1299_v20 = vpop.f32.mrf.mxu0 }
 0x3c5   : > { %v6142_v48 = vmul.f32 0.35355338, %v1299_v20 }
 0x3c7   : > { %v1332_v17 = vsel %vm1310_vm12, %v6142_v48, -inf }
 0x3c8   : > { %1333 = vmax.xlane.f32.xlu0 %v1332_v17 }
 0x3cc   : > { %v1698_v50 = vpop.f32.mrf.mxu0 }
 0x3cd   : > { %v1699_v25 = vadd.f32 %v5096_v11, %v1698_v50 }
 0x3d4   : > { %v1701_v62 = vpop.f32.mrf.mxu0 }
 0x3d5   : > { %v1702_v46 = vadd.f32 %v5096_v11, %v1701_v62 }
 0x3dc   : > { %v1704_v7 = vpop.f32.mrf.mxu0 }
 0x3dd   : > { %v1705_v22 = vadd.f32 %v5096_v11, %v1704_v7 }
 0x3e4   : > { %v1707_v21 = vpop.f32.mrf.mxu0 }
 0x3e5   : > { %v1708_v24 = vadd.f32 %v5096_v11, %v1707_v21 }
 0x3ec   : > { %v1710_v54 = vpop.f32.mrf.mxu0 }
 0x3ed   : > { %v1711_v34 = vadd.f32 %v5096_v11, %v1710_v54 }
 0x3f4   : > { %v1713_v4 = vpop.f32.mrf.mxu0 }
 0x3f5   : > { %v1714_v33 = vadd.f32 %v5096_v11, %v1713_v4 }
 0x3fc   : > { %v1716_v42 = vpop.f32.mrf.mxu0 }
 0x3fd   : > { %v1717_v38 = vadd.f32 %v5096_v11, %v1716_v42 }
 0x403   : > { %v1313_v31 = vpop.xlane.xlu1 %1312 }
 0x404   : > { %v1335_v45 = vsub.f32 %v6083_v23, %v1313_v31  ;;  %v1719_v15 = vpop.f32.mrf.mxu0 }
 0x405   : > { %v1720_v49 = vadd.f32 %v5096_v11, %v1719_v15 }
 0x406   : > { %v1343_v28 = vmul.f32 1.442695, %v1335_v45 }
 0x407   : > { %2221 = vmatpush.msrb.mxu0 %v1720_v49 }
 0x408   : > { %5126 = vpow2.f32 %v1343_v28 }
 0x409   : > { %2222 = vmatpush.msrb.mxu0 %v1717_v38 }
 0x40b   : > { %v1316_v12 = vpop.xlane.xlu2 %1315  ;;  %2223 = vmatpush.msrb.mxu0 %v1714_v33 }
 0x40c   : > { %v1336_v32 = vsub.f32 %v6090_v5, %v1316_v12 }
 0x40d   : > { %2224 = vmatpush.msrb.mxu0 %v1711_v34 }
 0x40e   : > { %v6151_v43 = vpop.eup %5126  ;;  %v1345_v30 = vmul.f32 1.442695, %v1336_v32 }
 0x40f   : > { %2225 = vmatpush.msrb.mxu0 %v1708_v24  ;;  %v1359_v23 = vsel %vm1310_vm12, %v6151_v43, 0.0 }
 0x410   : > { %5128 = vpow2.f32 %v1345_v30  ;;  %1360 = vadd.xlane.f32.xlu2 %v1359_v23 }
 0x411   : > { %2226 = vmatpush.msrb.mxu0 %v1705_v22 }
 0x413   : > { %v1319_v20 = vpop.xlane.xlu0 %1318  ;;  %2227 = vmatpush.msrb.mxu0 %v1702_v46 }
 0x414   : > { %v1337_v17 = vsub.f32 %v6102_v44, %v1319_v20 }
 0x415   : > { %2228 = vmatpush.msrb.mxu0 %v1699_v25 }
 0x416   : > { %v6156_v5 = vpop.eup %5128  ;;  %v1347_v21 = vmul.f32 1.442695, %v1337_v17 }
 0x417   : > { %v1362_v7 = vsel %vm1310_vm12, %v6156_v5, 0.0 }
 0x418   : > { %5130 = vpow2.f32 %v1347_v21  ;;  %1363 = vadd.xlane.f32.xlu1 %v1362_v7 }
 0x41b   : > { %v1322_v54 = vpop.xlane.xlu1 %1321 }
 0x41c   : > { %v1338_v4 = vsub.f32 %v6114_v10, %v1322_v54 }
 0x41e   : > { %v6161_v42 = vpop.eup %5130  ;;  %v1349_v62 = vmul.f32 1.442695, %v1338_v4 }
 0x41f   : > { %v1365_v50 = vsel %vm1310_vm12, %v6161_v42, 0.0 }
 0x420   : > { %5132 = vpow2.f32 %v1349_v62  ;;  %1366 = vadd.xlane.f32.xlu2 %v1365_v50 }
 0x423   : > { %v1325_v44 = vpop.xlane.xlu2 %1324 }
 0x424   : > { %v1339_v11 = vsub.f32 %v6126_v51, %v1325_v44 }
 0x426   : > { %v6166_v31 = vpop.eup %5132  ;;  %v1351_v45 = vmul.f32 1.442695, %v1339_v11 }
 0x427   : > { %v1368_v15 = vsel %vm1310_vm12, %v6166_v31, 0.0 }
 0x428   : > { %5134 = vpow2.f32 %v1351_v45  ;;  %1369 = vadd.xlane.f32.xlu0 %v1368_v15 }
 0x42b   : > { %v1328_v10 = vpop.xlane.xlu0 %1327 }
 0x42c   : > { %v1340_v49 = vsub.f32 %v6134_v19, %v1328_v10 }
 0x42e   : > { %v6171_v28 = vpop.eup %5134  ;;  %v1353_v38 = vmul.f32 1.442695, %v1340_v49 }
 0x42f   : > { %v1371_v33 = vsel %vm1310_vm12, %v6171_v28, 0.0 }
 0x430   : > { %5136 = vpow2.f32 %v1353_v38  ;;  %1372 = vadd.xlane.f32.xlu1 %v1371_v33 }
 0x433   : > { %v1331_v51 = vpop.xlane.xlu1 %1330 }
 0x434   : > { %v1341_v34 = vsub.f32 %v6138_v16, %v1331_v51 }
 0x436   : > { %v6176_v12 = vpop.eup %5136  ;;  %v1355_v32 = vmul.f32 1.442695, %v1341_v34 }
 0x437   : > { %v1374_v24 = vsel %vm1310_vm12, %v6176_v12, 0.0 }
 0x438   : > { %5138 = vpow2.f32 %v1355_v32  ;;  %1375 = vadd.xlane.f32.xlu2 %v1374_v24 }
 0x43b   : > { %v1334_v19 = vpop.xlane.xlu0 %1333 }
 0x43c   : > { %v1342_v30 = vsub.f32 %v6142_v48, %v1334_v19 }
 0x43e   : > { %v6181_v22 = vpop.eup %5138  ;;  %v1357_v23 = vmul.f32 1.442695, %v1342_v30 }
 0x43f   : > { %v1377_v46 = vsel %vm1310_vm12, %v6181_v22, 0.0 }
 0x440   : > { %5140 = vpow2.f32 %v1357_v23  ;;  %1378 = vadd.xlane.f32.xlu0 %v1377_v46 }
 0x446   : > { %v6185_v16 = vpop.eup %5140 }
 0x447   : > { %v1380_v25 = vsel %vm1310_vm12, %v6185_v16, 0.0 }
 0x448   : > { %1381 = vadd.xlane.f32.xlu1 %v1380_v25 }
 0x483   : > { %v1361_v20 = vpop.xlane.xlu2 %1360 }
 0x484   : > { %5142 = vrcp.f32 %v1361_v20  ;;  %v1394_v54 = vand.u32 2147483648, %v1361_v20  ;;  %v1392_v62 = vand.u32 2147483647, %v1361_v20  ;;  %vm1388_vm14 = vweird.f32 %v1361_v20 }
 0x486   : > { %v1395_v11 = vor.u32 1.1754944e-38, %v1394_v54  ;;  %vm1393_vm1 = vcmp.eq.f32.partialorder %v1392_v62, 8.507059e+37 }
 0x48a   : > { %v5143_v17 = vpop.eup %5142 }
 0x48b   : > { %v1384_v21 = vmul.f32 %v5143_v17, %v1361_v20  ;;  %v1364_v7 = vpop.xlane.xlu1 %1363  ;;  %vm1389_vm13 = vweird.f32 %v5143_v17 }
 0x48c   : > { %5144 = vrcp.f32 %v1364_v7  ;;  %vm1390_vm15 = vmor %vm1388_vm14, %vm1389_vm13  ;;  %v1409_v51 = vand.u32 2147483648, %v1364_v7  ;;  %v1407_v32 = vand.u32 2147483647, %v1364_v7  ;;  %vm1403_vm3 = vweird.f32 %v1364_v7 }
 0x48d   : > { %v1385_v48 = vsub.f32 1.0, %v1384_v21 }
 0x48e   : > { %v1410_v30 = vor.u32 1.1754944e-38, %v1409_v51  ;;  %vm1408_vm5 = vcmp.eq.f32.partialorder %v1407_v32, 8.507059e+37 }
 0x48f   : > { %v1386_v4 = vmul.f32 %v5143_v17, %v1385_v48 }
 0x491   : > { %v1387_v50 = vadd.f32 %v5143_v17, %v1386_v4 }
 0x492   : > { %v5145_v44 = vpop.eup %5144 }
 0x493   : > { %v1391_v45 = vsel %vm1390_vm15, %v5143_v17, %v1387_v50  ;;  %v1399_v15 = vmul.f32 %v5145_v44, %v1364_v7  ;;  %v1367_v10 = vpop.xlane.xlu2 %1366  ;;  %vm1404_vm2 = vweird.f32 %v5145_v44 }
 0x494   : > { %v1396_v49 = vsel %vm1393_vm1, %v1395_v11, %v1391_v45  ;;  %5146 = vrcp.f32 %v1367_v10  ;;  %vm1405_vm4 = vmor %vm1403_vm3, %vm1404_vm2  ;;  %v1424_v21 = vand.u32 2147483648, %v1367_v10  ;;  %v1422_v54 = vand.u32 2147483647, %v1367_v10 }
 0x495   : > { %v1400_v38 = vsub.f32 1.0, %v1399_v15  ;;  %v1397_v33 = vmul.f32 %v6151_v43, %v1396_v49  ;;  %vm1418_vm7 = vweird.f32 %v1367_v10 }
 0x496   : > { %v1425_v62 = vor.u32 1.1754944e-38, %v1424_v21  ;;  %vm1423_vm9 = vcmp.eq.f32.partialorder %v1422_v54, 8.507059e+37 }
 0x497   : > { %v1401_v34 = vmul.f32 %v5145_v44, %v1400_v38  ;;  %4764 = vmatmul.msk.f32.vlgmr.msra.gmra.mxu1 %vm1310_vm12, %v1397_v33 }
 0x499   : > { %v1402_v24 = vadd.f32 %v5145_v44, %v1401_v34 }
 0x49a   : > { %v5147_v19 = vpop.eup %5146 }
 0x49b   : > { %v1414_v23 = vmul.f32 %v5147_v19, %v1367_v10  ;;  %v1370_v46 = vpop.xlane.xlu0 %1369  ;;  %v1406_v25 = vsel %vm1405_vm4, %v5145_v44, %v1402_v24  ;;  %vm1419_vm6 = vweird.f32 %v5147_v19 }
 0x49c   : > { %5148 = vrcp.f32 %v1370_v46  ;;  %v1411_v20 = vsel %vm1408_vm5, %v1410_v30, %v1406_v25  ;;  %vm1420_vm8 = vmor %vm1418_vm7, %vm1419_vm6  ;;  %v1439_v49 = vand.u32 2147483648, %v1370_v46  ;;  %v1437_v33 = vand.u32 2147483647, %v1370_v46 }
 0x49d   : > { %v1415_v17 = vsub.f32 1.0, %v1414_v23  ;;  %v1412_v43 = vmul.f32 %v6156_v5, %v1411_v20  ;;  %vm1433_vm13 = vweird.f32 %v1370_v46 }
 0x49e   : > { %v1440_v34 = vor.u32 1.1754944e-38, %v1439_v49  ;;  %vm1438_vm15 = vcmp.eq.f32.partialorder %v1437_v33, 8.507059e+37 }
 0x49f   : > { %v1416_v48 = vmul.f32 %v5147_v19, %v1415_v17  ;;  %4765 = vmatmul.msk.f32.gmra.mxu1 %vm1310_vm12, %v1412_v43 }
 0x4a1   : > { %v1417_v7 = vadd.f32 %v5147_v19, %v1416_v48 }
 0x4a2   : > { %v5149_v4 = vpop.eup %5148 }
 0x4a3   : > { %v1429_v50 = vmul.f32 %v5149_v4, %v1370_v46  ;;  %v1373_v11 = vpop.xlane.xlu1 %1372  ;;  %v1421_v44 = vsel %vm1420_vm8, %v5147_v19, %v1417_v7  ;;  %vm1434_vm10 = vweird.f32 %v5149_v4 }
 0x4a4   : > { %5150 = vrcp.f32 %v1373_v11  ;;  %v1426_v45 = vsel %vm1423_vm9, %v1425_v62, %v1421_v44  ;;  %vm1435_vm14 = vmor %vm1433_vm13, %vm1434_vm10  ;;  %v1454_v25 = vand.u32 2147483648, %v1373_v11  ;;  %v1452_v17 = vand.u32 2147483647, %v1373_v11 }
 0x4a5   : > { %v1430_v15 = vsub.f32 1.0, %v1429_v50  ;;  %v1427_v5 = vmul.f32 %v6161_v42, %v1426_v45  ;;  %vm1448_vm2 = vweird.f32 %v1373_v11 }
 0x4a6   : > { %v1455_v21 = vor.u32 1.1754944e-38, %v1454_v25  ;;  %vm1453_vm4 = vcmp.eq.f32.partialorder %v1452_v17, 8.507059e+37 }
 0x4a7   : > { %v1431_v38 = vmul.f32 %v5149_v4, %v1430_v15  ;;  %4766 = vmatmul.msk.f32.gmra.mxu1 %vm1310_vm12, %v1427_v5 }
 0x4a9   : > { %v1432_v10 = vadd.f32 %v5149_v4, %v1431_v38 }
 0x4aa   : > { %v5151_v51 = vpop.eup %5150 }
 0x4ab   : > { %v1444_v32 = vmul.f32 %v5151_v51, %v1373_v11  ;;  %v1376_v24 = vpop.xlane.xlu2 %1375  ;;  %v1436_v19 = vsel %vm1435_vm14, %v5149_v4, %v1432_v10  ;;  %vm1449_vm1 = vweird.f32 %v5151_v51 }
 0x4ac   : > { %5152 = vrcp.f32 %v1376_v24  ;;  %v1441_v30 = vsel %vm1438_vm15, %v1440_v34, %v1436_v19  ;;  %vm1450_vm3 = vmor %vm1448_vm2, %vm1449_vm1  ;;  %v1469_v50 = vand.u32 2147483648, %v1376_v24  ;;  %v1467_v45 = vand.u32 2147483647, %v1376_v24 }
 0x4ad   : > { %v1445_v23 = vsub.f32 1.0, %v1444_v32  ;;  %v1442_v42 = vmul.f32 %v6166_v31, %v1441_v30  ;;  %vm1463_vm6 = vweird.f32 %v1376_v24 }
 0x4ae   : > { %v1470_v5 = vor.u32 1.1754944e-38, %v1469_v50  ;;  %vm1468_vm8 = vcmp.eq.f32.partialorder %v1467_v45, 8.507059e+37  ;;  %v1568_v45 = vld [vmem:[%s7549_s12] sm:$0xff] }
 0x4af   : > { %v1446_v20 = vmul.f32 %v5151_v51, %v1445_v23  ;;  %4767 = vmatmul.msk.f32.gmra.mxu1 %vm1310_vm12, %v1442_v42  ;;  %2360 = vmatpush.msra.mxu2 %v1568_v45 }
 0x4b1   : > { %v1447_v46 = vadd.f32 %v5151_v51, %v1446_v20 }
 0x4b2   : > { %v5153_v43 = vpop.eup %5152 }
 0x4b3   : > { %v1459_v48 = vmul.f32 %v5153_v43, %v1376_v24  ;;  %v1379_v54 = vpop.xlane.xlu0 %1378  ;;  %v1451_v7 = vsel %vm1450_vm3, %v5151_v51, %v1447_v46  ;;  %vm1464_vm5 = vweird.f32 %v5153_v43 }
 0x4b4   : > { %5154 = vrcp.f32 %v1379_v54  ;;  %v1456_v4 = vsel %vm1453_vm4, %v1455_v21, %v1451_v7  ;;  %vm1465_vm7 = vmor %vm1463_vm6, %vm1464_vm5  ;;  %v1484_v34 = vand.u32 2147483648, %v1379_v54  ;;  %v1482_v19 = vand.u32 2147483647, %v1379_v54 }
 0x4b5   : > { %v1460_v62 = vsub.f32 1.0, %v1459_v48  ;;  %v1457_v31 = vmul.f32 %v6171_v28, %v1456_v4  ;;  %vm1478_vm10 = vweird.f32 %v1379_v54 }
 0x4b6   : > { %v1485_v23 = vor.u32 1.1754944e-38, %v1484_v34  ;;  %vm1483_vm14 = vcmp.eq.f32.partialorder %v1482_v19, 8.507059e+37 }
 0x4b7   : > { %v1461_v44 = vmul.f32 %v5153_v43, %v1460_v62  ;;  %4768 = vmatmul.msk.f32.gmra.mxu1 %vm1310_vm12, %v1457_v31 }
 0x4b9   : > { %v1462_v11 = vadd.f32 %v5153_v43, %v1461_v44 }
 0x4ba   : > { %v5155_v15 = vpop.eup %5154 }
 0x4bb   : > { %v1474_v49 = vmul.f32 %v5155_v15, %v1379_v54  ;;  %v1382_v38 = vpop.xlane.xlu1 %1381  ;;  %v1466_v33 = vsel %vm1465_vm7, %v5153_v43, %v1462_v11  ;;  %vm1479_vm9 = vweird.f32 %v5155_v15 }
 0x4bc   : > { %5156 = vrcp.f32 %v1382_v38  ;;  %v1471_v10 = vsel %vm1468_vm8, %v1470_v5, %v1466_v33  ;;  %vm1480_vm13 = vmor %vm1478_vm10, %vm1479_vm9  ;;  %v1499_v43 = vand.u32 2147483648, %v1382_v38  ;;  %v1497_v21 = vand.u32 2147483647, %v1382_v38 }
 0x4bd   : > { %v1475_v51 = vsub.f32 1.0, %v1474_v49  ;;  %v1472_v28 = vmul.f32 %v6176_v12, %v1471_v10  ;;  %vm1493_vm1 = vweird.f32 %v1382_v38 }
 0x4be   : > { %v1500_v54 = vor.u32 1.1754944e-38, %v1499_v43  ;;  %vm1498_vm3 = vcmp.eq.f32.partialorder %v1497_v21, 8.507059e+37 }
 0x4bf   : > { %v1476_v32 = vmul.f32 %v5155_v15, %v1475_v51  ;;  %4769 = vmatmul.msk.f32.gmra.mxu1 %vm1310_vm12, %v1472_v28 }
 0x4c1   : > { %v1477_v24 = vadd.f32 %v5155_v15, %v1476_v32 }
 0x4c2   : > { %v5157_v30 = vpop.eup %5156 }
 0x4c3   : > { %v1489_v42 = vmul.f32 %v5157_v30, %v1382_v38  ;;  %v1481_v25 = vsel %vm1480_vm13, %v5155_v15, %v1477_v24  ;;  %vm1494_vm15 = vweird.f32 %v5157_v30  ;;  %v7582_v15 = vld [vmem:[#allocation4_spill] sm:$0xff] }
 0x4c4   : > { %v1486_v20 = vsel %vm1483_vm14, %v1485_v23, %v1481_v25  ;;  %vm1495_vm2 = vmor %vm1493_vm1, %vm1494_vm15 }
 0x4c5   : > { %v1490_v17 = vsub.f32 1.0, %v1489_v42  ;;  %v1487_v46 = vmul.f32 %v6181_v22, %v1486_v20  ;;  %v5094_v22 = vld [vmem:[%s7578_s4 + $0x1] ss:$0 sm:$0xff] }
 0x4c6   : > { %v1597_v31 = vadd.f32 %v5094_v22, %v5804_v52  ;;  %v1600_v50 = vadd.f32 %v5094_v22, %v5810_v27  ;;  %v1603_v44 = vadd.f32 %v5094_v22, %v5817_v63  ;;  %v1609_v52 = vadd.f32 %v5094_v22, %v5829_v53  ;;  %v6223_v27 = vld [vmem:[%s7548_s11] sm:$0xff] }
 0x4c7   : > { %v1491_v12 = vmul.f32 %v5157_v30, %v1490_v17  ;;  %4770 = vmatmul.msk.f32.gmra.mxu1 %vm1310_vm12, %v1487_v46  ;;  %2586 = vmatpush.msrb.mxu2 %v6223_v27  ;;  %v1612_v63 = vadd.f32 %v5094_v22, %v5832_v8  ;;  %v6232_v53 = vadd.f32 %v5094_v22, %v7582_v15 }
 0x4c8   : > { %v1722_v32 = vmul.f32 %v1597_v31, %v6007_v57  ;;  %v1723_v23 = vmul.f32 %v1600_v50, %v5988_v55  ;;  %v1724_v17 = vmul.f32 %v1603_v44, %v5974_v1  ;;  %v4870_v1 = vld [vmem:[%s7573_s28 + $0x50] sm:$0xff] }
 0x4c9   : > { %v1492_v48 = vadd.f32 %v5157_v30, %v1491_v12 }
 0x4cb   : > { %v1496_v7 = vsel %vm1495_vm2, %v5157_v30, %v1492_v48 }
 0x4cc   : > { %v1501_v4 = vsel %vm1498_vm3, %v1500_v54, %v1496_v7  ;;  %v4868_v54 = vld [vmem:[%s7573_s28 + $0x40] sm:$0xff] }
 0x4cd   : > { %v1502_v62 = vmul.f32 %v6185_v16, %v1501_v4  ;;  %v1606_v16 = vadd.f32 %v5094_v22, %v5823_v2  ;;  %v7581_v2 = vld [vmem:[#allocation3_spill] sm:$0xff]  ;;  %v1727_v4 = vmul.f32 %v1612_v63, %v5923_v58 }
 0x4ce   : > { %v1615_v11 = vadd.f32 %v5094_v22, %v7581_v2 }
 0x4cf   : > { %4771 = vmatmul.msk.f32.gmra.mxu1 %vm1310_vm12, %v1502_v62  ;;  %v1725_v57 = vmul.f32 %v1606_v16, %v5955_v3 }
 0x4d7   : > { %4811 = vmatmul.msk.f32.vlgmr.msrb.gmra.mxu1 %vm1042_vm11, %v1597_v31 }
 0x4df   : > { %4812 = vmatmul.msk.f32.gmra.mxu1 %vm1042_vm11, %v1600_v50 }
 0x4e7   : > { %4813 = vmatmul.msk.f32.gmra.mxu1 %vm1042_vm11, %v1603_v44 }
 0x4ef   : > { %4814 = vmatmul.msk.f32.gmra.mxu1 %vm1042_vm11, %v1606_v16  ;;  %v1729_v16 = vmul.f32 %v6232_v53, %v5892_v59 }
 0x4f7   : > { %4815 = vmatmul.msk.f32.gmra.mxu1 %vm1042_vm11, %v1609_v52 }
 0x4ff   : > { %4816 = vmatmul.msk.f32.gmra.mxu1 %vm1042_vm11, %v1612_v63 }
 0x507   : > { %4817 = vmatmul.msk.f32.gmra.mxu1 %vm1042_vm11, %v1615_v11 }
 0x50f   : > { %4818 = vmatmul.msk.f32.gmra.mxu1 %vm1042_vm11, %v6232_v53 }
 0x514   : > { %v1544_v5 = vpop.f32.mrf.mxu1 }
 0x515   : > { %4860 = vmatmul.msk.f32.vlgmr.msra.gmra.mxu2 %vm1042_vm11, %v1544_v5 }
 0x51c   : > { %v1547_v49 = vpop.f32.mrf.mxu1 }
 0x51d   : > { %4861 = vmatmul.msk.f32.gmra.mxu2 %vm1042_vm11, %v1547_v49 }
 0x524   : > { %v1550_v38 = vpop.f32.mrf.mxu1 }
 0x525   : > { %4862 = vmatmul.msk.f32.gmra.mxu2 %vm1042_vm11, %v1550_v38 }
 0x52c   : > { %v1553_v8 = vpop.f32.mrf.mxu1 }
 0x52d   : > { %4863 = vmatmul.msk.f32.gmra.mxu2 %vm1042_vm11, %v1553_v8 }
 0x534   : > { %v1556_v33 = vpop.f32.mrf.mxu1 }
 0x535   : > { %4864 = vmatmul.msk.f32.gmra.mxu2 %vm1042_vm11, %v1556_v33 }
 0x53c   : > { %v1559_v10 = vpop.f32.mrf.mxu1 }
 0x53d   : > { %4865 = vmatmul.msk.f32.gmra.mxu2 %vm1042_vm11, %v1559_v10 }
 0x544   : > { %v1562_v51 = vpop.f32.mrf.mxu1 }
 0x545   : > { %4866 = vmatmul.msk.f32.gmra.mxu2 %vm1042_vm11, %v1562_v51 }
 0x54c   : > { %v1565_v28 = vpop.f32.mrf.mxu1 }
 0x54d   : > { %4867 = vmatmul.msk.f32.gmra.mxu2 %vm1042_vm11, %v1565_v28 }
 0x554   : > { %v1771_v34 = vpop.f32.mrf.mxu1 }
 0x555   : > { %v1795_v19 = vmul.f32 %v1771_v34, %v5999_v56 }
 0x557   : > { %v1803_v24 = vadd.f32 %v1795_v19, %v1722_v32 }
 0x559   : > { %4835 = vmatmul.msk.f32.vlgmr.msrb.gmra.mxu3 %vm1042_vm11, %v1803_v24 }
 0x55c   : > { %v1774_v30 = vpop.f32.mrf.mxu1 }
 0x55d   : > { %v1796_v42 = vmul.f32 %v1774_v30, %v5982_v36  ;;  %v4871_v36 = vld [vmem:[%s7573_s28 + $0x58] sm:$0xff] }
 0x55e   : > { %2408 = vmatpush.msra.mxu3 %v4871_v36 }
 0x55f   : > { %v1804_v25 = vadd.f32 %v1796_v42, %v1723_v23  ;;  %v5097_v23 = vld [vmem:[%s7578_s4 + $0x2] ss:$0 sm:$0xff] }
 0x560   : > { %2409 = vmatpush.msra.mxu3 %v4870_v1 }
 0x561   : > { %4836 = vmatmul.msk.f32.gmra.mxu3 %vm1042_vm11, %v1804_v25 }
 0x564   : > { %v1777_v20 = vpop.f32.mrf.mxu1 }
 0x565   : > { %v1797_v46 = vmul.f32 %v1777_v20, %v5966_v13  ;;  %v4869_v13 = vld [vmem:[%s7573_s28 + $0x48] sm:$0xff] }
 0x566   : > { %2410 = vmatpush.msra.mxu3 %v4869_v13 }
 0x567   : > { %v1805_v43 = vadd.f32 %v1797_v46, %v1724_v17 }
 0x568   : > { %2411 = vmatpush.msra.mxu3 %v4868_v54 }
 0x569   : > { %4837 = vmatmul.msk.f32.gmra.mxu3 %vm1042_vm11, %v1805_v43 }
 0x56a   : > { %2675 = vmatpush.msrb.mxu3 %v6223_v27 }
 0x56c   : > { %v1780_v56 = vpop.f32.mrf.mxu1 }
 0x56d   : > { %v1798_v12 = vmul.f32 %v1780_v56, %v5949_v0  ;;  %v1726_v0 = vmul.f32 %v1609_v52, %v5941_v6  ;;  %v1728_v6 = vmul.f32 %v1615_v11, %v5910_v29 }
 0x56f   : > { %v1806_v21 = vadd.f32 %v1798_v12, %v1725_v57 }
 0x571   : > { %4838 = vmatmul.msk.f32.gmra.mxu3 %vm1042_vm11, %v1806_v21 }
 0x574   : > { %v1783_v55 = vpop.f32.mrf.mxu1 }
 0x575   : > { %v1799_v3 = vmul.f32 %v1783_v55, %v5933_v26 }
 0x577   : > { %v1807_v48 = vadd.f32 %v1799_v3, %v1726_v0 }
 0x579   : > { %4839 = vmatmul.msk.f32.gmra.mxu3 %vm1042_vm11, %v1807_v48 }
 0x57c   : > { %v1786_v7 = vpop.f32.mrf.mxu1 }
 0x57d   : > { %v1800_v62 = vmul.f32 %v1786_v7, %v5917_v41 }
 0x57f   : > { %v1808_v22 = vadd.f32 %v1800_v62, %v1727_v4 }
 0x581   : > { %4840 = vmatmul.msk.f32.gmra.mxu3 %vm1042_vm11, %v1808_v22 }
 0x584   : > { %v1789_v26 = vpop.f32.mrf.mxu1 }
 0x585   : > { %v1801_v31 = vmul.f32 %v1789_v26, %v5904_v18 }
 0x587   : > { %v1809_v50 = vadd.f32 %v1801_v31, %v1728_v6 }
 0x589   : > { %4841 = vmatmul.msk.f32.gmra.mxu3 %vm1042_vm11, %v1809_v50 }
 0x58c   : > { %v1792_v44 = vpop.f32.mrf.mxu1 }
 0x58d   : > { %v1802_v45 = vmul.f32 %v1792_v44, %v5897_v61 }
 0x58f   : > { %v1810_v58 = vadd.f32 %v1802_v45, %v1729_v16 }
 0x591   : > { %4842 = vmatmul.msk.f32.gmra.mxu3 %vm1042_vm11, %v1810_v58 }
 0x599   : > { %4873 = vmatmul.msk.f32.vlgmr.msra.gmra.mxu3 %vm638_vm0, %v5578_v60 }
 0x5a1   : > { %4874 = vmatmul.msk.f32.gmra.mxu3 %vm638_vm0, %v5600_v14 }
 0x5a9   : > { %4875 = vmatmul.msk.f32.gmra.mxu3 %vm638_vm0, %v5615_v35 }
 0x5b1   : > { %4876 = vmatmul.msk.f32.gmra.mxu3 %vm638_vm0, %v5631_v39 }
 0x5b9   : > { %4877 = vmatmul.msk.f32.gmra.mxu3 %vm638_vm0, %v5620_v37 }
 0x5c1   : > { %4878 = vmatmul.msk.f32.gmra.mxu3 %vm638_vm0, %v5634_v40 }
 0x5c9   : > { %4879 = vmatmul.msk.f32.gmra.mxu3 %vm638_vm0, %v5645_v47 }
 0x5d1   : > { %4880 = vmatmul.msk.f32.gmra.mxu3 %vm638_vm0, %v5700_v9 }
 0x5dc   : > { %v1965_v59 = vpop.f32.mrf.mxu3 }
 0x5dd   : > { %v1989_v61 = vmul.f32 0.35355338, %v1965_v59 }
 0x5df   : > { %v1997_v18 = vsel %vm1310_vm12, %v1989_v61, -inf }
 0x5e0   : > { %1998 = vmax.xlane.f32.xlu2 %v1997_v18 }
 0x5e4   : > { %v1968_v29 = vpop.f32.mrf.mxu3 }
 0x5e5   : > { %v1990_v41 = vmul.f32 0.35355338, %v1968_v29 }
 0x5e7   : > { %v2000_v52 = vsel %vm1310_vm12, %v1990_v41, -inf }
 0x5e8   : > { %2001 = vmax.xlane.f32.xlu0 %v2000_v52 }
 0x5ec   : > { %v1971_v63 = vpop.f32.mrf.mxu3 }
 0x5ed   : > { %v1991_v2 = vmul.f32 0.35355338, %v1971_v63 }
 0x5ef   : > { %v2003_v11 = vsel %vm1310_vm12, %v1991_v2, -inf }
 0x5f0   : > { %2004 = vmax.xlane.f32.xlu1 %v2003_v11 }
 0x5f4   : > { %v1974_v15 = vpop.f32.mrf.mxu3 }
 0x5f5   : > { %v6301_v53 = vmul.f32 0.35355338, %v1974_v15 }
 0x5f7   : > { %v2006_v5 = vsel %vm1310_vm12, %v6301_v53, -inf }
 0x5f8   : > { %2007 = vmax.xlane.f32.xlu2 %v2006_v5 }
 0x5fc   : > { %v1977_v49 = vpop.f32.mrf.mxu3 }
 0x5fd   : > { %v6305_v38 = vmul.f32 0.35355338, %v1977_v49 }
 0x5ff   : > { %v2009_v8 = vsel %vm1310_vm12, %v6305_v38, -inf }
 0x600   : > { %2010 = vmax.xlane.f32.xlu0 %v2009_v8 }
 0x604   : > { %v1980_v33 = vpop.f32.mrf.mxu3 }
 0x605   : > { %v6309_v10 = vmul.f32 0.35355338, %v1980_v33 }
 0x607   : > { %v2012_v51 = vsel %vm1310_vm12, %v6309_v10, -inf }
 0x608   : > { %2013 = vmax.xlane.f32.xlu1 %v2012_v51 }
 0x60c   : > { %v1983_v28 = vpop.f32.mrf.mxu3 }
 0x60d   : > { %v6313_v34 = vmul.f32 0.35355338, %v1983_v28 }
 0x60f   : > { %v2015_v32 = vsel %vm1310_vm12, %v6313_v34, -inf }
 0x610   : > { %2016 = vmax.xlane.f32.xlu2 %v2015_v32 }
 0x614   : > { %v1986_v19 = vpop.f32.mrf.mxu3 }
 0x615   : > { %v6317_v24 = vmul.f32 0.35355338, %v1986_v19 }
 0x617   : > { %v2018_v30 = vsel %vm1310_vm12, %v6317_v24, -inf }
 0x618   : > { %2019 = vmax.xlane.f32.xlu1 %v2018_v30 }
 0x61c   : > { %v2413_v42 = vpop.f32.mrf.mxu3 }
 0x61d   : > { %v6324_v25 = vadd.f32 %v5097_v23, %v2413_v42 }
 0x61f   : > { %4907 = vmatmul.msk.f32.vlgmr.msrb.gmra.mxu2 %vm1042_vm11, %v6324_v25 }
 0x624   : > { %v2416_v20 = vpop.f32.mrf.mxu3 }
 0x625   : > { %v6328_v17 = vadd.f32 %v5097_v23, %v2416_v20 }
 0x627   : > { %4908 = vmatmul.msk.f32.gmra.mxu2 %vm1042_vm11, %v6328_v17 }
 0x62c   : > { %v2419_v46 = vpop.f32.mrf.mxu3 }
 0x62d   : > { %v6332_v43 = vadd.f32 %v5097_v23, %v2419_v46 }
 0x62f   : > { %4909 = vmatmul.msk.f32.gmra.mxu2 %vm1042_vm11, %v6332_v43 }
 0x634   : > { %v2422_v56 = vpop.f32.mrf.mxu3 }
 0x635   : > { %v6336_v57 = vadd.f32 %v5097_v23, %v2422_v56 }
 0x637   : > { %4910 = vmatmul.msk.f32.gmra.mxu2 %vm1042_vm11, %v6336_v57 }
 0x63c   : > { %v2425_v12 = vpop.f32.mrf.mxu3 }
 0x63d   : > { %v6340_v21 = vadd.f32 %v5097_v23, %v2425_v12 }
 0x63f   : > { %4911 = vmatmul.msk.f32.gmra.mxu2 %vm1042_vm11, %v6340_v21 }
 0x644   : > { %v2428_v36 = vpop.f32.mrf.mxu3 }
 0x645   : > { %v6344_v1 = vadd.f32 %v5097_v23, %v2428_v36 }
 0x647   : > { %4912 = vmatmul.msk.f32.gmra.mxu2 %vm1042_vm11, %v6344_v1 }
 0x64c   : > { %v2431_v13 = vpop.f32.mrf.mxu3 }
 0x64d   : > { %v6348_v55 = vadd.f32 %v5097_v23, %v2431_v13 }
 0x64f   : > { %4913 = vmatmul.msk.f32.gmra.mxu2 %vm1042_vm11, %v6348_v55 }
 0x653   : > { %v1999_v0 = vpop.xlane.xlu2 %1998 }
 0x654   : > { %v2021_v3 = vsub.f32 %v1989_v61, %v1999_v0  ;;  %v2434_v48 = vpop.f32.mrf.mxu3 }
 0x655   : > { %v6352_v54 = vadd.f32 %v5097_v23, %v2434_v48 }
 0x656   : > { %v2029_v7 = vmul.f32 1.442695, %v2021_v3 }
 0x657   : > { %4914 = vmatmul.msk.f32.gmra.mxu2 %vm1042_vm11, %v6352_v54 }
 0x658   : > { %5158 = vpow2.f32 %v2029_v7 }
 0x65b   : > { %v2002_v4 = vpop.xlane.xlu0 %2001 }
 0x65c   : > { %v2022_v62 = vsub.f32 %v1990_v41, %v2002_v4 }
 0x65e   : > { %v6356_v22 = vpop.eup %5158  ;;  %v2031_v26 = vmul.f32 1.442695, %v2022_v62 }
 0x65f   : > { %v2045_v6 = vsel %vm1310_vm12, %v6356_v22, 0.0 }
 0x660   : > { %5160 = vpow2.f32 %v2031_v26  ;;  %2046 = vadd.xlane.f32.xlu0 %v2045_v6 }
 0x663   : > { %v2005_v31 = vpop.xlane.xlu1 %2004 }
 0x664   : > { %v2023_v50 = vsub.f32 %v1991_v2, %v2005_v31 }
 0x666   : > { %v6360_v44 = vpop.eup %5160  ;;  %v2033_v16 = vmul.f32 1.442695, %v2023_v50 }
 0x667   : > { %v2048_v45 = vsel %vm1310_vm12, %v6360_v44, 0.0 }
 0x668   : > { %5162 = vpow2.f32 %v2033_v16  ;;  %2049 = vadd.xlane.f32.xlu2 %v2048_v45 }
 0x66b   : > { %v2008_v58 = vpop.xlane.xlu2 %2007 }
 0x66c   : > { %v2024_v59 = vsub.f32 %v6301_v53, %v2008_v58 }
 0x66e   : > { %v6365_v61 = vpop.eup %5162  ;;  %v2035_v18 = vmul.f32 1.442695, %v2024_v59 }
 0x66f   : > { %v2051_v29 = vsel %vm1310_vm12, %v6365_v61, 0.0 }
 0x670   : > { %5164 = vpow2.f32 %v2035_v18  ;;  %2052 = vadd.xlane.f32.xlu0 %v2051_v29 }
 0x673   : > { %v2011_v41 = vpop.xlane.xlu0 %2010 }
 0x674   : > { %v2025_v52 = vsub.f32 %v6305_v38, %v2011_v41 }
 0x676   : > { %v6370_v63 = vpop.eup %5164  ;;  %v2037_v2 = vmul.f32 1.442695, %v2025_v52 }
 0x677   : > { %v2054_v11 = vsel %vm1310_vm12, %v6370_v63, 0.0 }
 0x678   : > { %5166 = vpow2.f32 %v2037_v2  ;;  %2055 = vadd.xlane.f32.xlu1 %v2054_v11 }
 0x67b   : > { %v2014_v15 = vpop.xlane.xlu1 %2013 }
 0x67c   : > { %v2026_v53 = vsub.f32 %v6309_v10, %v2014_v15 }
 0x67e   : > { %v6375_v5 = vpop.eup %5166  ;;  %v2039_v49 = vmul.f32 1.442695, %v2026_v53 }
 0x67f   : > { %v2057_v8 = vsel %vm1310_vm12, %v6375_v5, 0.0 }
 0x680   : > { %5168 = vpow2.f32 %v2039_v49  ;;  %2058 = vadd.xlane.f32.xlu2 %v2057_v8 }
 0x683   : > { %v2017_v38 = vpop.xlane.xlu2 %2016 }
 0x684   : > { %v2027_v33 = vsub.f32 %v6313_v34, %v2017_v38 }
 0x686   : > { %v6380_v51 = vpop.eup %5168  ;;  %v2041_v28 = vmul.f32 1.442695, %v2027_v33 }
 0x687   : > { %v2060_v32 = vsel %vm1310_vm12, %v6380_v51, 0.0 }
 0x688   : > { %5170 = vpow2.f32 %v2041_v28  ;;  %2061 = vadd.xlane.f32.xlu0 %v2060_v32  ;;  %v4884_v28 = vld [vmem:[%s7542_s5 + $0x58] sm:$0xff] }
 0x689   : > { %2459 = vmatpush.msra.mxu0 %v4884_v28 }
 0x68b   : > { %v2020_v10 = vpop.xlane.xlu1 %2019 }
 0x68c   : > { %v2028_v19 = vsub.f32 %v6317_v24, %v2020_v10 }
 0x68e   : > { %v6385_v30 = vpop.eup %5170  ;;  %v2043_v23 = vmul.f32 1.442695, %v2028_v19 }
 0x68f   : > { %v2063_v42 = vsel %vm1310_vm12, %v6385_v30, 0.0 }
 0x690   : > { %5172 = vpow2.f32 %v2043_v23  ;;  %2064 = vadd.xlane.f32.xlu1 %v2063_v42 }
 0x696   : > { %v6389_v34 = vpop.eup %5172 }
 0x697   : > { %v2066_v20 = vsel %vm1310_vm12, %v6389_v34, 0.0 }
 0x698   : > { %2067 = vadd.xlane.f32.xlu2 %v2066_v20 }
 0x6d3   : > { %v2047_v46 = vpop.xlane.xlu0 %2046 }
 0x6d4   : > { %5174 = vrcp.f32 %v2047_v46  ;;  %v2080_v13 = vand.u32 2147483648, %v2047_v46  ;;  %v2078_v3 = vand.u32 2147483647, %v2047_v46  ;;  %vm2074_vm5 = vweird.f32 %v2047_v46 }
 0x6d6   : > { %v2081_v4 = vor.u32 1.1754944e-38, %v2080_v13  ;;  %vm2079_vm7 = vcmp.eq.f32.partialorder %v2078_v3, 8.507059e+37  ;;  %v4883_v13 = vld [vmem:[%s7542_s5 + $0x50] sm:$0xff] }
 0x6d7   : > { %2460 = vmatpush.msra.mxu0 %v4883_v13 }
 0x6da   : > { %v5175_v56 = vpop.eup %5174 }
 0x6db   : > { %v2070_v12 = vmul.f32 %v5175_v56, %v2047_v46  ;;  %v2050_v36 = vpop.xlane.xlu2 %2049  ;;  %vm2075_vm4 = vweird.f32 %v5175_v56 }
 0x6dc   : > { %5176 = vrcp.f32 %v2050_v36  ;;  %vm2076_vm6 = vmor %vm2074_vm5, %vm2075_vm4  ;;  %v2095_v45 = vand.u32 2147483648, %v2050_v36  ;;  %v2093_v59 = vand.u32 2147483647, %v2050_v36  ;;  %vm2089_vm9 = vweird.f32 %v2050_v36 }
 0x6dd   : > { %v2071_v24 = vsub.f32 1.0, %v2070_v12 }
 0x6de   : > { %v2096_v41 = vor.u32 1.1754944e-38, %v2095_v45  ;;  %vm2094_vm13 = vcmp.eq.f32.partialorder %v2093_v59, 8.507059e+37  ;;  %v4881_v45 = vld [vmem:[%s7542_s5 + $0x40] sm:$0xff] }
 0x6df   : > { %v2072_v0 = vmul.f32 %v5175_v56, %v2071_v24 }
 0x6e1   : > { %v2073_v48 = vadd.f32 %v5175_v56, %v2072_v0 }
 0x6e2   : > { %v5177_v7 = vpop.eup %5176 }
 0x6e3   : > { %v2077_v62 = vsel %vm2076_vm6, %v5175_v56, %v2073_v48  ;;  %v2085_v26 = vmul.f32 %v5177_v7, %v2050_v36  ;;  %v2053_v6 = vpop.xlane.xlu0 %2052  ;;  %vm2090_vm8 = vweird.f32 %v5177_v7 }
 0x6e4   : > { %v2082_v31 = vsel %vm2079_vm7, %v2081_v4, %v2077_v62  ;;  %5178 = vrcp.f32 %v2053_v6  ;;  %vm2091_vm10 = vmor %vm2089_vm9, %vm2090_vm8  ;;  %v2110_v8 = vand.u32 2147483648, %v2053_v6  ;;  %v2108_v38 = vand.u32 2147483647, %v2053_v6 }
 0x6e5   : > { %v2086_v50 = vsub.f32 1.0, %v2085_v26  ;;  %v2083_v16 = vmul.f32 %v6356_v22, %v2082_v31  ;;  %vm2104_vm15 = vweird.f32 %v2053_v6 }
 0x6e6   : > { %v2111_v10 = vor.u32 1.1754944e-38, %v2110_v8  ;;  %vm2109_vm2 = vcmp.eq.f32.partialorder %v2108_v38, 8.507059e+37 }
 0x6e7   : > { %v2087_v58 = vmul.f32 %v5177_v7, %v2086_v50  ;;  %4843 = vmatmul.msk.f32.vlgmr.msrb.gmra.mxu0 %vm1310_vm12, %v2083_v16  ;;  %v4882_v16 = vld [vmem:[%s7542_s5 + $0x48] sm:$0xff] }
 0x6e8   : > { %2461 = vmatpush.msra.mxu0 %v4882_v16  ;;  %v4897_v16 = vld [vmem:[%s7544_s7 + $0x58] sm:$0xff] }
 0x6e9   : > { %v2088_v18 = vadd.f32 %v5177_v7, %v2087_v58 }
 0x6ea   : > { %v5179_v29 = vpop.eup %5178  ;;  %2462 = vmatpush.msra.mxu0 %v4881_v45  ;;  %v4896_v45 = vld [vmem:[%s7544_s7 + $0x50] sm:$0xff] }
 0x6eb   : > { %v2100_v52 = vmul.f32 %v5179_v29, %v2053_v6  ;;  %v2056_v2 = vpop.xlane.xlu1 %2055  ;;  %v2092_v11 = vsel %vm2091_vm10, %v5177_v7, %v2088_v18  ;;  %vm2105_vm14 = vweird.f32 %v5179_v29 }
 0x6ec   : > { %5180 = vrcp.f32 %v2056_v2  ;;  %v2097_v15 = vsel %vm2094_vm13, %v2096_v41, %v2092_v11  ;;  %vm2106_vm1 = vmor %vm2104_vm15, %vm2105_vm14  ;;  %v2125_v12 = vand.u32 2147483648, %v2056_v2  ;;  %v2123_v36 = vand.u32 2147483647, %v2056_v2 }
 0x6ed   : > { %v2101_v53 = vsub.f32 1.0, %v2100_v52  ;;  %v2098_v22 = vmul.f32 %v6360_v44, %v2097_v15  ;;  %vm2119_vm4 = vweird.f32 %v2056_v2 }
 0x6ee   : > { %v2126_v3 = vor.u32 1.1754944e-38, %v2125_v12  ;;  %vm2124_vm6 = vcmp.eq.f32.partialorder %v2123_v36, 8.507059e+37 }
 0x6ef   : > { %v2102_v49 = vmul.f32 %v5179_v29, %v2101_v53  ;;  %4844 = vmatmul.msk.f32.gmra.mxu0 %vm1310_vm12, %v2098_v22 }
 0x6f1   : > { %v2103_v33 = vadd.f32 %v5179_v29, %v2102_v49 }
 0x6f2   : > { %v5181_v32 = vpop.eup %5180 }
 0x6f3   : > { %v2115_v19 = vmul.f32 %v5181_v32, %v2056_v2  ;;  %v2059_v23 = vpop.xlane.xlu2 %2058  ;;  %v2107_v42 = vsel %vm2106_vm1, %v5179_v29, %v2103_v33  ;;  %vm2120_vm3 = vweird.f32 %v5181_v32 }
 0x6f4   : > { %5182 = vrcp.f32 %v2059_v23  ;;  %v2112_v20 = vsel %vm2109_vm2, %v2111_v10, %v2107_v42  ;;  %vm2121_vm5 = vmor %vm2119_vm4, %vm2120_vm3  ;;  %v2140_v31 = vand.u32 2147483648, %v2059_v23  ;;  %v2138_v50 = vand.u32 2147483647, %v2059_v23 }
 0x6f5   : > { %v2116_v44 = vsub.f32 1.0, %v2115_v19  ;;  %v2113_v46 = vmul.f32 %v6365_v61, %v2112_v20  ;;  %vm2134_vm8 = vweird.f32 %v2059_v23 }
 0x6f6   : > { %vm2139_vm10 = vcmp.eq.f32.partialorder %v2138_v50, 8.507059e+37 }
 0x6f7   : > { %v2117_v56 = vmul.f32 %v5181_v32, %v2116_v44  ;;  %4845 = vmatmul.msk.f32.gmra.mxu0 %vm1310_vm12, %v2113_v46 }
 0x6f9   : > { %v2118_v24 = vadd.f32 %v5181_v32, %v2117_v56 }
 0x6fa   : > { %v5183_v0 = vpop.eup %5182 }
 0x6fb   : > { %v2130_v48 = vmul.f32 %v5183_v0, %v2059_v23  ;;  %v2062_v7 = vpop.xlane.xlu0 %2061  ;;  %v2122_v4 = vsel %vm2121_vm5, %v5181_v32, %v2118_v24  ;;  %vm2135_vm7 = vweird.f32 %v5183_v0 }
 0x6fc   : > { %5184 = vrcp.f32 %v2062_v7  ;;  %v2127_v62 = vsel %vm2124_vm6, %v2126_v3, %v2122_v4  ;;  %vm2136_vm9 = vmor %vm2134_vm8, %vm2135_vm7  ;;  %v2155_v53 = vand.u32 2147483648, %v2062_v7  ;;  %v2153_v22 = vand.u32 2147483647, %v2062_v7 }
 0x6fd   : > { %v2131_v61 = vsub.f32 1.0, %v2130_v48  ;;  %v2128_v26 = vmul.f32 %v6370_v63, %v2127_v62  ;;  %v2141_v63 = vor.u32 1.1754944e-38, %v2140_v31  ;;  %vm2149_vm14 = vweird.f32 %v2062_v7 }
 0x6fe   : > { %v2156_v38 = vor.u32 1.1754944e-38, %v2155_v53  ;;  %vm2154_vm1 = vcmp.eq.f32.partialorder %v2153_v22, 8.507059e+37 }
 0x6ff   : > { %v2132_v6 = vmul.f32 %v5183_v0, %v2131_v61  ;;  %4846 = vmatmul.msk.f32.gmra.mxu0 %vm1310_vm12, %v2128_v26 }
 0x701   : > { %v2133_v58 = vadd.f32 %v5183_v0, %v2132_v6 }
 0x702   : > { %v5185_v59 = vpop.eup %5184 }
 0x703   : > { %v2145_v18 = vmul.f32 %v5185_v59, %v2062_v7  ;;  %v2065_v29 = vpop.xlane.xlu1 %2064  ;;  %v2137_v41 = vsel %vm2136_vm9, %v5183_v0, %v2133_v58  ;;  %vm2150_vm13 = vweird.f32 %v5185_v59  ;;  %v4895_v58 = vld [vmem:[%s7544_s7 + $0x48] sm:$0xff] }
 0x704   : > { %5186 = vrcp.f32 %v2065_v29  ;;  %v2142_v2 = vsel %vm2139_vm10, %v2141_v63, %v2137_v41  ;;  %vm2151_vm15 = vmor %vm2149_vm14, %vm2150_vm13  ;;  %v2170_v23 = vand.u32 2147483648, %v2065_v29  ;;  %v2168_v44 = vand.u32 2147483647, %v2065_v29 }
 0x705   : > { %v2146_v52 = vsub.f32 1.0, %v2145_v18  ;;  %v2143_v11 = vmul.f32 %v6375_v5, %v2142_v2  ;;  %vm2164_vm3 = vweird.f32 %v2065_v29 }
 0x706   : > { %v2171_v56 = vor.u32 1.1754944e-38, %v2170_v23  ;;  %vm2169_vm5 = vcmp.eq.f32.partialorder %v2168_v44, 8.507059e+37 }
 0x707   : > { %v2147_v15 = vmul.f32 %v5185_v59, %v2146_v52  ;;  %4847 = vmatmul.msk.f32.gmra.mxu0 %vm1310_vm12, %v2143_v11  ;;  %v5098_v52 = vld [vmem:[%s7543_s6 + $0x2] ss:$0 sm:$0xff] }
 0x709   : > { %v2148_v49 = vadd.f32 %v5185_v59, %v2147_v15 }
 0x70a   : > { %v5187_v8 = vpop.eup %5186 }
 0x70b   : > { %v2160_v33 = vmul.f32 %v5187_v8, %v2065_v29  ;;  %v2068_v28 = vpop.xlane.xlu2 %2067  ;;  %v2152_v32 = vsel %vm2151_vm15, %v5185_v59, %v2148_v49  ;;  %vm2165_vm2 = vweird.f32 %v5187_v8  ;;  %v4894_v59 = vld [vmem:[%s7544_s7 + $0x40] sm:$0xff] }
 0x70c   : > { %5188 = vrcp.f32 %v2068_v28  ;;  %v2157_v19 = vsel %vm2154_vm1, %v2156_v38, %v2152_v32  ;;  %vm2166_vm4 = vmor %vm2164_vm3, %vm2165_vm2  ;;  %v2185_v3 = vand.u32 2147483648, %v2068_v28  ;;  %vm2179_vm7 = vweird.f32 %v2068_v28  ;;  %v4957_v32 = vld [vmem:[%s7573_s28 + $0x68] sm:$0xff] }
 0x70d   : > { %v2161_v10 = vsub.f32 1.0, %v2160_v33  ;;  %v2158_v5 = vmul.f32 %v6380_v51, %v2157_v19  ;;  %v2183_v51 = vand.u32 2147483647, %v2068_v28  ;;  %v4959_v33 = vld [vmem:[%s7573_s28 + $0x78] sm:$0xff] }
 0x70e   : > { %v2186_v4 = vor.u32 1.1754944e-38, %v2185_v3  ;;  %3168 = vmatpush.msra.mxu3 %v4959_v33 }
 0x70f   : > { %v2162_v42 = vmul.f32 %v5187_v8, %v2161_v10  ;;  %4848 = vmatmul.msk.f32.gmra.mxu0 %vm1310_vm12, %v2158_v5  ;;  %vm2184_vm9 = vcmp.eq.f32.partialorder %v2183_v51, 8.507059e+37  ;;  %v4956_v10 = vld [vmem:[%s7573_s28 + $0x60] sm:$0xff]  ;;  %v6553_v51 = vpop.f32.mrf.mxu2 }
 0x710   : > { %7591 = vst [vmem:[#allocation11_spill] sm:$0xff] %v6553_v51 }
 0x711   : > { %v2163_v20 = vadd.f32 %v5187_v8, %v2162_v42 }
 0x712   : > { %v5189_v46 = vpop.eup %5188 }
 0x713   : > { %v2175_v12 = vmul.f32 %v5189_v46, %v2068_v28  ;;  %v2167_v36 = vsel %vm2166_vm4, %v5187_v8, %v2163_v20  ;;  %vm2180_vm6 = vweird.f32 %v5189_v46  ;;  %v4958_v28 = vld [vmem:[%s7573_s28 + $0x70] sm:$0xff] }
 0x714   : > { %v2172_v24 = vsel %vm2169_vm5, %v2171_v56, %v2167_v36  ;;  %vm2181_vm8 = vmor %vm2179_vm7, %vm2180_vm6  ;;  %3169 = vmatpush.msra.mxu3 %v4958_v28 }
 0x715   : > { %v2176_v13 = vsub.f32 1.0, %v2175_v12  ;;  %v2173_v0 = vmul.f32 %v6385_v30, %v2172_v24  ;;  %v4851_v30 = vld [vmem:[%s7549_s12 + $0x8] sm:$0xff] }
 0x716   : > { %2295 = vmatpush.msra.mxu1 %v4851_v30  ;;  %3170 = vmatpush.msra.mxu3 %v4957_v32 }
 0x717   : > { %v2177_v48 = vmul.f32 %v5189_v46, %v2176_v13  ;;  %4849 = vmatmul.msk.f32.gmra.mxu0 %vm1310_vm12, %v2173_v0 }
 0x718   : > { %2510 = vmatpush.msrb.mxu1 %v4897_v16  ;;  %3171 = vmatpush.msra.mxu3 %v4956_v10 }
 0x719   : > { %v2178_v7 = vadd.f32 %v5189_v46, %v2177_v48 }
 0x71a   : > { %2511 = vmatpush.msrb.mxu1 %v4896_v45 }
 0x71b   : > { %v2182_v61 = vsel %vm2181_vm8, %v5189_v46, %v2178_v7 }
 0x71c   : > { %v2187_v62 = vsel %vm2184_vm9, %v2186_v4, %v2182_v61  ;;  %2512 = vmatpush.msrb.mxu1 %v4895_v58 }
 0x71d   : > { %v2188_v26 = vmul.f32 %v6389_v34, %v2187_v62  ;;  %v6557_v62 = vpop.f32.mrf.mxu2 }
 0x71e   : > { %2513 = vmatpush.msrb.mxu1 %v4894_v59  ;;  %7592 = vst [vmem:[#allocation12_spill] sm:$0xff] %v6557_v62 }
 0x71f   : > { %4850 = vmatmul.msk.f32.gmra.mxu0 %vm1310_vm12, %v2188_v26 }
 0x727   : > { %4886 = vmatmul.msk.f32.vlgmr.msra.gmra.mxu0 %vm638_vm0, %v5578_v60 }
 0x72f   : > { %4887 = vmatmul.msk.f32.gmra.mxu0 %vm638_vm0, %v5600_v14 }
 0x737   : > { %4888 = vmatmul.msk.f32.gmra.mxu0 %vm638_vm0, %v5615_v35 }
 0x73f   : > { %4889 = vmatmul.msk.f32.gmra.mxu0 %vm638_vm0, %v5631_v39 }
 0x747   : > { %4890 = vmatmul.msk.f32.gmra.mxu0 %vm638_vm0, %v5620_v37 }
 0x74f   : > { %4891 = vmatmul.msk.f32.gmra.mxu0 %vm638_vm0, %v5634_v40 }
 0x757   : > { %4892 = vmatmul.msk.f32.gmra.mxu0 %vm638_vm0, %v5645_v47 }
 0x75f   : > { %4893 = vmatmul.msk.f32.gmra.mxu0 %vm638_vm0, %v5700_v9 }
 0x764   : > { %v2230_v34 = vpop.f32.mrf.mxu0 }
 0x765   : > { %4852 = vmatmul.msk.f32.vlgmr.msra.gmra.mxu1 %vm1042_vm11, %v2230_v34  ;;  %v6561_v34 = vpop.f32.mrf.mxu2 }
 0x766   : > { %7593 = vst [vmem:[#allocation13_spill] sm:$0xff] %v6561_v34 }
 0x76c   : > { %v2233_v6 = vpop.f32.mrf.mxu0 }
 0x76d   : > { %4853 = vmatmul.msk.f32.gmra.mxu1 %vm1042_vm11, %v2233_v6 }
 0x774   : > { %v2236_v31 = vpop.f32.mrf.mxu0 }
 0x775   : > { %4854 = vmatmul.msk.f32.gmra.mxu1 %vm1042_vm11, %v2236_v31 }
 0x77c   : > { %v2239_v50 = vpop.f32.mrf.mxu0 }
 0x77d   : > { %4855 = vmatmul.msk.f32.gmra.mxu1 %vm1042_vm11, %v2239_v50  ;;  %v6563_v50 = vpop.f32.mrf.mxu2 }
 0x77e   : > { %7594 = vst [vmem:[#allocation14_spill] sm:$0xff] %v6563_v50 }
 0x784   : > { %v2242_v63 = vpop.f32.mrf.mxu0 }
 0x785   : > { %4856 = vmatmul.msk.f32.gmra.mxu1 %vm1042_vm11, %v2242_v63  ;;  %v6565_v58 = vpop.f32.mrf.mxu2 }
 0x786   : > { %7595 = vst [vmem:[#allocation15_spill] sm:$0xff] %v6565_v58 }
 0x78c   : > { %v2245_v18 = vpop.f32.mrf.mxu0 }
 0x78d   : > { %4857 = vmatmul.msk.f32.gmra.mxu1 %vm1042_vm11, %v2245_v18 }
 0x794   : > { %v2248_v29 = vpop.f32.mrf.mxu0 }
 0x795   : > { %4858 = vmatmul.msk.f32.gmra.mxu1 %vm1042_vm11, %v2248_v29 }
 0x79c   : > { %v2251_v41 = vpop.f32.mrf.mxu0 }
 0x79d   : > { %4859 = vmatmul.msk.f32.gmra.mxu1 %vm1042_vm11, %v2251_v41  ;;  %v6567_v41 = vpop.f32.mrf.mxu2 }
 0x79e   : > { %7596 = vst [vmem:[#allocation16_spill] sm:$0xff] %v6567_v41 }
 0x7a4   : > { %v2464_v2 = vpop.f32.mrf.mxu0 }
 0x7a5   : > { %v6463_v11 = vadd.f32 %v5098_v52, %v2464_v2  ;;  %4899 = vmatmul.msk.f32.vlgmr.msrb.gmra.mxu1 %vm638_vm0, %v5578_v60 }
 0x7a7   : > { %4915 = vmatmul.msk.f32.vlgmr.msrb.gmra.mxu3 %vm1042_vm11, %v6463_v11 }
 0x7a8   : > { %3435 = vmatpush.msrb.mxu3 %v6223_v27 }
 0x7ac   : > { %v2467_v15 = vpop.f32.mrf.mxu0 }
 0x7ad   : > { %v6469_v53 = vadd.f32 %v5098_v52, %v2467_v15  ;;  %4900 = vmatmul.msk.f32.gmra.mxu1 %vm638_vm0, %v5600_v14 }
 0x7af   : > { %4916 = vmatmul.msk.f32.gmra.mxu3 %vm1042_vm11, %v6469_v53 }
 0x7b4   : > { %v2470_v22 = vpop.f32.mrf.mxu0 }
 0x7b5   : > { %v6475_v49 = vadd.f32 %v5098_v52, %v2470_v22  ;;  %4901 = vmatmul.msk.f32.gmra.mxu1 %vm638_vm0, %v5615_v35 }
 0x7b7   : > { %4917 = vmatmul.msk.f32.gmra.mxu3 %vm1042_vm11, %v6475_v49 }
 0x7bc   : > { %v2473_v8 = vpop.f32.mrf.mxu0 }
 0x7bd   : > { %v6481_v38 = vadd.f32 %v5098_v52, %v2473_v8  ;;  %4902 = vmatmul.msk.f32.gmra.mxu1 %vm638_vm0, %v5631_v39  ;;  %v6572_v8 = vpop.f32.mrf.mxu2 }
 0x7be   : > { %7597 = vst [vmem:[#allocation17_spill] sm:$0xff] %v6572_v8 }
 0x7bf   : > { %4918 = vmatmul.msk.f32.gmra.mxu3 %vm1042_vm11, %v6481_v38 }
 0x7c4   : > { %v2476_v19 = vpop.f32.mrf.mxu0 }
 0x7c5   : > { %v6499_v23 = vadd.f32 %v5098_v52, %v2476_v19  ;;  %4903 = vmatmul.msk.f32.gmra.mxu1 %vm638_vm0, %v5620_v37  ;;  %v6577_v19 = vld [vmem:[%s7546_s9 + $0x38] sm:$0xff] }
 0x7c7   : > { %4919 = vmatmul.msk.f32.gmra.mxu3 %vm1042_vm11, %v6499_v23 }
 0x7cc   : > { %v2479_v5 = vpop.f32.mrf.mxu0 }
 0x7cd   : > { %v6506_v42 = vadd.f32 %v5098_v52, %v2479_v5  ;;  %4904 = vmatmul.msk.f32.gmra.mxu1 %vm638_vm0, %v5634_v40 }
 0x7cf   : > { %4920 = vmatmul.msk.f32.gmra.mxu3 %vm1042_vm11, %v6506_v42 }
 0x7d4   : > { %v2482_v44 = vpop.f32.mrf.mxu0 }
 0x7d5   : > { %v6512_v20 = vadd.f32 %v5098_v52, %v2482_v44  ;;  %4905 = vmatmul.msk.f32.gmra.mxu1 %vm638_vm0, %v5645_v47 }
 0x7d7   : > { %4921 = vmatmul.msk.f32.gmra.mxu3 %vm1042_vm11, %v6512_v20 }
 0x7dc   : > { %v2485_v46 = vpop.f32.mrf.mxu0 }
 0x7dd   : > { %v2486_v27 = vadd.f32 %v5098_v52, %v2485_v46  ;;  %4906 = vmatmul.msk.f32.gmra.mxu1 %vm638_vm0, %v5700_v9  ;;  %v5099_v52 = vld [vmem:[%s7545_s8 + $0x2] ss:$0 sm:$0xff]  ;;  %v6583_v46 = vld [vmem:[%s7547_s10 + $0x38] sm:$0xff] }
 0x7df   : > { %4922 = vmatmul.msk.f32.gmra.mxu3 %vm1042_vm11, %v2486_v27  ;;  %v2635_v5 = vmul.f32 %v6577_v19, %v2486_v27  ;;  %v6592_v27 = vpop.f32.mrf.mxu2 }
 0x7e0   : > { %7598 = vst [vmem:[#allocation18_spill] sm:$0xff] %v6592_v27 }
 0x7e2   : > { %v6521_v56 = vpop.f32.mrf.mxu1 }
 0x7e3   : > { %7583 = vst [vmem:[#allocation3_spill] sm:$0xff] %v6521_v56 }
 0x7e7   : > { %4961 = vmatmul.msk.f32.vlgmr.msra.gmra.mxu3 %vm638_vm0, %v5578_v60 }
 0x7ea   : > { %v6525_v12 = vpop.f32.mrf.mxu1 }
 0x7eb   : > { %7584 = vst [vmem:[#allocation4_spill] sm:$0xff] %v6525_v12 }
 0x7ef   : > { %4962 = vmatmul.msk.f32.gmra.mxu3 %vm638_vm0, %v5600_v14 }
 0x7f2   : > { %v6529_v36 = vpop.f32.mrf.mxu1 }
 0x7f3   : > { %7585 = vst [vmem:[#allocation5_spill] sm:$0xff] %v6529_v36 }
 0x7f7   : > { %4963 = vmatmul.msk.f32.gmra.mxu3 %vm638_vm0, %v5615_v35 }
 0x7fa   : > { %v6533_v24 = vpop.f32.mrf.mxu1 }
 0x7fb   : > { %7586 = vst [vmem:[#allocation6_spill] sm:$0xff] %v6533_v24 }
 0x7ff   : > { %4964 = vmatmul.msk.f32.gmra.mxu3 %vm638_vm0, %v5631_v39 }
 0x802   : > { %v6537_v13 = vpop.f32.mrf.mxu1 }
 0x803   : > { %7587 = vst [vmem:[#allocation7_spill] sm:$0xff] %v6537_v13 }
 0x807   : > { %4965 = vmatmul.msk.f32.gmra.mxu3 %vm638_vm0, %v5620_v37 }
 0x80a   : > { %v6541_v0 = vpop.f32.mrf.mxu1 }
 0x80b   : > { %7588 = vst [vmem:[#allocation8_spill] sm:$0xff] %v6541_v0 }
 0x80f   : > { %4966 = vmatmul.msk.f32.gmra.mxu3 %vm638_vm0, %v5634_v40 }
 0x812   : > { %v6545_v3 = vpop.f32.mrf.mxu1 }
 0x813   : > { %7589 = vst [vmem:[#allocation9_spill] sm:$0xff] %v6545_v3 }
 0x817   : > { %4967 = vmatmul.msk.f32.gmra.mxu3 %vm638_vm0, %v5645_v47 }
 0x81a   : > { %v6549_v48 = vpop.f32.mrf.mxu1 }
 0x81b   : > { %7590 = vst [vmem:[#allocation10_spill] sm:$0xff] %v6549_v48 }
 0x81f   : > { %4968 = vmatmul.msk.f32.gmra.mxu3 %vm638_vm0, %v5700_v9 }
 0x822   : > { %v2515_v7 = vpop.f32.mrf.mxu1 }
 0x82a   : > { %v2518_v4 = vpop.f32.mrf.mxu1  ;;  %v6555_v61 = vpop.f32.mrf.mxu3 }
 0x832   : > { %v2521_v26 = vpop.f32.mrf.mxu1  ;;  %v6559_v30 = vpop.f32.mrf.mxu3 }
 0x83a   : > { %v2524_v6 = vpop.f32.mrf.mxu1  ;;  %v2683_v31 = vpop.f32.mrf.mxu3 }
 0x83b   : > { %v2525_v44 = vadd.f32 %v5099_v52, %v2524_v6  ;;  %v6597_v6 = vld [vmem:[%s7546_s9 + $0x30] sm:$0xff] }
 0x842   : > { %v2527_v16 = vpop.f32.mrf.mxu1  ;;  %v2686_v45 = vpop.f32.mrf.mxu3 }
 0x843   : > { %v2528_v32 = vadd.f32 %v5099_v52, %v2527_v16  ;;  %v6589_v16 = vld [vmem:[%s7547_s10 + $0x30] sm:$0xff] }
 0x84a   : > { %v2530_v59 = vpop.f32.mrf.mxu1  ;;  %v2689_v63 = vpop.f32.mrf.mxu3 }
 0x84b   : > { %v2531_v28 = vadd.f32 %v5099_v52, %v2530_v59  ;;  %v2522_v59 = vadd.f32 %v5099_v52, %v2521_v26  ;;  %v2519_v26 = vadd.f32 %v5099_v52, %v2518_v4 }
 0x852   : > { %v2533_v18 = vpop.f32.mrf.mxu1  ;;  %v2692_v29 = vpop.f32.mrf.mxu3 }
 0x853   : > { %v2534_v33 = vadd.f32 %v5099_v52, %v2533_v18 }
 0x85a   : > { %v2536_v2 = vpop.f32.mrf.mxu1  ;;  %v2695_v15 = vpop.f32.mrf.mxu3 }
 0x85b   : > { %v2537_v22 = vadd.f32 %v5099_v52, %v2536_v2  ;;  %v2707_v2 = vmul.f32 %v6589_v16, %v2695_v15  ;;  %v6605_v15 = vld [vmem:[%s7547_s10 + $0x28] sm:$0xff] }
 0x85d   : > { %3038 = vmatpush.msra.mxu1 %v2537_v22 }
 0x85f   : > { %3039 = vmatpush.msra.mxu1 %v2534_v33  ;;  %v2634_v33 = vmul.f32 %v6597_v6, %v6512_v20 }
 0x861   : > { %3040 = vmatpush.msra.mxu1 %v2531_v28  ;;  %v2516_v28 = vadd.f32 %v5099_v52, %v2515_v7  ;;  %v6619_v7 = vld [vmem:[%s7547_s10 + $0x20] sm:$0xff]  ;;  %v2588_v52 = vpop.f32.mrf.mxu2 }
 0x862   : > { %v2698_v10 = vpop.f32.mrf.mxu3  ;;  %v2705_v4 = vmul.f32 %v6619_v7, %v2689_v63 }
 0x863   : > { %v2708_v18 = vmul.f32 %v6583_v46, %v2698_v10  ;;  %3041 = vmatpush.msra.mxu1 %v2528_v32  ;;  %v2706_v32 = vmul.f32 %v6605_v15, %v2692_v29  ;;  %v2715_v10 = vadd.f32 %v2707_v2, %v2634_v33  ;;  %v6639_v2 = vld [vmem:[%s7546_s9 + $0x18] sm:$0xff] }
 0x865   : > { %v2716_v22 = vadd.f32 %v2708_v18, %v2635_v5  ;;  %3042 = vmatpush.msra.mxu1 %v2525_v44  ;;  %v6611_v5 = vld [vmem:[%s7546_s9 + $0x28] sm:$0xff]  ;;  %v6625_v44 = vld [vmem:[%s7546_s9 + $0x20] sm:$0xff]  ;;  %v6633_v18 = vld [vmem:[%s7547_s10 + $0x18] sm:$0xff] }
 0x866   : > { %v2633_v20 = vmul.f32 %v6611_v5, %v6506_v42  ;;  %v2632_v42 = vmul.f32 %v6625_v44, %v6499_v23  ;;  %v6647_v23 = vld [vmem:[%s7547_s10 + $0x10] sm:$0xff] }
 0x867   : > { %4923 = vmatpush.xpose.msk.msrb.mxu0 %vm1042_vm11, %v2716_v22  ;;  %3043 = vmatpush.msra.mxu1 %v2522_v59  ;;  %v2704_v59 = vmul.f32 %v6633_v18, %v2686_v45  ;;  %v2631_v22 = vmul.f32 %v6639_v2, %v6481_v38  ;;  %v2703_v33 = vmul.f32 %v6647_v23, %v2683_v31  ;;  %v6653_v45 = vld [vmem:[%s7546_s9 + $0x10] sm:$0xff] }
 0x868   : > { %v2714_v29 = vadd.f32 %v2706_v32, %v2633_v20  ;;  %v2713_v63 = vadd.f32 %v2705_v4, %v2632_v42  ;;  %v6661_v32 = vld [vmem:[%s7547_s10 + $0x8] sm:$0xff]  ;;  %v6676_v4 = vld [vmem:[%s7547_s10] sm:$0xff] }
 0x869   : > { %3044 = vmatpush.msra.mxu1 %v2519_v26  ;;  %v2712_v26 = vadd.f32 %v2704_v59, %v2631_v22  ;;  %v2591_v38 = vpop.f32.mrf.mxu2  ;;  %7599 = vst [vmem:[#allocation19_spill] sm:$0xff] %v6661_v32  ;;  %v2702_v31 = vmul.f32 %v6661_v32, %v6559_v30  ;;  %v6668_v20 = vld [vmem:[%s7546_s9 + $0x8] sm:$0xff]  ;;  %v6683_v42 = vld [vmem:[%s7546_s9] sm:$0xff] }
 0x86a   : > { %7600 = vst [vmem:[#allocation20_spill] sm:$0xff] %v6668_v20  ;;  %v2628_v59 = vmul.f32 %v6683_v42, %v6463_v11  ;;  %v2539_v22 = vmul.f32 %v6683_v42, %v6324_v25  ;;  %v2541_v25 = vmul.f32 %v6653_v45, %v6332_v43  ;;  %v4971_v43 = vld [vmem:[%s7542_s5 + $0x70] sm:$0xff] }
 0x86b   : > { %4924 = vmatpush.xpose.msk.msrb.mxu0 %vm1042_vm11, %v2715_v10  ;;  %3045 = vmatpush.msra.mxu1 %v2516_v28  ;;  %v2630_v28 = vmul.f32 %v6653_v45, %v6475_v49  ;;  %v2629_v49 = vmul.f32 %v6668_v20, %v6469_v53  ;;  %7601 = vst [vmem:[#allocation21_spill] sm:$0xff] %v6676_v4 }
 0x86c   : > { %7602 = vst [vmem:[#allocation22_spill] sm:$0xff] %v6683_v42  ;;  %v2612_v53 = vmul.f32 %v6676_v4, %v2588_v52 }
 0x86d   : > { %v2711_v10 = vadd.f32 %v2703_v33, %v2630_v28  ;;  %v2710_v30 = vadd.f32 %v2702_v31, %v2629_v49  ;;  %v2540_v28 = vmul.f32 %v6668_v20, %v6328_v17  ;;  %v4972_v17 = vld [vmem:[%s7542_s5 + $0x78] sm:$0xff] }
 0x86f   : > { %4925 = vmatpush.xpose.msk.msrb.mxu0 %vm1042_vm11, %v2714_v29  ;;  %v2701_v29 = vmul.f32 %v6676_v4, %v6555_v61  ;;  %v2620_v61 = vadd.f32 %v2612_v53, %v2539_v22  ;;  %v4970_v53 = vld [vmem:[%s7542_s5 + $0x68] sm:$0xff]  ;;  %v4969_v22 = vld [vmem:[%s7542_s5 + $0x60] sm:$0xff] }
 0x871   : > { %v2594_v33 = vpop.f32.mrf.mxu2 }
 0x872   : > { %v2614_v52 = vmul.f32 %v6647_v23, %v2594_v33 }
 0x873   : > { %4926 = vmatpush.xpose.msk.msrb.mxu0 %vm1042_vm11, %v2713_v63  ;;  %v2709_v63 = vadd.f32 %v2701_v29, %v2628_v59 }
 0x877   : > { %4927 = vmatpush.xpose.msk.msrb.mxu0 %vm1042_vm11, %v2712_v26  ;;  %v2613_v26 = vmul.f32 %v6661_v32, %v2591_v38  ;;  %v2542_v38 = vmul.f32 %v6639_v2, %v6336_v57  ;;  %v2543_v57 = vmul.f32 %v6625_v44, %v6340_v21 }
 0x879   : > { %v2621_v11 = vadd.f32 %v2613_v26, %v2540_v28  ;;  %v2597_v31 = vpop.f32.mrf.mxu2  ;;  %v2544_v26 = vmul.f32 %v6611_v5, %v6344_v1 }
 0x87a   : > { %v2615_v29 = vmul.f32 %v6633_v18, %v2597_v31  ;;  %v2545_v31 = vmul.f32 %v6597_v6, %v6348_v55 }
 0x87b   : > { %4928 = vmatpush.xpose.msk.msrb.mxu0 %vm1042_vm11, %v2711_v10  ;;  %v2622_v10 = vadd.f32 %v2614_v52, %v2541_v25 }
 0x87f   : > { %4929 = vmatpush.xpose.msk.msrb.mxu0 %vm1042_vm11, %v2710_v30  ;;  %v2623_v30 = vadd.f32 %v2615_v29, %v2542_v38 }
 0x881   : > { %v2600_v49 = vpop.f32.mrf.mxu2 }
 0x882   : > { %v2616_v59 = vmul.f32 %v6619_v7, %v2600_v49  ;;  %v2546_v49 = vmul.f32 %v6577_v19, %v6352_v54 }
 0x883   : > { %4930 = vmatpush.xpose.msk.msrb.mxu0 %vm1042_vm11, %v2709_v63 }
 0x884   : > { %v2624_v33 = vadd.f32 %v2616_v59, %v2543_v57 }
 0x886   : > { %4931 = vmatmul.msk.f32.vlgmr.msrb.gmra.mxu0 %vm1042_vm11, %v2620_v61 }
 0x887   : > { %3219 = vmatpush.msra.mxu0 %v4972_v17 }
 0x889   : > { %v2603_v63 = vpop.f32.mrf.mxu2  ;;  %3220 = vmatpush.msra.mxu0 %v4971_v43 }
 0x88a   : > { %v2617_v61 = vmul.f32 %v6605_v15, %v2603_v63 }
 0x88b   : > { %3221 = vmatpush.msra.mxu0 %v4970_v53 }
 0x88d   : > { %3222 = vmatpush.msra.mxu0 %v4969_v22 }
 0x88e   : > { %4932 = vmatmul.msk.f32.gmra.mxu0 %vm1042_vm11, %v2621_v11  ;;  %v2625_v11 = vadd.f32 %v2617_v61, %v2544_v26 }
 0x891   : > { %v2606_v28 = vpop.f32.mrf.mxu2 }
 0x892   : > { %v2618_v21 = vmul.f32 %v6589_v16, %v2606_v28 }
 0x894   : > { %v2626_v52 = vadd.f32 %v2618_v21, %v2545_v31 }
 0x896   : > { %4933 = vmatmul.msk.f32.gmra.mxu0 %vm1042_vm11, %v2622_v10 }
 0x899   : > { %v2609_v25 = vpop.f32.mrf.mxu2 }
 0x89a   : > { %v2619_v10 = vmul.f32 %v6583_v46, %v2609_v25 }
 0x89c   : > { %v2627_v29 = vadd.f32 %v2619_v10, %v2546_v49 }
 0x89e   : > { %4934 = vmatmul.msk.f32.gmra.mxu0 %vm1042_vm11, %v2623_v30 }
 0x8a6   : > { %4935 = vmatmul.msk.f32.gmra.mxu0 %vm1042_vm11, %v2624_v33 }
 0x8ae   : > { %4936 = vmatmul.msk.f32.gmra.mxu0 %vm1042_vm11, %v2625_v11 }
 0x8b6   : > { %4937 = vmatmul.msk.f32.gmra.mxu0 %vm1042_vm11, %v2626_v52 }
 0x8be   : > { %4938 = vmatmul.msk.f32.gmra.mxu0 %vm1042_vm11, %v2627_v29 }
 0x8c6   : > { %4974 = vmatmul.msk.f32.vlgmr.msra.gmra.mxu0 %vm638_vm0, %v5578_v60 }
 0x8ce   : > { %4975 = vmatmul.msk.f32.gmra.mxu0 %vm638_vm0, %v5600_v14 }
 0x8d6   : > { %4976 = vmatmul.msk.f32.gmra.mxu0 %vm638_vm0, %v5615_v35 }
 0x8de   : > { %4977 = vmatmul.msk.f32.gmra.mxu0 %vm638_vm0, %v5631_v39 }
 0x8e6   : > { %4978 = vmatmul.msk.f32.gmra.mxu0 %vm638_vm0, %v5620_v37 }
 0x8ee   : > { %4979 = vmatmul.msk.f32.gmra.mxu0 %vm638_vm0, %v5634_v40 }
 0x8f6   : > { %4980 = vmatmul.msk.f32.gmra.mxu0 %vm638_vm0, %v5645_v47 }
 0x8fe   : > { %4981 = vmatmul.msk.f32.gmra.mxu0 %vm638_vm0, %v5700_v9 }
 0x903   : > { %v2782_v1 = vpop.f32.mrf.mxu0 }
 0x904   : > { %v2806_v55 = vmul.f32 0.35355338, %v2782_v1  ;;  %v5101_v1 = vld [vmem:[%s7543_s6 + $0x3] ss:$0 sm:$0xff] }
 0x906   : > { %v2814_v54 = vsel %vm1310_vm12, %v2806_v55, -inf }
 0x907   : > { %2815 = vmax.xlane.f32.xlu0 %v2814_v54 }
 0x90b   : > { %v2785_v38 = vpop.f32.mrf.mxu0 }
 0x90c   : > { %v2807_v30 = vmul.f32 0.35355338, %v2785_v38 }
 0x90e   : > { %v2817_v17 = vsel %vm1310_vm12, %v2807_v30, -inf }
 0x90f   : > { %2818 = vmax.xlane.f32.xlu1 %v2817_v17 }
 0x913   : > { %v2788_v43 = vpop.f32.mrf.mxu0 }
 0x914   : > { %v6751_v59 = vmul.f32 0.35355338, %v2788_v43 }
 0x916   : > { %v2820_v53 = vsel %vm1310_vm12, %v6751_v59, -inf }
 0x917   : > { %2821 = vmax.xlane.f32.xlu2 %v2820_v53 }
 0x91b   : > { %v2791_v63 = vpop.f32.mrf.mxu0 }
 0x91c   : > { %v6755_v57 = vmul.f32 0.35355338, %v2791_v63 }
 0x91e   : > { %v2823_v22 = vsel %vm1310_vm12, %v6755_v57, -inf }
 0x91f   : > { %2824 = vmax.xlane.f32.xlu0 %v2823_v22 }
 0x923   : > { %v2794_v33 = vpop.f32.mrf.mxu0 }
 0x924   : > { %v6759_v61 = vmul.f32 0.35355338, %v2794_v33 }
 0x926   : > { %v2826_v26 = vsel %vm1310_vm12, %v6759_v61, -inf }
 0x927   : > { %2827 = vmax.xlane.f32.xlu1 %v2826_v26 }
 0x92b   : > { %v2797_v28 = vpop.f32.mrf.mxu0 }
 0x92c   : > { %v6763_v11 = vmul.f32 0.35355338, %v2797_v28 }
 0x92e   : > { %v2829_v21 = vsel %vm1310_vm12, %v6763_v11, -inf }
 0x92f   : > { %2830 = vmax.xlane.f32.xlu2 %v2829_v21 }
 0x933   : > { %v2800_v31 = vpop.f32.mrf.mxu0 }
 0x934   : > { %v6767_v52 = vmul.f32 0.35355338, %v2800_v31 }
 0x936   : > { %v2832_v25 = vsel %vm1310_vm12, %v6767_v52, -inf }
 0x937   : > { %2833 = vmax.xlane.f32.xlu0 %v2832_v25 }
 0x93b   : > { %v2803_v10 = vpop.f32.mrf.mxu0 }
 0x93c   : > { %v6771_v49 = vmul.f32 0.35355338, %v2803_v10 }
 0x93e   : > { %v2835_v29 = vsel %vm1310_vm12, %v6771_v49, -inf }
 0x93f   : > { %2836 = vmax.xlane.f32.xlu2 %v2835_v29 }
 0x943   : > { %v3224_v54 = vpop.f32.mrf.mxu0 }
 0x944   : > { %v6778_v38 = vadd.f32 %v5101_v1, %v3224_v54  ;;  %v6806_v54 = vpop.f32.mrf.mxu3 }
 0x946   : > { %5003 = vmatmul.msk.f32.vlgmr.msrb.gmra.mxu3 %vm1042_vm11, %v6778_v38 }
 0x94b   : > { %v3227_v17 = vpop.f32.mrf.mxu0 }
 0x94c   : > { %v6782_v43 = vadd.f32 %v5101_v1, %v3227_v17 }
 0x94e   : > { %5004 = vmatmul.msk.f32.gmra.mxu3 %vm1042_vm11, %v6782_v43 }
 0x953   : > { %v3230_v53 = vpop.f32.mrf.mxu0 }
 0x954   : > { %v6786_v63 = vadd.f32 %v5101_v1, %v3230_v53 }
 0x956   : > { %5005 = vmatmul.msk.f32.gmra.mxu3 %vm1042_vm11, %v6786_v63 }
 0x95b   : > { %v3233_v22 = vpop.f32.mrf.mxu0 }
 0x95c   : > { %v6790_v33 = vadd.f32 %v5101_v1, %v3233_v22 }
 0x95e   : > { %5006 = vmatmul.msk.f32.gmra.mxu3 %vm1042_vm11, %v6790_v33 }
 0x963   : > { %v3236_v26 = vpop.f32.mrf.mxu0 }
 0x964   : > { %v6794_v28 = vadd.f32 %v5101_v1, %v3236_v26 }
 0x966   : > { %5007 = vmatmul.msk.f32.gmra.mxu3 %vm1042_vm11, %v6794_v28 }
 0x96b   : > { %v3239_v21 = vpop.f32.mrf.mxu0 }
 0x96c   : > { %v6798_v31 = vadd.f32 %v5101_v1, %v3239_v21 }
 0x96e   : > { %5008 = vmatmul.msk.f32.gmra.mxu3 %vm1042_vm11, %v6798_v31 }
 0x973   : > { %v3242_v25 = vpop.f32.mrf.mxu0 }
 0x974   : > { %v6802_v10 = vadd.f32 %v5101_v1, %v3242_v25  ;;  %v6814_v25 = vpop.f32.mrf.mxu3 }
 0x976   : > { %5009 = vmatmul.msk.f32.gmra.mxu3 %vm1042_vm11, %v6802_v10 }
 0x97a   : > { %v2816_v29 = vpop.xlane.xlu0 %2815 }
 0x97b   : > { %v2838_v17 = vsub.f32 %v2806_v55, %v2816_v29  ;;  %v3245_v53 = vpop.f32.mrf.mxu0 }
 0x97c   : > { %v6808_v22 = vadd.f32 %v5101_v1, %v3245_v53 }
 0x97d   : > { %v2846_v26 = vmul.f32 1.442695, %v2838_v17 }
 0x97e   : > { %5010 = vmatmul.msk.f32.gmra.mxu3 %vm1042_vm11, %v6808_v22 }
 0x97f   : > { %5190 = vpow2.f32 %v2846_v26 }
 0x982   : > { %v2819_v21 = vpop.xlane.xlu1 %2818 }
 0x983   : > { %v2839_v27 = vsub.f32 %v2807_v30, %v2819_v21  ;;  %v6823_v30 = vpop.f32.mrf.mxu3 }
 0x985   : > { %v6812_v48 = vpop.eup %5190  ;;  %v2848_v8 = vmul.f32 1.442695, %v2839_v27 }
 0x986   : > { %v2862_v3 = vsel %vm1310_vm12, %v6812_v48, 0.0 }
 0x987   : > { %5192 = vpow2.f32 %v2848_v8  ;;  %2863 = vadd.xlane.f32.xlu1 %v2862_v3 }
 0x98a   : > { %v2822_v55 = vpop.xlane.xlu2 %2821 }
 0x98b   : > { %v2840_v1 = vsub.f32 %v6751_v59, %v2822_v55  ;;  %v6830_v59 = vpop.f32.mrf.mxu3 }
 0x98d   : > { %v6819_v29 = vpop.eup %5192  ;;  %v2850_v17 = vmul.f32 1.442695, %v2840_v1 }
 0x98e   : > { %v2865_v53 = vsel %vm1310_vm12, %v6819_v29, 0.0 }
 0x98f   : > { %5194 = vpow2.f32 %v2850_v17  ;;  %2866 = vadd.xlane.f32.xlu0 %v2865_v53 }
 0x992   : > { %v2825_v26 = vpop.xlane.xlu0 %2824 }
 0x993   : > { %v2841_v27 = vsub.f32 %v6755_v57, %v2825_v26  ;;  %v6837_v26 = vpop.f32.mrf.mxu3 }
 0x995   : > { %v6826_v21 = vpop.eup %5194  ;;  %v2852_v8 = vmul.f32 1.442695, %v2841_v27 }
 0x996   : > { %v2868_v3 = vsel %vm1310_vm12, %v6826_v21, 0.0 }
 0x997   : > { %5196 = vpow2.f32 %v2852_v8  ;;  %2869 = vadd.xlane.f32.xlu1 %v2868_v3 }
 0x99a   : > { %v2828_v55 = vpop.xlane.xlu1 %2827 }
 0x99b   : > { %v2842_v1 = vsub.f32 %v6759_v61, %v2828_v55 }
 0x99d   : > { %v6833_v41 = vpop.eup %5196  ;;  %v2854_v17 = vmul.f32 1.442695, %v2842_v1 }
 0x99e   : > { %v2871_v53 = vsel %vm1310_vm12, %v6833_v41, 0.0 }
 0x99f   : > { %5198 = vpow2.f32 %v2854_v17  ;;  %2872 = vadd.xlane.f32.xlu2 %v2871_v53  ;;  %v6847_v17 = vpop.f32.mrf.mxu3 }
 0x9a2   : > { %v2831_v57 = vpop.xlane.xlu2 %2830 }
 0x9a3   : > { %v2843_v27 = vsub.f32 %v6763_v11, %v2831_v57 }
 0x9a5   : > { %v6840_v8 = vpop.eup %5198  ;;  %v2856_v3 = vmul.f32 1.442695, %v2843_v27 }
 0x9a6   : > { %v2874_v0 = vsel %vm1310_vm12, %v6840_v8, 0.0 }
 0x9a7   : > { %5200 = vpow2.f32 %v2856_v3  ;;  %2875 = vadd.xlane.f32.xlu0 %v2874_v0 }
 0x9aa   : > { %v2834_v61 = vpop.xlane.xlu0 %2833 }
 0x9ab   : > { %v2844_v55 = vsub.f32 %v6767_v52, %v2834_v61  ;;  %v6856_v52 = vpop.f32.mrf.mxu3 }
 0x9ad   : > { %v6845_v1 = vpop.eup %5200  ;;  %v2858_v53 = vmul.f32 1.442695, %v2844_v55 }
 0x9ae   : > { %v2877_v58 = vsel %vm1310_vm12, %v6845_v1, 0.0 }
 0x9af   : > { %5202 = vpow2.f32 %v2858_v53  ;;  %2878 = vadd.xlane.f32.xlu1 %v2877_v58 }
 0x9b2   : > { %v2837_v11 = vpop.xlane.xlu2 %2836 }
 0x9b3   : > { %v2845_v57 = vsub.f32 %v6771_v49, %v2837_v11  ;;  %v6862_v58 = vpop.f32.mrf.mxu3  ;;  %v3388_v49 = vmul.f32 %v6683_v42, %v6778_v38 }
 0x9b5   : > { %v6852_v27 = vpop.eup %5202  ;;  %v2860_v3 = vmul.f32 1.442695, %v2845_v57 }
 0x9b6   : > { %v2880_v0 = vsel %vm1310_vm12, %v6852_v27, 0.0 }
 0x9b7   : > { %5204 = vpow2.f32 %v2860_v3  ;;  %2881 = vadd.xlane.f32.xlu2 %v2880_v0  ;;  %v3389_v3 = vmul.f32 %v6668_v20, %v6782_v43 }
 0x9bd   : > { %v6858_v61 = vpop.eup %5204 }
 0x9be   : > { %v2883_v55 = vsel %vm1310_vm12, %v6858_v61, 0.0 }
 0x9bf   : > { %2884 = vadd.xlane.f32.xlu0 %v2883_v55 }
 0x9c9   : > { %v3437_v53 = vpop.f32.mrf.mxu3 }
 0x9ca   : > { %v3461_v11 = vmul.f32 %v6676_v4, %v3437_v53 }
 0x9cc   : > { %v6867_v57 = vadd.f32 %v3461_v11, %v3388_v49  ;;  %v3395_v49 = vmul.f32 %v6577_v19, %v6808_v22 }
 0x9d1   : > { %v3440_v13 = vpop.f32.mrf.mxu3 }
 0x9d2   : > { %v3462_v0 = vmul.f32 %v6661_v32, %v3440_v13  ;;  %v3394_v32 = vmul.f32 %v6597_v6, %v6802_v10 }
 0x9d4   : > { %v6872_v50 = vadd.f32 %v3462_v0, %v3389_v3 }
 0x9d9   : > { %v6874_v24 = vpop.f32.mrf.mxu3 }
 0x9e1   : > { %v3446_v55 = vpop.f32.mrf.mxu3 }
 0x9e9   : > { %v3449_v34 = vpop.f32.mrf.mxu3 }
 0x9f1   : > { %v3452_v36 = vpop.f32.mrf.mxu3 }
 0x9f2   : > { %v3466_v19 = vmul.f32 %v6605_v15, %v3452_v36 }
 0x9f9   : > { %v3455_v62 = vpop.f32.mrf.mxu3 }
 0x9fa   : > { %v2864_v12 = vpop.xlane.xlu1 %2863  ;;  %v3467_v13 = vmul.f32 %v6589_v16, %v3455_v62  ;;  %v3393_v62 = vmul.f32 %v6611_v5, %v6798_v31 }
 0x9fb   : > { %5206 = vrcp.f32 %v2864_v12  ;;  %v2897_v56 = vand.u32 2147483648, %v2864_v12  ;;  %v2895_v4 = vand.u32 2147483647, %v2864_v12  ;;  %vm2891_vm13 = vweird.f32 %v2864_v12 }
 0x9fc   : > { %v3475_v22 = vadd.f32 %v3467_v13, %v3394_v32  ;;  %v3474_v36 = vadd.f32 %v3466_v19, %v3393_v62 }
 0x9fd   : > { %vm2896_vm15 = vcmp.eq.f32.partialorder %v2895_v4, 8.507059e+37 }
 0xa01   : > { %v5207_v38 = vpop.eup %5206  ;;  %v3458_v53 = vpop.f32.mrf.mxu3 }
 0xa02   : > { %v2887_v11 = vmul.f32 %v5207_v38, %v2864_v12  ;;  %v3468_v43 = vmul.f32 %v6583_v46, %v3458_v53  ;;  %v2867_v51 = vpop.xlane.xlu0 %2866  ;;  %vm2892_vm10 = vweird.f32 %v5207_v38  ;;  %v2898_v53 = vor.u32 1.1754944e-38, %v2897_v56 }
 0xa03   : > { %5208 = vrcp.f32 %v2867_v51  ;;  %vm2893_vm14 = vmor %vm2891_vm13, %vm2892_vm10  ;;  %v3392_v56 = vmul.f32 %v6625_v44, %v6794_v28  ;;  %v2912_v31 = vand.u32 2147483648, %v2867_v51  ;;  %v2910_v4 = vand.u32 2147483647, %v2867_v51 }
 0xa04   : > { %v2888_v3 = vsub.f32 1.0, %v2887_v11  ;;  %v3476_v0 = vadd.f32 %v3468_v43, %v3395_v49  ;;  %v3465_v43 = vmul.f32 %v6619_v7, %v3449_v34  ;;  %vm2906_vm2 = vweird.f32 %v2867_v51 }
 0xa05   : > { %vm2911_vm4 = vcmp.eq.f32.partialorder %v2910_v4, 8.507059e+37 }
 0xa06   : > { %v2889_v20 = vmul.f32 %v5207_v38, %v2888_v3  ;;  %5011 = vmatpush.xpose.msk.msrb.mxu0 %vm1042_vm11, %v3476_v0  ;;  %v2913_v3 = vor.u32 1.1754944e-38, %v2912_v31 }
 0xa08   : > { %v2890_v42 = vadd.f32 %v5207_v38, %v2889_v20 }
 0xa09   : > { %v5209_v46 = vpop.eup %5208 }
 0xa0a   : > { %v2894_v16 = vsel %vm2893_vm14, %v5207_v38, %v2890_v42  ;;  %v2902_v49 = vmul.f32 %v5209_v46, %v2867_v51  ;;  %v2870_v10 = vpop.xlane.xlu1 %2869  ;;  %5012 = vmatpush.xpose.msk.msrb.mxu0 %vm1042_vm11, %v3475_v22  ;;  %vm2907_vm1 = vweird.f32 %v5209_v46  ;;  %v3464_v42 = vmul.f32 %v6633_v18, %v3446_v55 }
 0xa0b   : > { %v2899_v11 = vsel %vm2896_vm15, %v2898_v53, %v2894_v16  ;;  %5210 = vrcp.f32 %v2870_v10  ;;  %v3473_v38 = vadd.f32 %v3465_v43, %v3392_v56  ;;  %vm2908_vm3 = vmor %vm2906_vm2, %vm2907_vm1  ;;  %v3463_v22 = vmul.f32 %v6647_v23, %v6874_v24 }
 0xa0c   : > { %v2900_v32 = vmul.f32 %v6812_v48, %v2899_v11  ;;  %v2903_v12 = vsub.f32 1.0, %v2902_v49  ;;  %v3391_v48 = vmul.f32 %v6639_v2, %v6790_v33  ;;  %v3390_v16 = vmul.f32 %v6653_v45, %v6786_v63 }
 0xa0d   : > { %v2927_v49 = vand.u32 2147483648, %v2870_v10  ;;  %v2925_v11 = vand.u32 2147483647, %v2870_v10  ;;  %vm2921_vm6 = vweird.f32 %v2870_v10 }
 0xa0e   : > { %v2904_v20 = vmul.f32 %v5209_v46, %v2903_v12  ;;  %4939 = vmatmul.msk.f32.vlgmr.msra.gmra.mxu1 %vm1310_vm12, %v2900_v32  ;;  %5013 = vmatpush.xpose.msk.msrb.mxu0 %vm1042_vm11, %v3474_v36  ;;  %v3472_v55 = vadd.f32 %v3464_v42, %v3391_v48 }
 0xa0f   : > { %v2928_v36 = vor.u32 1.1754944e-38, %v2927_v49  ;;  %vm2926_vm8 = vcmp.eq.f32.partialorder %v2925_v11, 8.507059e+37  ;;  %v4982_v11 = vld [vmem:[%s7544_s7 + $0x60] sm:$0xff] }
 0xa10   : > { %v2905_v13 = vadd.f32 %v5209_v46, %v2904_v20 }
 0xa11   : > { %v5211_v34 = vpop.eup %5210 }
 0xa12   : > { %v2917_v28 = vmul.f32 %v5211_v34, %v2870_v10  ;;  %5014 = vmatpush.xpose.msk.msrb.mxu0 %vm1042_vm11, %v3473_v38  ;;  %v2873_v0 = vpop.xlane.xlu2 %2872  ;;  %v2909_v19 = vsel %vm2908_vm3, %v5209_v46, %v2905_v13  ;;  %vm2922_vm5 = vweird.f32 %v5211_v34  ;;  %v3471_v46 = vadd.f32 %v3463_v22, %v3390_v16 }
 0xa13   : > { %5212 = vrcp.f32 %v2873_v0  ;;  %v2914_v62 = vsel %vm2911_vm4, %v2913_v3, %v2909_v19  ;;  %vm2923_vm7 = vmor %vm2921_vm6, %vm2922_vm5  ;;  %v2942_v4 = vand.u32 2147483648, %v2873_v0  ;;  %v2940_v10 = vand.u32 2147483647, %v2873_v0 }
 0xa14   : > { %v2918_v53 = vsub.f32 1.0, %v2917_v28  ;;  %v2915_v51 = vmul.f32 %v6819_v29, %v2914_v62  ;;  %vm2936_vm10 = vweird.f32 %v2873_v0 }
 0xa15   : > { %v2943_v13 = vor.u32 1.1754944e-38, %v2942_v4  ;;  %vm2941_vm14 = vcmp.eq.f32.partialorder %v2940_v10, 8.507059e+37 }
 0xa16   : > { %v2919_v33 = vmul.f32 %v5211_v34, %v2918_v53  ;;  %5015 = vmatpush.xpose.msk.msrb.mxu0 %vm1042_vm11, %v3472_v55  ;;  %4940 = vmatmul.msk.f32.gmra.mxu1 %vm1310_vm12, %v2915_v51 }
 0xa18   : > { %v2920_v43 = vadd.f32 %v5211_v34, %v2919_v33 }
 0xa19   : > { %v5213_v24 = vpop.eup %5212 }
 0xa1a   : > { %v2932_v32 = vmul.f32 %v5213_v24, %v2873_v0  ;;  %v2876_v12 = vpop.xlane.xlu0 %2875  ;;  %5016 = vmatpush.xpose.msk.msrb.mxu0 %vm1042_vm11, %v3471_v46  ;;  %v2924_v29 = vsel %vm2923_vm7, %v5211_v34, %v2920_v43  ;;  %vm2937_vm9 = vweird.f32 %v5213_v24  ;;  %v4985_v0 = vld [vmem:[%s7544_s7 + $0x78] sm:$0xff] }
 0xa1b   : > { %5214 = vrcp.f32 %v2876_v12  ;;  %v2929_v56 = vsel %vm2926_vm8, %v2928_v36, %v2924_v29  ;;  %vm2938_vm13 = vmor %vm2936_vm10, %vm2937_vm9  ;;  %v2957_v22 = vand.u32 2147483648, %v2876_v12  ;;  %v2955_v55 = vand.u32 2147483647, %v2876_v12  ;;  %3270 = vmatpush.msrb.mxu1 %v4985_v0 }
 0xa1c   : > { %v2933_v63 = vsub.f32 1.0, %v2932_v32  ;;  %v2930_v20 = vmul.f32 %v6826_v21, %v2929_v56  ;;  %vm2951_vm1 = vweird.f32 %v2876_v12 }
 0xa1d   : > { %v2958_v51 = vor.u32 1.1754944e-38, %v2957_v22  ;;  %vm2956_vm3 = vcmp.eq.f32.partialorder %v2955_v55, 8.507059e+37 }
 0xa1e   : > { %v2934_v31 = vmul.f32 %v5213_v24, %v2933_v63  ;;  %5017 = vmatpush.xpose.msk.msrb.mxu0 %vm1042_vm11, %v6872_v50  ;;  %4941 = vmatmul.msk.f32.gmra.mxu1 %vm1310_vm12, %v2930_v20 }
 0xa20   : > { %v2935_v42 = vadd.f32 %v5213_v24, %v2934_v31 }
 0xa21   : > { %v5215_v38 = vpop.eup %5214 }
 0xa22   : > { %v2947_v34 = vmul.f32 %v5215_v38, %v2876_v12  ;;  %v2879_v48 = vpop.xlane.xlu1 %2878  ;;  %5018 = vmatpush.xpose.msk.msrb.mxu0 %vm1042_vm11, %v6867_v57  ;;  %v2939_v21 = vsel %vm2938_vm13, %v5213_v24, %v2935_v42  ;;  %vm2952_vm15 = vweird.f32 %v5215_v38  ;;  %v4984_v57 = vld [vmem:[%s7544_s7 + $0x70] sm:$0xff] }
 0xa23   : > { %5216 = vrcp.f32 %v2879_v48  ;;  %v2944_v28 = vsel %vm2941_vm14, %v2943_v13, %v2939_v21  ;;  %vm2953_vm2 = vmor %vm2951_vm1, %vm2952_vm15  ;;  %3271 = vmatpush.msrb.mxu1 %v4984_v57  ;;  %v2972_v32 = vand.u32 2147483648, %v2879_v48  ;;  %v2970_v12 = vand.u32 2147483647, %v2879_v48 }
 0xa24   : > { %v2948_v3 = vsub.f32 1.0, %v2947_v34  ;;  %v2945_v50 = vmul.f32 %v6833_v41, %v2944_v28  ;;  %v4983_v41 = vld [vmem:[%s7544_s7 + $0x68] sm:$0xff]  ;;  %vm2966_vm5 = vweird.f32 %v2879_v48 }
 0xa25   : > { %3272 = vmatpush.msrb.mxu1 %v4983_v41  ;;  %v2973_v56 = vor.u32 1.1754944e-38, %v2972_v32  ;;  %vm2971_vm7 = vcmp.eq.f32.partialorder %v2970_v12, 8.507059e+37 }
 0xa26   : > { %v2949_v19 = vmul.f32 %v5215_v38, %v2948_v3  ;;  %4942 = vmatmul.msk.f32.gmra.mxu1 %vm1310_vm12, %v2945_v50 }
 0xa27   : > { %3273 = vmatpush.msrb.mxu1 %v4982_v11 }
 0xa28   : > { %v2950_v53 = vadd.f32 %v5215_v38, %v2949_v19 }
 0xa29   : > { %v5217_v62 = vpop.eup %5216 }
 0xa2a   : > { %v2962_v16 = vmul.f32 %v5217_v62, %v2879_v48  ;;  %v2882_v33 = vpop.xlane.xlu2 %2881  ;;  %v2954_v49 = vsel %vm2953_vm2, %v5215_v38, %v2950_v53  ;;  %vm2967_vm4 = vweird.f32 %v5217_v62 }
 0xa2b   : > { %5218 = vrcp.f32 %v2882_v33  ;;  %v2959_v43 = vsel %vm2956_vm3, %v2958_v51, %v2954_v49  ;;  %vm2968_vm6 = vmor %vm2966_vm5, %vm2967_vm4  ;;  %v2985_v34 = vand.u32 2147483647, %v2882_v33  ;;  %vm2981_vm9 = vweird.f32 %v2882_v33 }
 0xa2c   : > { %v2963_v46 = vsub.f32 1.0, %v2962_v16  ;;  %v2960_v24 = vmul.f32 %v6840_v8, %v2959_v43  ;;  %v2987_v8 = vand.u32 2147483648, %v2882_v33 }
 0xa2d   : > { %vm2986_vm13 = vcmp.eq.f32.partialorder %v2985_v34, 8.507059e+37 }
 0xa2e   : > { %v2964_v36 = vmul.f32 %v5217_v62, %v2963_v46  ;;  %4943 = vmatmul.msk.f32.gmra.mxu1 %vm1310_vm12, %v2960_v24  ;;  %v2988_v3 = vor.u32 1.1754944e-38, %v2987_v8 }
 0xa30   : > { %v2965_v29 = vadd.f32 %v5217_v62, %v2964_v36 }
 0xa31   : > { %v5219_v63 = vpop.eup %5218 }
 0xa32   : > { %v2977_v20 = vmul.f32 %v5219_v63, %v2882_v33  ;;  %v2885_v31 = vpop.xlane.xlu0 %2884  ;;  %v2969_v4 = vsel %vm2968_vm6, %v5217_v62, %v2965_v29  ;;  %vm2982_vm8 = vweird.f32 %v5219_v63  ;;  %v5303_v33 = vld [vmem:[%s7548_s11] sm:$0xff] }
 0xa33   : > { %5220 = vrcp.f32 %v2885_v31  ;;  %v2974_v42 = vsel %vm2971_vm7, %v2973_v56, %v2969_v4  ;;  %vm2983_vm10 = vmor %vm2981_vm9, %vm2982_vm8  ;;  %v3002_v0 = vand.u32 2147483648, %v2885_v31  ;;  %vm2996_vm15 = vweird.f32 %v2885_v31 }
 0xa34   : > { %v2978_v10 = vsub.f32 1.0, %v2977_v20  ;;  %v2975_v38 = vmul.f32 %v6845_v1, %v2974_v42  ;;  %v3000_v1 = vand.u32 2147483647, %v2885_v31 }
 0xa35   : > { %v3003_v62 = vor.u32 1.1754944e-38, %v3002_v0  ;;  %v7604_v0 = vld [vmem:[#allocation21_spill] sm:$0xff] }
 0xa36   : > { %v2979_v13 = vmul.f32 %v5219_v63, %v2978_v10  ;;  %4944 = vmatmul.msk.f32.gmra.mxu1 %vm1310_vm12, %v2975_v38  ;;  %vm3001_vm2 = vcmp.eq.f32.partialorder %v3000_v1, 8.507059e+37 }
 0xa38   : > { %v2980_v21 = vadd.f32 %v5219_v63, %v2979_v13 }
 0xa39   : > { %v5221_v48 = vpop.eup %5220 }
 0xa3a   : > { %v2992_v28 = vmul.f32 %v5221_v48, %v2885_v31  ;;  %v2984_v50 = vsel %vm2983_vm10, %v5219_v63, %v2980_v21  ;;  %vm2997_vm14 = vweird.f32 %v5221_v48 }
 0xa3b   : > { %v2989_v19 = vsel %vm2986_vm13, %v2988_v3, %v2984_v50  ;;  %vm2998_vm1 = vmor %vm2996_vm15, %vm2997_vm14 }
 0xa3c   : > { %v2993_v22 = vsub.f32 1.0, %v2992_v28  ;;  %v2990_v55 = vmul.f32 %v6852_v27, %v2989_v19  ;;  %v4947_v27 = vld [vmem:[%s7549_s12 + $0x10] sm:$0xff] }
 0xa3d   : > { %3112 = vmatpush.msra.mxu2 %v4947_v27 }
 0xa3e   : > { %v2994_v57 = vmul.f32 %v5221_v48, %v2993_v22  ;;  %4945 = vmatmul.msk.f32.gmra.mxu1 %vm1310_vm12, %v2990_v55  ;;  %v7603_v22 = vld [vmem:[#allocation22_spill] sm:$0xff] }
 0xa3f   : > { %3346 = vmatpush.msrb.mxu2 %v5303_v33 }
 0xa40   : > { %v2995_v53 = vadd.f32 %v5221_v48, %v2994_v57 }
 0xa42   : > { %v2999_v41 = vsel %vm2998_vm1, %v5221_v48, %v2995_v53 }
 0xa43   : > { %v3004_v51 = vsel %vm3001_vm2, %v3003_v62, %v2999_v41  ;;  %v7605_v62 = vld [vmem:[#allocation20_spill] sm:$0xff] }
 0xa44   : > { %v3005_v16 = vmul.f32 %v6858_v61, %v3004_v51  ;;  %v5100_v61 = vld [vmem:[%s7578_s4 + $0x3] ss:$0 sm:$0xff]  ;;  %v7606_v51 = vld [vmem:[#allocation19_spill] sm:$0xff] }
 0xa45   : > { %v3174_v49 = vadd.f32 %v5100_v61, %v6806_v54  ;;  %v3177_v46 = vadd.f32 %v5100_v61, %v6814_v25  ;;  %v3180_v24 = vadd.f32 %v5100_v61, %v6823_v30  ;;  %v3183_v32 = vadd.f32 %v5100_v61, %v6830_v59 }
 0xa46   : > { %4946 = vmatmul.msk.f32.gmra.mxu1 %vm1310_vm12, %v3005_v16  ;;  %v3186_v54 = vadd.f32 %v5100_v61, %v6837_v26  ;;  %v3189_v25 = vadd.f32 %v5100_v61, %v6847_v17  ;;  %v3192_v30 = vadd.f32 %v5100_v61, %v6856_v52  ;;  %v6981_v59 = vadd.f32 %v5100_v61, %v6862_v58  ;;  %v5102_v26 = vld [vmem:[%s7545_s8 + $0x3] ss:$0 sm:$0xff] }
 0xa47   : > { %v3299_v55 = vmul.f32 %v7603_v22, %v3174_v49  ;;  %v3300_v41 = vmul.f32 %v7605_v62, %v3177_v46 }
 0xa48   : > { %v3303_v61 = vmul.f32 %v6625_v44, %v3186_v54  ;;  %v5304_v44 = vld [vmem:[%s7547_s10 + $0x30] sm:$0xff] }
 0xa4e   : > { %4987 = vmatmul.msk.f32.vlgmr.msrb.gmra.mxu1 %vm638_vm0, %v5578_v60 }
 0xa56   : > { %4988 = vmatmul.msk.f32.gmra.mxu1 %vm638_vm0, %v5600_v14 }
 0xa5e   : > { %4989 = vmatmul.msk.f32.gmra.mxu1 %vm638_vm0, %v5615_v35 }
 0xa66   : > { %4990 = vmatmul.msk.f32.gmra.mxu1 %vm638_vm0, %v5631_v39 }
 0xa6e   : > { %4991 = vmatmul.msk.f32.gmra.mxu1 %vm638_vm0, %v5620_v37 }
 0xa76   : > { %4992 = vmatmul.msk.f32.gmra.mxu1 %vm638_vm0, %v5634_v40 }
 0xa7e   : > { %4993 = vmatmul.msk.f32.gmra.mxu1 %vm638_vm0, %v5645_v47 }
 0xa86   : > { %4994 = vmatmul.msk.f32.gmra.mxu1 %vm638_vm0, %v5700_v9 }
 0xa8b   : > { %v3047_v60 = vpop.f32.mrf.mxu1 }
 0xa8c   : > { %4948 = vmatmul.msk.f32.vlgmr.msra.gmra.mxu2 %vm1042_vm11, %v3047_v60  ;;  %v3301_v60 = vmul.f32 %v6653_v45, %v3180_v24  ;;  %v3304_v45 = vmul.f32 %v6611_v5, %v3189_v25  ;;  %v5305_v5 = vld [vmem:[%s7546_s9 + $0x38] sm:$0xff] }
 0xa93   : > { %v3050_v14 = vpop.f32.mrf.mxu1 }
 0xa94   : > { %4949 = vmatmul.msk.f32.gmra.mxu2 %vm1042_vm11, %v3050_v14 }
 0xa9b   : > { %v3053_v35 = vpop.f32.mrf.mxu1 }
 0xa9c   : > { %4950 = vmatmul.msk.f32.gmra.mxu2 %vm1042_vm11, %v3053_v35 }
 0xaa3   : > { %v3056_v39 = vpop.f32.mrf.mxu1 }
 0xaa4   : > { %4951 = vmatmul.msk.f32.gmra.mxu2 %vm1042_vm11, %v3056_v39 }
 0xaab   : > { %v3059_v37 = vpop.f32.mrf.mxu1 }
 0xaac   : > { %4952 = vmatmul.msk.f32.gmra.mxu2 %vm1042_vm11, %v3059_v37  ;;  %v3302_v37 = vmul.f32 %v6639_v2, %v3183_v32  ;;  %v3305_v2 = vmul.f32 %v6597_v6, %v3192_v30 }
 0xab3   : > { %v3062_v40 = vpop.f32.mrf.mxu1 }
 0xab4   : > { %4953 = vmatmul.msk.f32.gmra.mxu2 %vm1042_vm11, %v3062_v40 }
 0xabb   : > { %v3065_v47 = vpop.f32.mrf.mxu1 }
 0xabc   : > { %4954 = vmatmul.msk.f32.gmra.mxu2 %vm1042_vm11, %v3065_v47 }
 0xac3   : > { %v3068_v9 = vpop.f32.mrf.mxu1 }
 0xac4   : > { %4955 = vmatmul.msk.f32.gmra.mxu2 %vm1042_vm11, %v3068_v9 }
 0xacb   : > { %v3275_v11 = vpop.f32.mrf.mxu1 }
 0xacc   : > { %4995 = vmatmul.msk.f32.vlgmr.msrb.gmra.mxu2 %vm1042_vm11, %v3174_v49  ;;  %v3276_v38 = vadd.f32 %v5102_v26, %v3275_v11 }
 0xad3   : > { %v3278_v43 = vpop.f32.mrf.mxu1 }
 0xad4   : > { %4996 = vmatmul.msk.f32.gmra.mxu2 %vm1042_vm11, %v3177_v46  ;;  %v3279_v8 = vadd.f32 %v5102_v26, %v3278_v43 }
 0xadb   : > { %v3281_v36 = vpop.f32.mrf.mxu1 }
 0xadc   : > { %4997 = vmatmul.msk.f32.gmra.mxu2 %vm1042_vm11, %v3180_v24  ;;  %v3282_v42 = vadd.f32 %v5102_v26, %v3281_v36 }
 0xae3   : > { %v3284_v12 = vpop.f32.mrf.mxu1 }
 0xae4   : > { %4998 = vmatmul.msk.f32.gmra.mxu2 %vm1042_vm11, %v3183_v32  ;;  %v3285_v10 = vadd.f32 %v5102_v26, %v3284_v12  ;;  %v5306_v32 = vld [vmem:[%s7547_s10 + $0x38] sm:$0xff] }
 0xaeb   : > { %v3287_v29 = vpop.f32.mrf.mxu1 }
 0xaec   : > { %4999 = vmatmul.msk.f32.gmra.mxu2 %vm1042_vm11, %v3186_v54  ;;  %v3288_v52 = vadd.f32 %v5102_v26, %v3287_v29 }
 0xaf3   : > { %v3290_v63 = vpop.f32.mrf.mxu1 }
 0xaf4   : > { %5000 = vmatmul.msk.f32.gmra.mxu2 %vm1042_vm11, %v3189_v25  ;;  %v3291_v4 = vadd.f32 %v5102_v26, %v3290_v63 }
 0xafb   : > { %v3293_v56 = vpop.f32.mrf.mxu1 }
 0xafc   : > { %5001 = vmatmul.msk.f32.gmra.mxu2 %vm1042_vm11, %v3192_v30  ;;  %v3294_v17 = vadd.f32 %v5102_v26, %v3293_v56 }
 0xb03   : > { %v3296_v20 = vpop.f32.mrf.mxu1 }
 0xb04   : > { %v3297_v31 = vadd.f32 %v5102_v26, %v3296_v20  ;;  %5002 = vmatmul.msk.f32.gmra.mxu2 %vm1042_vm11, %v6981_v59 }
 0xb06   : > { %3798 = vmatpush.msra.mxu1 %v3297_v31 }
 0xb08   : > { %3799 = vmatpush.msra.mxu1 %v3294_v17 }
 0xb0a   : > { %3800 = vmatpush.msra.mxu1 %v3291_v4 }
 0xb0c   : > { %3801 = vmatpush.msra.mxu1 %v3288_v52 }
 0xb0e   : > { %3802 = vmatpush.msra.mxu1 %v3285_v10 }
 0xb0f   : > { %v6988_v58 = vpop.f32.mrf.mxu2 }
 0xb10   : > { %3803 = vmatpush.msra.mxu1 %v3282_v42 }
 0xb12   : > { %3804 = vmatpush.msra.mxu1 %v3279_v8 }
 0xb14   : > { %3805 = vmatpush.msra.mxu1 %v3276_v38 }
 0xb17   : > { %v6990_v13 = vpop.f32.mrf.mxu2 }
 0xb1f   : > { %v6992_v34 = vpop.f32.mrf.mxu2 }
 0xb27   : > { %v6994_v21 = vpop.f32.mrf.mxu2 }
 0xb2f   : > { %v6996_v48 = vpop.f32.mrf.mxu2 }
 0xb37   : > { %v6998_v3 = vpop.f32.mrf.mxu2 }
 0xb3f   : > { %v7000_v28 = vpop.f32.mrf.mxu2 }
 0xb47   : > { %v7002_v50 = vpop.f32.mrf.mxu2 }
 0xb4f   : > { %v3348_v19 = vpop.f32.mrf.mxu2 }
 0xb50   : > { %v3372_v57 = vmul.f32 %v7604_v0, %v3348_v19 }
 0xb52   : > { %v3380_v1 = vadd.f32 %v3372_v57, %v3299_v55 }
 0xb54   : > { %5019 = vmatmul.msk.f32.vlgmr.msrb.gmra.mxu0 %vm1042_vm11, %v3380_v1 }
 0xb57   : > { %v3351_v53 = vpop.f32.mrf.mxu2 }
 0xb58   : > { %v3373_v16 = vmul.f32 %v7606_v51, %v3351_v53 }
 0xb5a   : > { %v3381_v27 = vadd.f32 %v3373_v16, %v3300_v41 }
 0xb5c   : > { %5020 = vmatmul.msk.f32.gmra.mxu0 %vm1042_vm11, %v3381_v27 }
 0xb5f   : > { %v3354_v33 = vpop.f32.mrf.mxu2 }
 0xb60   : > { %v3374_v14 = vmul.f32 %v6647_v23, %v3354_v33 }
 0xb62   : > { %v3382_v35 = vadd.f32 %v3374_v14, %v3301_v60 }
 0xb64   : > { %5021 = vmatmul.msk.f32.gmra.mxu0 %vm1042_vm11, %v3382_v35 }
 0xb67   : > { %v3357_v39 = vpop.f32.mrf.mxu2 }
 0xb68   : > { %v3375_v40 = vmul.f32 %v6633_v18, %v3357_v39 }
 0xb6a   : > { %v3383_v47 = vadd.f32 %v3375_v40, %v3302_v37 }
 0xb6c   : > { %5022 = vmatmul.msk.f32.gmra.mxu0 %vm1042_vm11, %v3383_v47 }
 0xb6f   : > { %v3360_v9 = vpop.f32.mrf.mxu2 }
 0xb70   : > { %v3376_v49 = vmul.f32 %v6619_v7, %v3360_v9 }
 0xb72   : > { %v3384_v11 = vadd.f32 %v3376_v49, %v3303_v61 }
 0xb74   : > { %5023 = vmatmul.msk.f32.gmra.mxu0 %vm1042_vm11, %v3384_v11 }
 0xb77   : > { %v3363_v23 = vpop.f32.mrf.mxu2 }
 0xb78   : > { %v3377_v46 = vmul.f32 %v6605_v15, %v3363_v23  ;;  %v3306_v15 = vmul.f32 %v5305_v5, %v6981_v59 }
 0xb7a   : > { %v3385_v43 = vadd.f32 %v3377_v46, %v3304_v45 }
 0xb7c   : > { %5024 = vmatmul.msk.f32.gmra.mxu0 %vm1042_vm11, %v3385_v43 }
 0xb7f   : > { %v3366_v18 = vpop.f32.mrf.mxu2 }
 0xb80   : > { %v3378_v24 = vmul.f32 %v5304_v44, %v3366_v18 }
 0xb82   : > { %v3386_v7 = vadd.f32 %v3378_v24, %v3305_v2 }
 0xb84   : > { %5025 = vmatmul.msk.f32.gmra.mxu0 %vm1042_vm11, %v3386_v7 }
 0xb87   : > { %v3369_v36 = vpop.f32.mrf.mxu2 }
 0xb88   : > { %v3379_v6 = vmul.f32 %v5306_v32, %v3369_v36 }
 0xb8a   : > { %v3387_v12 = vadd.f32 %v3379_v6, %v3306_v15 }
 0xb8c   : > { %5026 = vmatmul.msk.f32.gmra.mxu0 %vm1042_vm11, %v3387_v12 }
 0xbd1   : > { %v3542_v54 = vpop.f32.mrf.mxu0 }
 0xbd2   : > { %v3566_v29 = vmul.f32 0.35355338, %v3542_v54 }
 0xbd4   : > { %v3574_v25 = vsel %vm1310_vm12, %v3566_v29, -inf }
 0xbd5   : > { %3575 = vmax.xlane.f32.xlu1 %v3574_v25 }
 0xbd9   : > { %v3545_v63 = vpop.f32.mrf.mxu0 }
 0xbda   : > { %v3567_v30 = vmul.f32 0.35355338, %v3545_v63 }
 0xbdc   : > { %v3577_v56 = vsel %vm1310_vm12, %v3567_v30, -inf }
 0xbdd   : > { %3578 = vmax.xlane.f32.xlu2 %v3577_v56 }
 0xbe1   : > { %v3548_v26 = vpop.f32.mrf.mxu0 }
 0xbe2   : > { %v3568_v59 = vmul.f32 0.35355338, %v3548_v26 }
 0xbe4   : > { %v3580_v20 = vsel %vm1310_vm12, %v3568_v59, -inf }
 0xbe5   : > { %3581 = vmax.xlane.f32.xlu0 %v3580_v20 }
 0xbe9   : > { %v3551_v31 = vpop.f32.mrf.mxu0 }
 0xbea   : > { %v3569_v17 = vmul.f32 0.35355338, %v3551_v31 }
 0xbec   : > { %v3583_v4 = vsel %vm1310_vm12, %v3569_v17, -inf }
 0xbed   : > { %3584 = vmax.xlane.f32.xlu1 %v3583_v4 }
 0xbf1   : > { %v3554_v52 = vpop.f32.mrf.mxu0 }
 0xbf2   : > { %v3570_v10 = vmul.f32 0.35355338, %v3554_v52 }
 0xbf4   : > { %v3586_v42 = vsel %vm1310_vm12, %v3570_v10, -inf }
 0xbf5   : > { %3587 = vmax.xlane.f32.xlu2 %v3586_v42 }
 0xbf9   : > { %v3557_v8 = vpop.f32.mrf.mxu0 }
 0xbfa   : > { %v3571_v38 = vmul.f32 0.35355338, %v3557_v8 }
 0xbfc   : > { %v3589_v19 = vsel %vm1310_vm12, %v3571_v38, -inf }
 0xbfd   : > { %3590 = vmax.xlane.f32.xlu0 %v3589_v19 }
 0xc01   : > { %v3560_v22 = vpop.f32.mrf.mxu0 }
 0xc02   : > { %v3572_v55 = vmul.f32 0.35355338, %v3560_v22 }
 0xc04   : > { %v3592_v0 = vsel %vm1310_vm12, %v3572_v55, -inf }
 0xc05   : > { %3593 = vmax.xlane.f32.xlu1 %v3592_v0 }
 0xc09   : > { %v3563_v57 = vpop.f32.mrf.mxu0 }
 0xc0a   : > { %v3573_v1 = vmul.f32 0.35355338, %v3563_v57 }
 0xc0c   : > { %v3595_v53 = vsel %vm1310_vm12, %v3573_v1, -inf }
 0xc0d   : > { %3596 = vmax.xlane.f32.xlu0 %v3595_v53 }
 0xc48   : > { %v3576_v62 = vpop.xlane.xlu1 %3575 }
 0xc49   : > { %v3598_v41 = vsub.f32 %v3566_v29, %v3576_v62 }
 0xc4b   : > { %v3606_v51 = vmul.f32 1.442695, %v3598_v41 }
 0xc4d   : > { %5222 = vpow2.f32 %v3606_v51 }
 0xc50   : > { %v3579_v16 = vpop.xlane.xlu2 %3578 }
 0xc51   : > { %v3599_v27 = vsub.f32 %v3567_v30, %v3579_v16 }
 0xc53   : > { %v7043_v33 = vpop.eup %5222  ;;  %v3608_v60 = vmul.f32 1.442695, %v3599_v27 }
 0xc54   : > { %v3622_v14 = vsel %vm1310_vm12, %v7043_v33, 0.0 }
 0xc55   : > { %5224 = vpow2.f32 %v3608_v60  ;;  %3623 = vadd.xlane.f32.xlu2 %v3622_v14 }
 0xc58   : > { %v3582_v35 = vpop.xlane.xlu0 %3581 }
 0xc59   : > { %v3600_v39 = vsub.f32 %v3568_v59, %v3582_v35 }
 0xc5b   : > { %v7047_v37 = vpop.eup %5224  ;;  %v3610_v40 = vmul.f32 1.442695, %v3600_v39 }
 0xc5c   : > { %v3625_v47 = vsel %vm1310_vm12, %v7047_v37, 0.0 }
 0xc5d   : > { %5226 = vpow2.f32 %v3610_v40  ;;  %3626 = vadd.xlane.f32.xlu1 %v3625_v47 }
 0xc60   : > { %v3585_v9 = vpop.xlane.xlu1 %3584 }
 0xc61   : > { %v3601_v61 = vsub.f32 %v3569_v17, %v3585_v9 }
 0xc63   : > { %v7051_v49 = vpop.eup %5226  ;;  %v3612_v11 = vmul.f32 1.442695, %v3601_v61 }
 0xc64   : > { %v3628_v23 = vsel %vm1310_vm12, %v7051_v49, 0.0 }
 0xc65   : > { %5228 = vpow2.f32 %v3612_v11  ;;  %3629 = vadd.xlane.f32.xlu2 %v3628_v23 }
 0xc68   : > { %v3588_v45 = vpop.xlane.xlu2 %3587 }
 0xc69   : > { %v3602_v46 = vsub.f32 %v3570_v10, %v3588_v45 }
 0xc6b   : > { %v7055_v43 = vpop.eup %5228  ;;  %v3614_v18 = vmul.f32 1.442695, %v3602_v46 }
 0xc6c   : > { %v3631_v2 = vsel %vm1310_vm12, %v7055_v43, 0.0 }
 0xc6d   : > { %5230 = vpow2.f32 %v3614_v18  ;;  %3632 = vadd.xlane.f32.xlu0 %v3631_v2 }
 0xc70   : > { %v3591_v44 = vpop.xlane.xlu0 %3590 }
 0xc71   : > { %v3603_v24 = vsub.f32 %v3571_v38, %v3591_v44 }
 0xc73   : > { %v7059_v7 = vpop.eup %5230  ;;  %v3616_v36 = vmul.f32 1.442695, %v3603_v24 }
 0xc74   : > { %v3634_v5 = vsel %vm1310_vm12, %v7059_v7, 0.0 }
 0xc75   : > { %5232 = vpow2.f32 %v3616_v36  ;;  %3635 = vadd.xlane.f32.xlu1 %v3634_v5 }
 0xc78   : > { %v3594_v15 = vpop.xlane.xlu1 %3593 }
 0xc79   : > { %v3604_v32 = vsub.f32 %v3572_v55, %v3594_v15 }
 0xc7b   : > { %v7063_v6 = vpop.eup %5232  ;;  %v3618_v12 = vmul.f32 1.442695, %v3604_v32 }
 0xc7c   : > { %v3637_v54 = vsel %vm1310_vm12, %v7063_v6, 0.0 }
 0xc7d   : > { %5234 = vpow2.f32 %v3618_v12  ;;  %3638 = vadd.xlane.f32.xlu2 %v3637_v54 }
 0xc80   : > { %v3597_v29 = vpop.xlane.xlu0 %3596 }
 0xc81   : > { %v3605_v25 = vsub.f32 %v3573_v1, %v3597_v29 }
 0xc83   : > { %v7067_v63 = vpop.eup %5234  ;;  %v3620_v30 = vmul.f32 1.442695, %v3605_v25 }
 0xc84   : > { %v3640_v56 = vsel %vm1310_vm12, %v7067_v63, 0.0 }
 0xc85   : > { %5236 = vpow2.f32 %v3620_v30  ;;  %3641 = vadd.xlane.f32.xlu0 %v3640_v56 }
 0xc8b   : > { %v7071_v26 = vpop.eup %5236 }
 0xc8c   : > { %v3643_v59 = vsel %vm1310_vm12, %v7071_v26, 0.0 }
 0xc8d   : > { %3644 = vadd.xlane.f32.xlu1 %v3643_v59 }
 0xcc8   : > { %v3624_v20 = vpop.xlane.xlu2 %3623 }
 0xcc9   : > { %5238 = vrcp.f32 %v3624_v20  ;;  %v3657_v10 = vand.u32 2147483648, %v3624_v20  ;;  %v3655_v8 = vand.u32 2147483647, %v3624_v20  ;;  %vm3651_vm4 = vweird.f32 %v3624_v20 }
 0xccb   : > { %v3658_v22 = vor.u32 1.1754944e-38, %v3657_v10  ;;  %vm3656_vm6 = vcmp.eq.f32.partialorder %v3655_v8, 8.507059e+37  ;;  %v5035_v10 = vld [vmem:[%s7549_s12 + $0x18] sm:$0xff] }
 0xccc   : > { %3872 = vmatpush.msra.mxu2 %v5035_v10  ;;  %v5307_v10 = vld [vmem:[%s5445_s3] sm:$0xff] }
 0xccf   : > { %v5239_v31 = vpop.eup %5238 }
 0xcd0   : > { %v3647_v17 = vmul.f32 %v5239_v31, %v3624_v20  ;;  %v3627_v4 = vpop.xlane.xlu1 %3626  ;;  %vm3652_vm3 = vweird.f32 %v5239_v31 }
 0xcd1   : > { %5240 = vrcp.f32 %v3627_v4  ;;  %vm3653_vm5 = vmor %vm3651_vm4, %vm3652_vm3  ;;  %v3672_v51 = vand.u32 2147483648, %v3627_v4  ;;  %v3670_v16 = vand.u32 2147483647, %v3627_v4  ;;  %vm3666_vm8 = vweird.f32 %v3627_v4 }
 0xcd2   : > { %v3648_v52 = vsub.f32 1.0, %v3647_v17 }
 0xcd3   : > { %v3673_v14 = vor.u32 1.1754944e-38, %v3672_v51  ;;  %vm3671_vm10 = vcmp.eq.f32.partialorder %v3670_v16, 8.507059e+37 }
 0xcd4   : > { %v3649_v42 = vmul.f32 %v5239_v31, %v3648_v52 }
 0xcd6   : > { %v3650_v38 = vadd.f32 %v5239_v31, %v3649_v42 }
 0xcd7   : > { %v5241_v19 = vpop.eup %5240 }
 0xcd8   : > { %v3654_v55 = vsel %vm3653_vm5, %v5239_v31, %v3650_v38  ;;  %v3662_v0 = vmul.f32 %v5241_v19, %v3627_v4  ;;  %v3630_v57 = vpop.xlane.xlu2 %3629  ;;  %vm3667_vm7 = vweird.f32 %v5241_v19 }
 0xcd9   : > { %v3659_v1 = vsel %vm3656_vm6, %v3658_v22, %v3654_v55  ;;  %5242 = vrcp.f32 %v3630_v57  ;;  %vm3668_vm9 = vmor %vm3666_vm8, %vm3667_vm7  ;;  %v3687_v11 = vand.u32 2147483648, %v3630_v57  ;;  %v3685_v23 = vand.u32 2147483647, %v3630_v57 }
 0xcda   : > { %v3660_v53 = vmul.f32 %v7043_v33, %v3659_v1  ;;  %v3663_v62 = vsub.f32 1.0, %v3662_v0  ;;  %vm3681_vm14 = vweird.f32 %v3630_v57 }
 0xcdb   : > { %v3688_v18 = vor.u32 1.1754944e-38, %v3687_v11  ;;  %vm3686_vm1 = vcmp.eq.f32.partialorder %v3685_v23, 8.507059e+37 }
 0xcdc   : > { %v3664_v41 = vmul.f32 %v5241_v19, %v3663_v62  ;;  %5027 = vmatmul.msk.f32.vlgmr.msra.gmra.mxu1 %vm1310_vm12, %v3660_v53 }
 0xcde   : > { %v3665_v27 = vadd.f32 %v5241_v19, %v3664_v41 }
 0xcdf   : > { %v5243_v60 = vpop.eup %5242 }
 0xce0   : > { %v3677_v35 = vmul.f32 %v5243_v60, %v3630_v57  ;;  %v3633_v39 = vpop.xlane.xlu0 %3632  ;;  %v3669_v40 = vsel %vm3668_vm9, %v5241_v19, %v3665_v27  ;;  %vm3682_vm13 = vweird.f32 %v5243_v60 }
 0xce1   : > { %5244 = vrcp.f32 %v3633_v39  ;;  %v3674_v9 = vsel %vm3671_vm10, %v3673_v14, %v3669_v40  ;;  %vm3683_vm15 = vmor %vm3681_vm14, %vm3682_vm13  ;;  %v3702_v32 = vand.u32 2147483648, %v3633_v39  ;;  %v3700_v12 = vand.u32 2147483647, %v3633_v39 }
 0xce2   : > { %v3678_v47 = vsub.f32 1.0, %v3677_v35  ;;  %v3675_v33 = vmul.f32 %v7047_v37, %v3674_v9  ;;  %vm3696_vm3 = vweird.f32 %v3633_v39 }
 0xce3   : > { %v3703_v25 = vor.u32 1.1754944e-38, %v3702_v32  ;;  %vm3701_vm5 = vcmp.eq.f32.partialorder %v3700_v12, 8.507059e+37 }
 0xce4   : > { %v3679_v61 = vmul.f32 %v5243_v60, %v3678_v47  ;;  %5028 = vmatmul.msk.f32.gmra.mxu1 %vm1310_vm12, %v3675_v33 }
 0xce6   : > { %v3680_v45 = vadd.f32 %v5243_v60, %v3679_v61 }
 0xce7   : > { %v5245_v46 = vpop.eup %5244 }
 0xce8   : > { %v3692_v2 = vmul.f32 %v5245_v46, %v3633_v39  ;;  %v3636_v44 = vpop.xlane.xlu1 %3635  ;;  %v3684_v24 = vsel %vm3683_vm15, %v5243_v60, %v3680_v45  ;;  %vm3697_vm2 = vweird.f32 %v5245_v46 }
 0xce9   : > { %5246 = vrcp.f32 %v3636_v44  ;;  %v3689_v5 = vsel %vm3686_vm1, %v3688_v18, %v3684_v24  ;;  %vm3698_vm4 = vmor %vm3696_vm3, %vm3697_vm2  ;;  %v3717_v4 = vand.u32 2147483648, %v3636_v44  ;;  %v3715_v52 = vand.u32 2147483647, %v3636_v44 }
 0xcea   : > { %v3693_v36 = vsub.f32 1.0, %v3692_v2  ;;  %v3690_v37 = vmul.f32 %v7051_v49, %v3689_v5  ;;  %vm3711_vm7 = vweird.f32 %v3636_v44 }
 0xceb   : > { %v3718_v38 = vor.u32 1.1754944e-38, %v3717_v4  ;;  %vm3716_vm9 = vcmp.eq.f32.partialorder %v3715_v52, 8.507059e+37  ;;  %v7108_v52 = vld [vmem:[%s7550_s13] ss:$0 sm:$0xff] }
 0xcec   : > { %v3694_v15 = vmul.f32 %v5245_v46, %v3693_v36  ;;  %5029 = vmatmul.msk.f32.gmra.mxu1 %vm1310_vm12, %v3690_v37 }
 0xcee   : > { %v3695_v54 = vadd.f32 %v5245_v46, %v3694_v15 }
 0xcef   : > { %v5247_v29 = vpop.eup %5246 }
 0xcf0   : > { %v3707_v30 = vmul.f32 %v5247_v29, %v3636_v44  ;;  %v3639_v56 = vpop.xlane.xlu2 %3638  ;;  %v3699_v59 = vsel %vm3698_vm4, %v5245_v46, %v3695_v54  ;;  %vm3712_vm6 = vweird.f32 %v5247_v29 }
 0xcf1   : > { %5248 = vrcp.f32 %v3639_v56  ;;  %v3704_v31 = vsel %vm3701_vm5, %v3703_v25, %v3699_v59  ;;  %vm3713_vm8 = vmor %vm3711_vm7, %vm3712_vm6  ;;  %v3732_v53 = vand.u32 2147483648, %v3639_v56  ;;  %v3730_v62 = vand.u32 2147483647, %v3639_v56  ;;  %v7607_v59 = vld [vmem:[#allocation3_spill] sm:$0xff] }
 0xcf2   : > { %v3708_v20 = vsub.f32 1.0, %v3707_v30  ;;  %v3705_v49 = vmul.f32 %v7055_v43, %v3704_v31  ;;  %vm3726_vm13 = vweird.f32 %v3639_v56 }
 0xcf3   : > { %v3733_v16 = vor.u32 1.1754944e-38, %v3732_v53  ;;  %vm3731_vm15 = vcmp.eq.f32.partialorder %v3730_v62, 8.507059e+37  ;;  %v7611_v53 = vld [vmem:[#allocation5_spill] sm:$0xff] }
 0xcf4   : > { %v3709_v17 = vmul.f32 %v5247_v29, %v3708_v20  ;;  %5030 = vmatmul.msk.f32.gmra.mxu1 %vm1310_vm12, %v3705_v49  ;;  %v7608_v20 = vld [vmem:[#allocation11_spill] sm:$0xff]  ;;  %v7612_v62 = vld [vmem:[#allocation13_spill] sm:$0xff] }
 0xcf5   : > { %v2363_v31 = vadd.f32 %v7608_v20, %v7607_v59 }
 0xcf6   : > { %v3710_v42 = vadd.f32 %v5247_v29, %v3709_v17 }
 0xcf7   : > { %v5249_v8 = vpop.eup %5248  ;;  %v3138_v49 = vadd.f32 %v6988_v58, %v2363_v31 }
 0xcf8   : > { %v3722_v19 = vmul.f32 %v5249_v8, %v3639_v56  ;;  %v3642_v22 = vpop.xlane.xlu0 %3641  ;;  %v3714_v55 = vsel %vm3713_vm8, %v5247_v29, %v3710_v42  ;;  %vm3727_vm10 = vweird.f32 %v5249_v8 }
 0xcf9   : > { %5250 = vrcp.f32 %v3642_v22  ;;  %v3719_v0 = vsel %vm3716_vm9, %v3718_v38, %v3714_v55  ;;  %vm3728_vm14 = vmor %vm3726_vm13, %vm3727_vm10  ;;  %v3747_v40 = vand.u32 2147483648, %v3642_v22  ;;  %v3745_v9 = vand.u32 2147483647, %v3642_v22  ;;  %v7609_v38 = vld [vmem:[#allocation4_spill] sm:$0xff] }
 0xcfa   : > { %v3723_v43 = vsub.f32 1.0, %v3722_v19  ;;  %v3720_v57 = vmul.f32 %v7059_v7, %v3719_v0  ;;  %vm3741_vm2 = vweird.f32 %v3642_v22  ;;  %v7610_v19 = vld [vmem:[#allocation12_spill] sm:$0xff] }
 0xcfb   : > { %v3748_v11 = vor.u32 1.1754944e-38, %v3747_v40  ;;  %vm3746_vm4 = vcmp.eq.f32.partialorder %v3745_v9, 8.507059e+37  ;;  %v7614_v40 = vld [vmem:[#allocation14_spill] sm:$0xff] }
 0xcfc   : > { %v3724_v1 = vmul.f32 %v5249_v8, %v3723_v43  ;;  %5031 = vmatmul.msk.f32.gmra.mxu1 %vm1310_vm12, %v3720_v57  ;;  %v5308_v57 = vld [vmem:[%s5445_s3 + $0x8] sm:$0xff] }
 0xcfe   : > { %v3725_v41 = vadd.f32 %v5249_v8, %v3724_v1 }
 0xcff   : > { %v5251_v51 = vpop.eup %5250 }
 0xd00   : > { %v3737_v27 = vmul.f32 %v5251_v51, %v3642_v22  ;;  %v3645_v60 = vpop.xlane.xlu1 %3644  ;;  %v3729_v14 = vsel %vm3728_vm14, %v5249_v8, %v3725_v41  ;;  %vm3742_vm1 = vweird.f32 %v5251_v51  ;;  %v2366_v22 = vadd.f32 %v7610_v19, %v7609_v38  ;;  %v7622_v38 = vld [vmem:[#allocation18_spill] sm:$0xff] }
 0xd01   : > { %5252 = vrcp.f32 %v3645_v60  ;;  %v3734_v39 = vsel %vm3731_vm15, %v3733_v16, %v3729_v14  ;;  %vm3743_vm3 = vmor %vm3741_vm2, %vm3742_vm1  ;;  %v3762_v44 = vand.u32 2147483648, %v3645_v60  ;;  %vm3756_vm6 = vweird.f32 %v3645_v60  ;;  %v5309_v14 = vld [vmem:[%s5445_s3 + $0x10] sm:$0xff] }
 0xd02   : > { %v3738_v35 = vsub.f32 1.0, %v3737_v27  ;;  %v3735_v7 = vmul.f32 %v7063_v6, %v3734_v39  ;;  %v3760_v6 = vand.u32 2147483647, %v3645_v60  ;;  %v3139_v58 = vadd.f32 %v6990_v13, %v2366_v22  ;;  %v7613_v39 = vld [vmem:[#allocation6_spill] sm:$0xff] }
 0xd03   : > { %v3763_v5 = vor.u32 1.1754944e-38, %v3762_v44  ;;  %v2369_v41 = vadd.f32 %v7612_v62, %v7611_v53  ;;  %v7623_v62 = vld [vmem:[#allocation2_spill] sm:$0xff] }
 0xd04   : > { %v3739_v47 = vmul.f32 %v5251_v51, %v3738_v35  ;;  %5032 = vmatmul.msk.f32.gmra.mxu1 %vm1310_vm12, %v3735_v7  ;;  %vm3761_vm8 = vcmp.eq.f32.partialorder %v3760_v6, 8.507059e+37  ;;  %v2372_v7 = vadd.f32 %v7614_v40, %v7613_v39 }
 0xd05   : > { %v3140_v16 = vadd.f32 %v6992_v34, %v2369_v41 }
 0xd06   : > { %v3740_v33 = vadd.f32 %v5251_v51, %v3739_v47  ;;  %v3141_v9 = vadd.f32 %v6994_v21, %v2372_v7 }
 0xd07   : > { %v5253_v61 = vpop.eup %5252 }
 0xd08   : > { %v3752_v23 = vmul.f32 %v5253_v61, %v3645_v60  ;;  %v3744_v45 = vsel %vm3743_vm3, %v5251_v51, %v3740_v33  ;;  %vm3757_vm5 = vweird.f32 %v5253_v61 }
 0xd09   : > { %v3749_v46 = vsel %vm3746_vm4, %v3748_v11, %v3744_v45  ;;  %vm3758_vm7 = vmor %vm3756_vm6, %vm3757_vm5  ;;  %v5310_v11 = vld [vmem:[%s5445_s3 + $0x18] sm:$0xff]  ;;  %v7615_v45 = vld [vmem:[#allocation7_spill] sm:$0xff] }
 0xd0a   : > { %v3753_v18 = vsub.f32 1.0, %v3752_v23  ;;  %v3750_v2 = vmul.f32 %v7067_v63, %v3749_v46  ;;  %v7616_v46 = vld [vmem:[#allocation15_spill] sm:$0xff] }
 0xd0c   : > { %v3754_v24 = vmul.f32 %v5253_v61, %v3753_v18  ;;  %5033 = vmatmul.msk.f32.gmra.mxu1 %vm1310_vm12, %v3750_v2  ;;  %v2375_v18 = vadd.f32 %v7616_v46, %v7615_v45 }
 0xd0e   : > { %v3755_v36 = vadd.f32 %v5253_v61, %v3754_v24  ;;  %v3142_v44 = vadd.f32 %v6996_v48, %v2375_v18 }
 0xd10   : > { %v3759_v37 = vsel %vm3758_vm7, %v5253_v61, %v3755_v36  ;;  %v5311_v36 = vld [vmem:[%s5445_s3 + $0x20] sm:$0xff] }
 0xd11   : > { %v3764_v15 = vsel %vm3761_vm8, %v3763_v5, %v3759_v37  ;;  %v7617_v37 = vld [vmem:[#allocation8_spill] sm:$0xff] }
 0xd12   : > { %v3765_v32 = vmul.f32 %v7071_v26, %v3764_v15  ;;  %v7618_v15 = vld [vmem:[#allocation16_spill] sm:$0xff] }
 0xd14   : > { %5034 = vmatmul.msk.f32.gmra.mxu1 %vm1310_vm12, %v3765_v32  ;;  %v2378_v32 = vadd.f32 %v7618_v15, %v7617_v37 }
 0xd59   : > { %v3807_v12 = vpop.f32.mrf.mxu1 }
 0xd5a   : > { %5036 = vmatmul.msk.f32.vlgmr.msra.gmra.mxu2 %vm1042_vm11, %v3807_v12 }
 0xd61   : > { %v3810_v63 = vpop.f32.mrf.mxu1 }
 0xd62   : > { %5037 = vmatmul.msk.f32.gmra.mxu2 %vm1042_vm11, %v3810_v63  ;;  %v3143_v63 = vadd.f32 %v6998_v3, %v2378_v32 }
 0xd69   : > { %v3813_v54 = vpop.f32.mrf.mxu1 }
 0xd6a   : > { %5038 = vmatmul.msk.f32.gmra.mxu2 %vm1042_vm11, %v3813_v54 }
 0xd71   : > { %v3816_v29 = vpop.f32.mrf.mxu1 }
 0xd72   : > { %5039 = vmatmul.msk.f32.gmra.mxu2 %vm1042_vm11, %v3816_v29 }
 0xd79   : > { %v3819_v25 = vpop.f32.mrf.mxu1 }
 0xd7a   : > { %5040 = vmatmul.msk.f32.gmra.mxu2 %vm1042_vm11, %v3819_v25  ;;  %v5312_v25 = vld [vmem:[%s5445_s3 + $0x28] sm:$0xff] }
 0xd81   : > { %v3822_v30 = vpop.f32.mrf.mxu1 }
 0xd82   : > { %5041 = vmatmul.msk.f32.gmra.mxu2 %vm1042_vm11, %v3822_v30 }
 0xd89   : > { %v3825_v26 = vpop.f32.mrf.mxu1 }
 0xd8a   : > { %5042 = vmatmul.msk.f32.gmra.mxu2 %vm1042_vm11, %v3825_v26  ;;  %v7619_v26 = vld [vmem:[#allocation9_spill] sm:$0xff] }
 0xd91   : > { %v3828_v56 = vpop.f32.mrf.mxu1 }
 0xd92   : > { %5043 = vmatmul.msk.f32.gmra.mxu2 %vm1042_vm11, %v3828_v56  ;;  %v7620_v56 = vld [vmem:[#allocation17_spill] sm:$0xff] }
 0xd93   : > { %v2381_v59 = vadd.f32 %v7620_v56, %v7619_v26  ;;  %v4128_v26 = vld [vmem:[%s7553_s16 + $0x10] sm:$0xff]  ;;  %v4127_v56 = vld [vmem:[%s7553_s16 + $0x8] sm:$0xff] }
 0xd95   : > { %v3144_v31 = vadd.f32 %v7000_v28, %v2381_v59  ;;  %v4126_v59 = vld [vmem:[%s7553_s16] sm:$0xff] }
 0xddd   : > { %v3874_v17 = vpop.f32.mrf.mxu2 }
 0xdde   : > { %v3898_v4 = vadd.f32 %v3874_v17, %v3138_v49 }
 0xde0   : > { %v3906_v42 = vadd.f32 %v5307_v10, %v3898_v4  ;;  %v5313_v4 = vld [vmem:[%s5445_s3 + $0x30] sm:$0xff] }
 0xde2   : > { %v7112_v8 = vadd.f32 %v7108_v52, %v3906_v42  ;;  %v7621_v42 = vld [vmem:[#allocation10_spill] sm:$0xff] }
 0xde3   : > { %v2384_v19 = vadd.f32 %v7622_v38, %v7621_v42 }
 0xde4   : > { %v3926_v55 = vsel %vm638_vm0, %v7112_v8, 0.0 }
 0xde5   : > { %3927 = vadd.xlane.f32.xlu2 %v3926_v55  ;;  %v3877_v43 = vpop.f32.mrf.mxu2  ;;  %v3145_v55 = vadd.f32 %v7002_v50, %v2384_v19 }
 0xde6   : > { %v3899_v0 = vadd.f32 %v3877_v43, %v3139_v58 }
 0xde8   : > { %v3907_v1 = vadd.f32 %v5308_v57, %v3899_v0  ;;  %v5314_v0 = vld [vmem:[%s5445_s3 + $0x38] sm:$0xff] }
 0xdea   : > { %v7123_v51 = vadd.f32 %v7108_v52, %v3907_v1 }
 0xdec   : > { %v3929_v27 = vsel %vm638_vm0, %v7123_v51, 0.0 }
 0xded   : > { %v3880_v60 = vpop.f32.mrf.mxu2  ;;  %3930 = vadd.xlane.f32.xlu0 %v3929_v27 }
 0xdee   : > { %v3900_v13 = vadd.f32 %v3880_v60, %v3140_v16 }
 0xdf0   : > { %v3908_v35 = vadd.f32 %v5309_v14, %v3900_v13 }
 0xdf2   : > { %v7132_v47 = vadd.f32 %v7108_v52, %v3908_v35 }
 0xdf4   : > { %v3932_v34 = vsel %vm638_vm0, %v7132_v47, 0.0 }
 0xdf5   : > { %3933 = vadd.xlane.f32.xlu1 %v3932_v34  ;;  %v3883_v33 = vpop.f32.mrf.mxu2 }
 0xdf6   : > { %v3901_v61 = vadd.f32 %v3883_v33, %v3141_v9 }
 0xdf8   : > { %v3909_v23 = vadd.f32 %v5310_v11, %v3901_v61 }
 0xdfa   : > { %v7141_v2 = vadd.f32 %v7108_v52, %v3909_v23 }
 0xdfc   : > { %v3935_v21 = vsel %vm638_vm0, %v7141_v2, 0.0 }
 0xdfd   : > { %3936 = vadd.xlane.f32.xlu2 %v3935_v21  ;;  %v3886_v24 = vpop.f32.mrf.mxu2 }
 0xdfe   : > { %v3902_v6 = vadd.f32 %v3886_v24, %v3142_v44 }
 0xe00   : > { %v3910_v5 = vadd.f32 %v5311_v36, %v3902_v6 }
 0xe02   : > { %v7150_v12 = vadd.f32 %v7108_v52, %v3910_v5 }
 0xe04   : > { %v3938_v48 = vsel %vm638_vm0, %v7150_v12, 0.0 }
 0xe05   : > { %3939 = vadd.xlane.f32.xlu0 %v3938_v48  ;;  %v3889_v54 = vpop.f32.mrf.mxu2 }
 0xe06   : > { %v3903_v29 = vadd.f32 %v3889_v54, %v3143_v63 }
 0xe08   : > { %v3911_v30 = vadd.f32 %v5312_v25, %v3903_v29 }
 0xe0a   : > { %v7159_v20 = vadd.f32 %v7108_v52, %v3911_v30  ;;  %v4129_v30 = vld [vmem:[%s7553_s16 + $0x18] sm:$0xff] }
 0xe0b   : > { %4170 = vmatpush.msra.mxu3 %v4129_v30 }
 0xe0c   : > { %v3941_v3 = vsel %vm638_vm0, %v7159_v20, 0.0 }
 0xe0d   : > { %3942 = vadd.xlane.f32.xlu1 %v3941_v3  ;;  %v3892_v49 = vpop.f32.mrf.mxu2  ;;  %4171 = vmatpush.msra.mxu3 %v4128_v26 }
 0xe0e   : > { %v3904_v17 = vadd.f32 %v3892_v49, %v3144_v31 }
 0xe0f   : > { %4172 = vmatpush.msra.mxu3 %v4127_v56 }
 0xe10   : > { %v3912_v10 = vadd.f32 %v5313_v4, %v3904_v17 }
 0xe11   : > { %4173 = vmatpush.msra.mxu3 %v4126_v59 }
 0xe12   : > { %v7168_v22 = vadd.f32 %v7108_v52, %v3912_v10 }
 0xe14   : > { %v3944_v58 = vsel %vm638_vm0, %v7168_v22, 0.0 }
 0xe15   : > { %3945 = vadd.xlane.f32.xlu0 %v3944_v58  ;;  %v3895_v28 = vpop.f32.mrf.mxu2 }
 0xe16   : > { %v3905_v43 = vadd.f32 %v3895_v28, %v3145_v55 }
 0xe18   : > { %v3913_v57 = vadd.f32 %v5314_v0, %v3905_v43 }
 0xe1a   : > { %v7175_v1 = vadd.f32 %v7108_v52, %v3913_v57 }
 0xe1c   : > { %v3947_v35 = vsel %vm638_vm0, %v7175_v1, 0.0 }
 0xe58   : > { %v3928_v53 = vpop.xlane.xlu2 %3927 }
 0xe59   : > { %v3950_v41 = vmul.f32 %v3928_v53, %v7623_v62 }
 0xe5b   : > { %v7179_v16 = vsub.f32 %v7112_v8, %v3950_v41 }
 0xe5d   : > { %v3966_v50 = vmul.f32 %v7179_v16, %v7179_v16 }
 0xe5f   : > { %v3974_v27 = vsel %vm638_vm0, %v3966_v50, 0.0 }
 0xe60   : > { %3975 = vadd.xlane.f32.xlu2 %v3974_v27  ;;  %v3931_v60 = vpop.xlane.xlu0 %3930 }
 0xe61   : > { %v3951_v13 = vmul.f32 %v3931_v60, %v7623_v62 }
 0xe63   : > { %v7186_v14 = vsub.f32 %v7123_v51, %v3951_v13 }
 0xe65   : > { %v3967_v52 = vmul.f32 %v7186_v14, %v7186_v14 }
 0xe67   : > { %v3977_v39 = vsel %vm638_vm0, %v3967_v52, 0.0  ;;  %v7253_v52 = vld [vmem:[%s7551_s14] ss:$0 sm:$0xff] }
 0xe68   : > { %3948 = vadd.xlane.f32.xlu2 %v3947_v35  ;;  %v3934_v40 = vpop.xlane.xlu1 %3933  ;;  %3978 = vadd.xlane.f32.xlu1 %v3977_v39 }
 0xe69   : > { %v3952_v7 = vmul.f32 %v3934_v40, %v7623_v62  ;;  %v7258_v40 = vld [vmem:[%s7552_s15] ss:$0 sm:$0xff] }
 0xe6b   : > { %v7195_v9 = vsub.f32 %v7132_v47, %v3952_v7 }
 0xe6d   : > { %v3968_v34 = vmul.f32 %v7195_v9, %v7195_v9 }
 0xe6f   : > { %v3980_v33 = vsel %vm638_vm0, %v3968_v34, 0.0 }
 0xe70   : > { %v3937_v61 = vpop.xlane.xlu2 %3936  ;;  %3981 = vadd.xlane.f32.xlu0 %v3980_v33 }
 0xe71   : > { %v3953_v11 = vmul.f32 %v3937_v61, %v7623_v62 }
 0xe73   : > { %v7202_v23 = vsub.f32 %v7141_v2, %v3953_v11 }
 0xe75   : > { %v3969_v45 = vmul.f32 %v7202_v23, %v7202_v23 }
 0xe77   : > { %v3983_v46 = vsel %vm638_vm0, %v3969_v45, 0.0 }
 0xe78   : > { %3984 = vadd.xlane.f32.xlu1 %v3983_v46  ;;  %v3940_v18 = vpop.xlane.xlu0 %3939 }
 0xe79   : > { %v3954_v44 = vmul.f32 %v3940_v18, %v7623_v62 }
 0xe7b   : > { %v7209_v21 = vsub.f32 %v7150_v12, %v3954_v44 }
 0xe7d   : > { %v3970_v24 = vmul.f32 %v7209_v21, %v7209_v21 }
 0xe7f   : > { %v3986_v6 = vsel %vm638_vm0, %v3970_v24, 0.0 }
 0xe80   : > { %v3943_v36 = vpop.xlane.xlu1 %3942  ;;  %3987 = vadd.xlane.f32.xlu2 %v3986_v6 }
 0xe81   : > { %v3955_v5 = vmul.f32 %v3943_v36, %v7623_v62 }
 0xe83   : > { %v7216_v37 = vsub.f32 %v7159_v20, %v3955_v5 }
 0xe85   : > { %v3971_v15 = vmul.f32 %v7216_v37, %v7216_v37 }
 0xe87   : > { %v3989_v32 = vsel %vm638_vm0, %v3971_v15, 0.0 }
 0xe88   : > { %3990 = vadd.xlane.f32.xlu0 %v3989_v32  ;;  %v3946_v63 = vpop.xlane.xlu0 %3945 }
 0xe89   : > { %v3956_v48 = vmul.f32 %v3946_v63, %v7623_v62 }
 0xe8b   : > { %v7223_v54 = vsub.f32 %v7168_v22, %v3956_v48 }
 0xe8d   : > { %v3972_v29 = vmul.f32 %v7223_v54, %v7223_v54 }
 0xe8f   : > { %v3992_v25 = vsel %vm638_vm0, %v3972_v29, 0.0 }
 0xe90   : > { %3993 = vadd.xlane.f32.xlu1 %v3992_v25 }
 0xed3   : > { %v3976_v31 = vpop.xlane.xlu2 %3975 }
 0xed4   : > { %v3998_v3 = vmul.f32 %v3976_v31, %v7623_v62 }
 0xed6   : > { %v4006_v49 = vadd.f32 1e-05, %v3998_v3 }
 0xed8   : > { %5254 = vrsqrt.f32 %v4006_v49  ;;  %vm4020_vm9 = vweird.f32 %v4006_v49 }
 0xedb   : > { %v3949_v17 = vpop.xlane.xlu2 %3948  ;;  %v3979_v4 = vpop.xlane.xlu1 %3978 }
 0xedc   : > { %v3957_v10 = vmul.f32 %v3949_v17, %v7623_v62  ;;  %v3999_v42 = vmul.f32 %v3979_v4, %v7623_v62 }
 0xede   : > { %v5255_v38 = vpop.eup %5254  ;;  %v7244_v19 = vsub.f32 %v7175_v1, %v3957_v10  ;;  %v4007_v58 = vadd.f32 1e-05, %v3999_v42 }
 0xedf   : > { %v4015_v55 = vmul.f32 %v5255_v38, %v4006_v49  ;;  %vm4021_vm11 = vweird.f32 %v5255_v38 }
 0xee0   : > { %v3973_v28 = vmul.f32 %v7244_v19, %v7244_v19  ;;  %5256 = vrsqrt.f32 %v4007_v58  ;;  %vm4022_vm10 = vmor %vm4020_vm9, %vm4021_vm11  ;;  %vm4030_vm14 = vweird.f32 %v4007_v58 }
 0xee1   : > { %v4016_v43 = vmul.f32 %v5255_v38, %v4015_v55 }
 0xee2   : > { %v3995_v0 = vsel %vm638_vm0, %v3973_v28, 0.0 }
 0xee3   : > { %v4017_v57 = vmul.f32 0.5, %v4016_v43  ;;  %3996 = vadd.xlane.f32.xlu2 %v3995_v0  ;;  %v3982_v53 = vpop.xlane.xlu0 %3981 }
 0xee4   : > { %v4000_v50 = vmul.f32 %v3982_v53, %v7623_v62 }
 0xee5   : > { %v4018_v41 = vsub.f32 1.5, %v4017_v57 }
 0xee6   : > { %v5257_v27 = vpop.eup %5256  ;;  %v4008_v13 = vadd.f32 1e-05, %v4000_v50 }
 0xee7   : > { %v4019_v60 = vmul.f32 %v5255_v38, %v4018_v41  ;;  %v4025_v35 = vmul.f32 %v5257_v27, %v4007_v58  ;;  %vm4031_vm13 = vweird.f32 %v5257_v27 }
 0xee8   : > { %5258 = vrsqrt.f32 %v4008_v13  ;;  %vm4032_vm15 = vmor %vm4030_vm14, %vm4031_vm13  ;;  %vm4040_vm2 = vweird.f32 %v4008_v13 }
 0xee9   : > { %v4023_v39 = vsel %vm4022_vm10, %v5255_v38, %v4019_v60  ;;  %v4026_v34 = vmul.f32 %v5257_v27, %v4025_v35 }
 0xeea   : > { %v4094_v7 = vmul.f32 %v4023_v39, %v7179_v16 }
 0xeeb   : > { %v4027_v61 = vmul.f32 0.5, %v4026_v34  ;;  %v3985_v11 = vpop.xlane.xlu1 %3984 }
 0xeec   : > { %v4106_v33 = vmul.f32 %v7253_v52, %v4094_v7  ;;  %v4001_v45 = vmul.f32 %v3985_v11, %v7623_v62 }
 0xeed   : > { %v4028_v18 = vsub.f32 1.5, %v4027_v61 }
 0xeee   : > { %v4118_v46 = vadd.f32 %v7258_v40, %v4106_v33  ;;  %v5259_v44 = vpop.eup %5258  ;;  %v4009_v24 = vadd.f32 1e-05, %v4001_v45 }
 0xeef   : > { %v4029_v6 = vmul.f32 %v5257_v27, %v4028_v18  ;;  %v4035_v36 = vmul.f32 %v5259_v44, %v4008_v13  ;;  %vm4041_vm1 = vweird.f32 %v5259_v44 }
 0xef0   : > { %5044 = vmatmul.msk.f32.vlgmr.msra.gmra.mxu3 %vm638_vm0, %v4118_v46  ;;  %5260 = vrsqrt.f32 %v4009_v24  ;;  %vm4042_vm3 = vmor %vm4040_vm2, %vm4041_vm1  ;;  %vm4050_vm5 = vweird.f32 %v4009_v24 }
 0xef1   : > { %v4033_v16 = vsel %vm4032_vm15, %v5257_v27, %v4029_v6  ;;  %v4036_v5 = vmul.f32 %v5259_v44, %v4035_v36 }
 0xef2   : > { %v4095_v15 = vmul.f32 %v4033_v16, %v7186_v14 }
 0xef3   : > { %v4037_v32 = vmul.f32 0.5, %v4036_v5  ;;  %v3988_v63 = vpop.xlane.xlu2 %3987 }
 0xef4   : > { %v4002_v48 = vmul.f32 %v3988_v63, %v7623_v62  ;;  %v4107_v29 = vmul.f32 %v7253_v52, %v4095_v15 }
 0xef5   : > { %v4038_v25 = vsub.f32 1.5, %v4037_v32 }
 0xef6   : > { %v5261_v30 = vpop.eup %5260  ;;  %v4010_v26 = vadd.f32 1e-05, %v4002_v48  ;;  %v4119_v56 = vadd.f32 %v7258_v40, %v4107_v29 }
 0xef7   : > { %v4039_v59 = vmul.f32 %v5259_v44, %v4038_v25  ;;  %v4045_v31 = vmul.f32 %v5261_v30, %v4009_v24  ;;  %vm4051_vm4 = vweird.f32 %v5261_v30 }
 0xef8   : > { %5262 = vrsqrt.f32 %v4010_v26  ;;  %5045 = vmatmul.msk.f32.gmra.mxu3 %vm638_vm0, %v4119_v56  ;;  %vm4052_vm6 = vmor %vm4050_vm5, %vm4051_vm4  ;;  %vm4060_vm8 = vweird.f32 %v4010_v26 }
 0xef9   : > { %v4043_v14 = vsel %vm4042_vm3, %v5259_v44, %v4039_v59  ;;  %v4046_v3 = vmul.f32 %v5261_v30, %v4045_v31 }
 0xefa   : > { %v4096_v49 = vmul.f32 %v4043_v14, %v7195_v9 }
 0xefb   : > { %v4047_v17 = vmul.f32 0.5, %v4046_v3  ;;  %v3991_v4 = vpop.xlane.xlu0 %3990 }
 0xefc   : > { %v4003_v10 = vmul.f32 %v3991_v4, %v7623_v62  ;;  %v4108_v42 = vmul.f32 %v7253_v52, %v4096_v49 }
 0xefd   : > { %v4048_v38 = vsub.f32 1.5, %v4047_v17 }
 0xefe   : > { %v5263_v55 = vpop.eup %5262  ;;  %v4011_v58 = vadd.f32 1e-05, %v4003_v10  ;;  %v4120_v28 = vadd.f32 %v7258_v40, %v4108_v42 }
 0xeff   : > { %v4049_v43 = vmul.f32 %v5261_v30, %v4048_v38  ;;  %v4055_v0 = vmul.f32 %v5263_v55, %v4010_v26  ;;  %vm4061_vm7 = vweird.f32 %v5263_v55 }
 0xf00   : > { %5264 = vrsqrt.f32 %v4011_v58  ;;  %5046 = vmatmul.msk.f32.gmra.mxu3 %vm638_vm0, %v4120_v28  ;;  %vm4062_vm11 = vmor %vm4060_vm8, %vm4061_vm7  ;;  %vm4070_vm10 = vweird.f32 %v4011_v58 }
 0xf01   : > { %v4053_v9 = vsel %vm4052_vm6, %v5261_v30, %v4049_v43  ;;  %v4056_v57 = vmul.f32 %v5263_v55, %v4055_v0 }
 0xf02   : > { %v4097_v53 = vmul.f32 %v4053_v9, %v7202_v23 }
 0xf03   : > { %v4057_v41 = vmul.f32 0.5, %v4056_v57  ;;  %v3994_v50 = vpop.xlane.xlu1 %3993 }
 0xf04   : > { %v4004_v27 = vmul.f32 %v3994_v50, %v7623_v62  ;;  %v4109_v60 = vmul.f32 %v7253_v52, %v4097_v53 }
 0xf05   : > { %v4058_v13 = vsub.f32 1.5, %v4057_v41 }
 0xf06   : > { %v5265_v35 = vpop.eup %5264  ;;  %v4012_v39 = vadd.f32 1e-05, %v4004_v27  ;;  %v4121_v7 = vadd.f32 %v7258_v40, %v4109_v60 }
 0xf07   : > { %v4059_v34 = vmul.f32 %v5263_v55, %v4058_v13  ;;  %v4065_v33 = vmul.f32 %v5265_v35, %v4011_v58  ;;  %vm4071_vm9 = vweird.f32 %v5265_v35 }
 0xf08   : > { %5266 = vrsqrt.f32 %v4012_v39  ;;  %5047 = vmatmul.msk.f32.gmra.mxu3 %vm638_vm0, %v4121_v7  ;;  %vm4072_vm13 = vmor %vm4070_vm10, %vm4071_vm9  ;;  %vm4080_vm15 = vweird.f32 %v4012_v39 }
 0xf09   : > { %v4063_v23 = vsel %vm4062_vm11, %v5263_v55, %v4059_v34  ;;  %v4066_v61 = vmul.f32 %v5265_v35, %v4065_v33 }
 0xf0a   : > { %v4098_v11 = vmul.f32 %v4063_v23, %v7209_v21 }
 0xf0b   : > { %v4067_v45 = vmul.f32 0.5, %v4066_v61  ;;  %v4558_v61 = vld [vmem:[%s7555_s18 + $0x38] sm:$0xff] }
 0xf0c   : > { %v4110_v46 = vmul.f32 %v7253_v52, %v4098_v11  ;;  %4595 = vmatpush.msra.mxu0 %v4558_v61 }
 0xf0d   : > { %v4068_v18 = vsub.f32 1.5, %v4067_v45 }
 0xf0e   : > { %v5267_v44 = vpop.eup %5266  ;;  %v4122_v24 = vadd.f32 %v7258_v40, %v4110_v46 }
 0xf0f   : > { %v4069_v6 = vmul.f32 %v5265_v35, %v4068_v18  ;;  %v4075_v36 = vmul.f32 %v5267_v44, %v4012_v39  ;;  %vm4081_vm14 = vweird.f32 %v5267_v44 }
 0xf10   : > { %5048 = vmatmul.msk.f32.gmra.mxu3 %vm638_vm0, %v4122_v24  ;;  %vm4082_vm1 = vmor %vm4080_vm15, %vm4081_vm14 }
 0xf11   : > { %v4073_v16 = vsel %vm4072_vm13, %v5265_v35, %v4069_v6  ;;  %v4076_v5 = vmul.f32 %v5267_v44, %v4075_v36 }
 0xf12   : > { %v4099_v15 = vmul.f32 %v4073_v16, %v7216_v37 }
 0xf13   : > { %v4077_v32 = vmul.f32 0.5, %v4076_v5 }
 0xf14   : > { %v4111_v21 = vmul.f32 %v7253_v52, %v4099_v15 }
 0xf15   : > { %v4078_v63 = vsub.f32 1.5, %v4077_v32 }
 0xf16   : > { %v4123_v48 = vadd.f32 %v7258_v40, %v4111_v21 }
 0xf17   : > { %v4079_v29 = vmul.f32 %v5267_v44, %v4078_v63 }
 0xf18   : > { %5049 = vmatmul.msk.f32.gmra.mxu3 %vm638_vm0, %v4123_v48  ;;  %v4557_v48 = vld [vmem:[%s7555_s18 + $0x30] sm:$0xff] }
 0xf19   : > { %v4083_v25 = vsel %vm4082_vm1, %v5267_v44, %v4079_v29  ;;  %4596 = vmatpush.msra.mxu0 %v4557_v48 }
 0xf1a   : > { %v4100_v30 = vmul.f32 %v4083_v25, %v7223_v54 }
 0xf1c   : > { %v4112_v26 = vmul.f32 %v7253_v52, %v4100_v30 }
 0xf1e   : > { %v4124_v56 = vadd.f32 %v7258_v40, %v4112_v26 }
 0xf20   : > { %5050 = vmatmul.msk.f32.gmra.mxu3 %vm638_vm0, %v4124_v56 }
 0xf56   : > { %v3997_v37 = vpop.xlane.xlu2 %3996 }
 0xf57   : > { %v4005_v59 = vmul.f32 %v3997_v37, %v7623_v62  ;;  %v7298_v62 = vld [vmem:[%s7554_s17] ss:$0 sm:$0xff]  ;;  %v4556_v37 = vld [vmem:[%s7555_s18 + $0x28] sm:$0xff] }
 0xf58   : > { %4597 = vmatpush.msra.mxu0 %v4556_v37 }
 0xf59   : > { %v4013_v31 = vadd.f32 1e-05, %v4005_v59 }
 0xf5b   : > { %5268 = vrsqrt.f32 %v4013_v31  ;;  %vm4090_vm3 = vweird.f32 %v4013_v31 }
 0xf61   : > { %v5269_v14 = vpop.eup %5268 }
 0xf62   : > { %v4085_v3 = vmul.f32 %v5269_v14, %v4013_v31  ;;  %vm4091_vm2 = vweird.f32 %v5269_v14 }
 0xf63   : > { %vm4092_vm4 = vmor %vm4090_vm3, %vm4091_vm2 }
 0xf64   : > { %v4086_v49 = vmul.f32 %v5269_v14, %v4085_v3 }
 0xf66   : > { %v4087_v17 = vmul.f32 0.5, %v4086_v49 }
 0xf68   : > { %v4088_v4 = vsub.f32 1.5, %v4087_v17 }
 0xf6a   : > { %v4089_v10 = vmul.f32 %v5269_v14, %v4088_v4  ;;  %v4555_v4 = vld [vmem:[%s7555_s18 + $0x20] sm:$0xff] }
 0xf6b   : > { %4598 = vmatpush.msra.mxu0 %v4555_v4 }
 0xf6c   : > { %v4093_v54 = vsel %vm4092_vm4, %v5269_v14, %v4089_v10 }
 0xf6d   : > { %v4101_v42 = vmul.f32 %v4093_v54, %v7244_v19 }
 0xf6f   : > { %v4113_v38 = vmul.f32 %v7253_v52, %v4101_v42 }
 0xf71   : > { %v4125_v55 = vadd.f32 %v7258_v40, %v4113_v38  ;;  %v4554_v38 = vld [vmem:[%s7555_s18 + $0x18] sm:$0xff] }
 0xf72   : > { %4599 = vmatpush.msra.mxu0 %v4554_v38 }
 0xf73   : > { %v4175_v58 = vpop.f32.mrf.mxu3  ;;  %5051 = vmatmul.msk.f32.gmra.mxu3 %vm638_vm0, %v4125_v55 }
 0xf74   : > { %v7303_v28 = vadd.f32 %v7298_v62, %v4175_v58 }
 0xf76   : > { %v7306_v43 = vmul.f32 0.70710677, %v7303_v28 }
 0xf78   : > { %v4215_v19 = vmul.f32 %v7306_v43, %v7306_v43 }
 0xf7a   : > { %v4216_v52 = vmin.f32 %v4215_v19, 16.0 }
 0xf7b   : > { %v4178_v57 = vpop.f32.mrf.mxu3 }
 0xf7c   : > { %v4217_v0 = vmul.f32 2.1237322e-06, %v4216_v52  ;;  %v4228_v9 = vmul.f32 3.8918573e-05, %v4216_v52  ;;  %v7311_v53 = vadd.f32 %v7298_v62, %v4178_v57 }
 0xf7e   : > { %v4218_v40 = vadd.f32 0.00028619796, %v4217_v0  ;;  %v4229_v41 = vadd.f32 0.001143296, %v4228_v9  ;;  %v7314_v50 = vmul.f32 0.70710677, %v7311_v53 }
 0xf80   : > { %v4219_v27 = vmul.f32 %v4218_v40, %v4216_v52  ;;  %v4230_v60 = vmul.f32 %v4229_v41, %v4216_v52  ;;  %v4255_v13 = vmul.f32 %v7314_v50, %v7314_v50 }
 0xf82   : > { %v4220_v35 = vadd.f32 0.0036580483, %v4219_v27  ;;  %v4231_v39 = vadd.f32 0.014752088, %v4230_v60  ;;  %v7318_v7 = vmin.f32 %v4255_v13, 16.0 }
 0xf83   : > { %v4181_v23 = vpop.f32.mrf.mxu3 }
 0xf84   : > { %v4221_v34 = vmul.f32 %v4220_v35, %v4216_v52  ;;  %v4232_v33 = vmul.f32 %v4231_v39, %v4216_v52  ;;  %v4257_v11 = vmul.f32 2.1237322e-06, %v7318_v7  ;;  %v4268_v45 = vmul.f32 3.8918573e-05, %v7318_v7  ;;  %v4553_v35 = vld [vmem:[%s7555_s18 + $0x10] sm:$0xff] }
 0xf85   : > { %v7326_v46 = vadd.f32 %v7298_v62, %v4181_v23  ;;  %4600 = vmatpush.msra.mxu0 %v4553_v35 }
 0xf86   : > { %v4222_v18 = vadd.f32 0.05243302, %v4221_v34  ;;  %v4233_v44 = vadd.f32 0.112945676, %v4232_v33  ;;  %v4258_v24 = vadd.f32 0.00028619796, %v4257_v11 }
 0xf87   : > { %v4269_v6 = vadd.f32 0.001143296, %v4268_v45  ;;  %v7329_v16 = vmul.f32 0.70710677, %v7326_v46  ;;  %v4552_v11 = vld [vmem:[%s7555_s18 + $0x8] sm:$0xff] }
 0xf88   : > { %v4234_v36 = vmul.f32 %v4233_v44, %v4216_v52  ;;  %v4259_v5 = vmul.f32 %v4258_v24, %v7318_v7  ;;  %v4223_v32 = vmul.f32 %v4222_v18, %v4216_v52  ;;  %4601 = vmatpush.msra.mxu0 %v4552_v11 }
 0xf89   : > { %v4270_v15 = vmul.f32 %v4269_v6, %v7318_v7  ;;  %v4295_v63 = vmul.f32 %v7329_v16, %v7329_v16 }
 0xf8a   : > { %v4235_v21 = vadd.f32 0.4994258, %v4234_v36  ;;  %v4260_v29 = vadd.f32 0.0036580483, %v4259_v5  ;;  %v4224_v14 = vadd.f32 0.18741608, %v4223_v32 }
 0xf8b   : > { %v4271_v25 = vadd.f32 0.014752088, %v4270_v15  ;;  %v7338_v26 = vmin.f32 %v4295_v63, 16.0  ;;  %v4184_v56 = vpop.f32.mrf.mxu3  ;;  %v4551_v32 = vld [vmem:[%s7555_s18] sm:$0xff] }
 0xf8c   : > { %v4236_v30 = vmul.f32 %v4235_v21, %v4216_v52  ;;  %v4261_v59 = vmul.f32 %v4260_v29, %v7318_v7  ;;  %v7347_v17 = vadd.f32 %v7298_v62, %v4184_v56  ;;  %v4225_v19 = vmul.f32 %v4224_v14, %v4216_v52  ;;  %4602 = vmatpush.msra.mxu0 %v4551_v32 }
 0xf8d   : > { %v4272_v31 = vmul.f32 %v4271_v25, %v7318_v7  ;;  %v4297_v49 = vmul.f32 2.1237322e-06, %v7338_v26  ;;  %v4308_v42 = vmul.f32 3.8918573e-05, %v7338_v26 }
 0xf8e   : > { %v4237_v3 = vadd.f32 1.0, %v4236_v30  ;;  %v4262_v10 = vadd.f32 0.05243302, %v4261_v59  ;;  %v7358_v9 = vmul.f32 0.70710677, %v7347_v17 }
 0xf8f   : > { %v4273_v54 = vadd.f32 0.112945676, %v4272_v31  ;;  %v4298_v58 = vadd.f32 0.00028619796, %v4297_v49  ;;  %v4309_v0 = vadd.f32 0.001143296, %v4308_v42 }
 0xf90   : > { %5270 = vrcp.f32 %v4237_v3  ;;  %v4263_v57 = vmul.f32 %v4262_v10, %v7318_v7  ;;  %v4335_v60 = vmul.f32 %v7358_v9, %v7358_v9  ;;  %v4226_v33 = vadd.f32 1.1283791, %v4225_v19 }
 0xf91   : > { %v4274_v55 = vmul.f32 %v4273_v54, %v7318_v7  ;;  %v4299_v41 = vmul.f32 %v4298_v58, %v7338_v26  ;;  %v4310_v27 = vmul.f32 %v4309_v0, %v7338_v26  ;;  %v4247_v63 = vand.u32 2147483647, %v4237_v3 }
 0xf92   : > { %v7369_v61 = vmin.f32 %v4335_v60, 16.0  ;;  %v4264_v18 = vadd.f32 0.18741608, %v4263_v57  ;;  %v4249_v48 = vand.u32 2147483648, %v4237_v3  ;;  %v4227_v59 = vmul.f32 %v4226_v33, %v7306_v43 }
 0xf93   : > { %v4275_v40 = vadd.f32 0.4994258, %v4274_v55  ;;  %v4187_v13 = vpop.f32.mrf.mxu3  ;;  %v4300_v39 = vadd.f32 0.0036580483, %v4299_v41  ;;  %v4311_v23 = vadd.f32 0.014752088, %v4310_v27  ;;  %vm4243_vm6 = vweird.f32 %v4237_v3 }
 0xf94   : > { %v7377_v24 = vadd.f32 %v7298_v62, %v4187_v13  ;;  %v4337_v5 = vmul.f32 2.1237322e-06, %v7369_v61  ;;  %v4348_v15 = vmul.f32 3.8918573e-05, %v7369_v61  ;;  %v4265_v31 = vmul.f32 %v4264_v18, %v7318_v7 }
 0xf95   : > { %v4276_v52 = vmul.f32 %v4275_v40, %v7318_v7  ;;  %v4301_v6 = vmul.f32 %v4300_v39, %v7338_v26  ;;  %v4312_v36 = vmul.f32 %v4311_v23, %v7338_v26  ;;  %vm4248_vm8 = vcmp.eq.f32.partialorder %v4247_v63, 8.507059e+37 }
 0xf96   : > { %v5271_v34 = vpop.eup %5270  ;;  %v4338_v56 = vadd.f32 0.00028619796, %v4337_v5  ;;  %v4349_v37 = vadd.f32 0.001143296, %v4348_v15  ;;  %v7390_v14 = vmul.f32 0.70710677, %v7377_v24 }
 0xf97   : > { %v4239_v45 = vmul.f32 %v5271_v34, %v4237_v3  ;;  %v7374_v44 = vadd.f32 1.0, %v4276_v52  ;;  %vm4244_vm5 = vweird.f32 %v5271_v34  ;;  %v4302_v29 = vadd.f32 0.05243302, %v4301_v6 }
 0xf98   : > { %v4313_v30 = vadd.f32 0.112945676, %v4312_v36  ;;  %v4339_v10 = vmul.f32 %v4338_v56, %v7369_v61  ;;  %v4350_v54 = vmul.f32 %v4349_v37, %v7369_v61  ;;  %vm4245_vm7 = vmor %vm4243_vm6, %vm4244_vm5  ;;  %v4250_v42 = vor.u32 1.1754944e-38, %v4249_v48 }
 0xf99   : > { %v4240_v21 = vsub.f32 1.0, %v4239_v45  ;;  %5272 = vrcp.f32 %v7374_v44  ;;  %v4303_v38 = vmul.f32 %v4302_v29, %v7338_v26  ;;  %v4375_v43 = vmul.f32 %v7390_v14, %v7390_v14 }
 0xf9a   : > { %v4314_v4 = vmul.f32 %v4313_v30, %v7338_v26  ;;  %v4340_v58 = vadd.f32 0.0036580483, %v4339_v10  ;;  %v4351_v19 = vadd.f32 0.014752088, %v4350_v54  ;;  %v4199_v0 = vmul.f32 0.5, %v7303_v28 }
 0xf9b   : > { %v4241_v25 = vmul.f32 %v5271_v34, %v4240_v21  ;;  %v4266_v40 = vadd.f32 1.1283791, %v4265_v31  ;;  %v4287_v60 = vand.u32 2147483647, %v7374_v44  ;;  %v4190_v52 = vpop.f32.mrf.mxu3  ;;  %v7406_v23 = vmin.f32 %v4375_v43, 16.0 }
 0xf9c   : > { %v4315_v55 = vadd.f32 0.4994258, %v4314_v4  ;;  %v4352_v35 = vmul.f32 %v4351_v19, %v7369_v61  ;;  %v4341_v33 = vmul.f32 %v4340_v58, %v7369_v61  ;;  %v4304_v11 = vadd.f32 0.18741608, %v4303_v38 }
 0xf9d   : > { %v4242_v49 = vadd.f32 %v5271_v34, %v4241_v25  ;;  %v4377_v36 = vmul.f32 2.1237322e-06, %v7406_v23  ;;  %v4388_v5 = vmul.f32 3.8918573e-05, %v7406_v23  ;;  %v4267_v32 = vmul.f32 %v4266_v40, %v7314_v50 }
 0xf9e   : > { %v4316_v13 = vmul.f32 %v4315_v55, %v7338_v26  ;;  %v4353_v18 = vadd.f32 0.112945676, %v4352_v35  ;;  %v7415_v21 = vadd.f32 %v7298_v62, %v4190_v52  ;;  %vm4283_vm9 = vweird.f32 %v7374_v44 }
 0xf9f   : > { %v5273_v7 = vpop.eup %5272  ;;  %v4246_v3 = vsel %vm4245_vm7, %v5271_v34, %v4242_v49  ;;  %v4289_v34 = vand.u32 2147483648, %v7374_v44  ;;  %v4342_v48 = vadd.f32 0.05243302, %v4341_v33  ;;  %v4378_v56 = vadd.f32 0.00028619796, %v4377_v36 }
 0xfa0   : > { %v4251_v57 = vsel %vm4248_vm8, %v4250_v42, %v4246_v3  ;;  %v4279_v41 = vmul.f32 %v5273_v7, %v7374_v44  ;;  %v7408_v45 = vadd.f32 1.0, %v4316_v13  ;;  %vm4284_vm11 = vweird.f32 %v5273_v7 }
 0xfa1   : > { %v4252_v27 = vmul.f32 %v4251_v57, %v4227_v59  ;;  %v4354_v29 = vmul.f32 %v4353_v18, %v7369_v61  ;;  %vm4285_vm10 = vmor %vm4283_vm9, %vm4284_vm11  ;;  %v4290_v30 = vor.u32 1.1754944e-38, %v4289_v34  ;;  %v4389_v37 = vadd.f32 0.001143296, %v4388_v5 }
 0xfa2   : > { %v4280_v39 = vsub.f32 1.0, %v4279_v41  ;;  %5274 = vrcp.f32 %v7408_v45  ;;  %vm4288_vm13 = vcmp.eq.f32.partialorder %v4287_v60, 8.507059e+37  ;;  %v4305_v50 = vmul.f32 %v4304_v11, %v7338_v26 }
 0xfa3   : > { %v5052_v28 = vclamps-f32 %v4252_v27, 1.0  ;;  %v4355_v31 = vadd.f32 0.4994258, %v4354_v29  ;;  %v4379_v4 = vmul.f32 %v4378_v56, %v7406_v23  ;;  %v4390_v10 = vmul.f32 %v4389_v37, %v7406_v23  ;;  %v4193_v3 = vpop.f32.mrf.mxu3 }
 0xfa4   : > { %v4281_v6 = vmul.f32 %v5273_v7, %v4280_v39  ;;  %v7423_v44 = vmul.f32 0.70710677, %v7415_v21  ;;  %v4343_v42 = vmul.f32 %v4342_v48, %v7369_v61  ;;  %v4200_v55 = vmul.f32 0.5, %v7311_v53 }
 0xfa5   : > { %v4535_v15 = vadd.f32 1.0, %v5052_v28  ;;  %v4356_v38 = vmul.f32 %v4355_v31, %v7369_v61  ;;  %v4306_v57 = vadd.f32 1.1283791, %v4305_v50  ;;  %v7438_v52 = vadd.f32 %v7298_v62, %v4193_v3 }
 0xfa6   : > { %v4282_v63 = vadd.f32 %v5273_v7, %v4281_v6  ;;  %v4415_v26 = vmul.f32 %v7423_v44, %v7423_v44  ;;  %v4344_v35 = vadd.f32 0.18741608, %v4343_v42  ;;  %v4327_v53 = vand.u32 2147483647, %v7408_v45 }
 0xfa7   : > { %v4543_v25 = vmul.f32 %v4535_v15, %v4199_v0  ;;  %v4380_v0 = vadd.f32 0.0036580483, %v4379_v4  ;;  %v7432_v40 = vadd.f32 1.0, %v4356_v38  ;;  %v4329_v39 = vand.u32 2147483648, %v7408_v45 }
 0xfa8   : > { %v4286_v59 = vsel %vm4285_vm10, %v5273_v7, %v4282_v63  ;;  %v5275_v43 = vpop.eup %5274  ;;  %v4391_v7 = vadd.f32 0.014752088, %v4390_v10  ;;  %v7435_v27 = vmin.f32 %v4415_v26, 16.0  ;;  %v4307_v18 = vmul.f32 %v4306_v57, %v7329_v16 }
 0xfa9   : > { %v4291_v49 = vsel %vm4288_vm13, %v4290_v30, %v4286_v59  ;;  %5060 = vmatmul.msk.f32.vlgmr.msra.gmra.mxu0 %vm1310_vm12, %v4543_v25  ;;  %v4319_v19 = vmul.f32 %v5275_v43, %v7408_v45  ;;  %vm4324_vm14 = vweird.f32 %v5275_v43  ;;  %5276 = vrcp.f32 %v7432_v40 }
 0xfaa   : > { %v4292_v54 = vmul.f32 %v4291_v49, %v4267_v32  ;;  %v4392_v41 = vmul.f32 %v4391_v7, %v7406_v23  ;;  %v4381_v28 = vmul.f32 %v4380_v0, %v7406_v23  ;;  %vm4323_vm15 = vweird.f32 %v7408_v45 }
 0xfab   : > { %v4320_v13 = vsub.f32 1.0, %v4319_v19  ;;  %v4417_v6 = vmul.f32 2.1237322e-06, %v7435_v27  ;;  %v4428_v36 = vmul.f32 3.8918573e-05, %v7435_v27  ;;  %v4345_v15 = vmul.f32 %v4344_v35, %v7369_v61  ;;  %vm4325_vm1 = vmor %vm4323_vm15, %vm4324_vm14 }
 0xfac   : > { %v5053_v58 = vclamps-f32 %v4292_v54, 1.0  ;;  %v4393_v11 = vadd.f32 0.112945676, %v4392_v41  ;;  %v7451_v63 = vmul.f32 0.70710677, %v7438_v52  ;;  %vm4328_vm2 = vcmp.eq.f32.partialorder %v4327_v53, 8.507059e+37 }
 0xfad   : > { %v4321_v33 = vmul.f32 %v5275_v43, %v4320_v13  ;;  %v4330_v16 = vor.u32 1.1754944e-38, %v4329_v39  ;;  %v4418_v48 = vadd.f32 0.00028619796, %v4417_v6  ;;  %v4429_v45 = vadd.f32 0.001143296, %v4428_v36 }
 0xfae   : > { %v4536_v60 = vadd.f32 1.0, %v5053_v58  ;;  %v4394_v32 = vmul.f32 %v4393_v11, %v7406_v23  ;;  %v4382_v25 = vadd.f32 0.05243302, %v4381_v28  ;;  %v4455_v56 = vmul.f32 %v7451_v63, %v7451_v63 }
 0xfaf   : > { %v4322_v5 = vadd.f32 %v5275_v43, %v4321_v33  ;;  %v5277_v61 = vpop.eup %5276  ;;  %v4419_v59 = vmul.f32 %v4418_v48, %v7435_v27  ;;  %v4430_v50 = vmul.f32 %v4429_v45, %v7435_v27  ;;  %v4201_v31 = vmul.f32 0.5, %v7326_v46 }
 0xfb0   : > { %v4544_v34 = vmul.f32 %v4536_v60, %v4200_v55  ;;  %v4395_v30 = vadd.f32 0.4994258, %v4394_v32  ;;  %v4346_v4 = vadd.f32 1.1283791, %v4345_v15  ;;  %v4359_v10 = vmul.f32 %v5277_v61, %v7432_v40 }
 0xfb1   : > { %v4326_v29 = vsel %vm4325_vm1, %v5275_v43, %v4322_v5  ;;  %v4367_v54 = vand.u32 2147483647, %v7432_v40  ;;  %v4431_v38 = vadd.f32 0.014752088, %v4430_v50  ;;  %v7463_v43 = vmin.f32 %v4455_v56, 16.0 }
 0xfb2   : > { %5061 = vmatmul.msk.f32.gmra.mxu0 %vm1310_vm12, %v4544_v34  ;;  %v4331_v37 = vsel %vm4328_vm2, %v4330_v16, %v4326_v29  ;;  %v4396_v42 = vmul.f32 %v4395_v30, %v7406_v23  ;;  %v4360_v26 = vsub.f32 1.0, %v4359_v10  ;;  %v4369_v3 = vand.u32 2147483648, %v7432_v40 }
 0xfb3   : > { %v4332_v49 = vmul.f32 %v4331_v37, %v4307_v18  ;;  %v4383_v55 = vmul.f32 %v4382_v25, %v7406_v23  ;;  %v4420_v19 = vadd.f32 0.0036580483, %v4419_v59  ;;  %v4432_v46 = vmul.f32 %v4431_v38, %v7435_v27 }
 0xfb4   : > { %v4397_v58 = vadd.f32 1.0, %v4396_v42  ;;  %v4457_v0 = vmul.f32 2.1237322e-06, %v7463_v43  ;;  %v4361_v41 = vmul.f32 %v5277_v61, %v4360_v26  ;;  %vm4364_vm3 = vweird.f32 %v5277_v61 }
 0xfb5   : > { %v5054_v7 = vclamps-f32 %v4332_v49, 1.0  ;;  %v4468_v60 = vmul.f32 3.8918573e-05, %v7463_v43  ;;  %vm4363_vm4 = vweird.f32 %v7432_v40  ;;  %v4384_v53 = vadd.f32 0.18741608, %v4383_v55 }
 0xfb6   : > { %5278 = vrcp.f32 %v4397_v58  ;;  %v4362_v35 = vadd.f32 %v5277_v61, %v4361_v41  ;;  %v4433_v39 = vadd.f32 0.112945676, %v4432_v46  ;;  %vm4365_vm5 = vmor %vm4363_vm4, %vm4364_vm3  ;;  %v4370_v34 = vor.u32 1.1754944e-38, %v4369_v3 }
 0xfb7   : > { %v4537_v57 = vadd.f32 1.0, %v5054_v7  ;;  %v4421_v33 = vmul.f32 %v4420_v19, %v7435_v27  ;;  %v4458_v28 = vadd.f32 0.00028619796, %v4457_v0  ;;  %v4469_v11 = vadd.f32 0.001143296, %v4468_v60 }
 0xfb8   : > { %v4347_v18 = vmul.f32 %v4346_v4, %v7358_v9  ;;  %v4366_v6 = vsel %vm4365_vm5, %v5277_v61, %v4362_v35  ;;  %vm4368_vm6 = vcmp.eq.f32.partialorder %v4367_v54, 8.507059e+37  ;;  %v4434_v36 = vmul.f32 %v4433_v39, %v7435_v27 }
 0xfb9   : > { %v4545_v13 = vmul.f32 %v4537_v57, %v4201_v31  ;;  %v4371_v40 = vsel %vm4368_vm6, %v4370_v34, %v4366_v6  ;;  %v4459_v5 = vmul.f32 %v4458_v28, %v7463_v43  ;;  %v4470_v15 = vmul.f32 %v4469_v11, %v7463_v43 }
 0xfba   : > { %v4372_v32 = vmul.f32 %v4371_v40, %v4347_v18  ;;  %v4385_v16 = vmul.f32 %v4384_v53, %v7406_v23  ;;  %v4435_v48 = vadd.f32 0.4994258, %v4434_v36  ;;  %v4422_v29 = vadd.f32 0.05243302, %v4421_v33 }
 0xfbb   : > { %5062 = vmatmul.msk.f32.gmra.mxu0 %vm1310_vm12, %v4545_v13  ;;  %v4471_v25 = vadd.f32 0.014752088, %v4470_v15  ;;  %v4460_v61 = vadd.f32 0.0036580483, %v4459_v5  ;;  %v4202_v59 = vmul.f32 0.5, %v7347_v17  ;;  %v4409_v4 = vand.u32 2147483648, %v4397_v58 }
 0xfbc   : > { %v5279_v45 = vpop.eup %5278  ;;  %v5055_v30 = vclamps-f32 %v4372_v32, 1.0  ;;  %v4436_v56 = vmul.f32 %v4435_v48, %v7435_v27  ;;  %v4386_v31 = vadd.f32 1.1283791, %v4385_v16  ;;  %v4423_v10 = vmul.f32 %v4422_v29, %v7435_v27 }
 0xfbd   : > { %v4399_v9 = vmul.f32 %v5279_v45, %v4397_v58  ;;  %v4472_v37 = vmul.f32 %v4471_v25, %v7463_v43  ;;  %vm4404_vm7 = vweird.f32 %v5279_v45  ;;  %v4407_v7 = vand.u32 2147483647, %v4397_v58 }
 0xfbe   : > { %v4538_v50 = vadd.f32 1.0, %v5055_v30  ;;  %v4437_v23 = vadd.f32 1.0, %v4436_v56  ;;  %v4461_v26 = vmul.f32 %v4460_v61, %v7463_v43  ;;  %vm4403_vm8 = vweird.f32 %v4397_v58 }
 0xfbf   : > { %v4400_v49 = vsub.f32 1.0, %v4399_v9  ;;  %v4473_v54 = vadd.f32 0.112945676, %v4472_v37  ;;  %vm4405_vm11 = vmor %vm4403_vm8, %vm4404_vm7  ;;  %v4410_v17 = vor.u32 1.1754944e-38, %v4409_v4  ;;  %v4424_v19 = vadd.f32 0.18741608, %v4423_v10 }
 0xfc0   : > { %v4546_v42 = vmul.f32 %v4538_v50, %v4202_v59  ;;  %5280 = vrcp.f32 %v4437_v23  ;;  %v4387_v46 = vmul.f32 %v4386_v31, %v7390_v14  ;;  %vm4408_vm9 = vcmp.eq.f32.partialorder %v4407_v7, 8.507059e+37 }
 0xfc1   : > { %v4401_v38 = vmul.f32 %v5279_v45, %v4400_v49  ;;  %v4474_v55 = vmul.f32 %v4473_v54, %v7463_v43  ;;  %v4462_v60 = vadd.f32 0.05243302, %v4461_v26  ;;  %v4425_v58 = vmul.f32 %v4424_v19, %v7435_v27 }
 0xfc2   : > { %v4203_v11 = vmul.f32 0.5, %v7377_v24  ;;  %v4449_v36 = vand.u32 2147483648, %v4437_v23  ;;  %v4447_v15 = vand.u32 2147483647, %v4437_v23  ;;  %vm4443_vm13 = vweird.f32 %v4437_v23 }
 0xfc3   : > { %v4402_v3 = vadd.f32 %v5279_v45, %v4401_v38  ;;  %5063 = vmatmul.msk.f32.gmra.mxu0 %vm1310_vm12, %v4546_v42  ;;  %v4475_v57 = vadd.f32 0.4994258, %v4474_v55  ;;  %v4463_v33 = vmul.f32 %v4462_v60, %v7463_v43  ;;  %v4426_v6 = vadd.f32 1.1283791, %v4425_v58 }
 0xfc4   : > { %v4450_v27 = vor.u32 1.1754944e-38, %v4449_v36  ;;  %vm4448_vm15 = vcmp.eq.f32.partialorder %v4447_v15, 8.507059e+37  ;;  %v4204_v37 = vmul.f32 0.5, %v7415_v21  ;;  %v4205_v7 = vmul.f32 0.5, %v7438_v52 }
 0xfc5   : > { %v4406_v0 = vsel %vm4405_vm11, %v5279_v45, %v4402_v3  ;;  %v4476_v35 = vmul.f32 %v4475_v57, %v7463_v43  ;;  %v4464_v32 = vadd.f32 0.18741608, %v4463_v33  ;;  %v4427_v48 = vmul.f32 %v4426_v6, %v7423_v44 }
 0xfc6   : > { %v4411_v41 = vsel %vm4408_vm9, %v4410_v17, %v4406_v0  ;;  %v5281_v53 = vpop.eup %5280 }
 0xfc7   : > { %v4412_v13 = vmul.f32 %v4411_v41, %v4387_v46  ;;  %v4439_v34 = vmul.f32 %v5281_v53, %v4437_v23  ;;  %v4477_v28 = vadd.f32 1.0, %v4476_v35  ;;  %vm4444_vm10 = vweird.f32 %v5281_v53 }
 0xfc8   : > { %vm4445_vm14 = vmor %vm4443_vm13, %vm4444_vm10  ;;  %v4465_v25 = vmul.f32 %v4464_v32, %v7463_v43 }
 0xfc9   : > { %v5056_v39 = vclamps-f32 %v4412_v13, 1.0  ;;  %v4440_v14 = vsub.f32 1.0, %v4439_v34  ;;  %5282 = vrcp.f32 %v4477_v28  ;;  %v4489_v50 = vand.u32 2147483648, %v4477_v28 }
 0xfca   : > { %v4466_v59 = vadd.f32 1.1283791, %v4465_v25  ;;  %v4487_v4 = vand.u32 2147483647, %v4477_v28  ;;  %vm4483_vm2 = vweird.f32 %v4477_v28 }
 0xfcb   : > { %v4539_v18 = vadd.f32 1.0, %v5056_v39  ;;  %v4441_v5 = vmul.f32 %v5281_v53, %v4440_v14  ;;  %v4490_v23 = vor.u32 1.1754944e-38, %v4489_v50 }
 0xfcc   : > { %v4467_v54 = vmul.f32 %v4466_v59, %v7451_v63  ;;  %vm4488_vm4 = vcmp.eq.f32.partialorder %v4487_v4, 8.507059e+37 }
 0xfcd   : > { %v4547_v40 = vmul.f32 %v4539_v18, %v4203_v11  ;;  %v4442_v16 = vadd.f32 %v5281_v53, %v4441_v5 }
 0xfcf   : > { %5064 = vmatmul.msk.f32.gmra.mxu0 %vm1310_vm12, %v4547_v40  ;;  %v4446_v45 = vsel %vm4445_vm14, %v5281_v53, %v4442_v16  ;;  %v5283_v24 = vpop.eup %5282 }
 0xfd0   : > { %v4451_v29 = vsel %vm4448_vm15, %v4450_v27, %v4446_v45  ;;  %v4479_v9 = vmul.f32 %v5283_v24, %v4477_v28  ;;  %vm4484_vm1 = vweird.f32 %v5283_v24 }
 0xfd1   : > { %v4452_v30 = vmul.f32 %v4451_v29, %v4427_v48  ;;  %vm4485_vm3 = vmor %vm4483_vm2, %vm4484_vm1 }
 0xfd2   : > { %v4480_v61 = vsub.f32 1.0, %v4479_v9  ;;  %v5107_v9 = vld [vmem:[%s7556_s19] ss:$0 sm:$0xff] }
 0xfd3   : > { %v5057_v56 = vclamps-f32 %v4452_v30, 1.0 }
 0xfd4   : > { %v4481_v49 = vmul.f32 %v5283_v24, %v4480_v61 }
 0xfd5   : > { %v4540_v31 = vadd.f32 1.0, %v5057_v56 }
 0xfd6   : > { %v4482_v44 = vadd.f32 %v5283_v24, %v4481_v49 }
 0xfd7   : > { %v4548_v10 = vmul.f32 %v4540_v31, %v4204_v37 }
 0xfd8   : > { %v4486_v43 = vsel %vm4485_vm3, %v5283_v24, %v4482_v44 }
 0xfd9   : > { %5065 = vmatmul.msk.f32.gmra.mxu0 %vm1310_vm12, %v4548_v10  ;;  %v4491_v42 = vsel %vm4488_vm4, %v4490_v23, %v4486_v43 }
 0xfda   : > { %v4492_v38 = vmul.f32 %v4491_v42, %v4467_v54 }
 0xfdc   : > { %v5058_v21 = vclamps-f32 %v4492_v38, 1.0 }
 0xfde   : > { %v4541_v26 = vadd.f32 1.0, %v5058_v21 }
 0xfe0   : > { %v4549_v3 = vmul.f32 %v4541_v26, %v4205_v7 }
 0xfe2   : > { %5066 = vmatmul.msk.f32.gmra.mxu0 %vm1310_vm12, %v4549_v3 }
 0xff6   : > { %v4196_v55 = vpop.f32.mrf.mxu3 }
 0xff7   : > { %v4197_v17 = vadd.f32 %v7298_v62, %v4196_v55 }
 0xff9   : > { %v4214_v19 = vmul.f32 0.70710677, %v4197_v17  ;;  %v4206_v50 = vmul.f32 0.5, %v4197_v17 }
 0xffb   : > { %v4495_v46 = vmul.f32 %v4214_v19, %v4214_v19 }
 0xffd   : > { %v4496_v0 = vmin.f32 %v4495_v46, 16.0 }
 0xfff   : > { %v4497_v63 = vmul.f32 2.1237322e-06, %v4496_v0  ;;  %v4508_v57 = vmul.f32 3.8918573e-05, %v4496_v0 }
0x1001   : > { %v4498_v41 = vadd.f32 0.00028619796, %v4497_v63  ;;  %v4509_v60 = vadd.f32 0.001143296, %v4508_v57 }
0x1003   : > { %v4499_v13 = vmul.f32 %v4498_v41, %v4496_v0  ;;  %v4510_v35 = vmul.f32 %v4509_v60, %v4496_v0 }
0x1005   : > { %v4511_v53 = vadd.f32 0.014752088, %v4510_v35  ;;  %v4500_v58 = vadd.f32 0.0036580483, %v4499_v13 }
0x1007   : > { %v4512_v39 = vmul.f32 %v4511_v53, %v4496_v0  ;;  %v4501_v34 = vmul.f32 %v4500_v58, %v4496_v0 }
0x1009   : > { %v4513_v52 = vadd.f32 0.112945676, %v4512_v39  ;;  %v4502_v11 = vadd.f32 0.05243302, %v4501_v34 }
0x100b   : > { %v4514_v33 = vmul.f32 %v4513_v52, %v4496_v0  ;;  %v4503_v62 = vmul.f32 %v4502_v11, %v4496_v0 }
0x100d   : > { %v4515_v28 = vadd.f32 0.4994258, %v4514_v33  ;;  %v4504_v6 = vadd.f32 0.18741608, %v4503_v62 }
0x100f   : > { %v4516_v18 = vmul.f32 %v4515_v28, %v4496_v0  ;;  %v4505_v40 = vmul.f32 %v4504_v6, %v4496_v0 }
0x1011   : > { %v4517_v14 = vadd.f32 1.0, %v4516_v18  ;;  %v4506_v16 = vadd.f32 1.1283791, %v4505_v40 }
0x1013   : > { %5284 = vrcp.f32 %v4517_v14  ;;  %v4529_v32 = vand.u32 2147483648, %v4517_v14  ;;  %v4527_v48 = vand.u32 2147483647, %v4517_v14  ;;  %vm4523_vm6 = vweird.f32 %v4517_v14 }
0x1014   : > { %v4507_v29 = vmul.f32 %v4506_v16, %v4214_v19 }
0x1015   : > { %v4530_v24 = vor.u32 1.1754944e-38, %v4529_v32  ;;  %vm4528_vm8 = vcmp.eq.f32.partialorder %v4527_v48, 8.507059e+37 }
0x1019   : > { %v5285_v36 = vpop.eup %5284 }
0x101a   : > { %v4519_v5 = vmul.f32 %v5285_v36, %v4517_v14  ;;  %vm4524_vm5 = vweird.f32 %v5285_v36 }
0x101b   : > { %vm4525_vm7 = vmor %vm4523_vm6, %vm4524_vm5 }
0x101c   : > { %v4520_v15 = vsub.f32 1.0, %v4519_v5 }
0x101e   : > { %v4521_v27 = vmul.f32 %v5285_v36, %v4520_v15 }
0x1020   : > { %v4522_v45 = vadd.f32 %v5285_v36, %v4521_v27 }
0x1022   : > { %v4526_v25 = vsel %vm4525_vm7, %v5285_v36, %v4522_v45 }
0x1023   : > { %v4531_v30 = vsel %vm4528_vm8, %v4530_v24, %v4526_v25 }
0x1024   : > { %v4532_v56 = vmul.f32 %v4531_v30, %v4507_v29 }
0x1026   : > { %v5059_v61 = vclamps-f32 %v4532_v56, 1.0  ;;  %v4604_v37 = vpop.f32.mrf.mxu0 }
0x1027   : > { %v4605_v59 = vadd.f32 %v5107_v9, %v4604_v37 }
0x1028   : > { %v4542_v31 = vadd.f32 1.0, %v5059_v61 }
0x1029   : > { %v4628_v49 = vadd.f32 %v4605_v59, %v7112_v8 }
0x102a   : > { %v4550_v4 = vmul.f32 %v4542_v31, %v4206_v50 }
0x102b   : > { %4636 = vst.msk [vmem:[%s7507_s0] sm:$0xff] %vm638_vm0, %v4628_v49 }
0x102c   : > { %5067 = vmatmul.msk.f32.gmra.mxu0 %vm1310_vm12, %v4550_v4 }
0x102f   : > { %v4607_v10 = vpop.f32.mrf.mxu0 }
0x1030   : > { %v4608_v44 = vadd.f32 %v5107_v9, %v4607_v10 }
0x1032   : > { %v4629_v23 = vadd.f32 %v4608_v44, %v7123_v51 }
0x1034   : > { %4637 = vst.msk [vmem:[%s7507_s0 + $0x8] sm:$0xff] %vm638_vm0, %v4629_v23 }
0x1038   : > { %v4610_v54 = vpop.f32.mrf.mxu0 }
0x1039   : > { %v4611_v43 = vadd.f32 %v5107_v9, %v4610_v54 }
0x103b   : > { %v4630_v42 = vadd.f32 %v4611_v43, %v7132_v47 }
0x103d   : > { %4638 = vst.msk [vmem:[%s7507_s0 + $0x10] sm:$0xff] %vm638_vm0, %v4630_v42 }
0x1040   : > { %v4613_v8 = vpop.f32.mrf.mxu0 }
0x1041   : > { %v4614_v38 = vadd.f32 %v5107_v9, %v4613_v8 }
0x1043   : > { %v4631_v21 = vadd.f32 %v4614_v38, %v7141_v2 }
0x1045   : > { %4639 = vst.msk [vmem:[%s7507_s0 + $0x18] sm:$0xff] %vm638_vm0, %v4631_v21 }
0x104c   : > { %v4616_v7 = vpop.f32.mrf.mxu0 }
0x104d   : > { %v4617_v26 = vadd.f32 %v5107_v9, %v4616_v7 }
0x104f   : > { %v4632_v51 = vadd.f32 %v4617_v26, %v7150_v12 }
0x1051   : > { %4640 = vst.msk [vmem:[%s7507_s0 + $0x20] sm:$0xff] %vm638_vm0, %v4632_v51 }
0x1056   : > { %v4619_v3 = vpop.f32.mrf.mxu0 }
0x1057   : > { %v4620_v55 = vadd.f32 %v5107_v9, %v4619_v3 }
0x1059   : > { %v4633_v47 = vadd.f32 %v4620_v55, %v7159_v20 }
0x105b   : > { %4641 = vst.msk [vmem:[%s7507_s0 + $0x28] sm:$0xff] %vm638_vm0, %v4633_v47 }
0x105f   : > { %v4622_v17 = vpop.f32.mrf.mxu0 }
0x1060   : > { %v4623_v19 = vadd.f32 %v5107_v9, %v4622_v17 }
0x1062   : > { %v4634_v46 = vadd.f32 %v4623_v19, %v7168_v22 }
0x1064   : > { %4642 = vst.msk [vmem:[%s7507_s0 + $0x30] sm:$0xff] %vm638_vm0, %v4634_v46 }
0x10a9   : > { %v4625_v2 = vpop.f32.mrf.mxu0 }
0x10aa   : > { %v4626_v0 = vadd.f32 %v5107_v9, %v4625_v2 }
0x10ac   : > { %v4635_v63 = vadd.f32 %v4626_v0, %v7175_v1 }
0x10ae   : > { %4643 = vst.msk [vmem:[%s7507_s0 + $0x38] sm:$0xff] %vm638_vm0, %v4635_v63 }
0x10af PF: > { %s30_s1 = sadd.s32 1, %s5321_s1  }
0x10b0   : > { %p27_p4 = scmp.ge.s32.totalorder %s30_s1, 4  }
0x10b2   :  { %29 = sbr.rel (!%p27_p4) target bundleno = 6 (0x6), region = 151 }

// kernel: gkformer_pallas.5
= control target key start
LH: loop header
LB: loop body
LE: loop exit
PB: predicated region body
PF: predicated region fallthrough
CT: control target
= control target key end

     0   :  { %s7716_s0 = inlined_call_operand.vmem [shape: f32[2,64,32], index: 0, kind: input, shape index: {}]   ;;  %s7717_s1 = inlined_call_operand.vmem [shape: f32[1,32], index: 1, kind: input, shape index: {}]   ;;  %s7718_s2 = inlined_call_operand.vmem [shape: f32[1,32], index: 2, kind: input, shape index: {}]   ;;  %s7719_s3 = inlined_call_operand.vmem [shape: f32[4,32,8], index: 3, kind: input, shape index: {}]   ;;  %s7720_s4 = inlined_call_operand.vmem [shape: f32[4,1,8], index: 4, kind: input, shape index: {}]   ;;  %s7721_s5 = inlined_call_operand.vmem [shape: f32[4,32,8], index: 5, kind: input, shape index: {}]   ;;  %s7722_s6 = inlined_call_operand.vmem [shape: f32[4,1,8], index: 6, kind: input, shape index: {}]   ;;  %s7723_s7 = inlined_call_operand.vmem [shape: f32[4,32,8], index: 7, kind: input, shape index: {}]   ;;  %s7724_s8 = inlined_call_operand.vmem [shape: f32[4,1,8], index: 8, kind: input, shape index: {}]   ;;  %s7725_s9 = inlined_call_operand.vmem [shape: f32[64,8], index: 9, kind: input, shape index: {}]   ;;  %s7726_s10 = inlined_call_operand.vmem [shape: f32[64,8], index: 10, kind: input, shape index: {}]   ;;  %s7727_s11 = inlined_call_operand.vmem [shape: f32[8,8], index: 11, kind: input, shape index: {}]   ;;  %s7728_s12 = inlined_call_operand.vmem [shape: f32[4,8,32], index: 12, kind: input, shape index: {}]   ;;  %s7729_s13 = inlined_call_operand.vmem [shape: f32[1,32], index: 13, kind: input, shape index: {}]   ;;  %s7730_s14 = inlined_call_operand.vmem [shape: f32[1,32], index: 14, kind: input, shape index: {}]   ;;  %s7731_s15 = inlined_call_operand.vmem [shape: f32[1,32], index: 15, kind: input, shape index: {}]   ;;  %s7732_s16 = inlined_call_operand.vmem [shape: f32[32,64], index: 16, kind: input, shape index: {}]   ;;  %s7733_s17 = inlined_call_operand.vmem [shape: f32[1,64], index: 17, kind: input, shape index: {}]   ;;  %s7734_s18 = inlined_call_operand.vmem [shape: f32[64,32], index: 18, kind: input, shape index: {}]   ;;  %s7735_s19 = inlined_call_operand.vmem [shape: f32[1,32], index: 19, kind: input, shape index: {}]   ;;  %s7736_s20 = inlined_call_operand.hbm [shape: f32[2,64,32], index: 20, kind: output, shape index: {}]  }
   0x1   :  { %7751 = sst [smem:[#allocation32_spill]] %s7716_s0 }
   0x2   :  { %7752 = sst [smem:[#allocation33_spill]] %s7717_s1 }
   0x3   :  { %7753 = sst [smem:[#allocation34_spill]] %s7718_s2 }
   0x4   :  { %7754 = sst [smem:[#allocation35_spill]] %s7719_s3 }
   0x5   :  { %7755 = sst [smem:[#allocation36_spill]] %s7720_s4 }
   0x6   :  { %7756 = sst [smem:[#allocation37_spill]] %s7721_s5 }
   0x7   :  { %7757 = sst [smem:[#allocation38_spill]] %s7722_s6 }
   0x8   :  { %7758 = sst [smem:[#allocation39_spill]] %s7723_s7 }
   0x9   :  { %7759 = sst [smem:[#allocation40_spill]] %s7724_s8 }
   0xa   :  { %25 = vsyncpa [#allocation3], 0 }
   0xb   :  { %27 = vsyncpa [#allocation3 + $0x1], 0  ;;  %s5542_s1 = smov 0   ;;  %s5544_s22 = smov 0  }
   0xc   :  { %s5546_s23 = smov 0   ;;  %s5548_s24 = smov 0  }
   0xd LB: > { %7760 = sst [smem:[#allocation5_spill]] %s5420_s1  ;;  %s5563_s2 = sadd.s32 4294967295, %s5432_s24   ;;  %s5432_s24 = sphi %s5548_s24, %s7828_s24   ;;  %s5428_s23 = sphi %s5546_s23, %s7830_s23   ;;  %s5424_s22 = sphi %s5544_s22, %s7832_s22   ;;  %s5420_s1 = sphi %s5542_s1, %s7831_s1  }
   0xe   : > { %7761 = sst [smem:[#allocation6_spill]] %s5428_s23  ;;  %s4720_s25 = sadd.s32 4294967294, %s5432_s24  }
   0xf   : > { %7762 = sst [smem:[#allocation7_spill]] %s5432_s24  ;;  %s5567_s3 = sadd.s32 1, %s5432_s24  }
  0x10   : > { %7763 = sst [smem:[#allocation8_spill]] %s5567_s3  ;;  %s465_s26 = sadd.s32 1, %s5428_s23 }
  0x11   : > { %s462_s27 = ssub.s32 %s5432_s24, %s5567_s3  ;;  %p475_p0 = scmp.ne.s32.totalorder %s5428_s23, %s5424_s22 }
  0x12   : > { %p463_p1 = scmp.eq.s32.totalorder %s462_s27, 0  ;;  %p476_p2 = scmp.eq.s32.totalorder %s5563_s2, 1 }
  0x13   : > { %p481_p3 = scmp.ne.s32.totalorder %s5424_s22, %s5420_s1  ;;  %p482_p4 = scmp.eq.s32.totalorder %s4720_s25, 1 }
  0x14   : > { %s5578_s28 = scalar_select %p463_p1, %s5428_s23, %s465_s26  }
  0x15   : > { %p5580_p5 = por %p476_p2, %p475_p0  ;;  %p5584_p6 = por %p482_p4, %p481_p3 }
  0x16   : > { %7764 = sst [smem:[#allocation9_spill]] %s5578_s28  ;;  %p4723_p7 = scmp.ge.s32.totalorder %s5432_s24, 1 }
  0x17   : > { %s7766_s29 = scalar_select %p5584_p6, 1, 0 }
  0x18   : > { %p565_p8 = scmp.lt.s32.totalorder %s5432_s24, 3 }
  0x19   : > { %7767 = sst [smem:[#allocation10_spill]] %s7766_s29 }
  0x1a   : > { %p566_p9 = pnand %p4723_p7, %p565_p8 }
  0x1c   : > { %569 = sbr.rel (%p566_p9) target bundleno = 4291 (0x10c3), region = 100 }
  0x21   : > { %p623_p10 = scmp.lt.s32.totalorder %s5563_s2, 1  ;;  %vm636_vm0 = vcmask 261120   ;;  %s7768_s26 = sld [smem:[#allocation32_spill]]  ;;  %v5434_v14 = vmov 32.0  }
  0x22   : > { %5163 = vrcp.f32 %v5434_v14  ;;  %s7770_s21 = sld [smem:[#allocation35_spill]] }
  0x23   : > { %s624_s30 = scalar_select %p623_p10, %s5563_s2, 1 }
  0x24   : > { %s7771_s7 = sld [smem:[#allocation39_spill]] }
  0x25   : > { %s5092_s0 = sshll.u32 %s624_s30, 6  ;;  %s7772_s30 = sld [smem:[#allocation33_spill]] }
  0x26   : > { %s7773_s23 = sld [smem:[#allocation34_spill]] }
  0x27   : > { %s5595_s27 = scalar_lea.vmem %s7768_s26, %s5092_s0  ;;  %s7776_s5 = sld [smem:[#allocation37_spill]] }
  0x28   : > { %v632_v0 = vld [vmem:[%s5595_s27 + $0x20] sm:$0xff]  ;;  %v630_v1 = vld [vmem:[%s5595_s27 + $0x10] sm:$0xff]  ;;  %v633_v6 = vld [vmem:[%s5595_s27 + $0x28] sm:$0xff]  ;;  %v5164_v15 = vpop.eup %5163  ;;  %s7777_s28 = sld [smem:[#allocation36_spill]]  ;;  %s5093_s26 = sshll.u32 %s5563_s2, 6 }
  0x29   : > { %v628_v2 = vld [vmem:[%s5595_s27] sm:$0xff]  ;;  %v649_v3 = vsel %vm636_vm0, %v632_v0, 0.0  ;;  %v643_v4 = vsel %vm636_vm0, %v630_v1, 0.0  ;;  %v631_v7 = vld [vmem:[%s5595_s27 + $0x18] sm:$0xff]  ;;  %v629_v8 = vld [vmem:[%s5595_s27 + $0x8] sm:$0xff]  ;;  %v652_v9 = vsel %vm636_vm0, %v633_v6, 0.0  ;;  %vm666_vm1 = vweird.f32 %v5164_v15  ;;  %s4654_s25 = scalar_lea.hbm %s7736_s20, %s5093_s26 }
  0x2a   : > { %v637_v5 = vsel %vm636_vm0, %v628_v2, 0.0  ;;  %650 = vadd.xlane.f32.xlu2 %v649_v3  ;;  %644 = vadd.xlane.f32.xlu1 %v643_v4  ;;  %v646_v10 = vsel %vm636_vm0, %v631_v7, 0.0  ;;  %v640_v11 = vsel %vm636_vm0, %v629_v8, 0.0  ;;  %v634_v12 = vld [vmem:[%s5595_s27 + $0x30] sm:$0xff]  ;;  %v662_v16 = vmul.f32 32.0, %v5164_v15  ;;  %v635_v40 = vld [vmem:[%s5595_s27 + $0x38] sm:$0xff] }
  0x2b   : > { %638 = vadd.xlane.f32.xlu0 %v637_v5  ;;  %v655_v13 = vsel %vm636_vm0, %v634_v12, 0.0  ;;  %v658_v45 = vsel %vm636_vm0, %v635_v40, 0.0  ;;  %v864_v58 = vld [vmem:[%s7770_s21 + $0x18] sm:$0xff]  ;;  %v863_v60 = vld [vmem:[%s7770_s21 + $0x10] sm:$0xff]  ;;  %v862_v62 = vld [vmem:[%s7770_s21 + $0x8] sm:$0xff]  ;;  %s7778_s8 = sld [smem:[#allocation40_spill]] }
  0x2c   : > { %v663_v17 = vsub.f32 1.0, %v662_v16  ;;  %v986_v59 = vld [vmem:[%s7771_s7 + $0x18] sm:$0xff]  ;;  %905 = vmatpush.msra.mxu0 %v864_v58  ;;  %v985_v61 = vld [vmem:[%s7771_s7 + $0x10] sm:$0xff]  ;;  %5094 = vmatpush.msra.mxu1 %v864_v58  ;;  %v984_v63 = vld [vmem:[%s7771_s7 + $0x8] sm:$0xff]  ;;  %s7779_s6 = sld [smem:[#allocation38_spill]] }
  0x2d   : > { %1003 = vmatpush.msra.mxu2 %v986_v59 }
  0x2e   : > { %v664_v18 = vmul.f32 %v5164_v15, %v663_v17  ;;  %906 = vmatpush.msra.mxu0 %v863_v60  ;;  %5095 = vmatpush.msra.mxu1 %v863_v60 }
  0x2f   : > { %1004 = vmatpush.msra.mxu2 %v985_v61 }
  0x30   : > { %v665_v19 = vadd.f32 %v5164_v15, %v664_v18  ;;  %907 = vmatpush.msra.mxu0 %v862_v62  ;;  %5096 = vmatpush.msra.mxu1 %v862_v62 }
  0x31   : > { %1005 = vmatpush.msra.mxu2 %v984_v63 }
  0x32   : > { %653 = vadd.xlane.f32.xlu2 %v652_v9  ;;  %647 = vadd.xlane.f32.xlu1 %v646_v10  ;;  %v5611_v20 = vsel %vm666_vm1, %v5164_v15, %v665_v19 }
  0x33   : > { %641 = vadd.xlane.f32.xlu0 %v640_v11  ;;  %7769 = vst [vmem:[#allocation11_spill] sm:$0xff] %v5611_v20 }
  0x3a   : > { %656 = vadd.xlane.f32.xlu1 %v655_v13 }
  0x9d   : > { %v651_v21 = vpop.xlane.xlu2 %650  ;;  %v645_v22 = vpop.xlane.xlu1 %644 }
  0x9e   : > { %v670_v23 = vmul.f32 %v5611_v20, %v645_v22  ;;  %v639_v24 = vpop.xlane.xlu0 %638  ;;  %v672_v36 = vmul.f32 %v5611_v20, %v651_v21 }
  0x9f   : > { %v668_v25 = vmul.f32 %v5611_v20, %v639_v24 }
  0xa0   : > { %v5615_v26 = vsub.f32 %v630_v1, %v670_v23  ;;  %v5636_v43 = vsub.f32 %v632_v0, %v672_v36  ;;  %v861_v0 = vld [vmem:[%s7770_s21] sm:$0xff] }
  0xa1   : > { %v5617_v27 = vsub.f32 %v628_v2, %v668_v25  ;;  %v983_v1 = vld [vmem:[%s7771_s7] sm:$0xff]  ;;  %908 = vmatpush.msra.mxu0 %v861_v0  ;;  %5097 = vmatpush.msra.mxu1 %v861_v0 }
  0xa2   : > { %v686_v28 = vmul.f32 %v5615_v26, %v5615_v26  ;;  %v688_v51 = vmul.f32 %v5636_v43, %v5636_v43  ;;  %1006 = vmatpush.msra.mxu2 %v983_v1 }
  0xa3   : > { %v684_v29 = vmul.f32 %v5617_v27, %v5617_v27 }
  0xa4   : > { %v698_v30 = vsel %vm636_vm0, %v686_v28, 0.0  ;;  %v704_v54 = vsel %vm636_vm0, %v688_v51, 0.0 }
  0xa5   : > { %v654_v31 = vpop.xlane.xlu2 %653  ;;  %699 = vadd.xlane.f32.xlu1 %v698_v30  ;;  %v692_v32 = vsel %vm636_vm0, %v684_v29, 0.0  ;;  %v648_v33 = vpop.xlane.xlu1 %647 }
  0xa6   : > { %v673_v34 = vmul.f32 %v5611_v20, %v654_v31  ;;  %693 = vadd.xlane.f32.xlu0 %v692_v32  ;;  %v642_v35 = vpop.xlane.xlu0 %641  ;;  %v671_v38 = vmul.f32 %v5611_v20, %v648_v33 }
  0xa7   : > { %v669_v37 = vmul.f32 %v5611_v20, %v642_v35 }
  0xa8   : > { %v5629_v39 = vsub.f32 %v633_v6, %v673_v34  ;;  %v5638_v44 = vsub.f32 %v631_v7, %v671_v38 }
  0xa9   : > { %v5632_v41 = vsub.f32 %v629_v8, %v669_v37 }
  0xaa   : > { %v689_v42 = vmul.f32 %v5629_v39, %v5629_v39  ;;  %v687_v52 = vmul.f32 %v5638_v44, %v5638_v44 }
  0xab   : > { %v685_v46 = vmul.f32 %v5632_v41, %v5632_v41 }
  0xac   : > { %v707_v47 = vsel %vm636_vm0, %v689_v42, 0.0  ;;  %v701_v55 = vsel %vm636_vm0, %v687_v52, 0.0 }
  0xad   : > { %708 = vadd.xlane.f32.xlu1 %v707_v47  ;;  %v695_v48 = vsel %vm636_vm0, %v685_v46, 0.0  ;;  %v657_v49 = vpop.xlane.xlu1 %656 }
  0xae   : > { %659 = vadd.xlane.f32.xlu0 %v658_v45  ;;  %696 = vadd.xlane.f32.xlu2 %v695_v48  ;;  %v674_v50 = vmul.f32 %v5611_v20, %v657_v49  ;;  %v5711_v45 = vld [vmem:[%s7772_s30] ss:$0 sm:$0xff]  ;;  %s5390_s30 = scalar_lea.hbm %s7736_s20, 128 }
  0xaf   : > { %v5719_v49 = vld [vmem:[%s7773_s23] ss:$0 sm:$0xff]  ;;  %s4657_s23 = sshll.u32 %s4654_s25, 4  ;;  %s4658_s23 = int_to_ptr.hbm [resolvable:$true] %s4657_s23 }
  0xb0   : > { %v5650_v53 = vsub.f32 %v634_v12, %v674_v50 }
  0xb2   : > { %v690_v56 = vmul.f32 %v5650_v53, %v5650_v53 }
  0xb4   : > { %v710_v57 = vsel %vm636_vm0, %v690_v56, 0.0 }
  0xb6   : > { %705 = vadd.xlane.f32.xlu0 %v704_v54  ;;  %702 = vadd.xlane.f32.xlu2 %v701_v55 }
  0xbe   : > { %711 = vadd.xlane.f32.xlu2 %v710_v57 }
 0x118   : > { %v700_v2 = vpop.xlane.xlu1 %699 }
 0x119   : > { %v718_v3 = vmul.f32 %v700_v2, %v5611_v20  ;;  %v694_v4 = vpop.xlane.xlu0 %693 }
 0x11a   : > { %v716_v5 = vmul.f32 %v694_v4, %v5611_v20 }
 0x11b   : > { %v5683_v6 = vadd.f32 1e-05, %v718_v3 }
 0x11c   : > { %v724_v7 = vadd.f32 1e-05, %v716_v5 }
 0x11d   : > { %5165 = vrsqrt.f32 %v5683_v6  ;;  %vm758_vm7 = vweird.f32 %v5683_v6 }
 0x11e   : > { %5167 = vrsqrt.f32 %v724_v7  ;;  %vm738_vm3 = vweird.f32 %v724_v7 }
 0x120   : > { %v709_v8 = vpop.xlane.xlu1 %708 }
 0x121   : > { %v721_v9 = vmul.f32 %v709_v8, %v5611_v20  ;;  %v697_v10 = vpop.xlane.xlu2 %696  ;;  %v660_v11 = vpop.xlane.xlu0 %659 }
 0x122   : > { %v717_v12 = vmul.f32 %v697_v10, %v5611_v20  ;;  %v675_v13 = vmul.f32 %v5611_v20, %v660_v11 }
 0x123   : > { %v5689_v14 = vpop.eup %5165  ;;  %v5691_v15 = vadd.f32 1e-05, %v721_v9 }
 0x124   : > { %v5168_v16 = vpop.eup %5167  ;;  %v725_v17 = vadd.f32 1e-05, %v717_v12  ;;  %v5693_v18 = vsub.f32 %v635_v40, %v675_v13  ;;  %v753_v19 = vmul.f32 %v5689_v14, %v5683_v6  ;;  %vm759_vm8 = vweird.f32 %v5689_v14 }
 0x125   : > { %v733_v21 = vmul.f32 %v5168_v16, %v724_v7  ;;  %5169 = vrsqrt.f32 %v5691_v15  ;;  %vm739_vm2 = vweird.f32 %v5168_v16  ;;  %vm5732_vm10 = vmor %vm758_vm7, %vm759_vm8  ;;  %vm788_vm13 = vweird.f32 %v5691_v15 }
 0x126   : > { %5171 = vrsqrt.f32 %v725_v17  ;;  %v691_v22 = vmul.f32 %v5693_v18, %v5693_v18  ;;  %v754_v25 = vmul.f32 %v5689_v14, %v753_v19  ;;  %vm740_vm4 = vmor %vm738_vm3, %vm739_vm2  ;;  %vm748_vm5 = vweird.f32 %v725_v17 }
 0x127   : > { %v734_v23 = vmul.f32 %v5168_v16, %v733_v21 }
 0x128   : > { %v713_v24 = vsel %vm636_vm0, %v691_v22, 0.0  ;;  %v755_v37 = vmul.f32 0.5, %v754_v25 }
 0x129   : > { %v735_v28 = vmul.f32 0.5, %v734_v23  ;;  %v703_v29 = vpop.xlane.xlu2 %702  ;;  %714 = vadd.xlane.f32.xlu0 %v713_v24  ;;  %v706_v30 = vpop.xlane.xlu0 %705 }
 0x12a   : > { %v719_v31 = vmul.f32 %v703_v29, %v5611_v20  ;;  %v720_v32 = vmul.f32 %v706_v30, %v5611_v20  ;;  %v756_v51 = vsub.f32 1.5, %v755_v37 }
 0x12b   : > { %v5704_v33 = vpop.eup %5169  ;;  %v736_v34 = vsub.f32 1.5, %v735_v28 }
 0x12c   : > { %v5172_v35 = vpop.eup %5171  ;;  %v5706_v36 = vadd.f32 1e-05, %v719_v31  ;;  %v728_v42 = vadd.f32 1e-05, %v720_v32  ;;  %v783_v46 = vmul.f32 %v5704_v33, %v5691_v15  ;;  %v757_v62 = vmul.f32 %v5689_v14, %v756_v51 }
 0x12d   : > { %v737_v38 = vmul.f32 %v5168_v16, %v736_v34  ;;  %v743_v40 = vmul.f32 %v5172_v35, %v725_v17  ;;  %vm749_vm6 = vweird.f32 %v5172_v35  ;;  %vm789_vm1 = vweird.f32 %v5704_v33 }
 0x12e   : > { %5173 = vrsqrt.f32 %v5706_v36  ;;  %v784_v56 = vmul.f32 %v5704_v33, %v783_v46  ;;  %vm750_vm9 = vmor %vm748_vm5, %vm749_vm6  ;;  %v761_v8 = vsel %vm5732_vm10, %v5689_v14, %v757_v62  ;;  %vm778_vm11 = vweird.f32 %v728_v42 }
 0x12f   : > { %v741_v47 = vsel %vm740_vm4, %v5168_v16, %v737_v38  ;;  %v744_v48 = vmul.f32 %v5172_v35, %v743_v40  ;;  %5175 = vrsqrt.f32 %v728_v42  ;;  %vm768_vm14 = vweird.f32 %v5706_v36  ;;  %vm790_vm4 = vmor %vm788_vm13, %vm789_vm1 }
 0x130   : > { %v812_v50 = vmul.f32 %v741_v47, %v5617_v27  ;;  %v785_v2 = vmul.f32 0.5, %v784_v56  ;;  %v935_v56 = vld [vmem:[%s7776_s5 + $0x8] sm:$0xff] }
 0x131   : > { %v745_v52 = vmul.f32 0.5, %v744_v48  ;;  %v712_v54 = vpop.xlane.xlu2 %711  ;;  %v937_v48 = vld [vmem:[%s7776_s5 + $0x18] sm:$0xff] }
 0x132   : > { %v824_v55 = vmul.f32 %v5711_v45, %v812_v50  ;;  %v722_v57 = vmul.f32 %v712_v54, %v5611_v20  ;;  %v786_v10 = vsub.f32 1.5, %v785_v2  ;;  %v4794_v50 = vld [vmem:[%s7770_s21 + $0x38] sm:$0xff]  ;;  %954 = vmatpush.msrb.mxu1 %v937_v48  ;;  %v4793_v54 = vld [vmem:[%s7770_s21 + $0x30] sm:$0xff] }
 0x133   : > { %v746_v58 = vsub.f32 1.5, %v745_v52  ;;  %1589 = vmatpush.msrb.mxu2 %v4794_v50  ;;  %v936_v52 = vld [vmem:[%s7776_s5 + $0x10] sm:$0xff] }
 0x134   : > { %v5174_v59 = vpop.eup %5173  ;;  %v5728_v60 = vadd.f32 %v5719_v49, %v824_v55  ;;  %v730_v27 = vadd.f32 1e-05, %v722_v57  ;;  %v787_v22 = vmul.f32 %v5704_v33, %v786_v10  ;;  %955 = vmatpush.msrb.mxu1 %v936_v52  ;;  %v4792_v57 = vld [vmem:[%s7770_s21 + $0x28] sm:$0xff] }
 0x135   : > { %v5176_v61 = vpop.eup %5175  ;;  %v747_v63 = vmul.f32 %v5172_v35, %v746_v58  ;;  %v763_v0 = vmul.f32 %v5174_v59, %v5706_v36  ;;  %vm769_vm15 = vweird.f32 %v5174_v59  ;;  %1590 = vmatpush.msrb.mxu2 %v4793_v54  ;;  %v934_v58 = vld [vmem:[%s7776_s5] sm:$0xff] }
 0x136   : > { %v773_v3 = vmul.f32 %v5176_v61, %v728_v42  ;;  %5177 = vrsqrt.f32 %v730_v27  ;;  %4727 = vmatmul.msk.f32.vlgmr.msra.gmra.mxu0 %vm636_vm0, %v5728_v60  ;;  %4743 = vmatmul.msk.f32.vlgmr.msra.gmra.mxu2 %vm636_vm0, %v5728_v60  ;;  %vm779_vm12 = vweird.f32 %v5176_v61  ;;  %vm770_vm3 = vmor %vm768_vm14, %vm769_vm15  ;;  %v791_v31 = vsel %vm790_vm4, %v5704_v33, %v787_v22 }
 0x137   : > { %v751_v4 = vsel %vm750_vm9, %v5172_v35, %v747_v63  ;;  %v764_v5 = vmul.f32 %v5174_v59, %v763_v0  ;;  %vm780_vm2 = vmor %vm778_vm11, %vm779_vm12  ;;  %vm798_vm5 = vweird.f32 %v730_v27  ;;  %v817_v15 = vmul.f32 %v791_v31, %v5629_v39  ;;  %956 = vmatpush.msrb.mxu1 %v935_v56  ;;  %1591 = vmatpush.msrb.mxu2 %v4792_v57 }
 0x138   : > { %v813_v6 = vmul.f32 %v751_v4, %v5632_v41  ;;  %v774_v7 = vmul.f32 %v5176_v61, %v773_v3  ;;  %v814_v41 = vmul.f32 %v761_v8, %v5615_v26  ;;  %v5840_v3 = vld [vmem:[%s7777_s28] ss:$0 sm:$0xff]  ;;  %vm1040_vm11 = vcmask 64512  }
 0x139   : > { %v765_v9 = vmul.f32 0.5, %v764_v5  ;;  %957 = vmatpush.msrb.mxu1 %v934_v58  ;;  %vm1308_vm12 = vcmask 523264  }
 0x13a   : > { %v825_v11 = vmul.f32 %v5711_v45, %v813_v6  ;;  %v775_v12 = vmul.f32 0.5, %v774_v7  ;;  %v826_v24 = vmul.f32 %v5711_v45, %v814_v41 }
 0x13b   : > { %v766_v13 = vsub.f32 1.5, %v765_v9 }
 0x13c   : > { %v5178_v16 = vpop.eup %5177  ;;  %v5750_v14 = vadd.f32 %v5719_v49, %v825_v11  ;;  %v776_v17 = vsub.f32 1.5, %v775_v12  ;;  %v5765_v35 = vadd.f32 %v5719_v49, %v826_v24 }
 0x13d   : > { %v767_v19 = vmul.f32 %v5174_v59, %v766_v13  ;;  %v793_v21 = vmul.f32 %v5178_v16, %v730_v27  ;;  %vm799_vm6 = vweird.f32 %v5178_v16  ;;  %v4791_v27 = vld [vmem:[%s7770_s21 + $0x20] sm:$0xff] }
 0x13e   : > { %v777_v23 = vmul.f32 %v5176_v61, %v776_v17  ;;  %4728 = vmatmul.msk.f32.gmra.mxu0 %vm636_vm0, %v5750_v14  ;;  %4744 = vmatmul.msk.f32.gmra.mxu2 %vm636_vm0, %v5750_v14  ;;  %vm800_vm7 = vmor %vm798_vm5, %vm799_vm6  ;;  %v4807_v17 = vld [vmem:[%s7776_s5 + $0x38] sm:$0xff] }
 0x13f   : > { %v794_v26 = vmul.f32 %v5178_v16, %v793_v21  ;;  %v771_v28 = vsel %vm770_vm3, %v5174_v59, %v767_v19  ;;  %1592 = vmatpush.msrb.mxu2 %v4791_v27  ;;  %v4806_v19 = vld [vmem:[%s7776_s5 + $0x30] sm:$0xff]  ;;  %v4805_v21 = vld [vmem:[%s7776_s5 + $0x28] sm:$0xff] }
 0x140   : > { %v781_v25 = vsel %vm780_vm2, %v5176_v61, %v777_v23  ;;  %v815_v36 = vmul.f32 %v771_v28, %v5638_v44  ;;  %v829_v44 = vmul.f32 %v5711_v45, %v817_v15  ;;  %v4804_v23 = vld [vmem:[%s7776_s5 + $0x20] sm:$0xff] }
 0x141   : > { %v816_v29 = vmul.f32 %v781_v25, %v5636_v43  ;;  %v795_v30 = vmul.f32 0.5, %v794_v26  ;;  %1640 = vmatpush.msra.mxu2 %v4807_v17 }
 0x142   : > { %v827_v43 = vmul.f32 %v5711_v45, %v815_v36  ;;  %v5784_v40 = vadd.f32 %v5719_v49, %v829_v44 }
 0x143   : > { %v828_v32 = vmul.f32 %v5711_v45, %v816_v29  ;;  %v796_v34 = vsub.f32 1.5, %v795_v30  ;;  %1641 = vmatpush.msra.mxu2 %v4806_v19 }
 0x144   : > { %v5781_v39 = vadd.f32 %v5719_v49, %v827_v43  ;;  %v5148_v43 = vld [vmem:[%s7779_s6] ss:$0 sm:$0xff] }
 0x145   : > { %v5770_v37 = vadd.f32 %v5719_v49, %v828_v32  ;;  %v797_v38 = vmul.f32 %v5178_v16, %v796_v34  ;;  %1642 = vmatpush.msra.mxu2 %v4805_v21 }
 0x146   : > { %4729 = vmatmul.msk.f32.gmra.mxu0 %vm636_vm0, %v5765_v35  ;;  %4745 = vmatmul.msk.f32.gmra.mxu2 %vm636_vm0, %v5765_v35 }
 0x147   : > { %4731 = vmatmul.msk.f32.vlgmr.msra.gmra.mxu1 %vm636_vm0, %v5770_v37  ;;  %v801_v33 = vsel %vm800_vm7, %v5178_v16, %v797_v38  ;;  %1643 = vmatpush.msra.mxu2 %v4804_v23  ;;  %v5147_v38 = vld [vmem:[%s7778_s8] ss:$0 sm:$0xff] }
 0x148   : > { %v818_v42 = vmul.f32 %v801_v33, %v5650_v53  ;;  %v5808_v53 = vld [vmem:[%s7727_s11] sm:$0xff] }
 0x149   : > { %1080 = vmatpush.msra.mxu3 %v5808_v53 }
 0x14a   : > { %v830_v46 = vmul.f32 %v5711_v45, %v818_v42 }
 0x14b   : > { %1169 = vmatpush.msrb.mxu3 %v5808_v53 }
 0x14c   : > { %v5795_v47 = vadd.f32 %v5719_v49, %v830_v46 }
 0x14e   : > { %4730 = vmatmul.msk.f32.gmra.mxu0 %vm636_vm0, %v5781_v39  ;;  %4746 = vmatmul.msk.f32.gmra.mxu2 %vm636_vm0, %v5781_v39 }
 0x14f   : > { %4732 = vmatmul.msk.f32.gmra.mxu1 %vm636_vm0, %v5784_v40 }
 0x156   : > { %4747 = vmatmul.msk.f32.gmra.mxu2 %vm636_vm0, %v5770_v37 }
 0x157   : > { %4733 = vmatmul.msk.f32.gmra.mxu1 %vm636_vm0, %v5795_v47 }
 0x15e   : > { %4748 = vmatmul.msk.f32.gmra.mxu2 %vm636_vm0, %v5784_v40 }
 0x166   : > { %4749 = vmatmul.msk.f32.gmra.mxu2 %vm636_vm0, %v5795_v47 }
 0x19c   : > { %v715_v51 = vpop.xlane.xlu0 %714 }
 0x19d   : > { %v723_v55 = vmul.f32 %v715_v51, %v5611_v20 }
 0x19f   : > { %v731_v59 = vadd.f32 1e-05, %v723_v55 }
 0x1a1   : > { %5179 = vrsqrt.f32 %v731_v59  ;;  %vm808_vm9 = vweird.f32 %v731_v59 }
 0x1a7   : > { %v5180_v61 = vpop.eup %5179 }
 0x1a8   : > { %v803_v62 = vmul.f32 %v5180_v61, %v731_v59  ;;  %vm809_vm8 = vweird.f32 %v5180_v61 }
 0x1a9   : > { %vm810_vm10 = vmor %vm808_vm9, %vm809_vm8 }
 0x1aa   : > { %v804_v63 = vmul.f32 %v5180_v61, %v803_v62 }
 0x1ac   : > { %v805_v0 = vmul.f32 0.5, %v804_v63 }
 0x1ae   : > { %v806_v1 = vsub.f32 1.5, %v805_v0 }
 0x1b0   : > { %v807_v2 = vmul.f32 %v5180_v61, %v806_v1 }
 0x1b2   : > { %v811_v4 = vsel %vm810_vm10, %v5180_v61, %v807_v2 }
 0x1b3   : > { %v819_v5 = vmul.f32 %v811_v4, %v5693_v18  ;;  %v910_v6 = vpop.f32.mrf.mxu0 }
 0x1b4   : > { %v5844_v7 = vadd.f32 %v5840_v3, %v910_v6 }
 0x1b5   : > { %v831_v8 = vmul.f32 %v5711_v45, %v819_v5 }
 0x1b6   : > { %4751 = vmatmul.msk.f32.vlgmr.msra.gmra.mxu3 %vm1040_vm11, %v5844_v7 }
 0x1b7   : > { %v5850_v9 = vadd.f32 %v5719_v49, %v831_v8  ;;  %5098 = vmatpush.msra.mxu3 %v4807_v17 }
 0x1b9   : > { %4734 = vmatmul.msk.f32.gmra.mxu1 %vm636_vm0, %v5850_v9  ;;  %4750 = vmatmul.msk.f32.gmra.mxu2 %vm636_vm0, %v5850_v9  ;;  %v1008_v25 = vpop.f32.mrf.mxu2 }
 0x1ba   : > { %5099 = vmatpush.msra.mxu3 %v4806_v19  ;;  %v1009_v59 = vadd.f32 %v5147_v38, %v1008_v25 }
 0x1bb   : > { %v913_v18 = vpop.f32.mrf.mxu0 }
 0x1bc   : > { %v5857_v10 = vadd.f32 %v5840_v3, %v913_v18  ;;  %5100 = vmatpush.msra.mxu3 %v4805_v21  ;;  %v5997_v21 = vld [vmem:[%s7779_s6 + $0x1] ss:$0 sm:$0xff] }
 0x1be   : > { %4752 = vmatmul.msk.f32.gmra.mxu3 %vm1040_vm11, %v5857_v10 }
 0x1bf   : > { %5101 = vmatpush.msra.mxu3 %v4804_v23 }
 0x1c1   : > { %4735 = vmatmul.msk.f32.vlgmr.msrb.gmra.mxu1 %vm636_vm0, %v5728_v60  ;;  %4796 = vmatmul.msk.f32.vlgmr.msrb.gmra.mxu2 %vm636_vm0, %v5728_v60  ;;  %v1011_v28 = vpop.f32.mrf.mxu2 }
 0x1c2   : > { %1856 = vmatpush.msrb.mxu2 %v5808_v53  ;;  %v1012_v58 = vadd.f32 %v5147_v38, %v1011_v28 }
 0x1c3   : > { %v916_v45 = vpop.f32.mrf.mxu0 }
 0x1c4   : > { %v5866_v49 = vadd.f32 %v5840_v3, %v916_v45  ;;  %v922_v13 = vpop.f32.mrf.mxu1 }
 0x1c5   : > { %v5884_v16 = vadd.f32 %v5840_v3, %v922_v13 }
 0x1c6   : > { %4753 = vmatmul.msk.f32.gmra.mxu3 %vm1040_vm11, %v5866_v49 }
 0x1c9   : > { %4736 = vmatmul.msk.f32.gmra.mxu1 %vm636_vm0, %v5750_v14  ;;  %4797 = vmatmul.msk.f32.gmra.mxu2 %vm636_vm0, %v5750_v14  ;;  %v1014_v29 = vpop.f32.mrf.mxu2 }
 0x1ca   : > { %v1015_v56 = vadd.f32 %v5147_v38, %v1014_v29 }
 0x1cb   : > { %v919_v11 = vpop.f32.mrf.mxu0 }
 0x1cc   : > { %v5875_v12 = vadd.f32 %v5840_v3, %v919_v11  ;;  %v925_v41 = vpop.f32.mrf.mxu1 }
 0x1cd   : > { %v5902_v22 = vadd.f32 %v5840_v3, %v925_v41 }
 0x1ce   : > { %4754 = vmatmul.msk.f32.gmra.mxu3 %vm1040_vm11, %v5875_v12 }
 0x1d1   : > { %4737 = vmatmul.msk.f32.gmra.mxu1 %vm636_vm0, %v5765_v35  ;;  %4798 = vmatmul.msk.f32.gmra.mxu2 %vm636_vm0, %v5765_v35  ;;  %v1017_v30 = vpop.f32.mrf.mxu2 }
 0x1d2   : > { %v1018_v54 = vadd.f32 %v5147_v38, %v1017_v30 }
 0x1d4   : > { %v928_v26 = vpop.f32.mrf.mxu1 }
 0x1d5   : > { %v5915_v24 = vadd.f32 %v5840_v3, %v928_v26 }
 0x1d6   : > { %4755 = vmatmul.msk.f32.gmra.mxu3 %vm1040_vm11, %v5884_v16 }
 0x1d9   : > { %4738 = vmatmul.msk.f32.gmra.mxu1 %vm636_vm0, %v5781_v39  ;;  %4799 = vmatmul.msk.f32.gmra.mxu2 %vm636_vm0, %v5781_v39  ;;  %v1020_v31 = vpop.f32.mrf.mxu2 }
 0x1da   : > { %v1021_v51 = vadd.f32 %v5147_v38, %v1020_v31 }
 0x1de   : > { %4756 = vmatmul.msk.f32.gmra.mxu3 %vm1040_vm11, %v5902_v22 }
 0x1e1   : > { %4739 = vmatmul.msk.f32.gmra.mxu1 %vm636_vm0, %v5770_v37  ;;  %4800 = vmatmul.msk.f32.gmra.mxu2 %vm636_vm0, %v5770_v37  ;;  %v1023_v32 = vpop.f32.mrf.mxu2 }
 0x1e2   : > { %v1024_v50 = vadd.f32 %v5147_v38, %v1023_v32 }
 0x1e6   : > { %4757 = vmatmul.msk.f32.gmra.mxu3 %vm1040_vm11, %v5915_v24 }
 0x1e9   : > { %4740 = vmatmul.msk.f32.gmra.mxu1 %vm636_vm0, %v5784_v40  ;;  %4801 = vmatmul.msk.f32.gmra.mxu2 %vm636_vm0, %v5784_v40  ;;  %v1026_v34 = vpop.f32.mrf.mxu2 }
 0x1ea   : > { %v1027_v46 = vadd.f32 %v5147_v38, %v1026_v34 }
 0x1f1   : > { %4741 = vmatmul.msk.f32.gmra.mxu1 %vm636_vm0, %v5795_v47  ;;  %4802 = vmatmul.msk.f32.gmra.mxu2 %vm636_vm0, %v5795_v47 }
 0x1f9   : > { %4742 = vmatmul.msk.f32.gmra.mxu1 %vm636_vm0, %v5850_v9  ;;  %4803 = vmatmul.msk.f32.gmra.mxu2 %vm636_vm0, %v5850_v9 }
 0x201   : > { %4809 = vmatmul.msk.f32.vlgmr.msra.gmra.mxu2 %vm636_vm0, %v5728_v60 }
 0x209   : > { %4810 = vmatmul.msk.f32.gmra.mxu2 %vm636_vm0, %v5750_v14 }
 0x211   : > { %4811 = vmatmul.msk.f32.gmra.mxu2 %vm636_vm0, %v5765_v35 }
 0x219   : > { %4812 = vmatmul.msk.f32.gmra.mxu2 %vm636_vm0, %v5781_v39 }
 0x236   : > { %v931_v36 = vpop.f32.mrf.mxu1 }
 0x237   : > { %v5940_v15 = vadd.f32 %v5840_v3, %v931_v36 }
 0x239   : > { %4758 = vmatmul.msk.f32.gmra.mxu3 %vm1040_vm11, %v5940_v15  ;;  %v5987_v17 = vpop.f32.mrf.mxu3 }
 0x23c   : > { %v1029_v44 = vpop.f32.mrf.mxu2 }
 0x23d   : > { %v1030_v33 = vadd.f32 %v5147_v38, %v1029_v44 }
 0x23e   : > { %v959_v42 = vpop.f32.mrf.mxu1 }
 0x23f   : > { %v5950_v48 = vadd.f32 %v5148_v43, %v959_v42  ;;  %1533 = vmatpush.msra.mxu1 %v1030_v33 }
 0x241   : > { %4759 = vmatmul.msk.f32.vlgmr.msrb.gmra.mxu3 %vm1040_vm11, %v5950_v48  ;;  %1534 = vmatpush.msra.mxu1 %v1027_v46  ;;  %v5999_v23 = vpop.f32.mrf.mxu3 }
 0x243   : > { %1535 = vmatpush.msra.mxu1 %v1024_v50 }
 0x244   : > { %v5954_v52 = vpop.f32.mrf.mxu2 }
 0x245   : > { %1536 = vmatpush.msra.mxu1 %v1021_v51 }
 0x246   : > { %v962_v55 = vpop.f32.mrf.mxu1 }
 0x247   : > { %v5956_v57 = vadd.f32 %v5148_v43, %v962_v55  ;;  %1537 = vmatpush.msra.mxu1 %v1018_v54 }
 0x249   : > { %4760 = vmatmul.msk.f32.gmra.mxu3 %vm1040_vm11, %v5956_v57  ;;  %1538 = vmatpush.msra.mxu1 %v1015_v56  ;;  %v6008_v28 = vpop.f32.mrf.mxu3 }
 0x24b   : > { %1539 = vmatpush.msra.mxu1 %v1012_v58 }
 0x24c   : > { %v5960_v27 = vpop.f32.mrf.mxu2 }
 0x24d   : > { %1540 = vmatpush.msra.mxu1 %v1009_v59  ;;  %v6042_v59 = vld [vmem:[%s7725_s9 + $0x38] sm:$0xff] }
 0x24e   : > { %v965_v61 = vpop.f32.mrf.mxu1 }
 0x24f   : > { %1767 = vmatpush.msrb.mxu1 %v5808_v53  ;;  %v5963_v62 = vadd.f32 %v5148_v43, %v965_v61  ;;  %v6047_v61 = vld [vmem:[%s7726_s10 + $0x38] sm:$0xff] }
 0x251   : > { %4761 = vmatmul.msk.f32.gmra.mxu3 %vm1040_vm11, %v5963_v62  ;;  %v6020_v34 = vpop.f32.mrf.mxu3 }
 0x254   : > { %v5967_v63 = vpop.f32.mrf.mxu2 }
 0x256   : > { %v968_v0 = vpop.f32.mrf.mxu1 }
 0x257   : > { %v5969_v1 = vadd.f32 %v5148_v43, %v968_v0 }
 0x259   : > { %4762 = vmatmul.msk.f32.gmra.mxu3 %vm1040_vm11, %v5969_v1 }
 0x25c   : > { %v5973_v2 = vpop.f32.mrf.mxu2 }
 0x25e   : > { %v971_v3 = vpop.f32.mrf.mxu1 }
 0x25f   : > { %v5975_v4 = vadd.f32 %v5148_v43, %v971_v3 }
 0x261   : > { %4763 = vmatmul.msk.f32.gmra.mxu3 %vm1040_vm11, %v5975_v4 }
 0x264   : > { %v5979_v53 = vpop.f32.mrf.mxu2 }
 0x266   : > { %v974_v5 = vpop.f32.mrf.mxu1 }
 0x267   : > { %v975_v6 = vadd.f32 %v5148_v43, %v974_v5 }
 0x269   : > { %4764 = vmatmul.msk.f32.gmra.mxu3 %vm1040_vm11, %v975_v6 }
 0x26c   : > { %v5982_v8 = vpop.f32.mrf.mxu2 }
 0x26e   : > { %v977_v18 = vpop.f32.mrf.mxu1 }
 0x26f   : > { %v978_v45 = vadd.f32 %v5148_v43, %v977_v18  ;;  %v6054_v18 = vld [vmem:[%s7726_s10 + $0x30] sm:$0xff] }
 0x271   : > { %4765 = vmatmul.msk.f32.gmra.mxu3 %vm1040_vm11, %v978_v45 }
 0x274   : > { %v5985_v11 = vpop.f32.mrf.mxu2 }
 0x275   : > { %7780 = vst [vmem:[#allocation12_spill] sm:$0xff] %v5985_v11 }
 0x276   : > { %v980_v13 = vpop.f32.mrf.mxu1 }
 0x277   : > { %v981_v41 = vadd.f32 %v5148_v43, %v980_v13  ;;  %v6031_v43 = vpop.f32.mrf.mxu3 }
 0x279   : > { %4766 = vmatmul.msk.f32.gmra.mxu3 %vm1040_vm11, %v981_v41  ;;  %v1129_v3 = vmul.f32 %v981_v41, %v6042_v59  ;;  %v6067_v41 = vld [vmem:[%s7726_s10 + $0x28] sm:$0xff] }
 0x27c   : > { %v5990_v19 = vpop.f32.mrf.mxu2 }
 0x27d   : > { %7781 = vst [vmem:[#allocation13_spill] sm:$0xff] %v5990_v19 }
 0x27f   : > { %v6033_v44 = vpop.f32.mrf.mxu3 }
 0x281   : > { %4813 = vmatmul.msk.f32.vlgmr.msra.gmra.mxu3 %vm636_vm0, %v5770_v37 }
 0x284   : > { %v1645_v26 = vpop.f32.mrf.mxu2 }
 0x285   : > { %v6002_v25 = vadd.f32 %v5997_v21, %v1645_v26 }
 0x287   : > { %4838 = vmatmul.msk.f32.vlgmr.msrb.gmra.mxu2 %vm1040_vm11, %v6002_v25  ;;  %v6035_v33 = vpop.f32.mrf.mxu3 }
 0x289   : > { %4814 = vmatmul.msk.f32.gmra.mxu3 %vm636_vm0, %v5784_v40 }
 0x28c   : > { %v1648_v29 = vpop.f32.mrf.mxu2 }
 0x28d   : > { %v6011_v30 = vadd.f32 %v5997_v21, %v1648_v29  ;;  %v6060_v29 = vld [vmem:[%s7725_s9 + $0x30] sm:$0xff] }
 0x28f   : > { %4839 = vmatmul.msk.f32.gmra.mxu2 %vm1040_vm11, %v6011_v30 }
 0x291   : > { %4815 = vmatmul.msk.f32.gmra.mxu3 %vm636_vm0, %v5795_v47 }
 0x294   : > { %v1651_v31 = vpop.f32.mrf.mxu2 }
 0x295   : > { %v6018_v32 = vadd.f32 %v5997_v21, %v1651_v31  ;;  %v1128_v31 = vmul.f32 %v978_v45, %v6060_v29 }
 0x297   : > { %4840 = vmatmul.msk.f32.gmra.mxu2 %vm1040_vm11, %v6018_v32 }
 0x299   : > { %4816 = vmatmul.msk.f32.gmra.mxu3 %vm636_vm0, %v5850_v9 }
 0x29c   : > { %v1654_v36 = vpop.f32.mrf.mxu2 }
 0x29d   : > { %v6027_v38 = vadd.f32 %v5997_v21, %v1654_v36 }
 0x29f   : > { %4841 = vmatmul.msk.f32.gmra.mxu2 %vm1040_vm11, %v6027_v38 }
 0x2bc   : > { %v6037_v42 = vpop.f32.mrf.mxu3 }
 0x2c4   : > { %v1171_v46 = vpop.f32.mrf.mxu3 }
 0x2cc   : > { %v1174_v50 = vpop.f32.mrf.mxu3 }
 0x2d4   : > { %v1177_v51 = vpop.f32.mrf.mxu3 }
 0x2dc   : > { %v1180_v54 = vpop.f32.mrf.mxu3 }
 0x2e4   : > { %v1183_v55 = vpop.f32.mrf.mxu3 }
 0x2ec   : > { %v1186_v56 = vpop.f32.mrf.mxu3 }
 0x2ed   : > { %v1200_v36 = vmul.f32 %v1186_v56, %v6067_v41 }
 0x2f4   : > { %v1189_v58 = vpop.f32.mrf.mxu3 }
 0x2f5   : > { %v1201_v13 = vmul.f32 %v1189_v58, %v6054_v18  ;;  %v6073_v58 = vld [vmem:[%s7725_s9 + $0x28] sm:$0xff] }
 0x2fc   : > { %v1192_v0 = vpop.f32.mrf.mxu3 }
 0x2fd   : > { %v1202_v5 = vmul.f32 %v1192_v0, %v6047_v61  ;;  %v1209_v0 = vadd.f32 %v1201_v13, %v1128_v31 }
 0x2ff   : > { %v1210_v26 = vadd.f32 %v1202_v5, %v1129_v3  ;;  %v1127_v5 = vmul.f32 %v975_v6, %v6073_v58  ;;  %v6091_v6 = vld [vmem:[%s7725_s9 + $0x20] sm:$0xff] }
 0x300   : > { %v1126_v31 = vmul.f32 %v5975_v4, %v6091_v6 }
 0x301   : > { %4767 = vmatpush.xpose.msk.msrb.mxu0 %vm1040_vm11, %v1210_v26  ;;  %v6083_v26 = vld [vmem:[%s7726_s10 + $0x20] sm:$0xff]  ;;  %v1208_v13 = vadd.f32 %v1200_v36, %v1127_v5 }
 0x302   : > { %v1199_v56 = vmul.f32 %v1183_v55, %v6083_v26 }
 0x304   : > { %v1657_v3 = vpop.f32.mrf.mxu3  ;;  %v1207_v36 = vadd.f32 %v1199_v56, %v1126_v31 }
 0x305   : > { %v6077_v45 = vadd.f32 %v5997_v21, %v1657_v3  ;;  %4768 = vmatpush.xpose.msk.msrb.mxu0 %vm1040_vm11, %v1209_v0  ;;  %v6099_v0 = vld [vmem:[%s7726_s10 + $0x18] sm:$0xff] }
 0x306   : > { %v1198_v55 = vmul.f32 %v1180_v54, %v6099_v0  ;;  %v6105_v3 = vld [vmem:[%s7725_s9 + $0x18] sm:$0xff] }
 0x307   : > { %4842 = vmatmul.msk.f32.gmra.mxu2 %vm1040_vm11, %v6077_v45  ;;  %v1125_v20 = vmul.f32 %v5969_v1, %v6105_v3  ;;  %v6124_v1 = vld [vmem:[%s7725_s9 + $0x10] sm:$0xff] }
 0x308   : > { %v1124_v31 = vmul.f32 %v5963_v62, %v6124_v1 }
 0x309   : > { %4769 = vmatpush.xpose.msk.msrb.mxu0 %vm1040_vm11, %v1208_v13  ;;  %v6116_v13 = vld [vmem:[%s7726_s10 + $0x10] sm:$0xff]  ;;  %v1206_v56 = vadd.f32 %v1198_v55, %v1125_v20  ;;  %v6138_v55 = vld [vmem:[%s7725_s9 + $0x8] sm:$0xff] }
 0x30a   : > { %v1197_v54 = vmul.f32 %v1177_v51, %v6116_v13  ;;  %v1123_v19 = vmul.f32 %v5956_v57, %v6138_v55  ;;  %v6157_v57 = vld [vmem:[%s7725_s9] sm:$0xff] }
 0x30c   : > { %v1660_v5 = vpop.f32.mrf.mxu3  ;;  %v1205_v51 = vadd.f32 %v1197_v54, %v1124_v31  ;;  %v1122_v31 = vmul.f32 %v5950_v48, %v6157_v57 }
 0x30d   : > { %v6110_v4 = vadd.f32 %v5997_v21, %v1660_v5  ;;  %4770 = vmatpush.xpose.msk.msrb.mxu0 %vm1040_vm11, %v1207_v36  ;;  %v6132_v36 = vld [vmem:[%s7726_s10 + $0x8] sm:$0xff] }
 0x30e   : > { %v1196_v20 = vmul.f32 %v1174_v50, %v6132_v36  ;;  %v1107_v48 = vmul.f32 %v5999_v23, %v6132_v36  ;;  %v1035_v23 = vmul.f32 %v5875_v12, %v6105_v3  ;;  %v1036_v12 = vmul.f32 %v5884_v16, %v6091_v6 }
 0x30f   : > { %4843 = vmatmul.msk.f32.gmra.mxu2 %vm1040_vm11, %v6110_v4  ;;  %v1112_v16 = vmul.f32 %v6035_v33, %v6054_v18 }
 0x310   : > { %v1204_v54 = vadd.f32 %v1196_v20, %v1123_v19  ;;  %v1032_v19 = vmul.f32 %v5844_v7, %v6157_v57  ;;  %v1108_v7 = vmul.f32 %v6008_v28, %v6116_v13  ;;  %v1110_v28 = vmul.f32 %v6031_v43, %v6083_v26 }
 0x311   : > { %4771 = vmatpush.xpose.msk.msrb.mxu0 %vm1040_vm11, %v1206_v56  ;;  %v6149_v56 = vld [vmem:[%s7726_s10] sm:$0xff]  ;;  %v1111_v43 = vmul.f32 %v6033_v44, %v6067_v41  ;;  %v1039_v44 = vmul.f32 %v5940_v15, %v6042_v59 }
 0x312   : > { %v1195_v50 = vmul.f32 %v1171_v46, %v6149_v56 }
 0x314   : > { %v1663_v5 = vpop.f32.mrf.mxu3 }
 0x315   : > { %v6143_v62 = vadd.f32 %v5997_v21, %v1663_v5  ;;  %4772 = vmatpush.xpose.msk.msrb.mxu0 %vm1040_vm11, %v1205_v51  ;;  %v1106_v51 = vmul.f32 %v5987_v17, %v6149_v56  ;;  %v1203_v5 = vadd.f32 %v1195_v50, %v1122_v31  ;;  %v1033_v17 = vmul.f32 %v5857_v10, %v6138_v55  ;;  %v4820_v10 = vld [vmem:[%s7771_s7 + $0x38] sm:$0xff] }
 0x317   : > { %4844 = vmatmul.msk.f32.gmra.mxu2 %vm1040_vm11, %v6143_v62  ;;  %v1114_v11 = vadd.f32 %v1106_v51, %v1032_v19  ;;  %v1115_v50 = vadd.f32 %v1107_v48, %v1033_v17  ;;  %v4817_v51 = vld [vmem:[%s7771_s7 + $0x20] sm:$0xff]  ;;  %v1037_v19 = vmul.f32 %v5902_v22, %v6073_v58  ;;  %v1038_v48 = vmul.f32 %v5915_v24, %v6060_v29  ;;  %v1858_v22 = vpop.f32.mrf.mxu2 }
 0x319   : > { %4773 = vmatpush.xpose.msk.msrb.mxu0 %vm1040_vm11, %v1204_v54  ;;  %v1120_v17 = vadd.f32 %v1112_v16, %v1038_v48 }
 0x31c   : > { %v1666_v46 = vpop.f32.mrf.mxu3 }
 0x31d   : > { %v1667_v20 = vadd.f32 %v5997_v21, %v1666_v46  ;;  %4774 = vmatpush.xpose.msk.msrb.mxu0 %vm1040_vm11, %v1203_v5  ;;  %v1034_v21 = vmul.f32 %v5866_v49, %v6124_v1  ;;  %v4819_v49 = vld [vmem:[%s7771_s7 + $0x30] sm:$0xff]  ;;  %v1118_v5 = vadd.f32 %v1110_v28, %v1036_v12  ;;  %v1119_v46 = vadd.f32 %v1111_v43, %v1037_v19 }
 0x31e   : > { %v1815_v43 = vmul.f32 %v6143_v62, %v6060_v29  ;;  %v1813_v62 = vmul.f32 %v6077_v45, %v6091_v6  ;;  %v1811_v45 = vmul.f32 %v6018_v32, %v6124_v1  ;;  %v1809_v32 = vmul.f32 %v6002_v25, %v6157_v57 }
 0x31f   : > { %4845 = vmatmul.msk.f32.gmra.mxu2 %vm1040_vm11, %v1667_v20  ;;  %v1116_v54 = vadd.f32 %v1108_v7, %v1034_v21  ;;  %v1861_v24 = vpop.f32.mrf.mxu2 }
 0x320   : > { %4775 = vmatmul.msk.f32.vlgmr.msrb.gmra.mxu0 %vm1040_vm11, %v1114_v11  ;;  %v1109_v11 = vmul.f32 %v6020_v34, %v6099_v0  ;;  %v4818_v34 = vld [vmem:[%s7771_s7 + $0x28] sm:$0xff] }
 0x321   : > { %1691 = vmatpush.msra.mxu0 %v4820_v10 }
 0x322   : > { %v1117_v31 = vadd.f32 %v1109_v11, %v1035_v23 }
 0x323   : > { %1692 = vmatpush.msra.mxu0 %v4819_v49  ;;  %v1816_v49 = vmul.f32 %v1667_v20, %v6042_v59  ;;  %v1814_v20 = vmul.f32 %v6110_v4, %v6073_v58  ;;  %v1812_v4 = vmul.f32 %v6027_v38, %v6105_v3  ;;  %v1810_v38 = vmul.f32 %v6011_v30, %v6138_v55 }
 0x325   : > { %1693 = vmatpush.msra.mxu0 %v4818_v34 }
 0x327   : > { %1694 = vmatpush.msra.mxu0 %v4817_v51  ;;  %v1864_v33 = vpop.f32.mrf.mxu2 }
 0x328   : > { %4776 = vmatmul.msk.f32.gmra.mxu0 %vm1040_vm11, %v1115_v50  ;;  %v1113_v50 = vmul.f32 %v6037_v42, %v6047_v61 }
 0x32a   : > { %v1121_v7 = vadd.f32 %v1113_v50, %v1039_v44 }
 0x32f   : > { %v1867_v15 = vpop.f32.mrf.mxu2 }
 0x330   : > { %4777 = vmatmul.msk.f32.gmra.mxu0 %vm1040_vm11, %v1116_v54 }
 0x338   : > { %4778 = vmatmul.msk.f32.gmra.mxu0 %vm1040_vm11, %v1117_v31 }
 0x340   : > { %4779 = vmatmul.msk.f32.gmra.mxu0 %vm1040_vm11, %v1118_v5 }
 0x348   : > { %4780 = vmatmul.msk.f32.gmra.mxu0 %vm1040_vm11, %v1119_v46 }
 0x350   : > { %4781 = vmatmul.msk.f32.gmra.mxu0 %vm1040_vm11, %v1120_v17 }
 0x358   : > { %4782 = vmatmul.msk.f32.gmra.mxu0 %vm1040_vm11, %v1121_v7 }
 0x360   : > { %4822 = vmatmul.msk.f32.vlgmr.msra.gmra.mxu0 %vm636_vm0, %v5728_v60 }
 0x368   : > { %4823 = vmatmul.msk.f32.gmra.mxu0 %vm636_vm0, %v5750_v14 }
 0x370   : > { %4824 = vmatmul.msk.f32.gmra.mxu0 %vm636_vm0, %v5765_v35 }
 0x378   : > { %4825 = vmatmul.msk.f32.gmra.mxu0 %vm636_vm0, %v5781_v39 }
 0x380   : > { %4826 = vmatmul.msk.f32.gmra.mxu0 %vm636_vm0, %v5770_v37 }
 0x388   : > { %4827 = vmatmul.msk.f32.gmra.mxu0 %vm636_vm0, %v5784_v40 }
 0x38a   : > { %v1870_v42 = vpop.f32.mrf.mxu2 }
 0x38b   : > { %v1886_v48 = vmul.f32 %v1870_v42, %v6083_v26  ;;  %v1884_v42 = vmul.f32 %v1864_v33, %v6116_v13  ;;  %v1882_v33 = vmul.f32 %v1858_v22, %v6149_v56 }
 0x390   : > { %4828 = vmatmul.msk.f32.gmra.mxu0 %vm636_vm0, %v5795_v47 }
 0x392   : > { %v1873_v21 = vpop.f32.mrf.mxu2 }
 0x393   : > { %v1887_v46 = vmul.f32 %v1873_v21, %v6067_v41  ;;  %v1885_v21 = vmul.f32 %v1867_v15, %v6099_v0 }
 0x395   : > { %v1895_v17 = vadd.f32 %v1887_v46, %v1814_v20 }
 0x398   : > { %4829 = vmatmul.msk.f32.gmra.mxu0 %vm636_vm0, %v5850_v9 }
 0x39a   : > { %v1876_v54 = vpop.f32.mrf.mxu2 }
 0x39b   : > { %v1888_v34 = vmul.f32 %v1876_v54, %v6054_v18  ;;  %v1894_v54 = vadd.f32 %v1886_v48, %v1813_v62 }
 0x39d   : > { %v1276_v11 = vpop.f32.mrf.mxu0  ;;  %v1896_v16 = vadd.f32 %v1888_v34, %v1815_v43  ;;  %v1890_v43 = vadd.f32 %v1882_v33, %v1809_v32 }
 0x39e   : > { %v6233_v23 = vmul.f32 0.35355338, %v1276_v11  ;;  %v1893_v11 = vadd.f32 %v1885_v21, %v1812_v4 }
 0x3a0   : > { %v1309_v31 = vsel %vm1308_vm12, %v6233_v23, -inf }
 0x3a1   : > { %1310 = vmax.xlane.f32.xlu1 %v1309_v31 }
 0x3a2   : > { %v1879_v10 = vpop.f32.mrf.mxu2 }
 0x3a3   : > { %v1889_v28 = vmul.f32 %v1879_v10, %v6047_v61 }
 0x3a5   : > { %v1897_v12 = vadd.f32 %v1889_v28, %v1816_v49  ;;  %v1279_v51 = vpop.f32.mrf.mxu0  ;;  %v1883_v49 = vmul.f32 %v1861_v24, %v6132_v36  ;;  %v1892_v28 = vadd.f32 %v1884_v42, %v1811_v45 }
 0x3a6   : > { %v6240_v5 = vmul.f32 0.35355338, %v1279_v51 }
 0x3a7   : > { %4846 = vmatpush.xpose.msk.msrb.mxu3 %vm1040_vm11, %v1897_v12  ;;  %v1891_v34 = vadd.f32 %v1883_v49, %v1810_v38 }
 0x3a8   : > { %v1312_v19 = vsel %vm1308_vm12, %v6240_v5, -inf }
 0x3a9   : > { %1313 = vmax.xlane.f32.xlu2 %v1312_v19 }
 0x3ab   : > { %4847 = vmatpush.xpose.msk.msrb.mxu3 %vm1040_vm11, %v1896_v16 }
 0x3ad   : > { %v1282_v50 = vpop.f32.mrf.mxu0 }
 0x3ae   : > { %v6252_v44 = vmul.f32 0.35355338, %v1282_v50 }
 0x3af   : > { %4848 = vmatpush.xpose.msk.msrb.mxu3 %vm1040_vm11, %v1895_v17 }
 0x3b0   : > { %v1315_v7 = vsel %vm1308_vm12, %v6252_v44, -inf }
 0x3b1   : > { %1316 = vmax.xlane.f32.xlu0 %v1315_v7 }
 0x3b3   : > { %4849 = vmatpush.xpose.msk.msrb.mxu3 %vm1040_vm11, %v1894_v54 }
 0x3b5   : > { %v1285_v31 = vpop.f32.mrf.mxu0 }
 0x3b6   : > { %v6264_v10 = vmul.f32 0.35355338, %v1285_v31 }
 0x3b7   : > { %4850 = vmatpush.xpose.msk.msrb.mxu3 %vm1040_vm11, %v1893_v11  ;;  %v5151_v11 = vld [vmem:[%s7778_s8 + $0x1] ss:$0 sm:$0xff] }
 0x3b8   : > { %v1318_v15 = vsel %vm1308_vm12, %v6264_v10, -inf }
 0x3b9   : > { %1319 = vmax.xlane.f32.xlu1 %v1318_v15 }
 0x3bb   : > { %4851 = vmatpush.xpose.msk.msrb.mxu3 %vm1040_vm11, %v1892_v28 }
 0x3bd   : > { %v1288_v12 = vpop.f32.mrf.mxu0 }
 0x3be   : > { %v6276_v51 = vmul.f32 0.35355338, %v1288_v12 }
 0x3bf   : > { %4852 = vmatpush.xpose.msk.msrb.mxu3 %vm1040_vm11, %v1891_v34 }
 0x3c0   : > { %v1321_v24 = vsel %vm1308_vm12, %v6276_v51, -inf }
 0x3c1   : > { %1322 = vmax.xlane.f32.xlu2 %v1321_v24 }
 0x3c3   : > { %4853 = vmatpush.xpose.msk.msrb.mxu3 %vm1040_vm11, %v1890_v43 }
 0x3c5   : > { %v1291_v30 = vpop.f32.mrf.mxu0 }
 0x3c6   : > { %v6284_v19 = vmul.f32 0.35355338, %v1291_v30 }
 0x3c8   : > { %v1324_v22 = vsel %vm1308_vm12, %v6284_v19, -inf }
 0x3c9   : > { %1325 = vmax.xlane.f32.xlu0 %v1324_v22 }
 0x3cd   : > { %v1294_v46 = vpop.f32.mrf.mxu0 }
 0x3ce   : > { %v6288_v16 = vmul.f32 0.35355338, %v1294_v46 }
 0x3d0   : > { %v1327_v25 = vsel %vm1308_vm12, %v6288_v16, -inf }
 0x3d1   : > { %1328 = vmax.xlane.f32.xlu1 %v1327_v25 }
 0x3d5   : > { %v1297_v20 = vpop.f32.mrf.mxu0 }
 0x3d6   : > { %v6292_v48 = vmul.f32 0.35355338, %v1297_v20 }
 0x3d8   : > { %v1330_v17 = vsel %vm1308_vm12, %v6292_v48, -inf }
 0x3d9   : > { %1331 = vmax.xlane.f32.xlu0 %v1330_v17 }
 0x3dd   : > { %v1696_v50 = vpop.f32.mrf.mxu0 }
 0x3de   : > { %v1697_v25 = vadd.f32 %v5151_v11, %v1696_v50 }
 0x3e5   : > { %v1699_v62 = vpop.f32.mrf.mxu0 }
 0x3e6   : > { %v1700_v46 = vadd.f32 %v5151_v11, %v1699_v62 }
 0x3ed   : > { %v1702_v7 = vpop.f32.mrf.mxu0 }
 0x3ee   : > { %v1703_v22 = vadd.f32 %v5151_v11, %v1702_v7 }
 0x3f5   : > { %v1705_v21 = vpop.f32.mrf.mxu0 }
 0x3f6   : > { %v1706_v24 = vadd.f32 %v5151_v11, %v1705_v21 }
 0x3fd   : > { %v1708_v54 = vpop.f32.mrf.mxu0 }
 0x3fe   : > { %v1709_v34 = vadd.f32 %v5151_v11, %v1708_v54 }
 0x405   : > { %v1711_v4 = vpop.f32.mrf.mxu0 }
 0x406   : > { %v1712_v33 = vadd.f32 %v5151_v11, %v1711_v4 }
 0x40d   : > { %v1714_v42 = vpop.f32.mrf.mxu0 }
 0x40e   : > { %v1715_v38 = vadd.f32 %v5151_v11, %v1714_v42 }
 0x414   : > { %v1311_v31 = vpop.xlane.xlu1 %1310 }
 0x415   : > { %v1333_v45 = vsub.f32 %v6233_v23, %v1311_v31  ;;  %v1717_v15 = vpop.f32.mrf.mxu0 }
 0x416   : > { %v1718_v49 = vadd.f32 %v5151_v11, %v1717_v15 }
 0x417   : > { %v1341_v28 = vmul.f32 1.442695, %v1333_v45 }
 0x418   : > { %2219 = vmatpush.msrb.mxu0 %v1718_v49 }
 0x419   : > { %5181 = vpow2.f32 %v1341_v28 }
 0x41a   : > { %2220 = vmatpush.msrb.mxu0 %v1715_v38 }
 0x41c   : > { %v1314_v12 = vpop.xlane.xlu2 %1313  ;;  %2221 = vmatpush.msrb.mxu0 %v1712_v33 }
 0x41d   : > { %v1334_v32 = vsub.f32 %v6240_v5, %v1314_v12 }
 0x41e   : > { %2222 = vmatpush.msrb.mxu0 %v1709_v34 }
 0x41f   : > { %v6301_v43 = vpop.eup %5181  ;;  %v1343_v30 = vmul.f32 1.442695, %v1334_v32 }
 0x420   : > { %2223 = vmatpush.msrb.mxu0 %v1706_v24  ;;  %v1357_v23 = vsel %vm1308_vm12, %v6301_v43, 0.0 }
 0x421   : > { %5183 = vpow2.f32 %v1343_v30  ;;  %1358 = vadd.xlane.f32.xlu2 %v1357_v23 }
 0x422   : > { %2224 = vmatpush.msrb.mxu0 %v1703_v22 }
 0x424   : > { %v1317_v20 = vpop.xlane.xlu0 %1316  ;;  %2225 = vmatpush.msrb.mxu0 %v1700_v46 }
 0x425   : > { %v1335_v17 = vsub.f32 %v6252_v44, %v1317_v20 }
 0x426   : > { %2226 = vmatpush.msrb.mxu0 %v1697_v25 }
 0x427   : > { %v6306_v5 = vpop.eup %5183  ;;  %v1345_v21 = vmul.f32 1.442695, %v1335_v17 }
 0x428   : > { %v1360_v7 = vsel %vm1308_vm12, %v6306_v5, 0.0 }
 0x429   : > { %5185 = vpow2.f32 %v1345_v21  ;;  %1361 = vadd.xlane.f32.xlu1 %v1360_v7 }
 0x42c   : > { %v1320_v54 = vpop.xlane.xlu1 %1319 }
 0x42d   : > { %v1336_v4 = vsub.f32 %v6264_v10, %v1320_v54 }
 0x42f   : > { %v6311_v42 = vpop.eup %5185  ;;  %v1347_v62 = vmul.f32 1.442695, %v1336_v4 }
 0x430   : > { %v1363_v50 = vsel %vm1308_vm12, %v6311_v42, 0.0 }
 0x431   : > { %5187 = vpow2.f32 %v1347_v62  ;;  %1364 = vadd.xlane.f32.xlu2 %v1363_v50 }
 0x434   : > { %v1323_v44 = vpop.xlane.xlu2 %1322 }
 0x435   : > { %v1337_v11 = vsub.f32 %v6276_v51, %v1323_v44 }
 0x437   : > { %v6316_v31 = vpop.eup %5187  ;;  %v1349_v45 = vmul.f32 1.442695, %v1337_v11 }
 0x438   : > { %v1366_v15 = vsel %vm1308_vm12, %v6316_v31, 0.0 }
 0x439   : > { %5189 = vpow2.f32 %v1349_v45  ;;  %1367 = vadd.xlane.f32.xlu0 %v1366_v15 }
 0x43c   : > { %v1326_v10 = vpop.xlane.xlu0 %1325 }
 0x43d   : > { %v1338_v49 = vsub.f32 %v6284_v19, %v1326_v10 }
 0x43f   : > { %v6321_v28 = vpop.eup %5189  ;;  %v1351_v38 = vmul.f32 1.442695, %v1338_v49 }
 0x440   : > { %v1369_v33 = vsel %vm1308_vm12, %v6321_v28, 0.0 }
 0x441   : > { %5191 = vpow2.f32 %v1351_v38  ;;  %1370 = vadd.xlane.f32.xlu1 %v1369_v33 }
 0x444   : > { %v1329_v51 = vpop.xlane.xlu1 %1328 }
 0x445   : > { %v1339_v34 = vsub.f32 %v6288_v16, %v1329_v51 }
 0x447   : > { %v6326_v12 = vpop.eup %5191  ;;  %v1353_v32 = vmul.f32 1.442695, %v1339_v34 }
 0x448   : > { %v1372_v24 = vsel %vm1308_vm12, %v6326_v12, 0.0 }
 0x449   : > { %5193 = vpow2.f32 %v1353_v32  ;;  %1373 = vadd.xlane.f32.xlu2 %v1372_v24 }
 0x44c   : > { %v1332_v19 = vpop.xlane.xlu0 %1331 }
 0x44d   : > { %v1340_v30 = vsub.f32 %v6292_v48, %v1332_v19 }
 0x44f   : > { %v6331_v22 = vpop.eup %5193  ;;  %v1355_v23 = vmul.f32 1.442695, %v1340_v30 }
 0x450   : > { %v1375_v46 = vsel %vm1308_vm12, %v6331_v22, 0.0 }
 0x451   : > { %5195 = vpow2.f32 %v1355_v23  ;;  %1376 = vadd.xlane.f32.xlu0 %v1375_v46 }
 0x457   : > { %v6335_v16 = vpop.eup %5195 }
 0x458   : > { %v1378_v25 = vsel %vm1308_vm12, %v6335_v16, 0.0 }
 0x459   : > { %1379 = vadd.xlane.f32.xlu1 %v1378_v25 }
 0x494   : > { %v1359_v20 = vpop.xlane.xlu2 %1358 }
 0x495   : > { %5197 = vrcp.f32 %v1359_v20  ;;  %v1392_v54 = vand.u32 2147483648, %v1359_v20  ;;  %v1390_v62 = vand.u32 2147483647, %v1359_v20  ;;  %vm1386_vm14 = vweird.f32 %v1359_v20 }
 0x497   : > { %v1393_v11 = vor.u32 1.1754944e-38, %v1392_v54  ;;  %vm1391_vm1 = vcmp.eq.f32.partialorder %v1390_v62, 8.507059e+37 }
 0x49b   : > { %v5198_v17 = vpop.eup %5197 }
 0x49c   : > { %v1382_v21 = vmul.f32 %v5198_v17, %v1359_v20  ;;  %v1362_v7 = vpop.xlane.xlu1 %1361  ;;  %vm1387_vm13 = vweird.f32 %v5198_v17 }
 0x49d   : > { %5199 = vrcp.f32 %v1362_v7  ;;  %vm1388_vm15 = vmor %vm1386_vm14, %vm1387_vm13  ;;  %v1407_v51 = vand.u32 2147483648, %v1362_v7  ;;  %v1405_v32 = vand.u32 2147483647, %v1362_v7  ;;  %vm1401_vm3 = vweird.f32 %v1362_v7 }
 0x49e   : > { %v1383_v48 = vsub.f32 1.0, %v1382_v21 }
 0x49f   : > { %v1408_v30 = vor.u32 1.1754944e-38, %v1407_v51  ;;  %vm1406_vm5 = vcmp.eq.f32.partialorder %v1405_v32, 8.507059e+37 }
 0x4a0   : > { %v1384_v4 = vmul.f32 %v5198_v17, %v1383_v48 }
 0x4a2   : > { %v1385_v50 = vadd.f32 %v5198_v17, %v1384_v4 }
 0x4a3   : > { %v5200_v44 = vpop.eup %5199 }
 0x4a4   : > { %v1389_v45 = vsel %vm1388_vm15, %v5198_v17, %v1385_v50  ;;  %v1397_v15 = vmul.f32 %v5200_v44, %v1362_v7  ;;  %v1365_v10 = vpop.xlane.xlu2 %1364  ;;  %vm1402_vm2 = vweird.f32 %v5200_v44 }
 0x4a5   : > { %v1394_v49 = vsel %vm1391_vm1, %v1393_v11, %v1389_v45  ;;  %5201 = vrcp.f32 %v1365_v10  ;;  %vm1403_vm4 = vmor %vm1401_vm3, %vm1402_vm2  ;;  %v1422_v21 = vand.u32 2147483648, %v1365_v10  ;;  %v1420_v54 = vand.u32 2147483647, %v1365_v10 }
 0x4a6   : > { %v1398_v38 = vsub.f32 1.0, %v1397_v15  ;;  %v1395_v33 = vmul.f32 %v6301_v43, %v1394_v49  ;;  %vm1416_vm7 = vweird.f32 %v1365_v10 }
 0x4a7   : > { %v1423_v62 = vor.u32 1.1754944e-38, %v1422_v21  ;;  %vm1421_vm9 = vcmp.eq.f32.partialorder %v1420_v54, 8.507059e+37 }
 0x4a8   : > { %v1399_v34 = vmul.f32 %v5200_v44, %v1398_v38  ;;  %4783 = vmatmul.msk.f32.vlgmr.msra.gmra.mxu1 %vm1308_vm12, %v1395_v33 }
 0x4aa   : > { %v1400_v24 = vadd.f32 %v5200_v44, %v1399_v34 }
 0x4ab   : > { %v5202_v19 = vpop.eup %5201 }
 0x4ac   : > { %v1412_v23 = vmul.f32 %v5202_v19, %v1365_v10  ;;  %v1368_v46 = vpop.xlane.xlu0 %1367  ;;  %v1404_v25 = vsel %vm1403_vm4, %v5200_v44, %v1400_v24  ;;  %vm1417_vm6 = vweird.f32 %v5202_v19 }
 0x4ad   : > { %5203 = vrcp.f32 %v1368_v46  ;;  %v1409_v20 = vsel %vm1406_vm5, %v1408_v30, %v1404_v25  ;;  %vm1418_vm8 = vmor %vm1416_vm7, %vm1417_vm6  ;;  %v1437_v49 = vand.u32 2147483648, %v1368_v46  ;;  %v1435_v33 = vand.u32 2147483647, %v1368_v46 }
 0x4ae   : > { %v1413_v17 = vsub.f32 1.0, %v1412_v23  ;;  %v1410_v43 = vmul.f32 %v6306_v5, %v1409_v20  ;;  %vm1431_vm13 = vweird.f32 %v1368_v46 }
 0x4af   : > { %v1438_v34 = vor.u32 1.1754944e-38, %v1437_v49  ;;  %vm1436_vm15 = vcmp.eq.f32.partialorder %v1435_v33, 8.507059e+37 }
 0x4b0   : > { %v1414_v48 = vmul.f32 %v5202_v19, %v1413_v17  ;;  %4784 = vmatmul.msk.f32.gmra.mxu1 %vm1308_vm12, %v1410_v43 }
 0x4b2   : > { %v1415_v7 = vadd.f32 %v5202_v19, %v1414_v48 }
 0x4b3   : > { %v5204_v4 = vpop.eup %5203 }
 0x4b4   : > { %v1427_v50 = vmul.f32 %v5204_v4, %v1368_v46  ;;  %v1371_v11 = vpop.xlane.xlu1 %1370  ;;  %v1419_v44 = vsel %vm1418_vm8, %v5202_v19, %v1415_v7  ;;  %vm1432_vm10 = vweird.f32 %v5204_v4 }
 0x4b5   : > { %5205 = vrcp.f32 %v1371_v11  ;;  %v1424_v45 = vsel %vm1421_vm9, %v1423_v62, %v1419_v44  ;;  %vm1433_vm14 = vmor %vm1431_vm13, %vm1432_vm10  ;;  %v1452_v25 = vand.u32 2147483648, %v1371_v11  ;;  %v1450_v17 = vand.u32 2147483647, %v1371_v11 }
 0x4b6   : > { %v1428_v15 = vsub.f32 1.0, %v1427_v50  ;;  %v1425_v5 = vmul.f32 %v6311_v42, %v1424_v45  ;;  %vm1446_vm2 = vweird.f32 %v1371_v11 }
 0x4b7   : > { %v1453_v21 = vor.u32 1.1754944e-38, %v1452_v25  ;;  %vm1451_vm4 = vcmp.eq.f32.partialorder %v1450_v17, 8.507059e+37 }
 0x4b8   : > { %v1429_v38 = vmul.f32 %v5204_v4, %v1428_v15  ;;  %4785 = vmatmul.msk.f32.gmra.mxu1 %vm1308_vm12, %v1425_v5 }
 0x4ba   : > { %v1430_v10 = vadd.f32 %v5204_v4, %v1429_v38 }
 0x4bb   : > { %v5206_v51 = vpop.eup %5205 }
 0x4bc   : > { %v1442_v32 = vmul.f32 %v5206_v51, %v1371_v11  ;;  %v1374_v24 = vpop.xlane.xlu2 %1373  ;;  %v1434_v19 = vsel %vm1433_vm14, %v5204_v4, %v1430_v10  ;;  %vm1447_vm1 = vweird.f32 %v5206_v51 }
 0x4bd   : > { %5207 = vrcp.f32 %v1374_v24  ;;  %v1439_v30 = vsel %vm1436_vm15, %v1438_v34, %v1434_v19  ;;  %vm1448_vm3 = vmor %vm1446_vm2, %vm1447_vm1  ;;  %v1467_v50 = vand.u32 2147483648, %v1374_v24  ;;  %v1465_v45 = vand.u32 2147483647, %v1374_v24 }
 0x4be   : > { %v1443_v23 = vsub.f32 1.0, %v1442_v32  ;;  %v1440_v42 = vmul.f32 %v6316_v31, %v1439_v30  ;;  %vm1461_vm6 = vweird.f32 %v1374_v24 }
 0x4bf   : > { %v1468_v5 = vor.u32 1.1754944e-38, %v1467_v50  ;;  %vm1466_vm8 = vcmp.eq.f32.partialorder %v1465_v45, 8.507059e+37  ;;  %v1566_v45 = vld [vmem:[%s7728_s12] sm:$0xff] }
 0x4c0   : > { %v1444_v20 = vmul.f32 %v5206_v51, %v1443_v23  ;;  %4786 = vmatmul.msk.f32.gmra.mxu1 %vm1308_vm12, %v1440_v42  ;;  %2358 = vmatpush.msra.mxu2 %v1566_v45 }
 0x4c2   : > { %v1445_v46 = vadd.f32 %v5206_v51, %v1444_v20 }
 0x4c3   : > { %v5208_v43 = vpop.eup %5207 }
 0x4c4   : > { %v1457_v48 = vmul.f32 %v5208_v43, %v1374_v24  ;;  %v1377_v54 = vpop.xlane.xlu0 %1376  ;;  %v1449_v7 = vsel %vm1448_vm3, %v5206_v51, %v1445_v46  ;;  %vm1462_vm5 = vweird.f32 %v5208_v43 }
 0x4c5   : > { %5209 = vrcp.f32 %v1377_v54  ;;  %v1454_v4 = vsel %vm1451_vm4, %v1453_v21, %v1449_v7  ;;  %vm1463_vm7 = vmor %vm1461_vm6, %vm1462_vm5  ;;  %v1482_v34 = vand.u32 2147483648, %v1377_v54  ;;  %v1480_v19 = vand.u32 2147483647, %v1377_v54 }
 0x4c6   : > { %v1458_v62 = vsub.f32 1.0, %v1457_v48  ;;  %v1455_v31 = vmul.f32 %v6321_v28, %v1454_v4  ;;  %vm1476_vm10 = vweird.f32 %v1377_v54 }
 0x4c7   : > { %v1483_v23 = vor.u32 1.1754944e-38, %v1482_v34  ;;  %vm1481_vm14 = vcmp.eq.f32.partialorder %v1480_v19, 8.507059e+37 }
 0x4c8   : > { %v1459_v44 = vmul.f32 %v5208_v43, %v1458_v62  ;;  %4787 = vmatmul.msk.f32.gmra.mxu1 %vm1308_vm12, %v1455_v31 }
 0x4ca   : > { %v1460_v11 = vadd.f32 %v5208_v43, %v1459_v44 }
 0x4cb   : > { %v5210_v15 = vpop.eup %5209 }
 0x4cc   : > { %v1472_v49 = vmul.f32 %v5210_v15, %v1377_v54  ;;  %v1380_v38 = vpop.xlane.xlu1 %1379  ;;  %v1464_v33 = vsel %vm1463_vm7, %v5208_v43, %v1460_v11  ;;  %vm1477_vm9 = vweird.f32 %v5210_v15 }
 0x4cd   : > { %5211 = vrcp.f32 %v1380_v38  ;;  %v1469_v10 = vsel %vm1466_vm8, %v1468_v5, %v1464_v33  ;;  %vm1478_vm13 = vmor %vm1476_vm10, %vm1477_vm9  ;;  %v1497_v43 = vand.u32 2147483648, %v1380_v38  ;;  %v1495_v21 = vand.u32 2147483647, %v1380_v38 }
 0x4ce   : > { %v1473_v51 = vsub.f32 1.0, %v1472_v49  ;;  %v1470_v28 = vmul.f32 %v6326_v12, %v1469_v10  ;;  %vm1491_vm1 = vweird.f32 %v1380_v38 }
 0x4cf   : > { %v1498_v54 = vor.u32 1.1754944e-38, %v1497_v43  ;;  %vm1496_vm3 = vcmp.eq.f32.partialorder %v1495_v21, 8.507059e+37 }
 0x4d0   : > { %v1474_v32 = vmul.f32 %v5210_v15, %v1473_v51  ;;  %4788 = vmatmul.msk.f32.gmra.mxu1 %vm1308_vm12, %v1470_v28 }
 0x4d2   : > { %v1475_v24 = vadd.f32 %v5210_v15, %v1474_v32 }
 0x4d3   : > { %v5212_v30 = vpop.eup %5211 }
 0x4d4   : > { %v1487_v42 = vmul.f32 %v5212_v30, %v1380_v38  ;;  %v1479_v25 = vsel %vm1478_vm13, %v5210_v15, %v1475_v24  ;;  %vm1492_vm15 = vweird.f32 %v5212_v30  ;;  %v7783_v15 = vld [vmem:[#allocation13_spill] sm:$0xff] }
 0x4d5   : > { %v1484_v20 = vsel %vm1481_vm14, %v1483_v23, %v1479_v25  ;;  %vm1493_vm2 = vmor %vm1491_vm1, %vm1492_vm15 }
 0x4d6   : > { %v1488_v17 = vsub.f32 1.0, %v1487_v42  ;;  %v1485_v46 = vmul.f32 %v6331_v22, %v1484_v20  ;;  %v5149_v22 = vld [vmem:[%s7777_s28 + $0x1] ss:$0 sm:$0xff] }
 0x4d7   : > { %v1595_v31 = vadd.f32 %v5149_v22, %v5954_v52  ;;  %v1598_v50 = vadd.f32 %v5149_v22, %v5960_v27  ;;  %v1601_v44 = vadd.f32 %v5149_v22, %v5967_v63  ;;  %v1607_v52 = vadd.f32 %v5149_v22, %v5979_v53  ;;  %v6373_v27 = vld [vmem:[%s7727_s11] sm:$0xff] }
 0x4d8   : > { %v1489_v12 = vmul.f32 %v5212_v30, %v1488_v17  ;;  %4789 = vmatmul.msk.f32.gmra.mxu1 %vm1308_vm12, %v1485_v46  ;;  %2584 = vmatpush.msrb.mxu2 %v6373_v27  ;;  %v1610_v63 = vadd.f32 %v5149_v22, %v5982_v8  ;;  %v6382_v53 = vadd.f32 %v5149_v22, %v7783_v15 }
 0x4d9   : > { %v1720_v32 = vmul.f32 %v1595_v31, %v6157_v57  ;;  %v1721_v23 = vmul.f32 %v1598_v50, %v6138_v55  ;;  %v1722_v17 = vmul.f32 %v1601_v44, %v6124_v1  ;;  %v4889_v1 = vld [vmem:[%s7770_s21 + $0x50] sm:$0xff] }
 0x4da   : > { %v1490_v48 = vadd.f32 %v5212_v30, %v1489_v12 }
 0x4dc   : > { %v1494_v7 = vsel %vm1493_vm2, %v5212_v30, %v1490_v48 }
 0x4dd   : > { %v1499_v4 = vsel %vm1496_vm3, %v1498_v54, %v1494_v7  ;;  %v4887_v54 = vld [vmem:[%s7770_s21 + $0x40] sm:$0xff] }
 0x4de   : > { %v1500_v62 = vmul.f32 %v6335_v16, %v1499_v4  ;;  %v1604_v16 = vadd.f32 %v5149_v22, %v5973_v2  ;;  %v7782_v2 = vld [vmem:[#allocation12_spill] sm:$0xff]  ;;  %v1725_v4 = vmul.f32 %v1610_v63, %v6073_v58 }
 0x4df   : > { %v1613_v11 = vadd.f32 %v5149_v22, %v7782_v2 }
 0x4e0   : > { %4790 = vmatmul.msk.f32.gmra.mxu1 %vm1308_vm12, %v1500_v62  ;;  %v1723_v57 = vmul.f32 %v1604_v16, %v6105_v3 }
 0x4e8   : > { %4830 = vmatmul.msk.f32.vlgmr.msrb.gmra.mxu1 %vm1040_vm11, %v1595_v31 }
 0x4f0   : > { %4831 = vmatmul.msk.f32.gmra.mxu1 %vm1040_vm11, %v1598_v50 }
 0x4f8   : > { %4832 = vmatmul.msk.f32.gmra.mxu1 %vm1040_vm11, %v1601_v44 }
 0x500   : > { %4833 = vmatmul.msk.f32.gmra.mxu1 %vm1040_vm11, %v1604_v16  ;;  %v1727_v16 = vmul.f32 %v6382_v53, %v6042_v59 }
 0x508   : > { %4834 = vmatmul.msk.f32.gmra.mxu1 %vm1040_vm11, %v1607_v52 }
 0x510   : > { %4835 = vmatmul.msk.f32.gmra.mxu1 %vm1040_vm11, %v1610_v63 }
 0x518   : > { %4836 = vmatmul.msk.f32.gmra.mxu1 %vm1040_vm11, %v1613_v11 }
 0x520   : > { %4837 = vmatmul.msk.f32.gmra.mxu1 %vm1040_vm11, %v6382_v53 }
 0x525   : > { %v1542_v5 = vpop.f32.mrf.mxu1 }
 0x526   : > { %4879 = vmatmul.msk.f32.vlgmr.msra.gmra.mxu2 %vm1040_vm11, %v1542_v5 }
 0x52d   : > { %v1545_v49 = vpop.f32.mrf.mxu1 }
 0x52e   : > { %4880 = vmatmul.msk.f32.gmra.mxu2 %vm1040_vm11, %v1545_v49 }
 0x535   : > { %v1548_v38 = vpop.f32.mrf.mxu1 }
 0x536   : > { %4881 = vmatmul.msk.f32.gmra.mxu2 %vm1040_vm11, %v1548_v38 }
 0x53d   : > { %v1551_v8 = vpop.f32.mrf.mxu1 }
 0x53e   : > { %4882 = vmatmul.msk.f32.gmra.mxu2 %vm1040_vm11, %v1551_v8 }
 0x545   : > { %v1554_v33 = vpop.f32.mrf.mxu1 }
 0x546   : > { %4883 = vmatmul.msk.f32.gmra.mxu2 %vm1040_vm11, %v1554_v33 }
 0x54d   : > { %v1557_v10 = vpop.f32.mrf.mxu1 }
 0x54e   : > { %4884 = vmatmul.msk.f32.gmra.mxu2 %vm1040_vm11, %v1557_v10 }
 0x555   : > { %v1560_v51 = vpop.f32.mrf.mxu1 }
 0x556   : > { %4885 = vmatmul.msk.f32.gmra.mxu2 %vm1040_vm11, %v1560_v51 }
 0x55d   : > { %v1563_v28 = vpop.f32.mrf.mxu1 }
 0x55e   : > { %4886 = vmatmul.msk.f32.gmra.mxu2 %vm1040_vm11, %v1563_v28 }
 0x565   : > { %v1769_v34 = vpop.f32.mrf.mxu1 }
 0x566   : > { %v1793_v19 = vmul.f32 %v1769_v34, %v6149_v56 }
 0x568   : > { %v1801_v24 = vadd.f32 %v1793_v19, %v1720_v32 }
 0x56a   : > { %4854 = vmatmul.msk.f32.vlgmr.msrb.gmra.mxu3 %vm1040_vm11, %v1801_v24 }
 0x56d   : > { %v1772_v30 = vpop.f32.mrf.mxu1 }
 0x56e   : > { %v1794_v42 = vmul.f32 %v1772_v30, %v6132_v36  ;;  %v4890_v36 = vld [vmem:[%s7770_s21 + $0x58] sm:$0xff] }
 0x56f   : > { %2406 = vmatpush.msra.mxu3 %v4890_v36 }
 0x570   : > { %v1802_v25 = vadd.f32 %v1794_v42, %v1721_v23  ;;  %v5152_v23 = vld [vmem:[%s7777_s28 + $0x2] ss:$0 sm:$0xff] }
 0x571   : > { %2407 = vmatpush.msra.mxu3 %v4889_v1 }
 0x572   : > { %4855 = vmatmul.msk.f32.gmra.mxu3 %vm1040_vm11, %v1802_v25 }
 0x575   : > { %v1775_v20 = vpop.f32.mrf.mxu1 }
 0x576   : > { %v1795_v46 = vmul.f32 %v1775_v20, %v6116_v13  ;;  %v4888_v13 = vld [vmem:[%s7770_s21 + $0x48] sm:$0xff] }
 0x577   : > { %2408 = vmatpush.msra.mxu3 %v4888_v13 }
 0x578   : > { %v1803_v43 = vadd.f32 %v1795_v46, %v1722_v17 }
 0x579   : > { %2409 = vmatpush.msra.mxu3 %v4887_v54 }
 0x57a   : > { %4856 = vmatmul.msk.f32.gmra.mxu3 %vm1040_vm11, %v1803_v43 }
 0x57b   : > { %2673 = vmatpush.msrb.mxu3 %v6373_v27 }
 0x57d   : > { %v1778_v56 = vpop.f32.mrf.mxu1 }
 0x57e   : > { %v1796_v12 = vmul.f32 %v1778_v56, %v6099_v0  ;;  %v1724_v0 = vmul.f32 %v1607_v52, %v6091_v6  ;;  %v1726_v6 = vmul.f32 %v1613_v11, %v6060_v29 }
 0x580   : > { %v1804_v21 = vadd.f32 %v1796_v12, %v1723_v57 }
 0x582   : > { %4857 = vmatmul.msk.f32.gmra.mxu3 %vm1040_vm11, %v1804_v21 }
 0x585   : > { %v1781_v55 = vpop.f32.mrf.mxu1 }
 0x586   : > { %v1797_v3 = vmul.f32 %v1781_v55, %v6083_v26 }
 0x588   : > { %v1805_v48 = vadd.f32 %v1797_v3, %v1724_v0 }
 0x58a   : > { %4858 = vmatmul.msk.f32.gmra.mxu3 %vm1040_vm11, %v1805_v48 }
 0x58d   : > { %v1784_v7 = vpop.f32.mrf.mxu1 }
 0x58e   : > { %v1798_v62 = vmul.f32 %v1784_v7, %v6067_v41 }
 0x590   : > { %v1806_v22 = vadd.f32 %v1798_v62, %v1725_v4 }
 0x592   : > { %4859 = vmatmul.msk.f32.gmra.mxu3 %vm1040_vm11, %v1806_v22 }
 0x595   : > { %v1787_v26 = vpop.f32.mrf.mxu1 }
 0x596   : > { %v1799_v31 = vmul.f32 %v1787_v26, %v6054_v18 }
 0x598   : > { %v1807_v50 = vadd.f32 %v1799_v31, %v1726_v6 }
 0x59a   : > { %4860 = vmatmul.msk.f32.gmra.mxu3 %vm1040_vm11, %v1807_v50 }
 0x59d   : > { %v1790_v44 = vpop.f32.mrf.mxu1 }
 0x59e   : > { %v1800_v45 = vmul.f32 %v1790_v44, %v6047_v61 }
 0x5a0   : > { %v1808_v58 = vadd.f32 %v1800_v45, %v1727_v16 }
 0x5a2   : > { %4861 = vmatmul.msk.f32.gmra.mxu3 %vm1040_vm11, %v1808_v58 }
 0x5aa   : > { %4892 = vmatmul.msk.f32.vlgmr.msra.gmra.mxu3 %vm636_vm0, %v5728_v60 }
 0x5b2   : > { %4893 = vmatmul.msk.f32.gmra.mxu3 %vm636_vm0, %v5750_v14 }
 0x5ba   : > { %4894 = vmatmul.msk.f32.gmra.mxu3 %vm636_vm0, %v5765_v35 }
 0x5c2   : > { %4895 = vmatmul.msk.f32.gmra.mxu3 %vm636_vm0, %v5781_v39 }
 0x5ca   : > { %4896 = vmatmul.msk.f32.gmra.mxu3 %vm636_vm0, %v5770_v37 }
 0x5d2   : > { %4897 = vmatmul.msk.f32.gmra.mxu3 %vm636_vm0, %v5784_v40 }
 0x5da   : > { %4898 = vmatmul.msk.f32.gmra.mxu3 %vm636_vm0, %v5795_v47 }
 0x5e2   : > { %4899 = vmatmul.msk.f32.gmra.mxu3 %vm636_vm0, %v5850_v9 }
 0x5ed   : > { %v1963_v59 = vpop.f32.mrf.mxu3 }
 0x5ee   : > { %v1987_v61 = vmul.f32 0.35355338, %v1963_v59 }
 0x5f0   : > { %v1995_v18 = vsel %vm1308_vm12, %v1987_v61, -inf }
 0x5f1   : > { %1996 = vmax.xlane.f32.xlu2 %v1995_v18 }
 0x5f5   : > { %v1966_v29 = vpop.f32.mrf.mxu3 }
 0x5f6   : > { %v1988_v41 = vmul.f32 0.35355338, %v1966_v29 }
 0x5f8   : > { %v1998_v52 = vsel %vm1308_vm12, %v1988_v41, -inf }
 0x5f9   : > { %1999 = vmax.xlane.f32.xlu0 %v1998_v52 }
 0x5fd   : > { %v1969_v63 = vpop.f32.mrf.mxu3 }
 0x5fe   : > { %v1989_v2 = vmul.f32 0.35355338, %v1969_v63 }
 0x600   : > { %v2001_v11 = vsel %vm1308_vm12, %v1989_v2, -inf }
 0x601   : > { %2002 = vmax.xlane.f32.xlu1 %v2001_v11 }
 0x605   : > { %v1972_v15 = vpop.f32.mrf.mxu3 }
 0x606   : > { %v6451_v53 = vmul.f32 0.35355338, %v1972_v15 }
 0x608   : > { %v2004_v5 = vsel %vm1308_vm12, %v6451_v53, -inf }
 0x609   : > { %2005 = vmax.xlane.f32.xlu2 %v2004_v5 }
 0x60d   : > { %v1975_v49 = vpop.f32.mrf.mxu3 }
 0x60e   : > { %v6455_v38 = vmul.f32 0.35355338, %v1975_v49 }
 0x610   : > { %v2007_v8 = vsel %vm1308_vm12, %v6455_v38, -inf }
 0x611   : > { %2008 = vmax.xlane.f32.xlu0 %v2007_v8 }
 0x615   : > { %v1978_v33 = vpop.f32.mrf.mxu3 }
 0x616   : > { %v6459_v10 = vmul.f32 0.35355338, %v1978_v33 }
 0x618   : > { %v2010_v51 = vsel %vm1308_vm12, %v6459_v10, -inf }
 0x619   : > { %2011 = vmax.xlane.f32.xlu1 %v2010_v51 }
 0x61d   : > { %v1981_v28 = vpop.f32.mrf.mxu3 }
 0x61e   : > { %v6463_v34 = vmul.f32 0.35355338, %v1981_v28 }
 0x620   : > { %v2013_v32 = vsel %vm1308_vm12, %v6463_v34, -inf }
 0x621   : > { %2014 = vmax.xlane.f32.xlu2 %v2013_v32 }
 0x625   : > { %v1984_v19 = vpop.f32.mrf.mxu3 }
 0x626   : > { %v6467_v24 = vmul.f32 0.35355338, %v1984_v19 }
 0x628   : > { %v2016_v30 = vsel %vm1308_vm12, %v6467_v24, -inf }
 0x629   : > { %2017 = vmax.xlane.f32.xlu1 %v2016_v30 }
 0x62d   : > { %v2411_v42 = vpop.f32.mrf.mxu3 }
 0x62e   : > { %v6474_v25 = vadd.f32 %v5152_v23, %v2411_v42 }
 0x630   : > { %4926 = vmatmul.msk.f32.vlgmr.msrb.gmra.mxu2 %vm1040_vm11, %v6474_v25 }
 0x635   : > { %v2414_v20 = vpop.f32.mrf.mxu3 }
 0x636   : > { %v6478_v17 = vadd.f32 %v5152_v23, %v2414_v20 }
 0x638   : > { %4927 = vmatmul.msk.f32.gmra.mxu2 %vm1040_vm11, %v6478_v17 }
 0x63d   : > { %v2417_v46 = vpop.f32.mrf.mxu3 }
 0x63e   : > { %v6482_v43 = vadd.f32 %v5152_v23, %v2417_v46 }
 0x640   : > { %4928 = vmatmul.msk.f32.gmra.mxu2 %vm1040_vm11, %v6482_v43 }
 0x645   : > { %v2420_v56 = vpop.f32.mrf.mxu3 }
 0x646   : > { %v6486_v57 = vadd.f32 %v5152_v23, %v2420_v56 }
 0x648   : > { %4929 = vmatmul.msk.f32.gmra.mxu2 %vm1040_vm11, %v6486_v57 }
 0x64d   : > { %v2423_v12 = vpop.f32.mrf.mxu3 }
 0x64e   : > { %v6490_v21 = vadd.f32 %v5152_v23, %v2423_v12 }
 0x650   : > { %4930 = vmatmul.msk.f32.gmra.mxu2 %vm1040_vm11, %v6490_v21 }
 0x655   : > { %v2426_v36 = vpop.f32.mrf.mxu3 }
 0x656   : > { %v6494_v1 = vadd.f32 %v5152_v23, %v2426_v36 }
 0x658   : > { %4931 = vmatmul.msk.f32.gmra.mxu2 %vm1040_vm11, %v6494_v1 }
 0x65d   : > { %v2429_v13 = vpop.f32.mrf.mxu3 }
 0x65e   : > { %v6498_v55 = vadd.f32 %v5152_v23, %v2429_v13 }
 0x660   : > { %4932 = vmatmul.msk.f32.gmra.mxu2 %vm1040_vm11, %v6498_v55 }
 0x664   : > { %v1997_v0 = vpop.xlane.xlu2 %1996 }
 0x665   : > { %v2019_v3 = vsub.f32 %v1987_v61, %v1997_v0  ;;  %v2432_v48 = vpop.f32.mrf.mxu3 }
 0x666   : > { %v6502_v54 = vadd.f32 %v5152_v23, %v2432_v48 }
 0x667   : > { %v2027_v7 = vmul.f32 1.442695, %v2019_v3 }
 0x668   : > { %4933 = vmatmul.msk.f32.gmra.mxu2 %vm1040_vm11, %v6502_v54 }
 0x669   : > { %5213 = vpow2.f32 %v2027_v7 }
 0x66c   : > { %v2000_v4 = vpop.xlane.xlu0 %1999 }
 0x66d   : > { %v2020_v62 = vsub.f32 %v1988_v41, %v2000_v4 }
 0x66f   : > { %v6506_v22 = vpop.eup %5213  ;;  %v2029_v26 = vmul.f32 1.442695, %v2020_v62 }
 0x670   : > { %v2043_v6 = vsel %vm1308_vm12, %v6506_v22, 0.0 }
 0x671   : > { %5215 = vpow2.f32 %v2029_v26  ;;  %2044 = vadd.xlane.f32.xlu0 %v2043_v6 }
 0x674   : > { %v2003_v31 = vpop.xlane.xlu1 %2002 }
 0x675   : > { %v2021_v50 = vsub.f32 %v1989_v2, %v2003_v31 }
 0x677   : > { %v6510_v44 = vpop.eup %5215  ;;  %v2031_v16 = vmul.f32 1.442695, %v2021_v50 }
 0x678   : > { %v2046_v45 = vsel %vm1308_vm12, %v6510_v44, 0.0 }
 0x679   : > { %5217 = vpow2.f32 %v2031_v16  ;;  %2047 = vadd.xlane.f32.xlu2 %v2046_v45 }
 0x67c   : > { %v2006_v58 = vpop.xlane.xlu2 %2005 }
 0x67d   : > { %v2022_v59 = vsub.f32 %v6451_v53, %v2006_v58 }
 0x67f   : > { %v6515_v61 = vpop.eup %5217  ;;  %v2033_v18 = vmul.f32 1.442695, %v2022_v59 }
 0x680   : > { %v2049_v29 = vsel %vm1308_vm12, %v6515_v61, 0.0 }
 0x681   : > { %5219 = vpow2.f32 %v2033_v18  ;;  %2050 = vadd.xlane.f32.xlu0 %v2049_v29 }
 0x684   : > { %v2009_v41 = vpop.xlane.xlu0 %2008 }
 0x685   : > { %v2023_v52 = vsub.f32 %v6455_v38, %v2009_v41 }
 0x687   : > { %v6520_v63 = vpop.eup %5219  ;;  %v2035_v2 = vmul.f32 1.442695, %v2023_v52 }
 0x688   : > { %v2052_v11 = vsel %vm1308_vm12, %v6520_v63, 0.0 }
 0x689   : > { %5221 = vpow2.f32 %v2035_v2  ;;  %2053 = vadd.xlane.f32.xlu1 %v2052_v11 }
 0x68c   : > { %v2012_v15 = vpop.xlane.xlu1 %2011 }
 0x68d   : > { %v2024_v53 = vsub.f32 %v6459_v10, %v2012_v15 }
 0x68f   : > { %v6525_v5 = vpop.eup %5221  ;;  %v2037_v49 = vmul.f32 1.442695, %v2024_v53 }
 0x690   : > { %v2055_v8 = vsel %vm1308_vm12, %v6525_v5, 0.0 }
 0x691   : > { %5223 = vpow2.f32 %v2037_v49  ;;  %2056 = vadd.xlane.f32.xlu2 %v2055_v8 }
 0x694   : > { %v2015_v38 = vpop.xlane.xlu2 %2014 }
 0x695   : > { %v2025_v33 = vsub.f32 %v6463_v34, %v2015_v38 }
 0x697   : > { %v6530_v51 = vpop.eup %5223  ;;  %v2039_v28 = vmul.f32 1.442695, %v2025_v33 }
 0x698   : > { %v2058_v32 = vsel %vm1308_vm12, %v6530_v51, 0.0 }
 0x699   : > { %5225 = vpow2.f32 %v2039_v28  ;;  %2059 = vadd.xlane.f32.xlu0 %v2058_v32  ;;  %v4903_v28 = vld [vmem:[%s7776_s5 + $0x58] sm:$0xff] }
 0x69a   : > { %2457 = vmatpush.msra.mxu0 %v4903_v28 }
 0x69c   : > { %v2018_v10 = vpop.xlane.xlu1 %2017 }
 0x69d   : > { %v2026_v19 = vsub.f32 %v6467_v24, %v2018_v10 }
 0x69f   : > { %v6535_v30 = vpop.eup %5225  ;;  %v2041_v23 = vmul.f32 1.442695, %v2026_v19 }
 0x6a0   : > { %v2061_v42 = vsel %vm1308_vm12, %v6535_v30, 0.0 }
 0x6a1   : > { %5227 = vpow2.f32 %v2041_v23  ;;  %2062 = vadd.xlane.f32.xlu1 %v2061_v42 }
 0x6a7   : > { %v6539_v34 = vpop.eup %5227 }
 0x6a8   : > { %v2064_v20 = vsel %vm1308_vm12, %v6539_v34, 0.0 }
 0x6a9   : > { %2065 = vadd.xlane.f32.xlu2 %v2064_v20 }
 0x6e4   : > { %v2045_v46 = vpop.xlane.xlu0 %2044 }
 0x6e5   : > { %5229 = vrcp.f32 %v2045_v46  ;;  %v2078_v13 = vand.u32 2147483648, %v2045_v46  ;;  %v2076_v3 = vand.u32 2147483647, %v2045_v46  ;;  %vm2072_vm5 = vweird.f32 %v2045_v46 }
 0x6e7   : > { %v2079_v4 = vor.u32 1.1754944e-38, %v2078_v13  ;;  %vm2077_vm7 = vcmp.eq.f32.partialorder %v2076_v3, 8.507059e+37  ;;  %v4902_v13 = vld [vmem:[%s7776_s5 + $0x50] sm:$0xff] }
 0x6e8   : > { %2458 = vmatpush.msra.mxu0 %v4902_v13 }
 0x6eb   : > { %v5230_v56 = vpop.eup %5229 }
 0x6ec   : > { %v2068_v12 = vmul.f32 %v5230_v56, %v2045_v46  ;;  %v2048_v36 = vpop.xlane.xlu2 %2047  ;;  %vm2073_vm4 = vweird.f32 %v5230_v56 }
 0x6ed   : > { %5231 = vrcp.f32 %v2048_v36  ;;  %vm2074_vm6 = vmor %vm2072_vm5, %vm2073_vm4  ;;  %v2093_v45 = vand.u32 2147483648, %v2048_v36  ;;  %v2091_v59 = vand.u32 2147483647, %v2048_v36  ;;  %vm2087_vm9 = vweird.f32 %v2048_v36 }
 0x6ee   : > { %v2069_v24 = vsub.f32 1.0, %v2068_v12 }
 0x6ef   : > { %v2094_v41 = vor.u32 1.1754944e-38, %v2093_v45  ;;  %vm2092_vm13 = vcmp.eq.f32.partialorder %v2091_v59, 8.507059e+37  ;;  %v4900_v45 = vld [vmem:[%s7776_s5 + $0x40] sm:$0xff] }
 0x6f0   : > { %v2070_v0 = vmul.f32 %v5230_v56, %v2069_v24 }
 0x6f2   : > { %v2071_v48 = vadd.f32 %v5230_v56, %v2070_v0 }
 0x6f3   : > { %v5232_v7 = vpop.eup %5231 }
 0x6f4   : > { %v2075_v62 = vsel %vm2074_vm6, %v5230_v56, %v2071_v48  ;;  %v2083_v26 = vmul.f32 %v5232_v7, %v2048_v36  ;;  %v2051_v6 = vpop.xlane.xlu0 %2050  ;;  %vm2088_vm8 = vweird.f32 %v5232_v7 }
 0x6f5   : > { %v2080_v31 = vsel %vm2077_vm7, %v2079_v4, %v2075_v62  ;;  %5233 = vrcp.f32 %v2051_v6  ;;  %vm2089_vm10 = vmor %vm2087_vm9, %vm2088_vm8  ;;  %v2108_v8 = vand.u32 2147483648, %v2051_v6  ;;  %v2106_v38 = vand.u32 2147483647, %v2051_v6 }
 0x6f6   : > { %v2084_v50 = vsub.f32 1.0, %v2083_v26  ;;  %v2081_v16 = vmul.f32 %v6506_v22, %v2080_v31  ;;  %vm2102_vm15 = vweird.f32 %v2051_v6 }
 0x6f7   : > { %v2109_v10 = vor.u32 1.1754944e-38, %v2108_v8  ;;  %vm2107_vm2 = vcmp.eq.f32.partialorder %v2106_v38, 8.507059e+37 }
 0x6f8   : > { %v2085_v58 = vmul.f32 %v5232_v7, %v2084_v50  ;;  %4862 = vmatmul.msk.f32.vlgmr.msrb.gmra.mxu0 %vm1308_vm12, %v2081_v16  ;;  %v4901_v16 = vld [vmem:[%s7776_s5 + $0x48] sm:$0xff] }
 0x6f9   : > { %2459 = vmatpush.msra.mxu0 %v4901_v16  ;;  %v4916_v16 = vld [vmem:[%s7771_s7 + $0x58] sm:$0xff] }
 0x6fa   : > { %v2086_v18 = vadd.f32 %v5232_v7, %v2085_v58 }
 0x6fb   : > { %v5234_v29 = vpop.eup %5233  ;;  %2460 = vmatpush.msra.mxu0 %v4900_v45  ;;  %v4915_v45 = vld [vmem:[%s7771_s7 + $0x50] sm:$0xff] }
 0x6fc   : > { %v2098_v52 = vmul.f32 %v5234_v29, %v2051_v6  ;;  %v2054_v2 = vpop.xlane.xlu1 %2053  ;;  %v2090_v11 = vsel %vm2089_vm10, %v5232_v7, %v2086_v18  ;;  %vm2103_vm14 = vweird.f32 %v5234_v29 }
 0x6fd   : > { %5235 = vrcp.f32 %v2054_v2  ;;  %v2095_v15 = vsel %vm2092_vm13, %v2094_v41, %v2090_v11  ;;  %vm2104_vm1 = vmor %vm2102_vm15, %vm2103_vm14  ;;  %v2123_v12 = vand.u32 2147483648, %v2054_v2  ;;  %v2121_v36 = vand.u32 2147483647, %v2054_v2 }
 0x6fe   : > { %v2099_v53 = vsub.f32 1.0, %v2098_v52  ;;  %v2096_v22 = vmul.f32 %v6510_v44, %v2095_v15  ;;  %vm2117_vm4 = vweird.f32 %v2054_v2 }
 0x6ff   : > { %v2124_v3 = vor.u32 1.1754944e-38, %v2123_v12  ;;  %vm2122_vm6 = vcmp.eq.f32.partialorder %v2121_v36, 8.507059e+37 }
 0x700   : > { %v2100_v49 = vmul.f32 %v5234_v29, %v2099_v53  ;;  %4863 = vmatmul.msk.f32.gmra.mxu0 %vm1308_vm12, %v2096_v22 }
 0x702   : > { %v2101_v33 = vadd.f32 %v5234_v29, %v2100_v49 }
 0x703   : > { %v5236_v32 = vpop.eup %5235 }
 0x704   : > { %v2113_v19 = vmul.f32 %v5236_v32, %v2054_v2  ;;  %v2057_v23 = vpop.xlane.xlu2 %2056  ;;  %v2105_v42 = vsel %vm2104_vm1, %v5234_v29, %v2101_v33  ;;  %vm2118_vm3 = vweird.f32 %v5236_v32 }
 0x705   : > { %5237 = vrcp.f32 %v2057_v23  ;;  %v2110_v20 = vsel %vm2107_vm2, %v2109_v10, %v2105_v42  ;;  %vm2119_vm5 = vmor %vm2117_vm4, %vm2118_vm3  ;;  %v2138_v31 = vand.u32 2147483648, %v2057_v23  ;;  %v2136_v50 = vand.u32 2147483647, %v2057_v23 }
 0x706   : > { %v2114_v44 = vsub.f32 1.0, %v2113_v19  ;;  %v2111_v46 = vmul.f32 %v6515_v61, %v2110_v20  ;;  %vm2132_vm8 = vweird.f32 %v2057_v23 }
 0x707   : > { %vm2137_vm10 = vcmp.eq.f32.partialorder %v2136_v50, 8.507059e+37 }
 0x708   : > { %v2115_v56 = vmul.f32 %v5236_v32, %v2114_v44  ;;  %4864 = vmatmul.msk.f32.gmra.mxu0 %vm1308_vm12, %v2111_v46 }
 0x70a   : > { %v2116_v24 = vadd.f32 %v5236_v32, %v2115_v56 }
 0x70b   : > { %v5238_v0 = vpop.eup %5237 }
 0x70c   : > { %v2128_v48 = vmul.f32 %v5238_v0, %v2057_v23  ;;  %v2060_v7 = vpop.xlane.xlu0 %2059  ;;  %v2120_v4 = vsel %vm2119_vm5, %v5236_v32, %v2116_v24  ;;  %vm2133_vm7 = vweird.f32 %v5238_v0 }
 0x70d   : > { %5239 = vrcp.f32 %v2060_v7  ;;  %v2125_v62 = vsel %vm2122_vm6, %v2124_v3, %v2120_v4  ;;  %vm2134_vm9 = vmor %vm2132_vm8, %vm2133_vm7  ;;  %v2153_v53 = vand.u32 2147483648, %v2060_v7  ;;  %v2151_v22 = vand.u32 2147483647, %v2060_v7 }
 0x70e   : > { %v2129_v61 = vsub.f32 1.0, %v2128_v48  ;;  %v2126_v26 = vmul.f32 %v6520_v63, %v2125_v62  ;;  %v2139_v63 = vor.u32 1.1754944e-38, %v2138_v31  ;;  %vm2147_vm14 = vweird.f32 %v2060_v7 }
 0x70f   : > { %v2154_v38 = vor.u32 1.1754944e-38, %v2153_v53  ;;  %vm2152_vm1 = vcmp.eq.f32.partialorder %v2151_v22, 8.507059e+37 }
 0x710   : > { %v2130_v6 = vmul.f32 %v5238_v0, %v2129_v61  ;;  %4865 = vmatmul.msk.f32.gmra.mxu0 %vm1308_vm12, %v2126_v26 }
 0x712   : > { %v2131_v58 = vadd.f32 %v5238_v0, %v2130_v6 }
 0x713   : > { %v5240_v59 = vpop.eup %5239 }
 0x714   : > { %v2143_v18 = vmul.f32 %v5240_v59, %v2060_v7  ;;  %v2063_v29 = vpop.xlane.xlu1 %2062  ;;  %v2135_v41 = vsel %vm2134_vm9, %v5238_v0, %v2131_v58  ;;  %vm2148_vm13 = vweird.f32 %v5240_v59  ;;  %v4914_v58 = vld [vmem:[%s7771_s7 + $0x48] sm:$0xff] }
 0x715   : > { %5241 = vrcp.f32 %v2063_v29  ;;  %v2140_v2 = vsel %vm2137_vm10, %v2139_v63, %v2135_v41  ;;  %vm2149_vm15 = vmor %vm2147_vm14, %vm2148_vm13  ;;  %v2168_v23 = vand.u32 2147483648, %v2063_v29  ;;  %v2166_v44 = vand.u32 2147483647, %v2063_v29 }
 0x716   : > { %v2144_v52 = vsub.f32 1.0, %v2143_v18  ;;  %v2141_v11 = vmul.f32 %v6525_v5, %v2140_v2  ;;  %vm2162_vm3 = vweird.f32 %v2063_v29 }
 0x717   : > { %v2169_v56 = vor.u32 1.1754944e-38, %v2168_v23  ;;  %vm2167_vm5 = vcmp.eq.f32.partialorder %v2166_v44, 8.507059e+37 }
 0x718   : > { %v2145_v15 = vmul.f32 %v5240_v59, %v2144_v52  ;;  %4866 = vmatmul.msk.f32.gmra.mxu0 %vm1308_vm12, %v2141_v11  ;;  %v5153_v52 = vld [vmem:[%s7779_s6 + $0x2] ss:$0 sm:$0xff] }
 0x71a   : > { %v2146_v49 = vadd.f32 %v5240_v59, %v2145_v15 }
 0x71b   : > { %v5242_v8 = vpop.eup %5241 }
 0x71c   : > { %v2158_v33 = vmul.f32 %v5242_v8, %v2063_v29  ;;  %v2066_v28 = vpop.xlane.xlu2 %2065  ;;  %v2150_v32 = vsel %vm2149_vm15, %v5240_v59, %v2146_v49  ;;  %vm2163_vm2 = vweird.f32 %v5242_v8  ;;  %v4913_v59 = vld [vmem:[%s7771_s7 + $0x40] sm:$0xff] }
 0x71d   : > { %5243 = vrcp.f32 %v2066_v28  ;;  %v2155_v19 = vsel %vm2152_vm1, %v2154_v38, %v2150_v32  ;;  %vm2164_vm4 = vmor %vm2162_vm3, %vm2163_vm2  ;;  %v2183_v3 = vand.u32 2147483648, %v2066_v28  ;;  %vm2177_vm7 = vweird.f32 %v2066_v28  ;;  %v4976_v32 = vld [vmem:[%s7770_s21 + $0x68] sm:$0xff] }
 0x71e   : > { %v2159_v10 = vsub.f32 1.0, %v2158_v33  ;;  %v2156_v5 = vmul.f32 %v6530_v51, %v2155_v19  ;;  %v2181_v51 = vand.u32 2147483647, %v2066_v28  ;;  %v4978_v33 = vld [vmem:[%s7770_s21 + $0x78] sm:$0xff] }
 0x71f   : > { %v2184_v4 = vor.u32 1.1754944e-38, %v2183_v3  ;;  %3166 = vmatpush.msra.mxu3 %v4978_v33 }
 0x720   : > { %v2160_v42 = vmul.f32 %v5242_v8, %v2159_v10  ;;  %4867 = vmatmul.msk.f32.gmra.mxu0 %vm1308_vm12, %v2156_v5  ;;  %vm2182_vm9 = vcmp.eq.f32.partialorder %v2181_v51, 8.507059e+37  ;;  %v4975_v10 = vld [vmem:[%s7770_s21 + $0x60] sm:$0xff]  ;;  %v6703_v51 = vpop.f32.mrf.mxu2 }
 0x721   : > { %7792 = vst [vmem:[#allocation20_spill] sm:$0xff] %v6703_v51 }
 0x722   : > { %v2161_v20 = vadd.f32 %v5242_v8, %v2160_v42 }
 0x723   : > { %v5244_v46 = vpop.eup %5243 }
 0x724   : > { %v2173_v12 = vmul.f32 %v5244_v46, %v2066_v28  ;;  %v2165_v36 = vsel %vm2164_vm4, %v5242_v8, %v2161_v20  ;;  %vm2178_vm6 = vweird.f32 %v5244_v46  ;;  %v4977_v28 = vld [vmem:[%s7770_s21 + $0x70] sm:$0xff] }
 0x725   : > { %v2170_v24 = vsel %vm2167_vm5, %v2169_v56, %v2165_v36  ;;  %vm2179_vm8 = vmor %vm2177_vm7, %vm2178_vm6  ;;  %3167 = vmatpush.msra.mxu3 %v4977_v28 }
 0x726   : > { %v2174_v13 = vsub.f32 1.0, %v2173_v12  ;;  %v2171_v0 = vmul.f32 %v6535_v30, %v2170_v24  ;;  %v4870_v30 = vld [vmem:[%s7728_s12 + $0x8] sm:$0xff] }
 0x727   : > { %2293 = vmatpush.msra.mxu1 %v4870_v30  ;;  %3168 = vmatpush.msra.mxu3 %v4976_v32 }
 0x728   : > { %v2175_v48 = vmul.f32 %v5244_v46, %v2174_v13  ;;  %4868 = vmatmul.msk.f32.gmra.mxu0 %vm1308_vm12, %v2171_v0 }
 0x729   : > { %2508 = vmatpush.msrb.mxu1 %v4916_v16  ;;  %3169 = vmatpush.msra.mxu3 %v4975_v10 }
 0x72a   : > { %v2176_v7 = vadd.f32 %v5244_v46, %v2175_v48 }
 0x72b   : > { %2509 = vmatpush.msrb.mxu1 %v4915_v45 }
 0x72c   : > { %v2180_v61 = vsel %vm2179_vm8, %v5244_v46, %v2176_v7 }
 0x72d   : > { %v2185_v62 = vsel %vm2182_vm9, %v2184_v4, %v2180_v61  ;;  %2510 = vmatpush.msrb.mxu1 %v4914_v58 }
 0x72e   : > { %v2186_v26 = vmul.f32 %v6539_v34, %v2185_v62  ;;  %v6707_v62 = vpop.f32.mrf.mxu2 }
 0x72f   : > { %2511 = vmatpush.msrb.mxu1 %v4913_v59  ;;  %7793 = vst [vmem:[#allocation21_spill] sm:$0xff] %v6707_v62 }
 0x730   : > { %4869 = vmatmul.msk.f32.gmra.mxu0 %vm1308_vm12, %v2186_v26 }
 0x738   : > { %4905 = vmatmul.msk.f32.vlgmr.msra.gmra.mxu0 %vm636_vm0, %v5728_v60 }
 0x740   : > { %4906 = vmatmul.msk.f32.gmra.mxu0 %vm636_vm0, %v5750_v14 }
 0x748   : > { %4907 = vmatmul.msk.f32.gmra.mxu0 %vm636_vm0, %v5765_v35 }
 0x750   : > { %4908 = vmatmul.msk.f32.gmra.mxu0 %vm636_vm0, %v5781_v39 }
 0x758   : > { %4909 = vmatmul.msk.f32.gmra.mxu0 %vm636_vm0, %v5770_v37 }
 0x760   : > { %4910 = vmatmul.msk.f32.gmra.mxu0 %vm636_vm0, %v5784_v40 }
 0x768   : > { %4911 = vmatmul.msk.f32.gmra.mxu0 %vm636_vm0, %v5795_v47 }
 0x770   : > { %4912 = vmatmul.msk.f32.gmra.mxu0 %vm636_vm0, %v5850_v9 }
 0x775   : > { %v2228_v34 = vpop.f32.mrf.mxu0 }
 0x776   : > { %4871 = vmatmul.msk.f32.vlgmr.msra.gmra.mxu1 %vm1040_vm11, %v2228_v34  ;;  %v6711_v34 = vpop.f32.mrf.mxu2 }
 0x777   : > { %7794 = vst [vmem:[#allocation22_spill] sm:$0xff] %v6711_v34 }
 0x77d   : > { %v2231_v6 = vpop.f32.mrf.mxu0 }
 0x77e   : > { %4872 = vmatmul.msk.f32.gmra.mxu1 %vm1040_vm11, %v2231_v6 }
 0x785   : > { %v2234_v31 = vpop.f32.mrf.mxu0 }
 0x786   : > { %4873 = vmatmul.msk.f32.gmra.mxu1 %vm1040_vm11, %v2234_v31 }
 0x78d   : > { %v2237_v50 = vpop.f32.mrf.mxu0 }
 0x78e   : > { %4874 = vmatmul.msk.f32.gmra.mxu1 %vm1040_vm11, %v2237_v50  ;;  %v6713_v50 = vpop.f32.mrf.mxu2 }
 0x78f   : > { %7795 = vst [vmem:[#allocation23_spill] sm:$0xff] %v6713_v50 }
 0x795   : > { %v2240_v63 = vpop.f32.mrf.mxu0 }
 0x796   : > { %4875 = vmatmul.msk.f32.gmra.mxu1 %vm1040_vm11, %v2240_v63  ;;  %v6715_v58 = vpop.f32.mrf.mxu2 }
 0x797   : > { %7796 = vst [vmem:[#allocation24_spill] sm:$0xff] %v6715_v58 }
 0x79d   : > { %v2243_v18 = vpop.f32.mrf.mxu0 }
 0x79e   : > { %4876 = vmatmul.msk.f32.gmra.mxu1 %vm1040_vm11, %v2243_v18 }
 0x7a5   : > { %v2246_v29 = vpop.f32.mrf.mxu0 }
 0x7a6   : > { %4877 = vmatmul.msk.f32.gmra.mxu1 %vm1040_vm11, %v2246_v29 }
 0x7ad   : > { %v2249_v41 = vpop.f32.mrf.mxu0 }
 0x7ae   : > { %4878 = vmatmul.msk.f32.gmra.mxu1 %vm1040_vm11, %v2249_v41  ;;  %v6717_v41 = vpop.f32.mrf.mxu2 }
 0x7af   : > { %7797 = vst [vmem:[#allocation25_spill] sm:$0xff] %v6717_v41 }
 0x7b5   : > { %v2462_v2 = vpop.f32.mrf.mxu0 }
 0x7b6   : > { %v6613_v11 = vadd.f32 %v5153_v52, %v2462_v2  ;;  %4918 = vmatmul.msk.f32.vlgmr.msrb.gmra.mxu1 %vm636_vm0, %v5728_v60 }
 0x7b8   : > { %4934 = vmatmul.msk.f32.vlgmr.msrb.gmra.mxu3 %vm1040_vm11, %v6613_v11 }
 0x7b9   : > { %3433 = vmatpush.msrb.mxu3 %v6373_v27 }
 0x7bd   : > { %v2465_v15 = vpop.f32.mrf.mxu0 }
 0x7be   : > { %v6619_v53 = vadd.f32 %v5153_v52, %v2465_v15  ;;  %4919 = vmatmul.msk.f32.gmra.mxu1 %vm636_vm0, %v5750_v14 }
 0x7c0   : > { %4935 = vmatmul.msk.f32.gmra.mxu3 %vm1040_vm11, %v6619_v53 }
 0x7c5   : > { %v2468_v22 = vpop.f32.mrf.mxu0 }
 0x7c6   : > { %v6625_v49 = vadd.f32 %v5153_v52, %v2468_v22  ;;  %4920 = vmatmul.msk.f32.gmra.mxu1 %vm636_vm0, %v5765_v35 }
 0x7c8   : > { %4936 = vmatmul.msk.f32.gmra.mxu3 %vm1040_vm11, %v6625_v49 }
 0x7cd   : > { %v2471_v8 = vpop.f32.mrf.mxu0 }
 0x7ce   : > { %v6631_v38 = vadd.f32 %v5153_v52, %v2471_v8  ;;  %4921 = vmatmul.msk.f32.gmra.mxu1 %vm636_vm0, %v5781_v39  ;;  %v6722_v8 = vpop.f32.mrf.mxu2 }
 0x7cf   : > { %7798 = vst [vmem:[#allocation26_spill] sm:$0xff] %v6722_v8 }
 0x7d0   : > { %4937 = vmatmul.msk.f32.gmra.mxu3 %vm1040_vm11, %v6631_v38 }
 0x7d5   : > { %v2474_v19 = vpop.f32.mrf.mxu0 }
 0x7d6   : > { %v6649_v23 = vadd.f32 %v5153_v52, %v2474_v19  ;;  %4922 = vmatmul.msk.f32.gmra.mxu1 %vm636_vm0, %v5770_v37  ;;  %v6727_v19 = vld [vmem:[%s7725_s9 + $0x38] sm:$0xff] }
 0x7d8   : > { %4938 = vmatmul.msk.f32.gmra.mxu3 %vm1040_vm11, %v6649_v23 }
 0x7dd   : > { %v2477_v5 = vpop.f32.mrf.mxu0 }
 0x7de   : > { %v6656_v42 = vadd.f32 %v5153_v52, %v2477_v5  ;;  %4923 = vmatmul.msk.f32.gmra.mxu1 %vm636_vm0, %v5784_v40 }
 0x7e0   : > { %4939 = vmatmul.msk.f32.gmra.mxu3 %vm1040_vm11, %v6656_v42 }
 0x7e5   : > { %v2480_v44 = vpop.f32.mrf.mxu0 }
 0x7e6   : > { %v6662_v20 = vadd.f32 %v5153_v52, %v2480_v44  ;;  %4924 = vmatmul.msk.f32.gmra.mxu1 %vm636_vm0, %v5795_v47 }
 0x7e8   : > { %4940 = vmatmul.msk.f32.gmra.mxu3 %vm1040_vm11, %v6662_v20 }
 0x7ed   : > { %v2483_v46 = vpop.f32.mrf.mxu0 }
 0x7ee   : > { %v2484_v27 = vadd.f32 %v5153_v52, %v2483_v46  ;;  %4925 = vmatmul.msk.f32.gmra.mxu1 %vm636_vm0, %v5850_v9  ;;  %v5154_v52 = vld [vmem:[%s7778_s8 + $0x2] ss:$0 sm:$0xff]  ;;  %v6733_v46 = vld [vmem:[%s7726_s10 + $0x38] sm:$0xff] }
 0x7f0   : > { %4941 = vmatmul.msk.f32.gmra.mxu3 %vm1040_vm11, %v2484_v27  ;;  %v2633_v5 = vmul.f32 %v6727_v19, %v2484_v27  ;;  %v6742_v27 = vpop.f32.mrf.mxu2 }
 0x7f1   : > { %7799 = vst [vmem:[#allocation27_spill] sm:$0xff] %v6742_v27 }
 0x7f3   : > { %v6671_v56 = vpop.f32.mrf.mxu1 }
 0x7f4   : > { %7784 = vst [vmem:[#allocation12_spill] sm:$0xff] %v6671_v56 }
 0x7f8   : > { %4980 = vmatmul.msk.f32.vlgmr.msra.gmra.mxu3 %vm636_vm0, %v5728_v60 }
 0x7fb   : > { %v6675_v12 = vpop.f32.mrf.mxu1 }
 0x7fc   : > { %7785 = vst [vmem:[#allocation13_spill] sm:$0xff] %v6675_v12 }
 0x800   : > { %4981 = vmatmul.msk.f32.gmra.mxu3 %vm636_vm0, %v5750_v14 }
 0x803   : > { %v6679_v36 = vpop.f32.mrf.mxu1 }
 0x804   : > { %7786 = vst [vmem:[#allocation14_spill] sm:$0xff] %v6679_v36 }
 0x808   : > { %4982 = vmatmul.msk.f32.gmra.mxu3 %vm636_vm0, %v5765_v35 }
 0x80b   : > { %v6683_v24 = vpop.f32.mrf.mxu1 }
 0x80c   : > { %7787 = vst [vmem:[#allocation15_spill] sm:$0xff] %v6683_v24 }
 0x810   : > { %4983 = vmatmul.msk.f32.gmra.mxu3 %vm636_vm0, %v5781_v39 }
 0x813   : > { %v6687_v13 = vpop.f32.mrf.mxu1 }
 0x814   : > { %7788 = vst [vmem:[#allocation16_spill] sm:$0xff] %v6687_v13 }
 0x818   : > { %4984 = vmatmul.msk.f32.gmra.mxu3 %vm636_vm0, %v5770_v37 }
 0x81b   : > { %v6691_v0 = vpop.f32.mrf.mxu1 }
 0x81c   : > { %7789 = vst [vmem:[#allocation17_spill] sm:$0xff] %v6691_v0 }
 0x820   : > { %4985 = vmatmul.msk.f32.gmra.mxu3 %vm636_vm0, %v5784_v40 }
 0x823   : > { %v6695_v3 = vpop.f32.mrf.mxu1 }
 0x824   : > { %7790 = vst [vmem:[#allocation18_spill] sm:$0xff] %v6695_v3 }
 0x828   : > { %4986 = vmatmul.msk.f32.gmra.mxu3 %vm636_vm0, %v5795_v47 }
 0x82b   : > { %v6699_v48 = vpop.f32.mrf.mxu1 }
 0x82c   : > { %7791 = vst [vmem:[#allocation19_spill] sm:$0xff] %v6699_v48 }
 0x830   : > { %4987 = vmatmul.msk.f32.gmra.mxu3 %vm636_vm0, %v5850_v9 }
 0x833   : > { %v2513_v7 = vpop.f32.mrf.mxu1 }
 0x83b   : > { %v2516_v4 = vpop.f32.mrf.mxu1  ;;  %v6705_v61 = vpop.f32.mrf.mxu3 }
 0x843   : > { %v2519_v26 = vpop.f32.mrf.mxu1  ;;  %v6709_v30 = vpop.f32.mrf.mxu3 }
 0x84b   : > { %v2522_v6 = vpop.f32.mrf.mxu1  ;;  %v2681_v31 = vpop.f32.mrf.mxu3 }
 0x84c   : > { %v2523_v44 = vadd.f32 %v5154_v52, %v2522_v6  ;;  %v6747_v6 = vld [vmem:[%s7725_s9 + $0x30] sm:$0xff] }
 0x853   : > { %v2525_v16 = vpop.f32.mrf.mxu1  ;;  %v2684_v45 = vpop.f32.mrf.mxu3 }
 0x854   : > { %v2526_v32 = vadd.f32 %v5154_v52, %v2525_v16  ;;  %v6739_v16 = vld [vmem:[%s7726_s10 + $0x30] sm:$0xff] }
 0x85b   : > { %v2528_v59 = vpop.f32.mrf.mxu1  ;;  %v2687_v63 = vpop.f32.mrf.mxu3 }
 0x85c   : > { %v2529_v28 = vadd.f32 %v5154_v52, %v2528_v59  ;;  %v2520_v59 = vadd.f32 %v5154_v52, %v2519_v26  ;;  %v2517_v26 = vadd.f32 %v5154_v52, %v2516_v4 }
 0x863   : > { %v2531_v18 = vpop.f32.mrf.mxu1  ;;  %v2690_v29 = vpop.f32.mrf.mxu3 }
 0x864   : > { %v2532_v33 = vadd.f32 %v5154_v52, %v2531_v18 }
 0x86b   : > { %v2534_v2 = vpop.f32.mrf.mxu1  ;;  %v2693_v15 = vpop.f32.mrf.mxu3 }
 0x86c   : > { %v2535_v22 = vadd.f32 %v5154_v52, %v2534_v2  ;;  %v2705_v2 = vmul.f32 %v6739_v16, %v2693_v15  ;;  %v6755_v15 = vld [vmem:[%s7726_s10 + $0x28] sm:$0xff] }
 0x86e   : > { %3036 = vmatpush.msra.mxu1 %v2535_v22 }
 0x870   : > { %3037 = vmatpush.msra.mxu1 %v2532_v33  ;;  %v2632_v33 = vmul.f32 %v6747_v6, %v6662_v20 }
 0x872   : > { %3038 = vmatpush.msra.mxu1 %v2529_v28  ;;  %v2514_v28 = vadd.f32 %v5154_v52, %v2513_v7  ;;  %v6769_v7 = vld [vmem:[%s7726_s10 + $0x20] sm:$0xff]  ;;  %v2586_v52 = vpop.f32.mrf.mxu2 }
 0x873   : > { %v2696_v10 = vpop.f32.mrf.mxu3  ;;  %v2703_v4 = vmul.f32 %v6769_v7, %v2687_v63 }
 0x874   : > { %v2706_v18 = vmul.f32 %v6733_v46, %v2696_v10  ;;  %3039 = vmatpush.msra.mxu1 %v2526_v32  ;;  %v2704_v32 = vmul.f32 %v6755_v15, %v2690_v29  ;;  %v2713_v10 = vadd.f32 %v2705_v2, %v2632_v33  ;;  %v6789_v2 = vld [vmem:[%s7725_s9 + $0x18] sm:$0xff] }
 0x876   : > { %v2714_v22 = vadd.f32 %v2706_v18, %v2633_v5  ;;  %3040 = vmatpush.msra.mxu1 %v2523_v44  ;;  %v6761_v5 = vld [vmem:[%s7725_s9 + $0x28] sm:$0xff]  ;;  %v6775_v44 = vld [vmem:[%s7725_s9 + $0x20] sm:$0xff]  ;;  %v6783_v18 = vld [vmem:[%s7726_s10 + $0x18] sm:$0xff] }
 0x877   : > { %v2631_v20 = vmul.f32 %v6761_v5, %v6656_v42  ;;  %v2630_v42 = vmul.f32 %v6775_v44, %v6649_v23  ;;  %v6797_v23 = vld [vmem:[%s7726_s10 + $0x10] sm:$0xff] }
 0x878   : > { %4942 = vmatpush.xpose.msk.msrb.mxu0 %vm1040_vm11, %v2714_v22  ;;  %3041 = vmatpush.msra.mxu1 %v2520_v59  ;;  %v2702_v59 = vmul.f32 %v6783_v18, %v2684_v45  ;;  %v2629_v22 = vmul.f32 %v6789_v2, %v6631_v38  ;;  %v2701_v33 = vmul.f32 %v6797_v23, %v2681_v31  ;;  %v6803_v45 = vld [vmem:[%s7725_s9 + $0x10] sm:$0xff] }
 0x879   : > { %v2712_v29 = vadd.f32 %v2704_v32, %v2631_v20  ;;  %v2711_v63 = vadd.f32 %v2703_v4, %v2630_v42  ;;  %v6811_v32 = vld [vmem:[%s7726_s10 + $0x8] sm:$0xff]  ;;  %v6826_v4 = vld [vmem:[%s7726_s10] sm:$0xff] }
 0x87a   : > { %3042 = vmatpush.msra.mxu1 %v2517_v26  ;;  %v2710_v26 = vadd.f32 %v2702_v59, %v2629_v22  ;;  %v2589_v38 = vpop.f32.mrf.mxu2  ;;  %7800 = vst [vmem:[#allocation28_spill] sm:$0xff] %v6811_v32  ;;  %v2700_v31 = vmul.f32 %v6811_v32, %v6709_v30  ;;  %v6818_v20 = vld [vmem:[%s7725_s9 + $0x8] sm:$0xff]  ;;  %v6833_v42 = vld [vmem:[%s7725_s9] sm:$0xff] }
 0x87b   : > { %7801 = vst [vmem:[#allocation29_spill] sm:$0xff] %v6818_v20  ;;  %v2626_v59 = vmul.f32 %v6833_v42, %v6613_v11  ;;  %v2537_v22 = vmul.f32 %v6833_v42, %v6474_v25  ;;  %v2539_v25 = vmul.f32 %v6803_v45, %v6482_v43  ;;  %v4990_v43 = vld [vmem:[%s7776_s5 + $0x70] sm:$0xff] }
 0x87c   : > { %4943 = vmatpush.xpose.msk.msrb.mxu0 %vm1040_vm11, %v2713_v10  ;;  %3043 = vmatpush.msra.mxu1 %v2514_v28  ;;  %v2628_v28 = vmul.f32 %v6803_v45, %v6625_v49  ;;  %v2627_v49 = vmul.f32 %v6818_v20, %v6619_v53  ;;  %7802 = vst [vmem:[#allocation30_spill] sm:$0xff] %v6826_v4 }
 0x87d   : > { %7803 = vst [vmem:[#allocation31_spill] sm:$0xff] %v6833_v42  ;;  %v2610_v53 = vmul.f32 %v6826_v4, %v2586_v52 }
 0x87e   : > { %v2709_v10 = vadd.f32 %v2701_v33, %v2628_v28  ;;  %v2708_v30 = vadd.f32 %v2700_v31, %v2627_v49  ;;  %v2538_v28 = vmul.f32 %v6818_v20, %v6478_v17  ;;  %v4991_v17 = vld [vmem:[%s7776_s5 + $0x78] sm:$0xff] }
 0x880   : > { %4944 = vmatpush.xpose.msk.msrb.mxu0 %vm1040_vm11, %v2712_v29  ;;  %v2699_v29 = vmul.f32 %v6826_v4, %v6705_v61  ;;  %v2618_v61 = vadd.f32 %v2610_v53, %v2537_v22  ;;  %v4989_v53 = vld [vmem:[%s7776_s5 + $0x68] sm:$0xff]  ;;  %v4988_v22 = vld [vmem:[%s7776_s5 + $0x60] sm:$0xff] }
 0x882   : > { %v2592_v33 = vpop.f32.mrf.mxu2 }
 0x883   : > { %v2612_v52 = vmul.f32 %v6797_v23, %v2592_v33 }
 0x884   : > { %4945 = vmatpush.xpose.msk.msrb.mxu0 %vm1040_vm11, %v2711_v63  ;;  %v2707_v63 = vadd.f32 %v2699_v29, %v2626_v59 }
 0x888   : > { %4946 = vmatpush.xpose.msk.msrb.mxu0 %vm1040_vm11, %v2710_v26  ;;  %v2611_v26 = vmul.f32 %v6811_v32, %v2589_v38  ;;  %v2540_v38 = vmul.f32 %v6789_v2, %v6486_v57  ;;  %v2541_v57 = vmul.f32 %v6775_v44, %v6490_v21 }
 0x88a   : > { %v2619_v11 = vadd.f32 %v2611_v26, %v2538_v28  ;;  %v2595_v31 = vpop.f32.mrf.mxu2  ;;  %v2542_v26 = vmul.f32 %v6761_v5, %v6494_v1 }
 0x88b   : > { %v2613_v29 = vmul.f32 %v6783_v18, %v2595_v31  ;;  %v2543_v31 = vmul.f32 %v6747_v6, %v6498_v55 }
 0x88c   : > { %4947 = vmatpush.xpose.msk.msrb.mxu0 %vm1040_vm11, %v2709_v10  ;;  %v2620_v10 = vadd.f32 %v2612_v52, %v2539_v25 }
 0x890   : > { %4948 = vmatpush.xpose.msk.msrb.mxu0 %vm1040_vm11, %v2708_v30  ;;  %v2621_v30 = vadd.f32 %v2613_v29, %v2540_v38 }
 0x892   : > { %v2598_v49 = vpop.f32.mrf.mxu2 }
 0x893   : > { %v2614_v59 = vmul.f32 %v6769_v7, %v2598_v49  ;;  %v2544_v49 = vmul.f32 %v6727_v19, %v6502_v54 }
 0x894   : > { %4949 = vmatpush.xpose.msk.msrb.mxu0 %vm1040_vm11, %v2707_v63 }
 0x895   : > { %v2622_v33 = vadd.f32 %v2614_v59, %v2541_v57 }
 0x897   : > { %4950 = vmatmul.msk.f32.vlgmr.msrb.gmra.mxu0 %vm1040_vm11, %v2618_v61 }
 0x898   : > { %3217 = vmatpush.msra.mxu0 %v4991_v17 }
 0x89a   : > { %v2601_v63 = vpop.f32.mrf.mxu2  ;;  %3218 = vmatpush.msra.mxu0 %v4990_v43 }
 0x89b   : > { %v2615_v61 = vmul.f32 %v6755_v15, %v2601_v63 }
 0x89c   : > { %3219 = vmatpush.msra.mxu0 %v4989_v53 }
 0x89e   : > { %3220 = vmatpush.msra.mxu0 %v4988_v22 }
 0x89f   : > { %4951 = vmatmul.msk.f32.gmra.mxu0 %vm1040_vm11, %v2619_v11  ;;  %v2623_v11 = vadd.f32 %v2615_v61, %v2542_v26 }
 0x8a2   : > { %v2604_v28 = vpop.f32.mrf.mxu2 }
 0x8a3   : > { %v2616_v21 = vmul.f32 %v6739_v16, %v2604_v28 }
 0x8a5   : > { %v2624_v52 = vadd.f32 %v2616_v21, %v2543_v31 }
 0x8a7   : > { %4952 = vmatmul.msk.f32.gmra.mxu0 %vm1040_vm11, %v2620_v10 }
 0x8aa   : > { %v2607_v25 = vpop.f32.mrf.mxu2 }
 0x8ab   : > { %v2617_v10 = vmul.f32 %v6733_v46, %v2607_v25 }
 0x8ad   : > { %v2625_v29 = vadd.f32 %v2617_v10, %v2544_v49 }
 0x8af   : > { %4953 = vmatmul.msk.f32.gmra.mxu0 %vm1040_vm11, %v2621_v30 }
 0x8b7   : > { %4954 = vmatmul.msk.f32.gmra.mxu0 %vm1040_vm11, %v2622_v33 }
 0x8bf   : > { %4955 = vmatmul.msk.f32.gmra.mxu0 %vm1040_vm11, %v2623_v11 }
 0x8c7   : > { %4956 = vmatmul.msk.f32.gmra.mxu0 %vm1040_vm11, %v2624_v52 }
 0x8cf   : > { %4957 = vmatmul.msk.f32.gmra.mxu0 %vm1040_vm11, %v2625_v29 }
 0x8d7   : > { %4993 = vmatmul.msk.f32.vlgmr.msra.gmra.mxu0 %vm636_vm0, %v5728_v60 }
 0x8df   : > { %4994 = vmatmul.msk.f32.gmra.mxu0 %vm636_vm0, %v5750_v14 }
 0x8e7   : > { %4995 = vmatmul.msk.f32.gmra.mxu0 %vm636_vm0, %v5765_v35 }
 0x8ef   : > { %4996 = vmatmul.msk.f32.gmra.mxu0 %vm636_vm0, %v5781_v39 }
 0x8f7   : > { %4997 = vmatmul.msk.f32.gmra.mxu0 %vm636_vm0, %v5770_v37 }
 0x8ff   : > { %4998 = vmatmul.msk.f32.gmra.mxu0 %vm636_vm0, %v5784_v40 }
 0x907   : > { %4999 = vmatmul.msk.f32.gmra.mxu0 %vm636_vm0, %v5795_v47 }
 0x90f   : > { %5000 = vmatmul.msk.f32.gmra.mxu0 %vm636_vm0, %v5850_v9 }
 0x914   : > { %v2780_v1 = vpop.f32.mrf.mxu0 }
 0x915   : > { %v2804_v55 = vmul.f32 0.35355338, %v2780_v1  ;;  %v5156_v1 = vld [vmem:[%s7779_s6 + $0x3] ss:$0 sm:$0xff] }
 0x917   : > { %v2812_v54 = vsel %vm1308_vm12, %v2804_v55, -inf }
 0x918   : > { %2813 = vmax.xlane.f32.xlu0 %v2812_v54 }
 0x91c   : > { %v2783_v38 = vpop.f32.mrf.mxu0 }
 0x91d   : > { %v2805_v30 = vmul.f32 0.35355338, %v2783_v38 }
 0x91f   : > { %v2815_v17 = vsel %vm1308_vm12, %v2805_v30, -inf }
 0x920   : > { %2816 = vmax.xlane.f32.xlu1 %v2815_v17 }
 0x924   : > { %v2786_v43 = vpop.f32.mrf.mxu0 }
 0x925   : > { %v6901_v59 = vmul.f32 0.35355338, %v2786_v43 }
 0x927   : > { %v2818_v53 = vsel %vm1308_vm12, %v6901_v59, -inf }
 0x928   : > { %2819 = vmax.xlane.f32.xlu2 %v2818_v53 }
 0x92c   : > { %v2789_v63 = vpop.f32.mrf.mxu0 }
 0x92d   : > { %v6905_v57 = vmul.f32 0.35355338, %v2789_v63 }
 0x92f   : > { %v2821_v22 = vsel %vm1308_vm12, %v6905_v57, -inf }
 0x930   : > { %2822 = vmax.xlane.f32.xlu0 %v2821_v22 }
 0x934   : > { %v2792_v33 = vpop.f32.mrf.mxu0 }
 0x935   : > { %v6909_v61 = vmul.f32 0.35355338, %v2792_v33 }
 0x937   : > { %v2824_v26 = vsel %vm1308_vm12, %v6909_v61, -inf }
 0x938   : > { %2825 = vmax.xlane.f32.xlu1 %v2824_v26 }
 0x93c   : > { %v2795_v28 = vpop.f32.mrf.mxu0 }
 0x93d   : > { %v6913_v11 = vmul.f32 0.35355338, %v2795_v28 }
 0x93f   : > { %v2827_v21 = vsel %vm1308_vm12, %v6913_v11, -inf }
 0x940   : > { %2828 = vmax.xlane.f32.xlu2 %v2827_v21 }
 0x944   : > { %v2798_v31 = vpop.f32.mrf.mxu0 }
 0x945   : > { %v6917_v52 = vmul.f32 0.35355338, %v2798_v31 }
 0x947   : > { %v2830_v25 = vsel %vm1308_vm12, %v6917_v52, -inf }
 0x948   : > { %2831 = vmax.xlane.f32.xlu0 %v2830_v25 }
 0x94c   : > { %v2801_v10 = vpop.f32.mrf.mxu0 }
 0x94d   : > { %v6921_v49 = vmul.f32 0.35355338, %v2801_v10 }
 0x94f   : > { %v2833_v29 = vsel %vm1308_vm12, %v6921_v49, -inf }
 0x950   : > { %2834 = vmax.xlane.f32.xlu2 %v2833_v29 }
 0x954   : > { %v3222_v54 = vpop.f32.mrf.mxu0 }
 0x955   : > { %v6928_v38 = vadd.f32 %v5156_v1, %v3222_v54  ;;  %v6956_v54 = vpop.f32.mrf.mxu3 }
 0x957   : > { %5022 = vmatmul.msk.f32.vlgmr.msrb.gmra.mxu3 %vm1040_vm11, %v6928_v38 }
 0x95c   : > { %v3225_v17 = vpop.f32.mrf.mxu0 }
 0x95d   : > { %v6932_v43 = vadd.f32 %v5156_v1, %v3225_v17 }
 0x95f   : > { %5023 = vmatmul.msk.f32.gmra.mxu3 %vm1040_vm11, %v6932_v43 }
 0x964   : > { %v3228_v53 = vpop.f32.mrf.mxu0 }
 0x965   : > { %v6936_v63 = vadd.f32 %v5156_v1, %v3228_v53 }
 0x967   : > { %5024 = vmatmul.msk.f32.gmra.mxu3 %vm1040_vm11, %v6936_v63 }
 0x96c   : > { %v3231_v22 = vpop.f32.mrf.mxu0 }
 0x96d   : > { %v6940_v33 = vadd.f32 %v5156_v1, %v3231_v22 }
 0x96f   : > { %5025 = vmatmul.msk.f32.gmra.mxu3 %vm1040_vm11, %v6940_v33 }
 0x974   : > { %v3234_v26 = vpop.f32.mrf.mxu0 }
 0x975   : > { %v6944_v28 = vadd.f32 %v5156_v1, %v3234_v26 }
 0x977   : > { %5026 = vmatmul.msk.f32.gmra.mxu3 %vm1040_vm11, %v6944_v28 }
 0x97c   : > { %v3237_v21 = vpop.f32.mrf.mxu0 }
 0x97d   : > { %v6948_v31 = vadd.f32 %v5156_v1, %v3237_v21 }
 0x97f   : > { %5027 = vmatmul.msk.f32.gmra.mxu3 %vm1040_vm11, %v6948_v31 }
 0x984   : > { %v3240_v25 = vpop.f32.mrf.mxu0 }
 0x985   : > { %v6952_v10 = vadd.f32 %v5156_v1, %v3240_v25  ;;  %v6964_v25 = vpop.f32.mrf.mxu3 }
 0x987   : > { %5028 = vmatmul.msk.f32.gmra.mxu3 %vm1040_vm11, %v6952_v10 }
 0x98b   : > { %v2814_v29 = vpop.xlane.xlu0 %2813 }
 0x98c   : > { %v2836_v17 = vsub.f32 %v2804_v55, %v2814_v29  ;;  %v3243_v53 = vpop.f32.mrf.mxu0 }
 0x98d   : > { %v6958_v22 = vadd.f32 %v5156_v1, %v3243_v53 }
 0x98e   : > { %v2844_v26 = vmul.f32 1.442695, %v2836_v17 }
 0x98f   : > { %5029 = vmatmul.msk.f32.gmra.mxu3 %vm1040_vm11, %v6958_v22 }
 0x990   : > { %5245 = vpow2.f32 %v2844_v26 }
 0x993   : > { %v2817_v21 = vpop.xlane.xlu1 %2816 }
 0x994   : > { %v2837_v27 = vsub.f32 %v2805_v30, %v2817_v21  ;;  %v6973_v30 = vpop.f32.mrf.mxu3 }
 0x996   : > { %v6962_v48 = vpop.eup %5245  ;;  %v2846_v8 = vmul.f32 1.442695, %v2837_v27 }
 0x997   : > { %v2860_v3 = vsel %vm1308_vm12, %v6962_v48, 0.0 }
 0x998   : > { %5247 = vpow2.f32 %v2846_v8  ;;  %2861 = vadd.xlane.f32.xlu1 %v2860_v3 }
 0x99b   : > { %v2820_v55 = vpop.xlane.xlu2 %2819 }
 0x99c   : > { %v2838_v1 = vsub.f32 %v6901_v59, %v2820_v55  ;;  %v6980_v59 = vpop.f32.mrf.mxu3 }
 0x99e   : > { %v6969_v29 = vpop.eup %5247  ;;  %v2848_v17 = vmul.f32 1.442695, %v2838_v1 }
 0x99f   : > { %v2863_v53 = vsel %vm1308_vm12, %v6969_v29, 0.0 }
 0x9a0   : > { %5249 = vpow2.f32 %v2848_v17  ;;  %2864 = vadd.xlane.f32.xlu0 %v2863_v53 }
 0x9a3   : > { %v2823_v26 = vpop.xlane.xlu0 %2822 }
 0x9a4   : > { %v2839_v27 = vsub.f32 %v6905_v57, %v2823_v26  ;;  %v6987_v26 = vpop.f32.mrf.mxu3 }
 0x9a6   : > { %v6976_v21 = vpop.eup %5249  ;;  %v2850_v8 = vmul.f32 1.442695, %v2839_v27 }
 0x9a7   : > { %v2866_v3 = vsel %vm1308_vm12, %v6976_v21, 0.0 }
 0x9a8   : > { %5251 = vpow2.f32 %v2850_v8  ;;  %2867 = vadd.xlane.f32.xlu1 %v2866_v3 }
 0x9ab   : > { %v2826_v55 = vpop.xlane.xlu1 %2825 }
 0x9ac   : > { %v2840_v1 = vsub.f32 %v6909_v61, %v2826_v55 }
 0x9ae   : > { %v6983_v41 = vpop.eup %5251  ;;  %v2852_v17 = vmul.f32 1.442695, %v2840_v1 }
 0x9af   : > { %v2869_v53 = vsel %vm1308_vm12, %v6983_v41, 0.0 }
 0x9b0   : > { %5253 = vpow2.f32 %v2852_v17  ;;  %2870 = vadd.xlane.f32.xlu2 %v2869_v53  ;;  %v6997_v17 = vpop.f32.mrf.mxu3 }
 0x9b3   : > { %v2829_v57 = vpop.xlane.xlu2 %2828 }
 0x9b4   : > { %v2841_v27 = vsub.f32 %v6913_v11, %v2829_v57 }
 0x9b6   : > { %v6990_v8 = vpop.eup %5253  ;;  %v2854_v3 = vmul.f32 1.442695, %v2841_v27 }
 0x9b7   : > { %v2872_v0 = vsel %vm1308_vm12, %v6990_v8, 0.0 }
 0x9b8   : > { %5255 = vpow2.f32 %v2854_v3  ;;  %2873 = vadd.xlane.f32.xlu0 %v2872_v0 }
 0x9bb   : > { %v2832_v61 = vpop.xlane.xlu0 %2831 }
 0x9bc   : > { %v2842_v55 = vsub.f32 %v6917_v52, %v2832_v61  ;;  %v7006_v52 = vpop.f32.mrf.mxu3 }
 0x9be   : > { %v6995_v1 = vpop.eup %5255  ;;  %v2856_v53 = vmul.f32 1.442695, %v2842_v55 }
 0x9bf   : > { %v2875_v58 = vsel %vm1308_vm12, %v6995_v1, 0.0 }
 0x9c0   : > { %5257 = vpow2.f32 %v2856_v53  ;;  %2876 = vadd.xlane.f32.xlu1 %v2875_v58 }
 0x9c3   : > { %v2835_v11 = vpop.xlane.xlu2 %2834 }
 0x9c4   : > { %v2843_v57 = vsub.f32 %v6921_v49, %v2835_v11  ;;  %v7012_v58 = vpop.f32.mrf.mxu3  ;;  %v3386_v49 = vmul.f32 %v6833_v42, %v6928_v38 }
 0x9c6   : > { %v7002_v27 = vpop.eup %5257  ;;  %v2858_v3 = vmul.f32 1.442695, %v2843_v57 }
 0x9c7   : > { %v2878_v0 = vsel %vm1308_vm12, %v7002_v27, 0.0 }
 0x9c8   : > { %5259 = vpow2.f32 %v2858_v3  ;;  %2879 = vadd.xlane.f32.xlu2 %v2878_v0  ;;  %v3387_v3 = vmul.f32 %v6818_v20, %v6932_v43 }
 0x9ce   : > { %v7008_v61 = vpop.eup %5259 }
 0x9cf   : > { %v2881_v55 = vsel %vm1308_vm12, %v7008_v61, 0.0 }
 0x9d0   : > { %2882 = vadd.xlane.f32.xlu0 %v2881_v55 }
 0x9da   : > { %v3435_v53 = vpop.f32.mrf.mxu3 }
 0x9db   : > { %v3459_v11 = vmul.f32 %v6826_v4, %v3435_v53 }
 0x9dd   : > { %v7017_v57 = vadd.f32 %v3459_v11, %v3386_v49  ;;  %v3393_v49 = vmul.f32 %v6727_v19, %v6958_v22 }
 0x9e2   : > { %v3438_v13 = vpop.f32.mrf.mxu3 }
 0x9e3   : > { %v3460_v0 = vmul.f32 %v6811_v32, %v3438_v13  ;;  %v3392_v32 = vmul.f32 %v6747_v6, %v6952_v10 }
 0x9e5   : > { %v7022_v50 = vadd.f32 %v3460_v0, %v3387_v3 }
 0x9ea   : > { %v7024_v24 = vpop.f32.mrf.mxu3 }
 0x9f2   : > { %v3444_v55 = vpop.f32.mrf.mxu3 }
 0x9fa   : > { %v3447_v34 = vpop.f32.mrf.mxu3 }
 0xa02   : > { %v3450_v36 = vpop.f32.mrf.mxu3 }
 0xa03   : > { %v3464_v19 = vmul.f32 %v6755_v15, %v3450_v36 }
 0xa0a   : > { %v3453_v62 = vpop.f32.mrf.mxu3 }
 0xa0b   : > { %v2862_v12 = vpop.xlane.xlu1 %2861  ;;  %v3465_v13 = vmul.f32 %v6739_v16, %v3453_v62  ;;  %v3391_v62 = vmul.f32 %v6761_v5, %v6948_v31 }
 0xa0c   : > { %5261 = vrcp.f32 %v2862_v12  ;;  %v2895_v56 = vand.u32 2147483648, %v2862_v12  ;;  %v2893_v4 = vand.u32 2147483647, %v2862_v12  ;;  %vm2889_vm13 = vweird.f32 %v2862_v12 }
 0xa0d   : > { %v3473_v22 = vadd.f32 %v3465_v13, %v3392_v32  ;;  %v3472_v36 = vadd.f32 %v3464_v19, %v3391_v62 }
 0xa0e   : > { %vm2894_vm15 = vcmp.eq.f32.partialorder %v2893_v4, 8.507059e+37 }
 0xa12   : > { %v5262_v38 = vpop.eup %5261  ;;  %v3456_v53 = vpop.f32.mrf.mxu3 }
 0xa13   : > { %v2885_v11 = vmul.f32 %v5262_v38, %v2862_v12  ;;  %v3466_v43 = vmul.f32 %v6733_v46, %v3456_v53  ;;  %v2865_v51 = vpop.xlane.xlu0 %2864  ;;  %vm2890_vm10 = vweird.f32 %v5262_v38  ;;  %v2896_v53 = vor.u32 1.1754944e-38, %v2895_v56 }
 0xa14   : > { %5263 = vrcp.f32 %v2865_v51  ;;  %vm2891_vm14 = vmor %vm2889_vm13, %vm2890_vm10  ;;  %v3390_v56 = vmul.f32 %v6775_v44, %v6944_v28  ;;  %v2910_v31 = vand.u32 2147483648, %v2865_v51  ;;  %v2908_v4 = vand.u32 2147483647, %v2865_v51 }
 0xa15   : > { %v2886_v3 = vsub.f32 1.0, %v2885_v11  ;;  %v3474_v0 = vadd.f32 %v3466_v43, %v3393_v49  ;;  %v3463_v43 = vmul.f32 %v6769_v7, %v3447_v34  ;;  %vm2904_vm2 = vweird.f32 %v2865_v51 }
 0xa16   : > { %vm2909_vm4 = vcmp.eq.f32.partialorder %v2908_v4, 8.507059e+37 }
 0xa17   : > { %v2887_v20 = vmul.f32 %v5262_v38, %v2886_v3  ;;  %5030 = vmatpush.xpose.msk.msrb.mxu0 %vm1040_vm11, %v3474_v0  ;;  %v2911_v3 = vor.u32 1.1754944e-38, %v2910_v31 }
 0xa19   : > { %v2888_v42 = vadd.f32 %v5262_v38, %v2887_v20 }
 0xa1a   : > { %v5264_v46 = vpop.eup %5263 }
 0xa1b   : > { %v2892_v16 = vsel %vm2891_vm14, %v5262_v38, %v2888_v42  ;;  %v2900_v49 = vmul.f32 %v5264_v46, %v2865_v51  ;;  %v2868_v10 = vpop.xlane.xlu1 %2867  ;;  %5031 = vmatpush.xpose.msk.msrb.mxu0 %vm1040_vm11, %v3473_v22  ;;  %vm2905_vm1 = vweird.f32 %v5264_v46  ;;  %v3462_v42 = vmul.f32 %v6783_v18, %v3444_v55 }
 0xa1c   : > { %v2897_v11 = vsel %vm2894_vm15, %v2896_v53, %v2892_v16  ;;  %5265 = vrcp.f32 %v2868_v10  ;;  %v3471_v38 = vadd.f32 %v3463_v43, %v3390_v56  ;;  %vm2906_vm3 = vmor %vm2904_vm2, %vm2905_vm1  ;;  %v3461_v22 = vmul.f32 %v6797_v23, %v7024_v24 }
 0xa1d   : > { %v2898_v32 = vmul.f32 %v6962_v48, %v2897_v11  ;;  %v2901_v12 = vsub.f32 1.0, %v2900_v49  ;;  %v3389_v48 = vmul.f32 %v6789_v2, %v6940_v33  ;;  %v3388_v16 = vmul.f32 %v6803_v45, %v6936_v63 }
 0xa1e   : > { %v2925_v49 = vand.u32 2147483648, %v2868_v10  ;;  %v2923_v11 = vand.u32 2147483647, %v2868_v10  ;;  %vm2919_vm6 = vweird.f32 %v2868_v10 }
 0xa1f   : > { %v2902_v20 = vmul.f32 %v5264_v46, %v2901_v12  ;;  %4958 = vmatmul.msk.f32.vlgmr.msra.gmra.mxu1 %vm1308_vm12, %v2898_v32  ;;  %5032 = vmatpush.xpose.msk.msrb.mxu0 %vm1040_vm11, %v3472_v36  ;;  %v3470_v55 = vadd.f32 %v3462_v42, %v3389_v48 }
 0xa20   : > { %v2926_v36 = vor.u32 1.1754944e-38, %v2925_v49  ;;  %vm2924_vm8 = vcmp.eq.f32.partialorder %v2923_v11, 8.507059e+37  ;;  %v5001_v11 = vld [vmem:[%s7771_s7 + $0x60] sm:$0xff] }
 0xa21   : > { %v2903_v13 = vadd.f32 %v5264_v46, %v2902_v20 }
 0xa22   : > { %v5266_v34 = vpop.eup %5265 }
 0xa23   : > { %v2915_v28 = vmul.f32 %v5266_v34, %v2868_v10  ;;  %5033 = vmatpush.xpose.msk.msrb.mxu0 %vm1040_vm11, %v3471_v38  ;;  %v2871_v0 = vpop.xlane.xlu2 %2870  ;;  %v2907_v19 = vsel %vm2906_vm3, %v5264_v46, %v2903_v13  ;;  %vm2920_vm5 = vweird.f32 %v5266_v34  ;;  %v3469_v46 = vadd.f32 %v3461_v22, %v3388_v16 }
 0xa24   : > { %5267 = vrcp.f32 %v2871_v0  ;;  %v2912_v62 = vsel %vm2909_vm4, %v2911_v3, %v2907_v19  ;;  %vm2921_vm7 = vmor %vm2919_vm6, %vm2920_vm5  ;;  %v2940_v4 = vand.u32 2147483648, %v2871_v0  ;;  %v2938_v10 = vand.u32 2147483647, %v2871_v0 }
 0xa25   : > { %v2916_v53 = vsub.f32 1.0, %v2915_v28  ;;  %v2913_v51 = vmul.f32 %v6969_v29, %v2912_v62  ;;  %vm2934_vm10 = vweird.f32 %v2871_v0 }
 0xa26   : > { %v2941_v13 = vor.u32 1.1754944e-38, %v2940_v4  ;;  %vm2939_vm14 = vcmp.eq.f32.partialorder %v2938_v10, 8.507059e+37 }
 0xa27   : > { %v2917_v33 = vmul.f32 %v5266_v34, %v2916_v53  ;;  %5034 = vmatpush.xpose.msk.msrb.mxu0 %vm1040_vm11, %v3470_v55  ;;  %4959 = vmatmul.msk.f32.gmra.mxu1 %vm1308_vm12, %v2913_v51 }
 0xa29   : > { %v2918_v43 = vadd.f32 %v5266_v34, %v2917_v33 }
 0xa2a   : > { %v5268_v24 = vpop.eup %5267 }
 0xa2b   : > { %v2930_v32 = vmul.f32 %v5268_v24, %v2871_v0  ;;  %v2874_v12 = vpop.xlane.xlu0 %2873  ;;  %5035 = vmatpush.xpose.msk.msrb.mxu0 %vm1040_vm11, %v3469_v46  ;;  %v2922_v29 = vsel %vm2921_vm7, %v5266_v34, %v2918_v43  ;;  %vm2935_vm9 = vweird.f32 %v5268_v24  ;;  %v5004_v0 = vld [vmem:[%s7771_s7 + $0x78] sm:$0xff] }
 0xa2c   : > { %5269 = vrcp.f32 %v2874_v12  ;;  %v2927_v56 = vsel %vm2924_vm8, %v2926_v36, %v2922_v29  ;;  %vm2936_vm13 = vmor %vm2934_vm10, %vm2935_vm9  ;;  %v2955_v22 = vand.u32 2147483648, %v2874_v12  ;;  %v2953_v55 = vand.u32 2147483647, %v2874_v12  ;;  %3268 = vmatpush.msrb.mxu1 %v5004_v0 }
 0xa2d   : > { %v2931_v63 = vsub.f32 1.0, %v2930_v32  ;;  %v2928_v20 = vmul.f32 %v6976_v21, %v2927_v56  ;;  %vm2949_vm1 = vweird.f32 %v2874_v12 }
 0xa2e   : > { %v2956_v51 = vor.u32 1.1754944e-38, %v2955_v22  ;;  %vm2954_vm3 = vcmp.eq.f32.partialorder %v2953_v55, 8.507059e+37 }
 0xa2f   : > { %v2932_v31 = vmul.f32 %v5268_v24, %v2931_v63  ;;  %5036 = vmatpush.xpose.msk.msrb.mxu0 %vm1040_vm11, %v7022_v50  ;;  %4960 = vmatmul.msk.f32.gmra.mxu1 %vm1308_vm12, %v2928_v20 }
 0xa31   : > { %v2933_v42 = vadd.f32 %v5268_v24, %v2932_v31 }
 0xa32   : > { %v5270_v38 = vpop.eup %5269 }
 0xa33   : > { %v2945_v34 = vmul.f32 %v5270_v38, %v2874_v12  ;;  %v2877_v48 = vpop.xlane.xlu1 %2876  ;;  %5037 = vmatpush.xpose.msk.msrb.mxu0 %vm1040_vm11, %v7017_v57  ;;  %v2937_v21 = vsel %vm2936_vm13, %v5268_v24, %v2933_v42  ;;  %vm2950_vm15 = vweird.f32 %v5270_v38  ;;  %v5003_v57 = vld [vmem:[%s7771_s7 + $0x70] sm:$0xff] }
 0xa34   : > { %5271 = vrcp.f32 %v2877_v48  ;;  %v2942_v28 = vsel %vm2939_vm14, %v2941_v13, %v2937_v21  ;;  %vm2951_vm2 = vmor %vm2949_vm1, %vm2950_vm15  ;;  %3269 = vmatpush.msrb.mxu1 %v5003_v57  ;;  %v2970_v32 = vand.u32 2147483648, %v2877_v48  ;;  %v2968_v12 = vand.u32 2147483647, %v2877_v48 }
 0xa35   : > { %v2946_v3 = vsub.f32 1.0, %v2945_v34  ;;  %v2943_v50 = vmul.f32 %v6983_v41, %v2942_v28  ;;  %v5002_v41 = vld [vmem:[%s7771_s7 + $0x68] sm:$0xff]  ;;  %vm2964_vm5 = vweird.f32 %v2877_v48 }
 0xa36   : > { %3270 = vmatpush.msrb.mxu1 %v5002_v41  ;;  %v2971_v56 = vor.u32 1.1754944e-38, %v2970_v32  ;;  %vm2969_vm7 = vcmp.eq.f32.partialorder %v2968_v12, 8.507059e+37 }
 0xa37   : > { %v2947_v19 = vmul.f32 %v5270_v38, %v2946_v3  ;;  %4961 = vmatmul.msk.f32.gmra.mxu1 %vm1308_vm12, %v2943_v50 }
 0xa38   : > { %3271 = vmatpush.msrb.mxu1 %v5001_v11 }
 0xa39   : > { %v2948_v53 = vadd.f32 %v5270_v38, %v2947_v19 }
 0xa3a   : > { %v5272_v62 = vpop.eup %5271 }
 0xa3b   : > { %v2960_v16 = vmul.f32 %v5272_v62, %v2877_v48  ;;  %v2880_v33 = vpop.xlane.xlu2 %2879  ;;  %v2952_v49 = vsel %vm2951_vm2, %v5270_v38, %v2948_v53  ;;  %vm2965_vm4 = vweird.f32 %v5272_v62 }
 0xa3c   : > { %5273 = vrcp.f32 %v2880_v33  ;;  %v2957_v43 = vsel %vm2954_vm3, %v2956_v51, %v2952_v49  ;;  %vm2966_vm6 = vmor %vm2964_vm5, %vm2965_vm4  ;;  %v2983_v34 = vand.u32 2147483647, %v2880_v33  ;;  %vm2979_vm9 = vweird.f32 %v2880_v33 }
 0xa3d   : > { %v2961_v46 = vsub.f32 1.0, %v2960_v16  ;;  %v2958_v24 = vmul.f32 %v6990_v8, %v2957_v43  ;;  %v2985_v8 = vand.u32 2147483648, %v2880_v33 }
 0xa3e   : > { %vm2984_vm13 = vcmp.eq.f32.partialorder %v2983_v34, 8.507059e+37 }
 0xa3f   : > { %v2962_v36 = vmul.f32 %v5272_v62, %v2961_v46  ;;  %4962 = vmatmul.msk.f32.gmra.mxu1 %vm1308_vm12, %v2958_v24  ;;  %v2986_v3 = vor.u32 1.1754944e-38, %v2985_v8 }
 0xa41   : > { %v2963_v29 = vadd.f32 %v5272_v62, %v2962_v36 }
 0xa42   : > { %v5274_v63 = vpop.eup %5273 }
 0xa43   : > { %v2975_v20 = vmul.f32 %v5274_v63, %v2880_v33  ;;  %v2883_v31 = vpop.xlane.xlu0 %2882  ;;  %v2967_v4 = vsel %vm2966_vm6, %v5272_v62, %v2963_v29  ;;  %vm2980_vm8 = vweird.f32 %v5274_v63  ;;  %v5358_v33 = vld [vmem:[%s7727_s11] sm:$0xff] }
 0xa44   : > { %5275 = vrcp.f32 %v2883_v31  ;;  %v2972_v42 = vsel %vm2969_vm7, %v2971_v56, %v2967_v4  ;;  %vm2981_vm10 = vmor %vm2979_vm9, %vm2980_vm8  ;;  %v3000_v0 = vand.u32 2147483648, %v2883_v31  ;;  %vm2994_vm15 = vweird.f32 %v2883_v31 }
 0xa45   : > { %v2976_v10 = vsub.f32 1.0, %v2975_v20  ;;  %v2973_v38 = vmul.f32 %v6995_v1, %v2972_v42  ;;  %v2998_v1 = vand.u32 2147483647, %v2883_v31 }
 0xa46   : > { %v3001_v62 = vor.u32 1.1754944e-38, %v3000_v0  ;;  %v7805_v0 = vld [vmem:[#allocation30_spill] sm:$0xff] }
 0xa47   : > { %v2977_v13 = vmul.f32 %v5274_v63, %v2976_v10  ;;  %4963 = vmatmul.msk.f32.gmra.mxu1 %vm1308_vm12, %v2973_v38  ;;  %vm2999_vm2 = vcmp.eq.f32.partialorder %v2998_v1, 8.507059e+37 }
 0xa49   : > { %v2978_v21 = vadd.f32 %v5274_v63, %v2977_v13 }
 0xa4a   : > { %v5276_v48 = vpop.eup %5275 }
 0xa4b   : > { %v2990_v28 = vmul.f32 %v5276_v48, %v2883_v31  ;;  %v2982_v50 = vsel %vm2981_vm10, %v5274_v63, %v2978_v21  ;;  %vm2995_vm14 = vweird.f32 %v5276_v48 }
 0xa4c   : > { %v2987_v19 = vsel %vm2984_vm13, %v2986_v3, %v2982_v50  ;;  %vm2996_vm1 = vmor %vm2994_vm15, %vm2995_vm14 }
 0xa4d   : > { %v2991_v22 = vsub.f32 1.0, %v2990_v28  ;;  %v2988_v55 = vmul.f32 %v7002_v27, %v2987_v19  ;;  %v4966_v27 = vld [vmem:[%s7728_s12 + $0x10] sm:$0xff] }
 0xa4e   : > { %3110 = vmatpush.msra.mxu2 %v4966_v27 }
 0xa4f   : > { %v2992_v57 = vmul.f32 %v5276_v48, %v2991_v22  ;;  %4964 = vmatmul.msk.f32.gmra.mxu1 %vm1308_vm12, %v2988_v55  ;;  %v7804_v22 = vld [vmem:[#allocation31_spill] sm:$0xff] }
 0xa50   : > { %3344 = vmatpush.msrb.mxu2 %v5358_v33 }
 0xa51   : > { %v2993_v53 = vadd.f32 %v5276_v48, %v2992_v57 }
 0xa53   : > { %v2997_v41 = vsel %vm2996_vm1, %v5276_v48, %v2993_v53 }
 0xa54   : > { %v3002_v51 = vsel %vm2999_vm2, %v3001_v62, %v2997_v41  ;;  %v7806_v62 = vld [vmem:[#allocation29_spill] sm:$0xff] }
 0xa55   : > { %v3003_v16 = vmul.f32 %v7008_v61, %v3002_v51  ;;  %v5155_v61 = vld [vmem:[%s7777_s28 + $0x3] ss:$0 sm:$0xff]  ;;  %v7807_v51 = vld [vmem:[#allocation28_spill] sm:$0xff] }
 0xa56   : > { %v3172_v49 = vadd.f32 %v5155_v61, %v6956_v54  ;;  %v3175_v46 = vadd.f32 %v5155_v61, %v6964_v25  ;;  %v3178_v24 = vadd.f32 %v5155_v61, %v6973_v30  ;;  %v3181_v32 = vadd.f32 %v5155_v61, %v6980_v59 }
 0xa57   : > { %4965 = vmatmul.msk.f32.gmra.mxu1 %vm1308_vm12, %v3003_v16  ;;  %v3184_v54 = vadd.f32 %v5155_v61, %v6987_v26  ;;  %v3187_v25 = vadd.f32 %v5155_v61, %v6997_v17  ;;  %v3190_v30 = vadd.f32 %v5155_v61, %v7006_v52  ;;  %v7131_v59 = vadd.f32 %v5155_v61, %v7012_v58  ;;  %v5157_v26 = vld [vmem:[%s7778_s8 + $0x3] ss:$0 sm:$0xff] }
 0xa58   : > { %v3297_v55 = vmul.f32 %v7804_v22, %v3172_v49  ;;  %v3298_v41 = vmul.f32 %v7806_v62, %v3175_v46 }
 0xa59   : > { %v3301_v61 = vmul.f32 %v6775_v44, %v3184_v54  ;;  %v5359_v44 = vld [vmem:[%s7726_s10 + $0x30] sm:$0xff] }
 0xa5f   : > { %5006 = vmatmul.msk.f32.vlgmr.msrb.gmra.mxu1 %vm636_vm0, %v5728_v60 }
 0xa67   : > { %5007 = vmatmul.msk.f32.gmra.mxu1 %vm636_vm0, %v5750_v14 }
 0xa6f   : > { %5008 = vmatmul.msk.f32.gmra.mxu1 %vm636_vm0, %v5765_v35 }
 0xa77   : > { %5009 = vmatmul.msk.f32.gmra.mxu1 %vm636_vm0, %v5781_v39 }
 0xa7f   : > { %5010 = vmatmul.msk.f32.gmra.mxu1 %vm636_vm0, %v5770_v37 }
 0xa87   : > { %5011 = vmatmul.msk.f32.gmra.mxu1 %vm636_vm0, %v5784_v40 }
 0xa8f   : > { %5012 = vmatmul.msk.f32.gmra.mxu1 %vm636_vm0, %v5795_v47 }
 0xa97   : > { %5013 = vmatmul.msk.f32.gmra.mxu1 %vm636_vm0, %v5850_v9 }
 0xa9c   : > { %v3045_v60 = vpop.f32.mrf.mxu1 }
 0xa9d   : > { %4967 = vmatmul.msk.f32.vlgmr.msra.gmra.mxu2 %vm1040_vm11, %v3045_v60  ;;  %v3299_v60 = vmul.f32 %v6803_v45, %v3178_v24  ;;  %v3302_v45 = vmul.f32 %v6761_v5, %v3187_v25  ;;  %v5360_v5 = vld [vmem:[%s7725_s9 + $0x38] sm:$0xff] }
 0xaa4   : > { %v3048_v14 = vpop.f32.mrf.mxu1 }
 0xaa5   : > { %4968 = vmatmul.msk.f32.gmra.mxu2 %vm1040_vm11, %v3048_v14 }
 0xaac   : > { %v3051_v35 = vpop.f32.mrf.mxu1 }
 0xaad   : > { %4969 = vmatmul.msk.f32.gmra.mxu2 %vm1040_vm11, %v3051_v35 }
 0xab4   : > { %v3054_v39 = vpop.f32.mrf.mxu1 }
 0xab5   : > { %4970 = vmatmul.msk.f32.gmra.mxu2 %vm1040_vm11, %v3054_v39 }
 0xabc   : > { %v3057_v37 = vpop.f32.mrf.mxu1 }
 0xabd   : > { %4971 = vmatmul.msk.f32.gmra.mxu2 %vm1040_vm11, %v3057_v37  ;;  %v3300_v37 = vmul.f32 %v6789_v2, %v3181_v32  ;;  %v3303_v2 = vmul.f32 %v6747_v6, %v3190_v30 }
 0xac4   : > { %v3060_v40 = vpop.f32.mrf.mxu1 }
 0xac5   : > { %4972 = vmatmul.msk.f32.gmra.mxu2 %vm1040_vm11, %v3060_v40 }
 0xacc   : > { %v3063_v47 = vpop.f32.mrf.mxu1 }
 0xacd   : > { %4973 = vmatmul.msk.f32.gmra.mxu2 %vm1040_vm11, %v3063_v47 }
 0xad4   : > { %v3066_v9 = vpop.f32.mrf.mxu1 }
 0xad5   : > { %4974 = vmatmul.msk.f32.gmra.mxu2 %vm1040_vm11, %v3066_v9 }
 0xadc   : > { %v3273_v11 = vpop.f32.mrf.mxu1 }
 0xadd   : > { %5014 = vmatmul.msk.f32.vlgmr.msrb.gmra.mxu2 %vm1040_vm11, %v3172_v49  ;;  %v3274_v38 = vadd.f32 %v5157_v26, %v3273_v11 }
 0xae4   : > { %v3276_v43 = vpop.f32.mrf.mxu1 }
 0xae5   : > { %5015 = vmatmul.msk.f32.gmra.mxu2 %vm1040_vm11, %v3175_v46  ;;  %v3277_v8 = vadd.f32 %v5157_v26, %v3276_v43 }
 0xaec   : > { %v3279_v36 = vpop.f32.mrf.mxu1 }
 0xaed   : > { %5016 = vmatmul.msk.f32.gmra.mxu2 %vm1040_vm11, %v3178_v24  ;;  %v3280_v42 = vadd.f32 %v5157_v26, %v3279_v36 }
 0xaf4   : > { %v3282_v12 = vpop.f32.mrf.mxu1 }
 0xaf5   : > { %5017 = vmatmul.msk.f32.gmra.mxu2 %vm1040_vm11, %v3181_v32  ;;  %v3283_v10 = vadd.f32 %v5157_v26, %v3282_v12  ;;  %v5361_v32 = vld [vmem:[%s7726_s10 + $0x38] sm:$0xff] }
 0xafc   : > { %v3285_v29 = vpop.f32.mrf.mxu1 }
 0xafd   : > { %5018 = vmatmul.msk.f32.gmra.mxu2 %vm1040_vm11, %v3184_v54  ;;  %v3286_v52 = vadd.f32 %v5157_v26, %v3285_v29 }
 0xb04   : > { %v3288_v63 = vpop.f32.mrf.mxu1 }
 0xb05   : > { %5019 = vmatmul.msk.f32.gmra.mxu2 %vm1040_vm11, %v3187_v25  ;;  %v3289_v4 = vadd.f32 %v5157_v26, %v3288_v63 }
 0xb0c   : > { %v3291_v56 = vpop.f32.mrf.mxu1 }
 0xb0d   : > { %5020 = vmatmul.msk.f32.gmra.mxu2 %vm1040_vm11, %v3190_v30  ;;  %v3292_v17 = vadd.f32 %v5157_v26, %v3291_v56 }
 0xb14   : > { %v3294_v20 = vpop.f32.mrf.mxu1 }
 0xb15   : > { %v3295_v31 = vadd.f32 %v5157_v26, %v3294_v20  ;;  %5021 = vmatmul.msk.f32.gmra.mxu2 %vm1040_vm11, %v7131_v59 }
 0xb17   : > { %3796 = vmatpush.msra.mxu1 %v3295_v31 }
 0xb19   : > { %3797 = vmatpush.msra.mxu1 %v3292_v17 }
 0xb1b   : > { %3798 = vmatpush.msra.mxu1 %v3289_v4 }
 0xb1d   : > { %3799 = vmatpush.msra.mxu1 %v3286_v52 }
 0xb1f   : > { %3800 = vmatpush.msra.mxu1 %v3283_v10 }
 0xb20   : > { %v7138_v58 = vpop.f32.mrf.mxu2 }
 0xb21   : > { %3801 = vmatpush.msra.mxu1 %v3280_v42 }
 0xb23   : > { %3802 = vmatpush.msra.mxu1 %v3277_v8 }
 0xb25   : > { %3803 = vmatpush.msra.mxu1 %v3274_v38 }
 0xb28   : > { %v7140_v13 = vpop.f32.mrf.mxu2 }
 0xb30   : > { %v7142_v34 = vpop.f32.mrf.mxu2 }
 0xb38   : > { %v7144_v21 = vpop.f32.mrf.mxu2 }
 0xb40   : > { %v7146_v48 = vpop.f32.mrf.mxu2 }
 0xb48   : > { %v7148_v3 = vpop.f32.mrf.mxu2 }
 0xb50   : > { %v7150_v28 = vpop.f32.mrf.mxu2 }
 0xb58   : > { %v7152_v50 = vpop.f32.mrf.mxu2 }
 0xb60   : > { %v3346_v19 = vpop.f32.mrf.mxu2 }
 0xb61   : > { %v3370_v57 = vmul.f32 %v7805_v0, %v3346_v19 }
 0xb63   : > { %v3378_v1 = vadd.f32 %v3370_v57, %v3297_v55 }
 0xb65   : > { %5038 = vmatmul.msk.f32.vlgmr.msrb.gmra.mxu0 %vm1040_vm11, %v3378_v1 }
 0xb68   : > { %v3349_v53 = vpop.f32.mrf.mxu2 }
 0xb69   : > { %v3371_v16 = vmul.f32 %v7807_v51, %v3349_v53 }
 0xb6b   : > { %v3379_v27 = vadd.f32 %v3371_v16, %v3298_v41 }
 0xb6d   : > { %5039 = vmatmul.msk.f32.gmra.mxu0 %vm1040_vm11, %v3379_v27 }
 0xb70   : > { %v3352_v33 = vpop.f32.mrf.mxu2 }
 0xb71   : > { %v3372_v14 = vmul.f32 %v6797_v23, %v3352_v33 }
 0xb73   : > { %v3380_v35 = vadd.f32 %v3372_v14, %v3299_v60 }
 0xb75   : > { %5040 = vmatmul.msk.f32.gmra.mxu0 %vm1040_vm11, %v3380_v35 }
 0xb78   : > { %v3355_v39 = vpop.f32.mrf.mxu2 }
 0xb79   : > { %v3373_v40 = vmul.f32 %v6783_v18, %v3355_v39 }
 0xb7b   : > { %v3381_v47 = vadd.f32 %v3373_v40, %v3300_v37 }
 0xb7d   : > { %5041 = vmatmul.msk.f32.gmra.mxu0 %vm1040_vm11, %v3381_v47 }
 0xb80   : > { %v3358_v9 = vpop.f32.mrf.mxu2 }
 0xb81   : > { %v3374_v49 = vmul.f32 %v6769_v7, %v3358_v9 }
 0xb83   : > { %v3382_v11 = vadd.f32 %v3374_v49, %v3301_v61 }
 0xb85   : > { %5042 = vmatmul.msk.f32.gmra.mxu0 %vm1040_vm11, %v3382_v11 }
 0xb88   : > { %v3361_v23 = vpop.f32.mrf.mxu2 }
 0xb89   : > { %v3375_v46 = vmul.f32 %v6755_v15, %v3361_v23  ;;  %v3304_v15 = vmul.f32 %v5360_v5, %v7131_v59 }
 0xb8b   : > { %v3383_v43 = vadd.f32 %v3375_v46, %v3302_v45 }
 0xb8d   : > { %5043 = vmatmul.msk.f32.gmra.mxu0 %vm1040_vm11, %v3383_v43 }
 0xb90   : > { %v3364_v18 = vpop.f32.mrf.mxu2 }
 0xb91   : > { %v3376_v24 = vmul.f32 %v5359_v44, %v3364_v18 }
 0xb93   : > { %v3384_v7 = vadd.f32 %v3376_v24, %v3303_v2 }
 0xb95   : > { %5044 = vmatmul.msk.f32.gmra.mxu0 %vm1040_vm11, %v3384_v7 }
 0xb98   : > { %v3367_v36 = vpop.f32.mrf.mxu2 }
 0xb99   : > { %v3377_v6 = vmul.f32 %v5361_v32, %v3367_v36 }
 0xb9b   : > { %v3385_v12 = vadd.f32 %v3377_v6, %v3304_v15 }
 0xb9d   : > { %5045 = vmatmul.msk.f32.gmra.mxu0 %vm1040_vm11, %v3385_v12 }
 0xbe2   : > { %v3540_v54 = vpop.f32.mrf.mxu0 }
 0xbe3   : > { %v3564_v29 = vmul.f32 0.35355338, %v3540_v54 }
 0xbe5   : > { %v3572_v25 = vsel %vm1308_vm12, %v3564_v29, -inf }
 0xbe6   : > { %3573 = vmax.xlane.f32.xlu1 %v3572_v25 }
 0xbea   : > { %v3543_v63 = vpop.f32.mrf.mxu0 }
 0xbeb   : > { %v3565_v30 = vmul.f32 0.35355338, %v3543_v63 }
 0xbed   : > { %v3575_v56 = vsel %vm1308_vm12, %v3565_v30, -inf }
 0xbee   : > { %3576 = vmax.xlane.f32.xlu2 %v3575_v56 }
 0xbf2   : > { %v3546_v26 = vpop.f32.mrf.mxu0 }
 0xbf3   : > { %v3566_v59 = vmul.f32 0.35355338, %v3546_v26 }
 0xbf5   : > { %v3578_v20 = vsel %vm1308_vm12, %v3566_v59, -inf }
 0xbf6   : > { %3579 = vmax.xlane.f32.xlu0 %v3578_v20 }
 0xbfa   : > { %v3549_v31 = vpop.f32.mrf.mxu0 }
 0xbfb   : > { %v3567_v17 = vmul.f32 0.35355338, %v3549_v31 }
 0xbfd   : > { %v3581_v4 = vsel %vm1308_vm12, %v3567_v17, -inf }
 0xbfe   : > { %3582 = vmax.xlane.f32.xlu1 %v3581_v4 }
 0xc02   : > { %v3552_v52 = vpop.f32.mrf.mxu0 }
 0xc03   : > { %v3568_v10 = vmul.f32 0.35355338, %v3552_v52 }
 0xc05   : > { %v3584_v42 = vsel %vm1308_vm12, %v3568_v10, -inf }
 0xc06   : > { %3585 = vmax.xlane.f32.xlu2 %v3584_v42 }
 0xc0a   : > { %v3555_v8 = vpop.f32.mrf.mxu0 }
 0xc0b   : > { %v3569_v38 = vmul.f32 0.35355338, %v3555_v8 }
 0xc0d   : > { %v3587_v19 = vsel %vm1308_vm12, %v3569_v38, -inf }
 0xc0e   : > { %3588 = vmax.xlane.f32.xlu0 %v3587_v19 }
 0xc12   : > { %v3558_v22 = vpop.f32.mrf.mxu0 }
 0xc13   : > { %v3570_v55 = vmul.f32 0.35355338, %v3558_v22 }
 0xc15   : > { %v3590_v0 = vsel %vm1308_vm12, %v3570_v55, -inf }
 0xc16   : > { %3591 = vmax.xlane.f32.xlu1 %v3590_v0 }
 0xc1a   : > { %v3561_v57 = vpop.f32.mrf.mxu0 }
 0xc1b   : > { %v3571_v1 = vmul.f32 0.35355338, %v3561_v57 }
 0xc1d   : > { %v3593_v53 = vsel %vm1308_vm12, %v3571_v1, -inf }
 0xc1e   : > { %3594 = vmax.xlane.f32.xlu0 %v3593_v53 }
 0xc59   : > { %v3574_v62 = vpop.xlane.xlu1 %3573 }
 0xc5a   : > { %v3596_v41 = vsub.f32 %v3564_v29, %v3574_v62 }
 0xc5c   : > { %v3604_v51 = vmul.f32 1.442695, %v3596_v41 }
 0xc5e   : > { %5277 = vpow2.f32 %v3604_v51 }
 0xc61   : > { %v3577_v16 = vpop.xlane.xlu2 %3576 }
 0xc62   : > { %v3597_v27 = vsub.f32 %v3565_v30, %v3577_v16 }
 0xc64   : > { %v7193_v33 = vpop.eup %5277  ;;  %v3606_v60 = vmul.f32 1.442695, %v3597_v27 }
 0xc65   : > { %v3620_v14 = vsel %vm1308_vm12, %v7193_v33, 0.0 }
 0xc66   : > { %5279 = vpow2.f32 %v3606_v60  ;;  %3621 = vadd.xlane.f32.xlu2 %v3620_v14 }
 0xc69   : > { %v3580_v35 = vpop.xlane.xlu0 %3579 }
 0xc6a   : > { %v3598_v39 = vsub.f32 %v3566_v59, %v3580_v35 }
 0xc6c   : > { %v7197_v37 = vpop.eup %5279  ;;  %v3608_v40 = vmul.f32 1.442695, %v3598_v39 }
 0xc6d   : > { %v3623_v47 = vsel %vm1308_vm12, %v7197_v37, 0.0 }
 0xc6e   : > { %5281 = vpow2.f32 %v3608_v40  ;;  %3624 = vadd.xlane.f32.xlu1 %v3623_v47 }
 0xc71   : > { %v3583_v9 = vpop.xlane.xlu1 %3582 }
 0xc72   : > { %v3599_v61 = vsub.f32 %v3567_v17, %v3583_v9 }
 0xc74   : > { %v7201_v49 = vpop.eup %5281  ;;  %v3610_v11 = vmul.f32 1.442695, %v3599_v61 }
 0xc75   : > { %v3626_v23 = vsel %vm1308_vm12, %v7201_v49, 0.0 }
 0xc76   : > { %5283 = vpow2.f32 %v3610_v11  ;;  %3627 = vadd.xlane.f32.xlu2 %v3626_v23 }
 0xc79   : > { %v3586_v45 = vpop.xlane.xlu2 %3585 }
 0xc7a   : > { %v3600_v46 = vsub.f32 %v3568_v10, %v3586_v45 }
 0xc7c   : > { %v7205_v43 = vpop.eup %5283  ;;  %v3612_v18 = vmul.f32 1.442695, %v3600_v46 }
 0xc7d   : > { %v3629_v2 = vsel %vm1308_vm12, %v7205_v43, 0.0 }
 0xc7e   : > { %5285 = vpow2.f32 %v3612_v18  ;;  %3630 = vadd.xlane.f32.xlu0 %v3629_v2 }
 0xc81   : > { %v3589_v44 = vpop.xlane.xlu0 %3588 }
 0xc82   : > { %v3601_v24 = vsub.f32 %v3569_v38, %v3589_v44 }
 0xc84   : > { %v7209_v7 = vpop.eup %5285  ;;  %v3614_v36 = vmul.f32 1.442695, %v3601_v24 }
 0xc85   : > { %v3632_v5 = vsel %vm1308_vm12, %v7209_v7, 0.0 }
 0xc86   : > { %5287 = vpow2.f32 %v3614_v36  ;;  %3633 = vadd.xlane.f32.xlu1 %v3632_v5 }
 0xc89   : > { %v3592_v15 = vpop.xlane.xlu1 %3591 }
 0xc8a   : > { %v3602_v32 = vsub.f32 %v3570_v55, %v3592_v15 }
 0xc8c   : > { %v7213_v6 = vpop.eup %5287  ;;  %v3616_v12 = vmul.f32 1.442695, %v3602_v32 }
 0xc8d   : > { %v3635_v54 = vsel %vm1308_vm12, %v7213_v6, 0.0 }
 0xc8e   : > { %5289 = vpow2.f32 %v3616_v12  ;;  %3636 = vadd.xlane.f32.xlu2 %v3635_v54 }
 0xc91   : > { %v3595_v29 = vpop.xlane.xlu0 %3594 }
 0xc92   : > { %v3603_v25 = vsub.f32 %v3571_v1, %v3595_v29 }
 0xc94   : > { %v7217_v63 = vpop.eup %5289  ;;  %v3618_v30 = vmul.f32 1.442695, %v3603_v25 }
 0xc95   : > { %v3638_v56 = vsel %vm1308_vm12, %v7217_v63, 0.0 }
 0xc96   : > { %5291 = vpow2.f32 %v3618_v30  ;;  %3639 = vadd.xlane.f32.xlu0 %v3638_v56 }
 0xc9c   : > { %v7221_v26 = vpop.eup %5291 }
 0xc9d   : > { %v3641_v59 = vsel %vm1308_vm12, %v7221_v26, 0.0 }
 0xc9e   : > { %3642 = vadd.xlane.f32.xlu1 %v3641_v59 }
 0xcd9   : > { %v3622_v20 = vpop.xlane.xlu2 %3621 }
 0xcda   : > { %5293 = vrcp.f32 %v3622_v20  ;;  %v3655_v10 = vand.u32 2147483648, %v3622_v20  ;;  %v3653_v8 = vand.u32 2147483647, %v3622_v20  ;;  %vm3649_vm4 = vweird.f32 %v3622_v20 }
 0xcdc   : > { %v3656_v22 = vor.u32 1.1754944e-38, %v3655_v10  ;;  %vm3654_vm6 = vcmp.eq.f32.partialorder %v3653_v8, 8.507059e+37  ;;  %v5054_v10 = vld [vmem:[%s7728_s12 + $0x18] sm:$0xff] }
 0xcdd   : > { %3870 = vmatpush.msra.mxu2 %v5054_v10  ;;  %v5362_v10 = vld [vmem:[%s5595_s27] sm:$0xff] }
 0xce0   : > { %v5294_v31 = vpop.eup %5293 }
 0xce1   : > { %v3645_v17 = vmul.f32 %v5294_v31, %v3622_v20  ;;  %v3625_v4 = vpop.xlane.xlu1 %3624  ;;  %vm3650_vm3 = vweird.f32 %v5294_v31 }
 0xce2   : > { %5295 = vrcp.f32 %v3625_v4  ;;  %vm3651_vm5 = vmor %vm3649_vm4, %vm3650_vm3  ;;  %v3670_v51 = vand.u32 2147483648, %v3625_v4  ;;  %v3668_v16 = vand.u32 2147483647, %v3625_v4  ;;  %vm3664_vm8 = vweird.f32 %v3625_v4 }
 0xce3   : > { %v3646_v52 = vsub.f32 1.0, %v3645_v17 }
 0xce4   : > { %v3671_v14 = vor.u32 1.1754944e-38, %v3670_v51  ;;  %vm3669_vm10 = vcmp.eq.f32.partialorder %v3668_v16, 8.507059e+37 }
 0xce5   : > { %v3647_v42 = vmul.f32 %v5294_v31, %v3646_v52 }
 0xce7   : > { %v3648_v38 = vadd.f32 %v5294_v31, %v3647_v42 }
 0xce8   : > { %v5296_v19 = vpop.eup %5295 }
 0xce9   : > { %v3652_v55 = vsel %vm3651_vm5, %v5294_v31, %v3648_v38  ;;  %v3660_v0 = vmul.f32 %v5296_v19, %v3625_v4  ;;  %v3628_v57 = vpop.xlane.xlu2 %3627  ;;  %vm3665_vm7 = vweird.f32 %v5296_v19 }
 0xcea   : > { %v3657_v1 = vsel %vm3654_vm6, %v3656_v22, %v3652_v55  ;;  %5297 = vrcp.f32 %v3628_v57  ;;  %vm3666_vm9 = vmor %vm3664_vm8, %vm3665_vm7  ;;  %v3685_v11 = vand.u32 2147483648, %v3628_v57  ;;  %v3683_v23 = vand.u32 2147483647, %v3628_v57 }
 0xceb   : > { %v3658_v53 = vmul.f32 %v7193_v33, %v3657_v1  ;;  %v3661_v62 = vsub.f32 1.0, %v3660_v0  ;;  %vm3679_vm14 = vweird.f32 %v3628_v57 }
 0xcec   : > { %v3686_v18 = vor.u32 1.1754944e-38, %v3685_v11  ;;  %vm3684_vm1 = vcmp.eq.f32.partialorder %v3683_v23, 8.507059e+37 }
 0xced   : > { %v3662_v41 = vmul.f32 %v5296_v19, %v3661_v62  ;;  %5046 = vmatmul.msk.f32.vlgmr.msra.gmra.mxu1 %vm1308_vm12, %v3658_v53 }
 0xcef   : > { %v3663_v27 = vadd.f32 %v5296_v19, %v3662_v41 }
 0xcf0   : > { %v5298_v60 = vpop.eup %5297 }
 0xcf1   : > { %v3675_v35 = vmul.f32 %v5298_v60, %v3628_v57  ;;  %v3631_v39 = vpop.xlane.xlu0 %3630  ;;  %v3667_v40 = vsel %vm3666_vm9, %v5296_v19, %v3663_v27  ;;  %vm3680_vm13 = vweird.f32 %v5298_v60 }
 0xcf2   : > { %5299 = vrcp.f32 %v3631_v39  ;;  %v3672_v9 = vsel %vm3669_vm10, %v3671_v14, %v3667_v40  ;;  %vm3681_vm15 = vmor %vm3679_vm14, %vm3680_vm13  ;;  %v3700_v32 = vand.u32 2147483648, %v3631_v39  ;;  %v3698_v12 = vand.u32 2147483647, %v3631_v39 }
 0xcf3   : > { %v3676_v47 = vsub.f32 1.0, %v3675_v35  ;;  %v3673_v33 = vmul.f32 %v7197_v37, %v3672_v9  ;;  %vm3694_vm3 = vweird.f32 %v3631_v39 }
 0xcf4   : > { %v3701_v25 = vor.u32 1.1754944e-38, %v3700_v32  ;;  %vm3699_vm5 = vcmp.eq.f32.partialorder %v3698_v12, 8.507059e+37 }
 0xcf5   : > { %v3677_v61 = vmul.f32 %v5298_v60, %v3676_v47  ;;  %5047 = vmatmul.msk.f32.gmra.mxu1 %vm1308_vm12, %v3673_v33 }
 0xcf7   : > { %v3678_v45 = vadd.f32 %v5298_v60, %v3677_v61 }
 0xcf8   : > { %v5300_v46 = vpop.eup %5299 }
 0xcf9   : > { %v3690_v2 = vmul.f32 %v5300_v46, %v3631_v39  ;;  %v3634_v44 = vpop.xlane.xlu1 %3633  ;;  %v3682_v24 = vsel %vm3681_vm15, %v5298_v60, %v3678_v45  ;;  %vm3695_vm2 = vweird.f32 %v5300_v46 }
 0xcfa   : > { %5301 = vrcp.f32 %v3634_v44  ;;  %v3687_v5 = vsel %vm3684_vm1, %v3686_v18, %v3682_v24  ;;  %vm3696_vm4 = vmor %vm3694_vm3, %vm3695_vm2  ;;  %v3715_v4 = vand.u32 2147483648, %v3634_v44  ;;  %v3713_v52 = vand.u32 2147483647, %v3634_v44 }
 0xcfb   : > { %v3691_v36 = vsub.f32 1.0, %v3690_v2  ;;  %v3688_v37 = vmul.f32 %v7201_v49, %v3687_v5  ;;  %vm3709_vm7 = vweird.f32 %v3634_v44 }
 0xcfc   : > { %v3716_v38 = vor.u32 1.1754944e-38, %v3715_v4  ;;  %vm3714_vm9 = vcmp.eq.f32.partialorder %v3713_v52, 8.507059e+37  ;;  %v7258_v52 = vld [vmem:[%s7729_s13] ss:$0 sm:$0xff] }
 0xcfd   : > { %v3692_v15 = vmul.f32 %v5300_v46, %v3691_v36  ;;  %5048 = vmatmul.msk.f32.gmra.mxu1 %vm1308_vm12, %v3688_v37 }
 0xcff   : > { %v3693_v54 = vadd.f32 %v5300_v46, %v3692_v15 }
 0xd00   : > { %v5302_v29 = vpop.eup %5301 }
 0xd01   : > { %v3705_v30 = vmul.f32 %v5302_v29, %v3634_v44  ;;  %v3637_v56 = vpop.xlane.xlu2 %3636  ;;  %v3697_v59 = vsel %vm3696_vm4, %v5300_v46, %v3693_v54  ;;  %vm3710_vm6 = vweird.f32 %v5302_v29 }
 0xd02   : > { %5303 = vrcp.f32 %v3637_v56  ;;  %v3702_v31 = vsel %vm3699_vm5, %v3701_v25, %v3697_v59  ;;  %vm3711_vm8 = vmor %vm3709_vm7, %vm3710_vm6  ;;  %v3730_v53 = vand.u32 2147483648, %v3637_v56  ;;  %v3728_v62 = vand.u32 2147483647, %v3637_v56  ;;  %v7808_v59 = vld [vmem:[#allocation12_spill] sm:$0xff] }
 0xd03   : > { %v3706_v20 = vsub.f32 1.0, %v3705_v30  ;;  %v3703_v49 = vmul.f32 %v7205_v43, %v3702_v31  ;;  %vm3724_vm13 = vweird.f32 %v3637_v56 }
 0xd04   : > { %v3731_v16 = vor.u32 1.1754944e-38, %v3730_v53  ;;  %vm3729_vm15 = vcmp.eq.f32.partialorder %v3728_v62, 8.507059e+37  ;;  %v7812_v53 = vld [vmem:[#allocation14_spill] sm:$0xff] }
 0xd05   : > { %v3707_v17 = vmul.f32 %v5302_v29, %v3706_v20  ;;  %5049 = vmatmul.msk.f32.gmra.mxu1 %vm1308_vm12, %v3703_v49  ;;  %v7809_v20 = vld [vmem:[#allocation20_spill] sm:$0xff]  ;;  %v7813_v62 = vld [vmem:[#allocation22_spill] sm:$0xff] }
 0xd06   : > { %v2361_v31 = vadd.f32 %v7809_v20, %v7808_v59 }
 0xd07   : > { %v3708_v42 = vadd.f32 %v5302_v29, %v3707_v17 }
 0xd08   : > { %v5304_v8 = vpop.eup %5303  ;;  %v3136_v49 = vadd.f32 %v7138_v58, %v2361_v31 }
 0xd09   : > { %v3720_v19 = vmul.f32 %v5304_v8, %v3637_v56  ;;  %v3640_v22 = vpop.xlane.xlu0 %3639  ;;  %v3712_v55 = vsel %vm3711_vm8, %v5302_v29, %v3708_v42  ;;  %vm3725_vm10 = vweird.f32 %v5304_v8 }
 0xd0a   : > { %5305 = vrcp.f32 %v3640_v22  ;;  %v3717_v0 = vsel %vm3714_vm9, %v3716_v38, %v3712_v55  ;;  %vm3726_vm14 = vmor %vm3724_vm13, %vm3725_vm10  ;;  %v3745_v40 = vand.u32 2147483648, %v3640_v22  ;;  %v3743_v9 = vand.u32 2147483647, %v3640_v22  ;;  %v7810_v38 = vld [vmem:[#allocation13_spill] sm:$0xff] }
 0xd0b   : > { %v3721_v43 = vsub.f32 1.0, %v3720_v19  ;;  %v3718_v57 = vmul.f32 %v7209_v7, %v3717_v0  ;;  %vm3739_vm2 = vweird.f32 %v3640_v22  ;;  %v7811_v19 = vld [vmem:[#allocation21_spill] sm:$0xff] }
 0xd0c   : > { %v3746_v11 = vor.u32 1.1754944e-38, %v3745_v40  ;;  %vm3744_vm4 = vcmp.eq.f32.partialorder %v3743_v9, 8.507059e+37  ;;  %v7815_v40 = vld [vmem:[#allocation23_spill] sm:$0xff] }
 0xd0d   : > { %v3722_v1 = vmul.f32 %v5304_v8, %v3721_v43  ;;  %5050 = vmatmul.msk.f32.gmra.mxu1 %vm1308_vm12, %v3718_v57  ;;  %v5363_v57 = vld [vmem:[%s5595_s27 + $0x8] sm:$0xff] }
 0xd0f   : > { %v3723_v41 = vadd.f32 %v5304_v8, %v3722_v1 }
 0xd10   : > { %v5306_v51 = vpop.eup %5305 }
 0xd11   : > { %v3735_v27 = vmul.f32 %v5306_v51, %v3640_v22  ;;  %v3643_v60 = vpop.xlane.xlu1 %3642  ;;  %v3727_v14 = vsel %vm3726_vm14, %v5304_v8, %v3723_v41  ;;  %vm3740_vm1 = vweird.f32 %v5306_v51  ;;  %v2364_v22 = vadd.f32 %v7811_v19, %v7810_v38  ;;  %v7823_v38 = vld [vmem:[#allocation27_spill] sm:$0xff] }
 0xd12   : > { %5307 = vrcp.f32 %v3643_v60  ;;  %v3732_v39 = vsel %vm3729_vm15, %v3731_v16, %v3727_v14  ;;  %vm3741_vm3 = vmor %vm3739_vm2, %vm3740_vm1  ;;  %v3760_v44 = vand.u32 2147483648, %v3643_v60  ;;  %vm3754_vm6 = vweird.f32 %v3643_v60  ;;  %v5364_v14 = vld [vmem:[%s5595_s27 + $0x10] sm:$0xff] }
 0xd13   : > { %v3736_v35 = vsub.f32 1.0, %v3735_v27  ;;  %v3733_v7 = vmul.f32 %v7213_v6, %v3732_v39  ;;  %v3758_v6 = vand.u32 2147483647, %v3643_v60  ;;  %v3137_v58 = vadd.f32 %v7140_v13, %v2364_v22  ;;  %v7814_v39 = vld [vmem:[#allocation15_spill] sm:$0xff] }
 0xd14   : > { %v3761_v5 = vor.u32 1.1754944e-38, %v3760_v44  ;;  %v2367_v41 = vadd.f32 %v7813_v62, %v7812_v53  ;;  %v7824_v62 = vld [vmem:[#allocation11_spill] sm:$0xff] }
 0xd15   : > { %v3737_v47 = vmul.f32 %v5306_v51, %v3736_v35  ;;  %5051 = vmatmul.msk.f32.gmra.mxu1 %vm1308_vm12, %v3733_v7  ;;  %vm3759_vm8 = vcmp.eq.f32.partialorder %v3758_v6, 8.507059e+37  ;;  %v2370_v7 = vadd.f32 %v7815_v40, %v7814_v39 }
 0xd16   : > { %v3138_v16 = vadd.f32 %v7142_v34, %v2367_v41 }
 0xd17   : > { %v3738_v33 = vadd.f32 %v5306_v51, %v3737_v47  ;;  %v3139_v9 = vadd.f32 %v7144_v21, %v2370_v7 }
 0xd18   : > { %v5308_v61 = vpop.eup %5307 }
 0xd19   : > { %v3750_v23 = vmul.f32 %v5308_v61, %v3643_v60  ;;  %v3742_v45 = vsel %vm3741_vm3, %v5306_v51, %v3738_v33  ;;  %vm3755_vm5 = vweird.f32 %v5308_v61 }
 0xd1a   : > { %v3747_v46 = vsel %vm3744_vm4, %v3746_v11, %v3742_v45  ;;  %vm3756_vm7 = vmor %vm3754_vm6, %vm3755_vm5  ;;  %v5365_v11 = vld [vmem:[%s5595_s27 + $0x18] sm:$0xff]  ;;  %v7816_v45 = vld [vmem:[#allocation16_spill] sm:$0xff] }
 0xd1b   : > { %v3751_v18 = vsub.f32 1.0, %v3750_v23  ;;  %v3748_v2 = vmul.f32 %v7217_v63, %v3747_v46  ;;  %v7817_v46 = vld [vmem:[#allocation24_spill] sm:$0xff] }
 0xd1d   : > { %v3752_v24 = vmul.f32 %v5308_v61, %v3751_v18  ;;  %5052 = vmatmul.msk.f32.gmra.mxu1 %vm1308_vm12, %v3748_v2  ;;  %v2373_v18 = vadd.f32 %v7817_v46, %v7816_v45 }
 0xd1f   : > { %v3753_v36 = vadd.f32 %v5308_v61, %v3752_v24  ;;  %v3140_v44 = vadd.f32 %v7146_v48, %v2373_v18 }
 0xd21   : > { %v3757_v37 = vsel %vm3756_vm7, %v5308_v61, %v3753_v36  ;;  %v5366_v36 = vld [vmem:[%s5595_s27 + $0x20] sm:$0xff] }
 0xd22   : > { %v3762_v15 = vsel %vm3759_vm8, %v3761_v5, %v3757_v37  ;;  %v7818_v37 = vld [vmem:[#allocation17_spill] sm:$0xff] }
 0xd23   : > { %v3763_v32 = vmul.f32 %v7221_v26, %v3762_v15  ;;  %v7819_v15 = vld [vmem:[#allocation25_spill] sm:$0xff] }
 0xd25   : > { %5053 = vmatmul.msk.f32.gmra.mxu1 %vm1308_vm12, %v3763_v32  ;;  %v2376_v32 = vadd.f32 %v7819_v15, %v7818_v37 }
 0xd6a   : > { %v3805_v12 = vpop.f32.mrf.mxu1 }
 0xd6b   : > { %5055 = vmatmul.msk.f32.vlgmr.msra.gmra.mxu2 %vm1040_vm11, %v3805_v12 }
 0xd72   : > { %v3808_v63 = vpop.f32.mrf.mxu1 }
 0xd73   : > { %5056 = vmatmul.msk.f32.gmra.mxu2 %vm1040_vm11, %v3808_v63  ;;  %v3141_v63 = vadd.f32 %v7148_v3, %v2376_v32 }
 0xd7a   : > { %v3811_v54 = vpop.f32.mrf.mxu1 }
 0xd7b   : > { %5057 = vmatmul.msk.f32.gmra.mxu2 %vm1040_vm11, %v3811_v54 }
 0xd82   : > { %v3814_v29 = vpop.f32.mrf.mxu1 }
 0xd83   : > { %5058 = vmatmul.msk.f32.gmra.mxu2 %vm1040_vm11, %v3814_v29 }
 0xd8a   : > { %v3817_v25 = vpop.f32.mrf.mxu1 }
 0xd8b   : > { %5059 = vmatmul.msk.f32.gmra.mxu2 %vm1040_vm11, %v3817_v25  ;;  %v5367_v25 = vld [vmem:[%s5595_s27 + $0x28] sm:$0xff] }
 0xd92   : > { %v3820_v30 = vpop.f32.mrf.mxu1 }
 0xd93   : > { %5060 = vmatmul.msk.f32.gmra.mxu2 %vm1040_vm11, %v3820_v30 }
 0xd9a   : > { %v3823_v26 = vpop.f32.mrf.mxu1 }
 0xd9b   : > { %5061 = vmatmul.msk.f32.gmra.mxu2 %vm1040_vm11, %v3823_v26  ;;  %v7820_v26 = vld [vmem:[#allocation18_spill] sm:$0xff] }
 0xda2   : > { %v3826_v56 = vpop.f32.mrf.mxu1 }
 0xda3   : > { %5062 = vmatmul.msk.f32.gmra.mxu2 %vm1040_vm11, %v3826_v56  ;;  %v7821_v56 = vld [vmem:[#allocation26_spill] sm:$0xff] }
 0xda4   : > { %v2379_v59 = vadd.f32 %v7821_v56, %v7820_v26  ;;  %v4126_v26 = vld [vmem:[%s7732_s16 + $0x10] sm:$0xff]  ;;  %v4125_v56 = vld [vmem:[%s7732_s16 + $0x8] sm:$0xff] }
 0xda6   : > { %v3142_v31 = vadd.f32 %v7150_v28, %v2379_v59  ;;  %v4124_v59 = vld [vmem:[%s7732_s16] sm:$0xff] }
 0xdee   : > { %v3872_v17 = vpop.f32.mrf.mxu2 }
 0xdef   : > { %v3896_v4 = vadd.f32 %v3872_v17, %v3136_v49 }
 0xdf1   : > { %v3904_v42 = vadd.f32 %v5362_v10, %v3896_v4  ;;  %v5368_v4 = vld [vmem:[%s5595_s27 + $0x30] sm:$0xff] }
 0xdf3   : > { %v7262_v8 = vadd.f32 %v7258_v52, %v3904_v42  ;;  %v7822_v42 = vld [vmem:[#allocation19_spill] sm:$0xff] }
 0xdf4   : > { %v2382_v19 = vadd.f32 %v7823_v38, %v7822_v42 }
 0xdf5   : > { %v3924_v55 = vsel %vm636_vm0, %v7262_v8, 0.0 }
 0xdf6   : > { %3925 = vadd.xlane.f32.xlu2 %v3924_v55  ;;  %v3875_v43 = vpop.f32.mrf.mxu2  ;;  %v3143_v55 = vadd.f32 %v7152_v50, %v2382_v19 }
 0xdf7   : > { %v3897_v0 = vadd.f32 %v3875_v43, %v3137_v58 }
 0xdf9   : > { %v3905_v1 = vadd.f32 %v5363_v57, %v3897_v0  ;;  %v5369_v0 = vld [vmem:[%s5595_s27 + $0x38] sm:$0xff]  ;;  %s620_s27 = sand.u32 1, %s5424_s22  }
 0xdfa   : > { %s4724_s29 = sshll.u32 %s620_s27, 6  ;;  %s4643_s3 = scalar_lea.sflag [#allocation3], %s620_s27 }
 0xdfb   : > { %v7273_v51 = vadd.f32 %v7258_v52, %v3905_v1  ;;  %s7656_s1 = scalar_lea.vmem [#allocation2], %s4724_s29  ;;  %s5384_s29 = sshra.s32 %s4658_s23, 4  ;;  %s5385_s29 = int_to_ptr.hbm [resolvable:$true] %s5384_s29 }
 0xdfc   : > { %s4655_s24 = sshll.u32 %s7656_s1, 4  ;;  %s5386_s5 = scalar_lea.hbm %s5385_s29, 64  ;;  %s4656_s24 = int_to_ptr.vmem [resolvable:$true] %s4655_s24 }
 0xdfd   : > { %v3927_v27 = vsel %vm636_vm0, %v7273_v51, 0.0  ;;  %p5387_p11 = scmp.ne.s32.totalorder %s5385_s29, %s5386_s5  ;;  %p5391_p0 = scmp.lt.s32.totalorder %s5385_s29, %s7736_s20 }
 0xdfe   : > { %v3878_v60 = vpop.f32.mrf.mxu2  ;;  %3928 = vadd.xlane.f32.xlu0 %v3927_v27  ;;  %p5392_p1 = scmp.lt.s32.totalorder %s5390_s30, %s5386_s5 }
 0xdff   : > { %v3898_v13 = vadd.f32 %v3878_v60, %v3138_v16  ;;  %p5388_p12 = pnand %p5387_p11, %p5580_p5 }
 0xe00   : > { %p5393_p2 = por %p5392_p1, %p5391_p0 }
 0xe01   : > { %v3906_v35 = vadd.f32 %v5364_v14, %v3898_v13  ;;  %p5389_p13 = pneg %p5388_p12 }
 0xe03   : > { %v7282_v47 = vadd.f32 %v7258_v52, %v3906_v35  ;;  %p5394_p3 = pnand %p5393_p2, %p5389_p13 }
 0xe05   : > { %v3930_v34 = vsel %vm636_vm0, %v7282_v47, 0.0 }
 0xe06   : > { %3931 = vadd.xlane.f32.xlu1 %v3930_v34  ;;  %v3881_v33 = vpop.f32.mrf.mxu2 }
 0xe07   : > { %v3899_v61 = vadd.f32 %v3881_v33, %v3139_v9 }
 0xe09   : > { %v3907_v23 = vadd.f32 %v5365_v11, %v3899_v61 }
 0xe0b   : > { %v7291_v2 = vadd.f32 %v7258_v52, %v3907_v23 }
 0xe0d   : > { %v3933_v21 = vsel %vm636_vm0, %v7291_v2, 0.0 }
 0xe0e   : > { %3934 = vadd.xlane.f32.xlu2 %v3933_v21  ;;  %v3884_v24 = vpop.f32.mrf.mxu2 }
 0xe0f   : > { %v3900_v6 = vadd.f32 %v3884_v24, %v3140_v44 }
 0xe11   : > { %v3908_v5 = vadd.f32 %v5366_v36, %v3900_v6 }
 0xe13   : > { %v7300_v12 = vadd.f32 %v7258_v52, %v3908_v5 }
 0xe15   : > { %v3936_v48 = vsel %vm636_vm0, %v7300_v12, 0.0 }
 0xe16   : > { %3937 = vadd.xlane.f32.xlu0 %v3936_v48  ;;  %v3887_v54 = vpop.f32.mrf.mxu2 }
 0xe17   : > { %v3901_v29 = vadd.f32 %v3887_v54, %v3141_v63 }
 0xe19   : > { %v3909_v30 = vadd.f32 %v5367_v25, %v3901_v29 }
 0xe1b   : > { %v7309_v20 = vadd.f32 %v7258_v52, %v3909_v30  ;;  %v4127_v30 = vld [vmem:[%s7732_s16 + $0x18] sm:$0xff] }
 0xe1c   : > { %4168 = vmatpush.msra.mxu3 %v4127_v30 }
 0xe1d   : > { %v3939_v3 = vsel %vm636_vm0, %v7309_v20, 0.0 }
 0xe1e   : > { %3940 = vadd.xlane.f32.xlu1 %v3939_v3  ;;  %v3890_v49 = vpop.f32.mrf.mxu2  ;;  %4169 = vmatpush.msra.mxu3 %v4126_v26 }
 0xe1f   : > { %v3902_v17 = vadd.f32 %v3890_v49, %v3142_v31 }
 0xe20   : > { %4170 = vmatpush.msra.mxu3 %v4125_v56 }
 0xe21   : > { %v3910_v10 = vadd.f32 %v5368_v4, %v3902_v17 }
 0xe22   : > { %4171 = vmatpush.msra.mxu3 %v4124_v59 }
 0xe23   : > { %v7318_v22 = vadd.f32 %v7258_v52, %v3910_v10 }
 0xe25   : > { %v3942_v58 = vsel %vm636_vm0, %v7318_v22, 0.0 }
 0xe26   : > { %3943 = vadd.xlane.f32.xlu0 %v3942_v58  ;;  %v3893_v28 = vpop.f32.mrf.mxu2 }
 0xe27   : > { %v3903_v43 = vadd.f32 %v3893_v28, %v3143_v55 }
 0xe29   : > { %v3911_v57 = vadd.f32 %v5369_v0, %v3903_v43 }
 0xe2b   : > { %v7325_v1 = vadd.f32 %v7258_v52, %v3911_v57 }
 0xe2d   : > { %v3945_v35 = vsel %vm636_vm0, %v7325_v1, 0.0 }
 0xe69   : > { %v3926_v53 = vpop.xlane.xlu2 %3925 }
 0xe6a   : > { %v3948_v41 = vmul.f32 %v3926_v53, %v7824_v62 }
 0xe6c   : > { %v7329_v16 = vsub.f32 %v7262_v8, %v3948_v41 }
 0xe6e   : > { %v3964_v50 = vmul.f32 %v7329_v16, %v7329_v16 }
 0xe70   : > { %v3972_v27 = vsel %vm636_vm0, %v3964_v50, 0.0 }
 0xe71   : > { %3973 = vadd.xlane.f32.xlu2 %v3972_v27  ;;  %v3929_v60 = vpop.xlane.xlu0 %3928 }
 0xe72   : > { %v3949_v13 = vmul.f32 %v3929_v60, %v7824_v62 }
 0xe74   : > { %v7336_v14 = vsub.f32 %v7273_v51, %v3949_v13 }
 0xe76   : > { %v3965_v52 = vmul.f32 %v7336_v14, %v7336_v14 }
 0xe78   : > { %v3975_v39 = vsel %vm636_vm0, %v3965_v52, 0.0  ;;  %v7403_v52 = vld [vmem:[%s7730_s14] ss:$0 sm:$0xff] }
 0xe79   : > { %3946 = vadd.xlane.f32.xlu2 %v3945_v35  ;;  %v3932_v40 = vpop.xlane.xlu1 %3931  ;;  %3976 = vadd.xlane.f32.xlu1 %v3975_v39 }
 0xe7a   : > { %v3950_v7 = vmul.f32 %v3932_v40, %v7824_v62  ;;  %v7408_v40 = vld [vmem:[%s7731_s15] ss:$0 sm:$0xff] }
 0xe7c   : > { %v7345_v9 = vsub.f32 %v7282_v47, %v3950_v7 }
 0xe7e   : > { %v3966_v34 = vmul.f32 %v7345_v9, %v7345_v9 }
 0xe80   : > { %v3978_v33 = vsel %vm636_vm0, %v3966_v34, 0.0 }
 0xe81   : > { %v3935_v61 = vpop.xlane.xlu2 %3934  ;;  %3979 = vadd.xlane.f32.xlu0 %v3978_v33 }
 0xe82   : > { %v3951_v11 = vmul.f32 %v3935_v61, %v7824_v62 }
 0xe84   : > { %v7352_v23 = vsub.f32 %v7291_v2, %v3951_v11 }
 0xe86   : > { %v3967_v45 = vmul.f32 %v7352_v23, %v7352_v23 }
 0xe88   : > { %v3981_v46 = vsel %vm636_vm0, %v3967_v45, 0.0 }
 0xe89   : > { %3982 = vadd.xlane.f32.xlu1 %v3981_v46  ;;  %v3938_v18 = vpop.xlane.xlu0 %3937 }
 0xe8a   : > { %v3952_v44 = vmul.f32 %v3938_v18, %v7824_v62 }
 0xe8c   : > { %v7359_v21 = vsub.f32 %v7300_v12, %v3952_v44 }
 0xe8e   : > { %v3968_v24 = vmul.f32 %v7359_v21, %v7359_v21 }
 0xe90   : > { %v3984_v6 = vsel %vm636_vm0, %v3968_v24, 0.0 }
 0xe91   : > { %v3941_v36 = vpop.xlane.xlu1 %3940  ;;  %3985 = vadd.xlane.f32.xlu2 %v3984_v6 }
 0xe92   : > { %v3953_v5 = vmul.f32 %v3941_v36, %v7824_v62 }
 0xe94   : > { %v7366_v37 = vsub.f32 %v7309_v20, %v3953_v5 }
 0xe96   : > { %v3969_v15 = vmul.f32 %v7366_v37, %v7366_v37 }
 0xe98   : > { %v3987_v32 = vsel %vm636_vm0, %v3969_v15, 0.0 }
 0xe99   : > { %3988 = vadd.xlane.f32.xlu0 %v3987_v32  ;;  %v3944_v63 = vpop.xlane.xlu0 %3943 }
 0xe9a   : > { %v3954_v48 = vmul.f32 %v3944_v63, %v7824_v62 }
 0xe9c   : > { %v7373_v54 = vsub.f32 %v7318_v22, %v3954_v48 }
 0xe9e   : > { %v3970_v29 = vmul.f32 %v7373_v54, %v7373_v54 }
 0xea0   : > { %v3990_v25 = vsel %vm636_vm0, %v3970_v29, 0.0 }
 0xea1   : > { %3991 = vadd.xlane.f32.xlu1 %v3990_v25 }
 0xee4   : > { %v3974_v31 = vpop.xlane.xlu2 %3973 }
 0xee5   : > { %v3996_v3 = vmul.f32 %v3974_v31, %v7824_v62 }
 0xee7   : > { %v4004_v49 = vadd.f32 1e-05, %v3996_v3 }
 0xee9   : > { %5309 = vrsqrt.f32 %v4004_v49  ;;  %vm4018_vm9 = vweird.f32 %v4004_v49 }
 0xeec   : > { %v3947_v17 = vpop.xlane.xlu2 %3946  ;;  %v3977_v4 = vpop.xlane.xlu1 %3976 }
 0xeed   : > { %v3955_v10 = vmul.f32 %v3947_v17, %v7824_v62  ;;  %v3997_v42 = vmul.f32 %v3977_v4, %v7824_v62 }
 0xeef   : > { %v5310_v38 = vpop.eup %5309  ;;  %v7394_v19 = vsub.f32 %v7325_v1, %v3955_v10  ;;  %v4005_v58 = vadd.f32 1e-05, %v3997_v42 }
 0xef0   : > { %v4013_v55 = vmul.f32 %v5310_v38, %v4004_v49  ;;  %vm4019_vm11 = vweird.f32 %v5310_v38 }
 0xef1   : > { %v3971_v28 = vmul.f32 %v7394_v19, %v7394_v19  ;;  %5311 = vrsqrt.f32 %v4005_v58  ;;  %vm4020_vm10 = vmor %vm4018_vm9, %vm4019_vm11  ;;  %vm4028_vm14 = vweird.f32 %v4005_v58 }
 0xef2   : > { %v4014_v43 = vmul.f32 %v5310_v38, %v4013_v55 }
 0xef3   : > { %v3993_v0 = vsel %vm636_vm0, %v3971_v28, 0.0 }
 0xef4   : > { %v4015_v57 = vmul.f32 0.5, %v4014_v43  ;;  %3994 = vadd.xlane.f32.xlu2 %v3993_v0  ;;  %v3980_v53 = vpop.xlane.xlu0 %3979 }
 0xef5   : > { %v3998_v50 = vmul.f32 %v3980_v53, %v7824_v62 }
 0xef6   : > { %v4016_v41 = vsub.f32 1.5, %v4015_v57 }
 0xef7   : > { %v5312_v27 = vpop.eup %5311  ;;  %v4006_v13 = vadd.f32 1e-05, %v3998_v50 }
 0xef8   : > { %v4017_v60 = vmul.f32 %v5310_v38, %v4016_v41  ;;  %v4023_v35 = vmul.f32 %v5312_v27, %v4005_v58  ;;  %vm4029_vm13 = vweird.f32 %v5312_v27 }
 0xef9   : > { %5313 = vrsqrt.f32 %v4006_v13  ;;  %vm4030_vm15 = vmor %vm4028_vm14, %vm4029_vm13  ;;  %vm4038_vm2 = vweird.f32 %v4006_v13 }
 0xefa   : > { %v4021_v39 = vsel %vm4020_vm10, %v5310_v38, %v4017_v60  ;;  %v4024_v34 = vmul.f32 %v5312_v27, %v4023_v35 }
 0xefb   : > { %v4092_v7 = vmul.f32 %v4021_v39, %v7329_v16 }
 0xefc   : > { %v4025_v61 = vmul.f32 0.5, %v4024_v34  ;;  %v3983_v11 = vpop.xlane.xlu1 %3982 }
 0xefd   : > { %v4104_v33 = vmul.f32 %v7403_v52, %v4092_v7  ;;  %v3999_v45 = vmul.f32 %v3983_v11, %v7824_v62 }
 0xefe   : > { %v4026_v18 = vsub.f32 1.5, %v4025_v61 }
 0xeff   : > { %v4116_v46 = vadd.f32 %v7408_v40, %v4104_v33  ;;  %v5314_v44 = vpop.eup %5313  ;;  %v4007_v24 = vadd.f32 1e-05, %v3999_v45 }
 0xf00   : > { %v4027_v6 = vmul.f32 %v5312_v27, %v4026_v18  ;;  %v4033_v36 = vmul.f32 %v5314_v44, %v4006_v13  ;;  %vm4039_vm1 = vweird.f32 %v5314_v44 }
 0xf01   : > { %5063 = vmatmul.msk.f32.vlgmr.msra.gmra.mxu3 %vm636_vm0, %v4116_v46  ;;  %5315 = vrsqrt.f32 %v4007_v24  ;;  %vm4040_vm3 = vmor %vm4038_vm2, %vm4039_vm1  ;;  %vm4048_vm5 = vweird.f32 %v4007_v24 }
 0xf02   : > { %v4031_v16 = vsel %vm4030_vm15, %v5312_v27, %v4027_v6  ;;  %v4034_v5 = vmul.f32 %v5314_v44, %v4033_v36 }
 0xf03   : > { %v4093_v15 = vmul.f32 %v4031_v16, %v7336_v14 }
 0xf04   : > { %v4035_v32 = vmul.f32 0.5, %v4034_v5  ;;  %v3986_v63 = vpop.xlane.xlu2 %3985 }
 0xf05   : > { %v4000_v48 = vmul.f32 %v3986_v63, %v7824_v62  ;;  %v4105_v29 = vmul.f32 %v7403_v52, %v4093_v15 }
 0xf06   : > { %v4036_v25 = vsub.f32 1.5, %v4035_v32 }
 0xf07   : > { %v5316_v30 = vpop.eup %5315  ;;  %v4008_v26 = vadd.f32 1e-05, %v4000_v48  ;;  %v4117_v56 = vadd.f32 %v7408_v40, %v4105_v29 }
 0xf08   : > { %v4037_v59 = vmul.f32 %v5314_v44, %v4036_v25  ;;  %v4043_v31 = vmul.f32 %v5316_v30, %v4007_v24  ;;  %vm4049_vm4 = vweird.f32 %v5316_v30 }
 0xf09   : > { %5317 = vrsqrt.f32 %v4008_v26  ;;  %5064 = vmatmul.msk.f32.gmra.mxu3 %vm636_vm0, %v4117_v56  ;;  %vm4050_vm6 = vmor %vm4048_vm5, %vm4049_vm4  ;;  %vm4058_vm8 = vweird.f32 %v4008_v26 }
 0xf0a   : > { %v4041_v14 = vsel %vm4040_vm3, %v5314_v44, %v4037_v59  ;;  %v4044_v3 = vmul.f32 %v5316_v30, %v4043_v31 }
 0xf0b   : > { %v4094_v49 = vmul.f32 %v4041_v14, %v7345_v9 }
 0xf0c   : > { %v4045_v17 = vmul.f32 0.5, %v4044_v3  ;;  %v3989_v4 = vpop.xlane.xlu0 %3988 }
 0xf0d   : > { %v4001_v10 = vmul.f32 %v3989_v4, %v7824_v62  ;;  %v4106_v42 = vmul.f32 %v7403_v52, %v4094_v49 }
 0xf0e   : > { %v4046_v38 = vsub.f32 1.5, %v4045_v17 }
 0xf0f   : > { %v5318_v55 = vpop.eup %5317  ;;  %v4009_v58 = vadd.f32 1e-05, %v4001_v10  ;;  %v4118_v28 = vadd.f32 %v7408_v40, %v4106_v42 }
 0xf10   : > { %v4047_v43 = vmul.f32 %v5316_v30, %v4046_v38  ;;  %v4053_v0 = vmul.f32 %v5318_v55, %v4008_v26  ;;  %vm4059_vm7 = vweird.f32 %v5318_v55 }
 0xf11   : > { %5319 = vrsqrt.f32 %v4009_v58  ;;  %5065 = vmatmul.msk.f32.gmra.mxu3 %vm636_vm0, %v4118_v28  ;;  %vm4060_vm11 = vmor %vm4058_vm8, %vm4059_vm7  ;;  %vm4068_vm10 = vweird.f32 %v4009_v58 }
 0xf12   : > { %v4051_v9 = vsel %vm4050_vm6, %v5316_v30, %v4047_v43  ;;  %v4054_v57 = vmul.f32 %v5318_v55, %v4053_v0 }
 0xf13   : > { %v4095_v53 = vmul.f32 %v4051_v9, %v7352_v23 }
 0xf14   : > { %v4055_v41 = vmul.f32 0.5, %v4054_v57  ;;  %v3992_v50 = vpop.xlane.xlu1 %3991 }
 0xf15   : > { %v4002_v27 = vmul.f32 %v3992_v50, %v7824_v62  ;;  %v4107_v60 = vmul.f32 %v7403_v52, %v4095_v53 }
 0xf16   : > { %v4056_v13 = vsub.f32 1.5, %v4055_v41 }
 0xf17   : > { %v5320_v35 = vpop.eup %5319  ;;  %v4010_v39 = vadd.f32 1e-05, %v4002_v27  ;;  %v4119_v7 = vadd.f32 %v7408_v40, %v4107_v60 }
 0xf18   : > { %v4057_v34 = vmul.f32 %v5318_v55, %v4056_v13  ;;  %v4063_v33 = vmul.f32 %v5320_v35, %v4009_v58  ;;  %vm4069_vm9 = vweird.f32 %v5320_v35 }
 0xf19   : > { %5321 = vrsqrt.f32 %v4010_v39  ;;  %5066 = vmatmul.msk.f32.gmra.mxu3 %vm636_vm0, %v4119_v7  ;;  %vm4070_vm13 = vmor %vm4068_vm10, %vm4069_vm9  ;;  %vm4078_vm15 = vweird.f32 %v4010_v39 }
 0xf1a   : > { %v4061_v23 = vsel %vm4060_vm11, %v5318_v55, %v4057_v34  ;;  %v4064_v61 = vmul.f32 %v5320_v35, %v4063_v33 }
 0xf1b   : > { %v4096_v11 = vmul.f32 %v4061_v23, %v7359_v21 }
 0xf1c   : > { %v4065_v45 = vmul.f32 0.5, %v4064_v61  ;;  %v4556_v61 = vld [vmem:[%s7734_s18 + $0x38] sm:$0xff] }
 0xf1d   : > { %v4108_v46 = vmul.f32 %v7403_v52, %v4096_v11  ;;  %4593 = vmatpush.msra.mxu0 %v4556_v61 }
 0xf1e   : > { %v4066_v18 = vsub.f32 1.5, %v4065_v45 }
 0xf1f   : > { %v5322_v44 = vpop.eup %5321  ;;  %v4120_v24 = vadd.f32 %v7408_v40, %v4108_v46 }
 0xf20   : > { %v4067_v6 = vmul.f32 %v5320_v35, %v4066_v18  ;;  %v4073_v36 = vmul.f32 %v5322_v44, %v4010_v39  ;;  %vm4079_vm14 = vweird.f32 %v5322_v44 }
 0xf21   : > { %5067 = vmatmul.msk.f32.gmra.mxu3 %vm636_vm0, %v4120_v24  ;;  %vm4080_vm1 = vmor %vm4078_vm15, %vm4079_vm14 }
 0xf22   : > { %v4071_v16 = vsel %vm4070_vm13, %v5320_v35, %v4067_v6  ;;  %v4074_v5 = vmul.f32 %v5322_v44, %v4073_v36 }
 0xf23   : > { %v4097_v15 = vmul.f32 %v4071_v16, %v7366_v37 }
 0xf24   : > { %v4075_v32 = vmul.f32 0.5, %v4074_v5 }
 0xf25   : > { %v4109_v21 = vmul.f32 %v7403_v52, %v4097_v15 }
 0xf26   : > { %v4076_v63 = vsub.f32 1.5, %v4075_v32 }
 0xf27   : > { %v4121_v48 = vadd.f32 %v7408_v40, %v4109_v21 }
 0xf28   : > { %v4077_v29 = vmul.f32 %v5322_v44, %v4076_v63 }
 0xf29   : > { %5068 = vmatmul.msk.f32.gmra.mxu3 %vm636_vm0, %v4121_v48  ;;  %v4555_v48 = vld [vmem:[%s7734_s18 + $0x30] sm:$0xff] }
 0xf2a   : > { %v4081_v25 = vsel %vm4080_vm1, %v5322_v44, %v4077_v29  ;;  %4594 = vmatpush.msra.mxu0 %v4555_v48 }
 0xf2b   : > { %v4098_v30 = vmul.f32 %v4081_v25, %v7373_v54 }
 0xf2d   : > { %v4110_v26 = vmul.f32 %v7403_v52, %v4098_v30 }
 0xf2f   : > { %v4122_v56 = vadd.f32 %v7408_v40, %v4110_v26 }
 0xf31   : > { %5069 = vmatmul.msk.f32.gmra.mxu3 %vm636_vm0, %v4122_v56 }
 0xf67   : > { %v3995_v37 = vpop.xlane.xlu2 %3994 }
 0xf68   : > { %v4003_v59 = vmul.f32 %v3995_v37, %v7824_v62  ;;  %v7448_v62 = vld [vmem:[%s7733_s17] ss:$0 sm:$0xff]  ;;  %v4554_v37 = vld [vmem:[%s7734_s18 + $0x28] sm:$0xff] }
 0xf69   : > { %4595 = vmatpush.msra.mxu0 %v4554_v37 }
 0xf6a   : > { %v4011_v31 = vadd.f32 1e-05, %v4003_v59 }
 0xf6c   : > { %5323 = vrsqrt.f32 %v4011_v31  ;;  %vm4088_vm3 = vweird.f32 %v4011_v31 }
 0xf72   : > { %v5324_v14 = vpop.eup %5323 }
 0xf73   : > { %v4083_v3 = vmul.f32 %v5324_v14, %v4011_v31  ;;  %vm4089_vm2 = vweird.f32 %v5324_v14 }
 0xf74   : > { %vm4090_vm4 = vmor %vm4088_vm3, %vm4089_vm2 }
 0xf75   : > { %v4084_v49 = vmul.f32 %v5324_v14, %v4083_v3 }
 0xf77   : > { %v4085_v17 = vmul.f32 0.5, %v4084_v49 }
 0xf79   : > { %v4086_v4 = vsub.f32 1.5, %v4085_v17 }
 0xf7b   : > { %v4087_v10 = vmul.f32 %v5324_v14, %v4086_v4  ;;  %v4553_v4 = vld [vmem:[%s7734_s18 + $0x20] sm:$0xff] }
 0xf7c   : > { %4596 = vmatpush.msra.mxu0 %v4553_v4 }
 0xf7d   : > { %v4091_v54 = vsel %vm4090_vm4, %v5324_v14, %v4087_v10 }
 0xf7e   : > { %v4099_v42 = vmul.f32 %v4091_v54, %v7394_v19 }
 0xf80   : > { %v4111_v38 = vmul.f32 %v7403_v52, %v4099_v42 }
 0xf82   : > { %v4123_v55 = vadd.f32 %v7408_v40, %v4111_v38  ;;  %v4552_v38 = vld [vmem:[%s7734_s18 + $0x18] sm:$0xff] }
 0xf83   : > { %4597 = vmatpush.msra.mxu0 %v4552_v38 }
 0xf84   : > { %v4173_v58 = vpop.f32.mrf.mxu3  ;;  %5070 = vmatmul.msk.f32.gmra.mxu3 %vm636_vm0, %v4123_v55 }
 0xf85   : > { %v7453_v28 = vadd.f32 %v7448_v62, %v4173_v58 }
 0xf87   : > { %v7456_v43 = vmul.f32 0.70710677, %v7453_v28 }
 0xf89   : > { %v4213_v19 = vmul.f32 %v7456_v43, %v7456_v43 }
 0xf8b   : > { %v4214_v52 = vmin.f32 %v4213_v19, 16.0 }
 0xf8c   : > { %v4176_v57 = vpop.f32.mrf.mxu3 }
 0xf8d   : > { %v4215_v0 = vmul.f32 2.1237322e-06, %v4214_v52  ;;  %v4226_v9 = vmul.f32 3.8918573e-05, %v4214_v52  ;;  %v7461_v53 = vadd.f32 %v7448_v62, %v4176_v57 }
 0xf8f   : > { %v4216_v40 = vadd.f32 0.00028619796, %v4215_v0  ;;  %v4227_v41 = vadd.f32 0.001143296, %v4226_v9  ;;  %v7464_v50 = vmul.f32 0.70710677, %v7461_v53 }
 0xf91   : > { %v4217_v27 = vmul.f32 %v4216_v40, %v4214_v52  ;;  %v4228_v60 = vmul.f32 %v4227_v41, %v4214_v52  ;;  %v4253_v13 = vmul.f32 %v7464_v50, %v7464_v50 }
 0xf93   : > { %v4218_v35 = vadd.f32 0.0036580483, %v4217_v27  ;;  %v4229_v39 = vadd.f32 0.014752088, %v4228_v60  ;;  %v7468_v7 = vmin.f32 %v4253_v13, 16.0 }
 0xf94   : > { %v4179_v23 = vpop.f32.mrf.mxu3 }
 0xf95   : > { %v4219_v34 = vmul.f32 %v4218_v35, %v4214_v52  ;;  %v4230_v33 = vmul.f32 %v4229_v39, %v4214_v52  ;;  %v4255_v11 = vmul.f32 2.1237322e-06, %v7468_v7  ;;  %v4266_v45 = vmul.f32 3.8918573e-05, %v7468_v7  ;;  %v4551_v35 = vld [vmem:[%s7734_s18 + $0x10] sm:$0xff] }
 0xf96   : > { %v7476_v46 = vadd.f32 %v7448_v62, %v4179_v23  ;;  %4598 = vmatpush.msra.mxu0 %v4551_v35 }
 0xf97   : > { %v4220_v18 = vadd.f32 0.05243302, %v4219_v34  ;;  %v4231_v44 = vadd.f32 0.112945676, %v4230_v33  ;;  %v4256_v24 = vadd.f32 0.00028619796, %v4255_v11 }
 0xf98   : > { %v4267_v6 = vadd.f32 0.001143296, %v4266_v45  ;;  %v7479_v16 = vmul.f32 0.70710677, %v7476_v46  ;;  %v4550_v11 = vld [vmem:[%s7734_s18 + $0x8] sm:$0xff] }
 0xf99   : > { %v4232_v36 = vmul.f32 %v4231_v44, %v4214_v52  ;;  %v4257_v5 = vmul.f32 %v4256_v24, %v7468_v7  ;;  %v4221_v32 = vmul.f32 %v4220_v18, %v4214_v52  ;;  %4599 = vmatpush.msra.mxu0 %v4550_v11 }
 0xf9a   : > { %v4268_v15 = vmul.f32 %v4267_v6, %v7468_v7  ;;  %v4293_v63 = vmul.f32 %v7479_v16, %v7479_v16 }
 0xf9b   : > { %v4233_v21 = vadd.f32 0.4994258, %v4232_v36  ;;  %v4258_v29 = vadd.f32 0.0036580483, %v4257_v5  ;;  %v4222_v14 = vadd.f32 0.18741608, %v4221_v32 }
 0xf9c   : > { %v4269_v25 = vadd.f32 0.014752088, %v4268_v15  ;;  %v7488_v26 = vmin.f32 %v4293_v63, 16.0  ;;  %v4182_v56 = vpop.f32.mrf.mxu3  ;;  %v4549_v32 = vld [vmem:[%s7734_s18] sm:$0xff] }
 0xf9d   : > { %v4234_v30 = vmul.f32 %v4233_v21, %v4214_v52  ;;  %v4259_v59 = vmul.f32 %v4258_v29, %v7468_v7  ;;  %v7497_v17 = vadd.f32 %v7448_v62, %v4182_v56  ;;  %v4223_v19 = vmul.f32 %v4222_v14, %v4214_v52  ;;  %4600 = vmatpush.msra.mxu0 %v4549_v32 }
 0xf9e   : > { %v4270_v31 = vmul.f32 %v4269_v25, %v7468_v7  ;;  %v4295_v49 = vmul.f32 2.1237322e-06, %v7488_v26  ;;  %v4306_v42 = vmul.f32 3.8918573e-05, %v7488_v26 }
 0xf9f   : > { %v4235_v3 = vadd.f32 1.0, %v4234_v30  ;;  %v4260_v10 = vadd.f32 0.05243302, %v4259_v59  ;;  %v7508_v9 = vmul.f32 0.70710677, %v7497_v17 }
 0xfa0   : > { %v4271_v54 = vadd.f32 0.112945676, %v4270_v31  ;;  %v4296_v58 = vadd.f32 0.00028619796, %v4295_v49  ;;  %v4307_v0 = vadd.f32 0.001143296, %v4306_v42 }
 0xfa1   : > { %5325 = vrcp.f32 %v4235_v3  ;;  %v4261_v57 = vmul.f32 %v4260_v10, %v7468_v7  ;;  %v4333_v60 = vmul.f32 %v7508_v9, %v7508_v9  ;;  %v4224_v33 = vadd.f32 1.1283791, %v4223_v19 }
 0xfa2   : > { %v4272_v55 = vmul.f32 %v4271_v54, %v7468_v7  ;;  %v4297_v41 = vmul.f32 %v4296_v58, %v7488_v26  ;;  %v4308_v27 = vmul.f32 %v4307_v0, %v7488_v26  ;;  %v4245_v63 = vand.u32 2147483647, %v4235_v3 }
 0xfa3   : > { %v7519_v61 = vmin.f32 %v4333_v60, 16.0  ;;  %v4262_v18 = vadd.f32 0.18741608, %v4261_v57  ;;  %v4247_v48 = vand.u32 2147483648, %v4235_v3  ;;  %v4225_v59 = vmul.f32 %v4224_v33, %v7456_v43 }
 0xfa4   : > { %v4273_v40 = vadd.f32 0.4994258, %v4272_v55  ;;  %v4185_v13 = vpop.f32.mrf.mxu3  ;;  %v4298_v39 = vadd.f32 0.0036580483, %v4297_v41  ;;  %v4309_v23 = vadd.f32 0.014752088, %v4308_v27  ;;  %vm4241_vm6 = vweird.f32 %v4235_v3 }
 0xfa5   : > { %v7527_v24 = vadd.f32 %v7448_v62, %v4185_v13  ;;  %v4335_v5 = vmul.f32 2.1237322e-06, %v7519_v61  ;;  %v4346_v15 = vmul.f32 3.8918573e-05, %v7519_v61  ;;  %v4263_v31 = vmul.f32 %v4262_v18, %v7468_v7 }
 0xfa6   : > { %v4274_v52 = vmul.f32 %v4273_v40, %v7468_v7  ;;  %v4299_v6 = vmul.f32 %v4298_v39, %v7488_v26  ;;  %v4310_v36 = vmul.f32 %v4309_v23, %v7488_v26  ;;  %vm4246_vm8 = vcmp.eq.f32.partialorder %v4245_v63, 8.507059e+37 }
 0xfa7   : > { %v5326_v34 = vpop.eup %5325  ;;  %v4336_v56 = vadd.f32 0.00028619796, %v4335_v5  ;;  %v4347_v37 = vadd.f32 0.001143296, %v4346_v15  ;;  %v7540_v14 = vmul.f32 0.70710677, %v7527_v24 }
 0xfa8   : > { %v4237_v45 = vmul.f32 %v5326_v34, %v4235_v3  ;;  %v7524_v44 = vadd.f32 1.0, %v4274_v52  ;;  %vm4242_vm5 = vweird.f32 %v5326_v34  ;;  %v4300_v29 = vadd.f32 0.05243302, %v4299_v6 }
 0xfa9   : > { %v4311_v30 = vadd.f32 0.112945676, %v4310_v36  ;;  %v4337_v10 = vmul.f32 %v4336_v56, %v7519_v61  ;;  %v4348_v54 = vmul.f32 %v4347_v37, %v7519_v61  ;;  %vm4243_vm7 = vmor %vm4241_vm6, %vm4242_vm5  ;;  %v4248_v42 = vor.u32 1.1754944e-38, %v4247_v48 }
 0xfaa   : > { %v4238_v21 = vsub.f32 1.0, %v4237_v45  ;;  %5327 = vrcp.f32 %v7524_v44  ;;  %v4301_v38 = vmul.f32 %v4300_v29, %v7488_v26  ;;  %v4373_v43 = vmul.f32 %v7540_v14, %v7540_v14 }
 0xfab   : > { %v4312_v4 = vmul.f32 %v4311_v30, %v7488_v26  ;;  %v4338_v58 = vadd.f32 0.0036580483, %v4337_v10  ;;  %v4349_v19 = vadd.f32 0.014752088, %v4348_v54  ;;  %v4197_v0 = vmul.f32 0.5, %v7453_v28 }
 0xfac   : > { %v4239_v25 = vmul.f32 %v5326_v34, %v4238_v21  ;;  %v4264_v40 = vadd.f32 1.1283791, %v4263_v31  ;;  %v4285_v60 = vand.u32 2147483647, %v7524_v44  ;;  %v4188_v52 = vpop.f32.mrf.mxu3  ;;  %v7556_v23 = vmin.f32 %v4373_v43, 16.0 }
 0xfad   : > { %v4313_v55 = vadd.f32 0.4994258, %v4312_v4  ;;  %v4350_v35 = vmul.f32 %v4349_v19, %v7519_v61  ;;  %v4339_v33 = vmul.f32 %v4338_v58, %v7519_v61  ;;  %v4302_v11 = vadd.f32 0.18741608, %v4301_v38 }
 0xfae   : > { %v4240_v49 = vadd.f32 %v5326_v34, %v4239_v25  ;;  %v4375_v36 = vmul.f32 2.1237322e-06, %v7556_v23  ;;  %v4386_v5 = vmul.f32 3.8918573e-05, %v7556_v23  ;;  %v4265_v32 = vmul.f32 %v4264_v40, %v7464_v50 }
 0xfaf   : > { %v4314_v13 = vmul.f32 %v4313_v55, %v7488_v26  ;;  %v4351_v18 = vadd.f32 0.112945676, %v4350_v35  ;;  %v7565_v21 = vadd.f32 %v7448_v62, %v4188_v52  ;;  %vm4281_vm9 = vweird.f32 %v7524_v44 }
 0xfb0   : > { %v5328_v7 = vpop.eup %5327  ;;  %v4244_v3 = vsel %vm4243_vm7, %v5326_v34, %v4240_v49  ;;  %v4287_v34 = vand.u32 2147483648, %v7524_v44  ;;  %v4340_v48 = vadd.f32 0.05243302, %v4339_v33  ;;  %v4376_v56 = vadd.f32 0.00028619796, %v4375_v36 }
 0xfb1   : > { %v4249_v57 = vsel %vm4246_vm8, %v4248_v42, %v4244_v3  ;;  %v4277_v41 = vmul.f32 %v5328_v7, %v7524_v44  ;;  %v7558_v45 = vadd.f32 1.0, %v4314_v13  ;;  %vm4282_vm11 = vweird.f32 %v5328_v7 }
 0xfb2   : > { %v4250_v27 = vmul.f32 %v4249_v57, %v4225_v59  ;;  %v4352_v29 = vmul.f32 %v4351_v18, %v7519_v61  ;;  %vm4283_vm10 = vmor %vm4281_vm9, %vm4282_vm11  ;;  %v4288_v30 = vor.u32 1.1754944e-38, %v4287_v34  ;;  %v4387_v37 = vadd.f32 0.001143296, %v4386_v5 }
 0xfb3   : > { %v4278_v39 = vsub.f32 1.0, %v4277_v41  ;;  %5329 = vrcp.f32 %v7558_v45  ;;  %vm4286_vm13 = vcmp.eq.f32.partialorder %v4285_v60, 8.507059e+37  ;;  %v4303_v50 = vmul.f32 %v4302_v11, %v7488_v26 }
 0xfb4   : > { %v5071_v28 = vclamps-f32 %v4250_v27, 1.0  ;;  %v4353_v31 = vadd.f32 0.4994258, %v4352_v29  ;;  %v4377_v4 = vmul.f32 %v4376_v56, %v7556_v23  ;;  %v4388_v10 = vmul.f32 %v4387_v37, %v7556_v23  ;;  %v4191_v3 = vpop.f32.mrf.mxu3 }
 0xfb5   : > { %v4279_v6 = vmul.f32 %v5328_v7, %v4278_v39  ;;  %v7573_v44 = vmul.f32 0.70710677, %v7565_v21  ;;  %v4341_v42 = vmul.f32 %v4340_v48, %v7519_v61  ;;  %v4198_v55 = vmul.f32 0.5, %v7461_v53 }
 0xfb6   : > { %v4533_v15 = vadd.f32 1.0, %v5071_v28  ;;  %v4354_v38 = vmul.f32 %v4353_v31, %v7519_v61  ;;  %v4304_v57 = vadd.f32 1.1283791, %v4303_v50  ;;  %v7588_v52 = vadd.f32 %v7448_v62, %v4191_v3 }
 0xfb7   : > { %v4280_v63 = vadd.f32 %v5328_v7, %v4279_v6  ;;  %v4413_v26 = vmul.f32 %v7573_v44, %v7573_v44  ;;  %v4342_v35 = vadd.f32 0.18741608, %v4341_v42  ;;  %v4325_v53 = vand.u32 2147483647, %v7558_v45 }
 0xfb8   : > { %v4541_v25 = vmul.f32 %v4533_v15, %v4197_v0  ;;  %v4378_v0 = vadd.f32 0.0036580483, %v4377_v4  ;;  %v7582_v40 = vadd.f32 1.0, %v4354_v38  ;;  %v4327_v39 = vand.u32 2147483648, %v7558_v45 }
 0xfb9   : > { %v4284_v59 = vsel %vm4283_vm10, %v5328_v7, %v4280_v63  ;;  %v5330_v43 = vpop.eup %5329  ;;  %v4389_v7 = vadd.f32 0.014752088, %v4388_v10  ;;  %v7585_v27 = vmin.f32 %v4413_v26, 16.0  ;;  %v4305_v18 = vmul.f32 %v4304_v57, %v7479_v16 }
 0xfba   : > { %v4289_v49 = vsel %vm4286_vm13, %v4288_v30, %v4284_v59  ;;  %5079 = vmatmul.msk.f32.vlgmr.msra.gmra.mxu0 %vm1308_vm12, %v4541_v25  ;;  %v4317_v19 = vmul.f32 %v5330_v43, %v7558_v45  ;;  %vm4322_vm14 = vweird.f32 %v5330_v43  ;;  %5331 = vrcp.f32 %v7582_v40 }
 0xfbb   : > { %v4290_v54 = vmul.f32 %v4289_v49, %v4265_v32  ;;  %v4390_v41 = vmul.f32 %v4389_v7, %v7556_v23  ;;  %v4379_v28 = vmul.f32 %v4378_v0, %v7556_v23  ;;  %vm4321_vm15 = vweird.f32 %v7558_v45 }
 0xfbc   : > { %v4318_v13 = vsub.f32 1.0, %v4317_v19  ;;  %v4415_v6 = vmul.f32 2.1237322e-06, %v7585_v27  ;;  %v4426_v36 = vmul.f32 3.8918573e-05, %v7585_v27  ;;  %v4343_v15 = vmul.f32 %v4342_v35, %v7519_v61  ;;  %vm4323_vm1 = vmor %vm4321_vm15, %vm4322_vm14 }
 0xfbd   : > { %v5072_v58 = vclamps-f32 %v4290_v54, 1.0  ;;  %v4391_v11 = vadd.f32 0.112945676, %v4390_v41  ;;  %v7601_v63 = vmul.f32 0.70710677, %v7588_v52  ;;  %vm4326_vm2 = vcmp.eq.f32.partialorder %v4325_v53, 8.507059e+37 }
 0xfbe   : > { %v4319_v33 = vmul.f32 %v5330_v43, %v4318_v13  ;;  %v4328_v16 = vor.u32 1.1754944e-38, %v4327_v39  ;;  %v4416_v48 = vadd.f32 0.00028619796, %v4415_v6  ;;  %v4427_v45 = vadd.f32 0.001143296, %v4426_v36 }
 0xfbf   : > { %v4534_v60 = vadd.f32 1.0, %v5072_v58  ;;  %v4392_v32 = vmul.f32 %v4391_v11, %v7556_v23  ;;  %v4380_v25 = vadd.f32 0.05243302, %v4379_v28  ;;  %v4453_v56 = vmul.f32 %v7601_v63, %v7601_v63 }
 0xfc0   : > { %v4320_v5 = vadd.f32 %v5330_v43, %v4319_v33  ;;  %v5332_v61 = vpop.eup %5331  ;;  %v4417_v59 = vmul.f32 %v4416_v48, %v7585_v27  ;;  %v4428_v50 = vmul.f32 %v4427_v45, %v7585_v27  ;;  %v4199_v31 = vmul.f32 0.5, %v7476_v46 }
 0xfc1   : > { %v4542_v34 = vmul.f32 %v4534_v60, %v4198_v55  ;;  %v4393_v30 = vadd.f32 0.4994258, %v4392_v32  ;;  %v4344_v4 = vadd.f32 1.1283791, %v4343_v15  ;;  %v4357_v10 = vmul.f32 %v5332_v61, %v7582_v40 }
 0xfc2   : > { %v4324_v29 = vsel %vm4323_vm1, %v5330_v43, %v4320_v5  ;;  %v4365_v54 = vand.u32 2147483647, %v7582_v40  ;;  %v4429_v38 = vadd.f32 0.014752088, %v4428_v50  ;;  %v7613_v43 = vmin.f32 %v4453_v56, 16.0 }
 0xfc3   : > { %5080 = vmatmul.msk.f32.gmra.mxu0 %vm1308_vm12, %v4542_v34  ;;  %v4329_v37 = vsel %vm4326_vm2, %v4328_v16, %v4324_v29  ;;  %v4394_v42 = vmul.f32 %v4393_v30, %v7556_v23  ;;  %v4358_v26 = vsub.f32 1.0, %v4357_v10  ;;  %v4367_v3 = vand.u32 2147483648, %v7582_v40 }
 0xfc4   : > { %v4330_v49 = vmul.f32 %v4329_v37, %v4305_v18  ;;  %v4381_v55 = vmul.f32 %v4380_v25, %v7556_v23  ;;  %v4418_v19 = vadd.f32 0.0036580483, %v4417_v59  ;;  %v4430_v46 = vmul.f32 %v4429_v38, %v7585_v27 }
 0xfc5   : > { %v4395_v58 = vadd.f32 1.0, %v4394_v42  ;;  %v4455_v0 = vmul.f32 2.1237322e-06, %v7613_v43  ;;  %v4359_v41 = vmul.f32 %v5332_v61, %v4358_v26  ;;  %vm4362_vm3 = vweird.f32 %v5332_v61 }
 0xfc6   : > { %v5073_v7 = vclamps-f32 %v4330_v49, 1.0  ;;  %v4466_v60 = vmul.f32 3.8918573e-05, %v7613_v43  ;;  %vm4361_vm4 = vweird.f32 %v7582_v40  ;;  %v4382_v53 = vadd.f32 0.18741608, %v4381_v55 }
 0xfc7   : > { %5333 = vrcp.f32 %v4395_v58  ;;  %v4360_v35 = vadd.f32 %v5332_v61, %v4359_v41  ;;  %v4431_v39 = vadd.f32 0.112945676, %v4430_v46  ;;  %vm4363_vm5 = vmor %vm4361_vm4, %vm4362_vm3  ;;  %v4368_v34 = vor.u32 1.1754944e-38, %v4367_v3 }
 0xfc8   : > { %v4535_v57 = vadd.f32 1.0, %v5073_v7  ;;  %v4419_v33 = vmul.f32 %v4418_v19, %v7585_v27  ;;  %v4456_v28 = vadd.f32 0.00028619796, %v4455_v0  ;;  %v4467_v11 = vadd.f32 0.001143296, %v4466_v60 }
 0xfc9   : > { %v4345_v18 = vmul.f32 %v4344_v4, %v7508_v9  ;;  %v4364_v6 = vsel %vm4363_vm5, %v5332_v61, %v4360_v35  ;;  %vm4366_vm6 = vcmp.eq.f32.partialorder %v4365_v54, 8.507059e+37  ;;  %v4432_v36 = vmul.f32 %v4431_v39, %v7585_v27 }
 0xfca   : > { %v4543_v13 = vmul.f32 %v4535_v57, %v4199_v31  ;;  %v4369_v40 = vsel %vm4366_vm6, %v4368_v34, %v4364_v6  ;;  %v4457_v5 = vmul.f32 %v4456_v28, %v7613_v43  ;;  %v4468_v15 = vmul.f32 %v4467_v11, %v7613_v43 }
 0xfcb   : > { %v4370_v32 = vmul.f32 %v4369_v40, %v4345_v18  ;;  %v4383_v16 = vmul.f32 %v4382_v53, %v7556_v23  ;;  %v4433_v48 = vadd.f32 0.4994258, %v4432_v36  ;;  %v4420_v29 = vadd.f32 0.05243302, %v4419_v33 }
 0xfcc   : > { %5081 = vmatmul.msk.f32.gmra.mxu0 %vm1308_vm12, %v4543_v13  ;;  %v4469_v25 = vadd.f32 0.014752088, %v4468_v15  ;;  %v4458_v61 = vadd.f32 0.0036580483, %v4457_v5  ;;  %v4200_v59 = vmul.f32 0.5, %v7497_v17  ;;  %v4407_v4 = vand.u32 2147483648, %v4395_v58 }
 0xfcd   : > { %v5334_v45 = vpop.eup %5333  ;;  %v5074_v30 = vclamps-f32 %v4370_v32, 1.0  ;;  %v4434_v56 = vmul.f32 %v4433_v48, %v7585_v27  ;;  %v4384_v31 = vadd.f32 1.1283791, %v4383_v16  ;;  %v4421_v10 = vmul.f32 %v4420_v29, %v7585_v27 }
 0xfce   : > { %v4397_v9 = vmul.f32 %v5334_v45, %v4395_v58  ;;  %v4470_v37 = vmul.f32 %v4469_v25, %v7613_v43  ;;  %vm4402_vm7 = vweird.f32 %v5334_v45  ;;  %v4405_v7 = vand.u32 2147483647, %v4395_v58 }
 0xfcf   : > { %v4536_v50 = vadd.f32 1.0, %v5074_v30  ;;  %v4435_v23 = vadd.f32 1.0, %v4434_v56  ;;  %v4459_v26 = vmul.f32 %v4458_v61, %v7613_v43  ;;  %vm4401_vm8 = vweird.f32 %v4395_v58 }
 0xfd0   : > { %v4398_v49 = vsub.f32 1.0, %v4397_v9  ;;  %v4471_v54 = vadd.f32 0.112945676, %v4470_v37  ;;  %vm4403_vm11 = vmor %vm4401_vm8, %vm4402_vm7  ;;  %v4408_v17 = vor.u32 1.1754944e-38, %v4407_v4  ;;  %v4422_v19 = vadd.f32 0.18741608, %v4421_v10 }
 0xfd1   : > { %v4544_v42 = vmul.f32 %v4536_v50, %v4200_v59  ;;  %5335 = vrcp.f32 %v4435_v23  ;;  %v4385_v46 = vmul.f32 %v4384_v31, %v7540_v14  ;;  %vm4406_vm9 = vcmp.eq.f32.partialorder %v4405_v7, 8.507059e+37 }
 0xfd2   : > { %v4399_v38 = vmul.f32 %v5334_v45, %v4398_v49  ;;  %v4472_v55 = vmul.f32 %v4471_v54, %v7613_v43  ;;  %v4460_v60 = vadd.f32 0.05243302, %v4459_v26  ;;  %v4423_v58 = vmul.f32 %v4422_v19, %v7585_v27 }
 0xfd3   : > { %v4201_v11 = vmul.f32 0.5, %v7527_v24  ;;  %v4447_v36 = vand.u32 2147483648, %v4435_v23  ;;  %v4445_v15 = vand.u32 2147483647, %v4435_v23  ;;  %vm4441_vm13 = vweird.f32 %v4435_v23 }
 0xfd4   : > { %v4400_v3 = vadd.f32 %v5334_v45, %v4399_v38  ;;  %5082 = vmatmul.msk.f32.gmra.mxu0 %vm1308_vm12, %v4544_v42  ;;  %v4473_v57 = vadd.f32 0.4994258, %v4472_v55  ;;  %v4461_v33 = vmul.f32 %v4460_v60, %v7613_v43  ;;  %v4424_v6 = vadd.f32 1.1283791, %v4423_v58 }
 0xfd5   : > { %v4448_v27 = vor.u32 1.1754944e-38, %v4447_v36  ;;  %vm4446_vm15 = vcmp.eq.f32.partialorder %v4445_v15, 8.507059e+37  ;;  %v4202_v37 = vmul.f32 0.5, %v7565_v21  ;;  %v4203_v7 = vmul.f32 0.5, %v7588_v52 }
 0xfd6   : > { %v4404_v0 = vsel %vm4403_vm11, %v5334_v45, %v4400_v3  ;;  %v4474_v35 = vmul.f32 %v4473_v57, %v7613_v43  ;;  %v4462_v32 = vadd.f32 0.18741608, %v4461_v33  ;;  %v4425_v48 = vmul.f32 %v4424_v6, %v7573_v44 }
 0xfd7   : > { %v4409_v41 = vsel %vm4406_vm9, %v4408_v17, %v4404_v0  ;;  %v5336_v53 = vpop.eup %5335 }
 0xfd8   : > { %v4410_v13 = vmul.f32 %v4409_v41, %v4385_v46  ;;  %v4437_v34 = vmul.f32 %v5336_v53, %v4435_v23  ;;  %v4475_v28 = vadd.f32 1.0, %v4474_v35  ;;  %vm4442_vm10 = vweird.f32 %v5336_v53 }
 0xfd9   : > { %vm4443_vm14 = vmor %vm4441_vm13, %vm4442_vm10  ;;  %v4463_v25 = vmul.f32 %v4462_v32, %v7613_v43 }
 0xfda   : > { %v5075_v39 = vclamps-f32 %v4410_v13, 1.0  ;;  %v4438_v14 = vsub.f32 1.0, %v4437_v34  ;;  %5337 = vrcp.f32 %v4475_v28  ;;  %v4487_v50 = vand.u32 2147483648, %v4475_v28 }
 0xfdb   : > { %v4464_v59 = vadd.f32 1.1283791, %v4463_v25  ;;  %v4485_v4 = vand.u32 2147483647, %v4475_v28  ;;  %vm4481_vm2 = vweird.f32 %v4475_v28 }
 0xfdc   : > { %v4537_v18 = vadd.f32 1.0, %v5075_v39  ;;  %v4439_v5 = vmul.f32 %v5336_v53, %v4438_v14  ;;  %v4488_v23 = vor.u32 1.1754944e-38, %v4487_v50 }
 0xfdd   : > { %v4465_v54 = vmul.f32 %v4464_v59, %v7601_v63  ;;  %vm4486_vm4 = vcmp.eq.f32.partialorder %v4485_v4, 8.507059e+37 }
 0xfde   : > { %v4545_v40 = vmul.f32 %v4537_v18, %v4201_v11  ;;  %v4440_v16 = vadd.f32 %v5336_v53, %v4439_v5 }
 0xfe0   : > { %5083 = vmatmul.msk.f32.gmra.mxu0 %vm1308_vm12, %v4545_v40  ;;  %v4444_v45 = vsel %vm4443_vm14, %v5336_v53, %v4440_v16  ;;  %v5338_v24 = vpop.eup %5337 }
 0xfe1   : > { %v4449_v29 = vsel %vm4446_vm15, %v4448_v27, %v4444_v45  ;;  %v4477_v9 = vmul.f32 %v5338_v24, %v4475_v28  ;;  %vm4482_vm1 = vweird.f32 %v5338_v24 }
 0xfe2   : > { %v4450_v30 = vmul.f32 %v4449_v29, %v4425_v48  ;;  %vm4483_vm3 = vmor %vm4481_vm2, %vm4482_vm1 }
 0xfe3   : > { %v4478_v61 = vsub.f32 1.0, %v4477_v9  ;;  %v5162_v9 = vld [vmem:[%s7735_s19] ss:$0 sm:$0xff] }
 0xfe4   : > { %v5076_v56 = vclamps-f32 %v4450_v30, 1.0 }
 0xfe5   : > { %v4479_v49 = vmul.f32 %v5338_v24, %v4478_v61 }
 0xfe6   : > { %v4538_v31 = vadd.f32 1.0, %v5076_v56 }
 0xfe7   : > { %v4480_v44 = vadd.f32 %v5338_v24, %v4479_v49 }
 0xfe8   : > { %v4546_v10 = vmul.f32 %v4538_v31, %v4202_v37 }
 0xfe9   : > { %v4484_v43 = vsel %vm4483_vm3, %v5338_v24, %v4480_v44 }
 0xfea   : > { %5084 = vmatmul.msk.f32.gmra.mxu0 %vm1308_vm12, %v4546_v10  ;;  %v4489_v42 = vsel %vm4486_vm4, %v4488_v23, %v4484_v43 }
 0xfeb   : > { %v4490_v38 = vmul.f32 %v4489_v42, %v4465_v54 }
 0xfed   : > { %v5077_v21 = vclamps-f32 %v4490_v38, 1.0 }
 0xfef   : > { %v4539_v26 = vadd.f32 1.0, %v5077_v21 }
 0xff1   : > { %v4547_v3 = vmul.f32 %v4539_v26, %v4203_v7 }
 0xff3   : > { %5085 = vmatmul.msk.f32.gmra.mxu0 %vm1308_vm12, %v4547_v3 }
0x1007   : > { %v4194_v55 = vpop.f32.mrf.mxu3 }
0x1008   : > { %v4195_v17 = vadd.f32 %v7448_v62, %v4194_v55 }
0x100a   : > { %v4212_v19 = vmul.f32 0.70710677, %v4195_v17  ;;  %v4204_v50 = vmul.f32 0.5, %v4195_v17 }
0x100c   : > { %v4493_v46 = vmul.f32 %v4212_v19, %v4212_v19 }
0x100e   : > { %v4494_v0 = vmin.f32 %v4493_v46, 16.0 }
0x1010   : > { %v4495_v63 = vmul.f32 2.1237322e-06, %v4494_v0  ;;  %v4506_v57 = vmul.f32 3.8918573e-05, %v4494_v0 }
0x1012   : > { %v4496_v41 = vadd.f32 0.00028619796, %v4495_v63  ;;  %v4507_v60 = vadd.f32 0.001143296, %v4506_v57 }
0x1014   : > { %v4497_v13 = vmul.f32 %v4496_v41, %v4494_v0  ;;  %v4508_v35 = vmul.f32 %v4507_v60, %v4494_v0 }
0x1016   : > { %v4509_v53 = vadd.f32 0.014752088, %v4508_v35  ;;  %v4498_v58 = vadd.f32 0.0036580483, %v4497_v13 }
0x1018   : > { %v4510_v39 = vmul.f32 %v4509_v53, %v4494_v0  ;;  %v4499_v34 = vmul.f32 %v4498_v58, %v4494_v0 }
0x101a   : > { %v4511_v52 = vadd.f32 0.112945676, %v4510_v39  ;;  %v4500_v11 = vadd.f32 0.05243302, %v4499_v34 }
0x101c   : > { %v4512_v33 = vmul.f32 %v4511_v52, %v4494_v0  ;;  %v4501_v62 = vmul.f32 %v4500_v11, %v4494_v0 }
0x101e   : > { %v4513_v28 = vadd.f32 0.4994258, %v4512_v33  ;;  %v4502_v6 = vadd.f32 0.18741608, %v4501_v62 }
0x1020   : > { %v4514_v18 = vmul.f32 %v4513_v28, %v4494_v0  ;;  %v4503_v40 = vmul.f32 %v4502_v6, %v4494_v0 }
0x1022   : > { %v4515_v14 = vadd.f32 1.0, %v4514_v18  ;;  %v4504_v16 = vadd.f32 1.1283791, %v4503_v40 }
0x1024   : > { %5339 = vrcp.f32 %v4515_v14  ;;  %v4527_v32 = vand.u32 2147483648, %v4515_v14  ;;  %v4525_v48 = vand.u32 2147483647, %v4515_v14  ;;  %vm4521_vm6 = vweird.f32 %v4515_v14 }
0x1025   : > { %v4505_v29 = vmul.f32 %v4504_v16, %v4212_v19 }
0x1026   : > { %v4528_v24 = vor.u32 1.1754944e-38, %v4527_v32  ;;  %vm4526_vm8 = vcmp.eq.f32.partialorder %v4525_v48, 8.507059e+37 }
0x102a   : > { %v5340_v36 = vpop.eup %5339 }
0x102b   : > { %v4517_v5 = vmul.f32 %v5340_v36, %v4515_v14  ;;  %vm4522_vm5 = vweird.f32 %v5340_v36 }
0x102c   : > { %vm4523_vm7 = vmor %vm4521_vm6, %vm4522_vm5 }
0x102d   : > { %v4518_v15 = vsub.f32 1.0, %v4517_v5 }
0x102f   : > { %v4519_v27 = vmul.f32 %v5340_v36, %v4518_v15 }
0x1031   : > { %v4520_v45 = vadd.f32 %v5340_v36, %v4519_v27 }
0x1033   : > { %v4524_v25 = vsel %vm4523_vm7, %v5340_v36, %v4520_v45 }
0x1034   : > { %v4529_v30 = vsel %vm4526_vm8, %v4528_v24, %v4524_v25 }
0x1035   : > { %v4530_v56 = vmul.f32 %v4529_v30, %v4505_v29 }
0x1037   : > { %v5078_v61 = vclamps-f32 %v4530_v56, 1.0  ;;  %v4602_v37 = vpop.f32.mrf.mxu0 }
0x1038   : > { %v4603_v59 = vadd.f32 %v5162_v9, %v4602_v37 }
0x1039   : > { %v4540_v31 = vadd.f32 1.0, %v5078_v61 }
0x103a   : > { %v4626_v49 = vadd.f32 %v4603_v59, %v7262_v8 }
0x103b   : > { %v4548_v4 = vmul.f32 %v4540_v31, %v4204_v50 }
0x103c   : > { %4634 = vst.msk [vmem:[%s7656_s1] sm:$0xff] %vm636_vm0, %v4626_v49 }
0x103d   : > { %5086 = vmatmul.msk.f32.gmra.mxu0 %vm1308_vm12, %v4548_v4 }
0x1040   : > { %v4605_v10 = vpop.f32.mrf.mxu0 }
0x1041   : > { %v4606_v44 = vadd.f32 %v5162_v9, %v4605_v10 }
0x1043   : > { %v4627_v23 = vadd.f32 %v4606_v44, %v7273_v51 }
0x1045   : > { %4635 = vst.msk [vmem:[%s7656_s1 + $0x8] sm:$0xff] %vm636_vm0, %v4627_v23 }
0x1049   : > { %v4608_v8 = vpop.f32.mrf.mxu0 }
0x104a   : > { %v4609_v54 = vadd.f32 %v5162_v9, %v4608_v8 }
0x104c   : > { %v4628_v43 = vadd.f32 %v4609_v54, %v7282_v47 }
0x104e   : > { %4636 = vst.msk [vmem:[%s7656_s1 + $0x10] sm:$0xff] %vm636_vm0, %v4628_v43 }
0x1051   : > { %v4611_v42 = vpop.f32.mrf.mxu0 }
0x1052   : > { %v4612_v38 = vadd.f32 %v5162_v9, %v4611_v42 }
0x1054   : > { %v4629_v21 = vadd.f32 %v4612_v38, %v7291_v2 }
0x1056   : > { %4637 = vst.msk [vmem:[%s7656_s1 + $0x18] sm:$0xff] %vm636_vm0, %v4629_v21 }
0x105d   : > { %v4614_v7 = vpop.f32.mrf.mxu0 }
0x105e   : > { %v4615_v51 = vadd.f32 %v5162_v9, %v4614_v7 }
0x1060   : > { %v4630_v26 = vadd.f32 %v4615_v51, %v7300_v12 }
0x1062   : > { %4638 = vst.msk [vmem:[%s7656_s1 + $0x20] sm:$0xff] %vm636_vm0, %v4630_v26 }
0x1067   : > { %v4617_v3 = vpop.f32.mrf.mxu0 }
0x1068   : > { %v4618_v55 = vadd.f32 %v5162_v9, %v4617_v3 }
0x106a   : > { %v4631_v47 = vadd.f32 %v4618_v55, %v7309_v20 }
0x106c   : > { %4639 = vst.msk [vmem:[%s7656_s1 + $0x28] sm:$0xff] %vm636_vm0, %v4631_v47 }
0x1070   : > { %v4620_v17 = vpop.f32.mrf.mxu0 }
0x1071   : > { %v4621_v19 = vadd.f32 %v5162_v9, %v4620_v17 }
0x1073   : > { %v4632_v2 = vadd.f32 %v4621_v19, %v7318_v22 }
0x1075   : > { %4640 = vst.msk [vmem:[%s7656_s1 + $0x30] sm:$0xff] %vm636_vm0, %v4632_v2 }
0x10ba   : > { %v4623_v12 = vpop.f32.mrf.mxu0 }
0x10bb   : > { %v4624_v46 = vadd.f32 %v5162_v9, %v4623_v12 }
0x10bd   : > { %v4633_v20 = vadd.f32 %v4624_v46, %v7325_v1 }
0x10bf   : > { %4641 = vst.msk [vmem:[%s7656_s1 + $0x38] sm:$0xff] %vm636_vm0, %v4633_v20 }
0x10c0   : > { %5397 = shalt.err (!%p5394_p3)
}
0x10c1   : > { %s5435_s27 = smov 128   ;;  %s5436_s1 = smov 8  }
0x10c2   : > { %5102 = dma.vmem_to_hbm [thread:$0]  (%p5580_p5), %s4656_s24, 1024, %s4658_s23, %s4643_s3, %s5435_s27, %s5435_s27, %s5436_s1  }
0x10c3 PF: > { %s7825_s6 = sld [smem:[#allocation7_spill]] }
0x10c4   : > { %s7826_s7 = sld [smem:[#allocation5_spill]] }
0x10c9   : > { %p5108_p4 = scmp.ge.s32.totalorder %s7825_s6, 2 }
0x10ca   : > { %s4672_s2 = sand.u32 1, %s7826_s7  }
0x10cb   : > { %p5105_p7 = pnand %p5108_p4, %p5584_p6  ;;  %s4673_s26 = scalar_lea.sflag [#allocation3], %s4672_s2 }
0x10cd   : > { %p5106_p8 = pneg %p5105_p7 }
0x10cf   : > { %5415 = dma.done.wait (%p5106_p8), %s4673_s26, 1024  }
0x10d0   : > { %5417 = vsyncadd (%p5106_p8), %s4673_s26, 4294966272  ;;  %s7828_s24 = sld [smem:[#allocation8_spill]]  ;;  %s7831_s1 = smov %s5424_s22 }
0x10d1   : > { %s7829_s5 = sld [smem:[#allocation6_spill]] }
0x10d2   : > { %s7830_s23 = sld [smem:[#allocation9_spill]] }
0x10d6   : > { %p30_p9 = scmp.ge.s32.totalorder %s7828_s24, 4  }
0x10d7   : > { %s7832_s22 = smov %s7829_s5 }
0x10d8   :  { %32 = sbr.rel (!%p30_p9) target bundleno = 13 (0xd), region = 156 }
0x10dd   :  { %4679 = vsyncpa [#allocation3], 1 }
0x10de   :  { %4681 = vsyncpa [#allocation3 + $0x1], 1 }

</bundles_post_ra>
